<compile_context>
chip_gen: v7x
topology: tpu7x:2x2x1
jax: 0.10.0
libtpu: 0.0.40
codegen_flags: <defaults>
</compile_context>

<pallas_src>
import functools

import numpy as np

import jax
import jax.numpy as jnp
from jax.experimental import pallas as pl
from jax.experimental.pallas import tpu as pltpu

NUM_CLASSES = 10
NEURON_SIZE = 10          # original: 500 (must equal NUM_CLASSES for eval chain)
IN_CH = 3
IN_CH_PAD = 8             # first conv's Cin padded 3 -> 8 (8-aligned im2col)
SPATIAL = 32
CFGS = [[8, 16, "M"], [16, 32, "M"], [32, "M"], [32, "M"]]


# ---------------------------------------------------------------------------
# Static per-stage geometry plan
# ---------------------------------------------------------------------------
def build_plan(cfgs, cin0, spatial):
    plan = []
    C, S = cin0, spatial
    for cfg in cfgs:
        for dim in cfg:
            if dim == "M":
                plan.append(("pool", dict(C=C, H=S, W=S)))
                S //= 2
            else:
                plan.append(("conv", dict(Cin=C, Cout=dim, H=S, W=S)))
                C = dim
    return tuple(plan), C, S


# ---------------------------------------------------------------------------
# The fused kernel: input pad + 6 convs + 4 pools + full classifier tail.
# ---------------------------------------------------------------------------
def _vgg_al_kernel(x_ref, w_ref, sh_ref, mask_ref, sel_ref, w4_ref, wc_ref,
                   bc_ref, o_ref, act_ref, *, plan, in_ch, n_hidden5,
                   n_classes):
    n_stage = len(plan)
    first = plan[0][1]
    H0, W0, C0 = first["H"], first["W"], first["Cin"]
    Wp0 = W0 + 2
    Lp0 = (H0 + 3) * Wp0
    base0 = Wp0 + 1

    # ---- in-kernel input staging: channel pad (3->8), spatial zero-pad, and
    #      flatten (H, W+2) onto the lane axis, entirely in VMEM.
    act_ref[0:C0, 0:Lp0] = jnp.zeros((C0, Lp0), jnp.float32)
    for h in range(H0):
        dst = base0 + h * Wp0
        act_ref[0:in_ch, dst:dst + W0] = x_ref[0:in_ch, h * W0:(h + 1) * W0]

    ci = mi = 0
    for si, (kind, g) in enumerate(plan):
        if kind == "conv":
            Cin, Cout, Hs, Ws = g["Cin"], g["Cout"], g["H"], g["W"]
            Wp = Ws + 2
            L = Hs * Wp                         # padded-width output length
            Lp = (Hs + 3) * Wp                  # padded input length
            K = 9 * Cin
            nxt = plan[si + 1][0] if si + 1 < n_stage else None
            w_slab = w_ref[ci, 0:Cout, 0:K]     # bf16, BN-scale folded
            shift = sh_ref[ci, 0:Cout, :]       # f32 folded BN shift
            mrow = mi

            def conv_scope(col_ref, Cin=Cin, Cout=Cout, Wp=Wp, L=L, Lp=Lp,
                           w_slab=w_slab, shift=shift, nxt=nxt, mrow=mrow):
                # im2col: pack the 9 taps onto the contraction axis.  The
                # scratch is sized exactly (9*Cin, L) for THIS conv; sequential
                # run_scoped scopes reuse the same VMEM region.
                for t in range(9):
                    off = (t // 3) * Wp + (t % 3)
                    col_ref[t * Cin:(t + 1) * Cin, :] = act_ref[0:Cin, off:off + L]
                # One single-pass bf16 MXU matmul per conv, f32 accumulation.
                y = jnp.dot(w_slab, col_ref[...].astype(jnp.bfloat16),
                            preferred_element_type=jnp.float32)
                y = jnp.maximum(y + shift, 0.0)            # BN shift + ReLU
                if nxt == "conv":
                    # Zero the 2 wrap-around garbage columns per row (they land
                    # on the next layout's pad columns) and re-zero the pads.
                    y = y * mask_ref[mrow:mrow + 1, 0:L]
                    act_ref[0:Cout, 0:Lp] = jnp.zeros((Cout, Lp), jnp.float32)
                # Shifted store rebuilds the padded layout for the next stage;
                # a following pool only reads interior cells, so no masking.
                act_ref[0:Cout, Wp + 1:Wp + 1 + L] = y

            pl.run_scoped(conv_scope, pltpu.VMEM((K, L), jnp.float32))
            ci += 1
            if nxt == "conv":
                mi += 1
        else:
            # ---- 2x2 stride-2 max-pool on the flat padded layout.
            C, Hs, Ws = g["C"], g["H"], g["W"]
            Wp = Ws + 2
            Ho, Wo = Hs // 2, Ws // 2
            base = Wp + 1
            LL = (Hs - 2) * Wp + Ws
            v00 = act_ref[0:C, base:base + LL]
            v01 = act_ref[0:C, base + 1:base + 1 + LL]
            v10 = act_ref[0:C, base + Wp:base + Wp + LL]
            v11 = act_ref[0:C, base + Wp + 1:base + Wp + 1 + LL]
            q = jnp.maximum(jnp.maximum(v00, v01), jnp.maximum(v10, v11))

            if si == n_stage - 1:
                # Final pool fused with the classifier head.  Window maxima are
                # read per spatial position as (C, 1) columns, so b1's flatten
                # contraction runs on the VPU with channels on sublanes (no
                # transpose / reshape, no second pallas_call).
                m = None
                for ho in range(Ho):
                    for wo in range(Wo):
                        s_idx = ho * Wo + wo
                        p = 2 * ho * Wp + 2 * wo
                        term = q[:, p:p + 1] * w4_ref[s_idx]   # (C, 5*hidden)
                        m = term if m is None else m + term
                t = jnp.sum(m, axis=0, keepdims=True) + bc_ref[0:1, 0:n_hidden5]
                t = 1.0 / (1.0 + jnp.exp(-t))                  # b1 sigmoid
                dins = [n_hidden5] + [n_classes] * 4           # b2, inv x4
                for i, din in enumerate(dins):
                    y = jnp.dot(t[:, 0:din], wc_ref[i, 0:din, 0:n_classes],
                                preferred_element_type=jnp.float32)
                    t = 1.0 / (1.0 + jnp.exp(-(y + bc_ref[i + 1:i + 2,
                                                          0:n_classes])))
                o_ref[...] = t
            else:
                # Factored pool: per output row, one tiny (W, Wo) 0/1-select
                # matmul (shared (32,16) stationary constant, sliced) replaces
                # the old whole-image (e.g. 1051x342) selection matmul.
                Wp2, Lp2 = Wo + 2, (Ho + 3) * (Wo + 2)
                sel = sel_ref[0:Ws, 0:Wo]
                act_ref[0:C, 0:Lp2] = jnp.zeros((C, Lp2), jnp.float32)
                for ho in range(Ho):
                    row = q[:, 2 * ho * Wp:2 * ho * Wp + Ws]
                    pooled = jnp.dot(row, sel, preferred_element_type=jnp.float32)
                    dst = (ho + 1) * Wp2 + 1
                    act_ref[0:C, dst:dst + Wo] = pooled


# ---------------------------------------------------------------------------
# Constant / parameter packing (runs under jit; params are closed-over consts)
# ---------------------------------------------------------------------------
def _conv_to_kernel(c, cin_pad):
    # c["w_taps"]: (9, Cin, Cout), c["scale_shift"]: (2, Cout)
    w_taps = c["w_taps"]
    scale, shift = c["scale_shift"][0], c["scale_shift"][1]
    _, cin, cout = w_taps.shape
    w = jnp.transpose(w_taps, (2, 0, 1))                     # (Cout, 9, Cin)
    if cin_pad > cin:
        w = jnp.pad(w, ((0, 0), (0, 0), (0, cin_pad - cin)))
    w2d = w.reshape(cout, 9 * cin_pad) * scale[:, None]      # fold BN scale
    return w2d, shift.reshape(cout, 1)


def _pack_conv_params(params, plan):
    conv_cfg = [g for k, g in plan if k == "conv"]
    conv_src = [c for layer in params for c in layer["convs"]]
    n_conv = len(conv_cfg)
    max_cout = max(g["Cout"] for g in conv_cfg)
    max_k = max(9 * g["Cin"] for g in conv_cfg)
    w_pack = jnp.zeros((n_conv, max_cout, max_k), jnp.bfloat16)
    sh_pack = jnp.zeros((n_conv, max_cout, 1), jnp.float32)
    for i, (g, c) in enumerate(zip(conv_cfg, conv_src)):
        w2d, sh = _conv_to_kernel(c, g["Cin"])
        w_pack = w_pack.at[i, :w2d.shape[0], :w2d.shape[1]].set(
            w2d.astype(jnp.bfloat16))
        sh_pack = sh_pack.at[i, :sh.shape[0], :].set(sh)
    return w_pack, sh_pack


def _build_masks(plan):
    max_l = max(g["H"] * (g["W"] + 2) for k, g in plan if k == "conv")
    rows = []
    for si, (kind, g) in enumerate(plan):
        if kind != "conv":
            continue
        nxt = plan[si + 1][0] if si + 1 < len(plan) else None
        if nxt == "conv":
            Wp = g["W"] + 2
            L = g["H"] * Wp
            m = np.zeros((max_l,), np.float32)
            m[:L] = (np.arange(L) % Wp < g["W"]).astype(np.float32)
            rows.append(m)
    if not rows:
        rows.append(np.zeros((max_l,), np.float32))
    return jnp.asarray(np.stack(rows))


def _build_sel(plan):
    # Single shared 0/1 column-select matrix; stages slice [0:W, 0:W//2].
    max_w = max(g["W"] for k, g in plan if k == "pool")
    S = np.zeros((max_w, max_w // 2), np.float32)
    for wo in range(max_w // 2):
        S[2 * wo, wo] = 1.0
    return jnp.asarray(S)


def _pack_classifier(params, c_last, n_spatial):
    h5 = params[3]["b1"]["w"].shape[1]            # 5 * neuron_size
    nc = params[0]["inv"]["w"].shape[1]           # num_classes
    # b1 weight (C*Ho*Wo, 5h) -> (Ho*Wo, C, 5h): channel contraction stays on
    # sublanes inside the kernel (no in-kernel transpose of the features).
    w4 = params[3]["b1"]["w"].reshape(c_last, n_spatial, h5).transpose(1, 0, 2)
    chain = [
        (params[3]["b2"]["w"], params[3]["b2"]["b"]),
        (params[3]["inv"]["w"], params[3]["inv"]["b"]),
        (params[2]["inv"]["w"], params[2]["inv"]["b"]),
        (params[1]["inv"]["w"], params[1]["inv"]["b"]),
        (params[0]["inv"]["w"], params[0]["inv"]["b"]),
    ]
    wc = jnp.zeros((len(chain), h5, nc), jnp.float32)
    bc = jnp.zeros((len(chain) + 1, h5), jnp.float32)
    bc = bc.at[0, :h5].set(params[3]["b1"]["b"][0])
    for i, (w, b) in enumerate(chain):
        wc = wc.at[i, :w.shape[0], :w.shape[1]].set(w)
        bc = bc.at[i + 1, :b.shape[1]].set(b[0])
    return w4, wc, bc, h5, nc


# ---------------------------------------------------------------------------
# Wrapper: one pallas_call for the whole eval forward pass.
# ---------------------------------------------------------------------------
def vgg_al_forward(params, cfgs, x_nchw):
    N, cin, H, W = x_nchw.shape
    plan, c_last, s_last = build_plan(cfgs, IN_CH_PAD, H)
    n_spatial = s_last * s_last

    w_pack, sh_pack = _pack_conv_params(params, plan)
    masks = _build_masks(plan)
    sel = _build_sel(plan)
    w4, wc, bc, h5, nc = _pack_classifier(params, c_last, n_spatial)

    x_flat = x_nchw.reshape(N, cin, H * W)        # free, contiguous reshape

    conv_cfg = [g for k, g in plan if k == "conv"]
    max_rows = max(max(g["Cout"] for g in conv_cfg), IN_CH_PAD)
    max_lp = max((g["H"] + 3) * (g["W"] + 2) for g in conv_cfg)

    kernel = functools.partial(_vgg_al_kernel, plan=plan, in_ch=cin,
                               n_hidden5=h5, n_classes=nc)

    # NOTE: grid=(N,) + "parallel" splits the batch across TensorCores on v7x;
    # use N >= 2 there for full-chip occupancy.
    out = pl.pallas_call(
        kernel,
        out_shape=jax.ShapeDtypeStruct((N, 1, nc), jnp.float32),
        grid=(N,),
        in_specs=[
            pl.BlockSpec((None, cin, H * W), lambda n: (n, 0, 0)),
            pl.BlockSpec(w_pack.shape, lambda n: (0, 0, 0)),
            pl.BlockSpec(sh_pack.shape, lambda n: (0, 0, 0)),
            pl.BlockSpec(masks.shape, lambda n: (0, 0)),
            pl.BlockSpec(sel.shape, lambda n: (0, 0)),
            pl.BlockSpec(w4.shape, lambda n: (0, 0, 0)),
            pl.BlockSpec(wc.shape, lambda n: (0, 0, 0)),
            pl.BlockSpec(bc.shape, lambda n: (0, 0)),
        ],
        out_specs=pl.BlockSpec((None, 1, nc), lambda n: (n, 0, 0)),
        scratch_shapes=[pltpu.VMEM((max_rows, max_lp), jnp.float32)],
        compiler_params=pltpu.CompilerParams(
            dimension_semantics=("parallel",)),
    )(x_flat, w_pack, sh_pack, masks, sel, w4, wc, bc)
    return out.reshape(N, nc)


# ---------------------------------------------------------------------------
# Deterministic parameter init (synthetic; mirrors the module's shapes)
# ---------------------------------------------------------------------------
def init_conv_bn(key, cin, cout):
    k1, k2, k3, k4, k5 = jax.random.split(key, 5)
    w = jax.random.normal(k1, (cout, cin, 3, 3), jnp.float32) / (3.0 * float(cin) ** 0.5)
    gamma = 1.0 + 0.1 * jax.random.normal(k2, (cout,), jnp.float32)
    beta = 0.1 * jax.random.normal(k3, (cout,), jnp.float32)
    mean = 0.1 * jax.random.normal(k4, (cout,), jnp.float32)
    var = jax.random.uniform(k5, (cout,), jnp.float32, 0.5, 1.5)
    scale = gamma / jnp.sqrt(var + 1e-5)                          # eval-mode BN
    shift = beta - mean * scale
    w_taps = jnp.transpose(w, (2, 3, 1, 0)).reshape(9, cin, cout)  # (9,Cin,Cout)
    return {"w_taps": w_taps, "scale_shift": jnp.stack([scale, shift], axis=0)}


def init_linear(key, din, dout):
    k1, k2 = jax.random.split(key)
    w = jax.random.normal(k1, (dout, din), jnp.float32) / float(din) ** 0.5
    b = 0.1 * jax.random.normal(k2, (dout,), jnp.float32)
    return {"w": jnp.transpose(w), "b": b.reshape(1, dout)}        # (Din,Dout)


def init_vgg_al(key, in_ch, spatial, num_classes, neuron_size, cfgs):
    params = []
    feats, shape = in_ch, spatial
    for li, cfg in enumerate(cfgs):
        keys = jax.random.split(jax.random.fold_in(key, li), 16)
        convs, ki = [], 0
        for dim in cfg:
            if dim == "M":
                shape //= 2
            else:
                convs.append(init_conv_bn(keys[ki], feats, dim))
                ki += 1
                feats = dim
        flatten_size = feats * shape * shape
        layer = {
            "convs": convs,
            "g": init_linear(keys[7], num_classes, neuron_size),   # unused eval
            "b1": init_linear(keys[8], flatten_size, 5 * neuron_size),
            "b2": init_linear(keys[9], 5 * neuron_size, neuron_size),
            "inv": init_linear(keys[10], neuron_size, num_classes),
        }
        params.append(layer)
    return params


# ---------------------------------------------------------------------------
# Plain-JAX reference (numerical self-check; f32 HIGHEST precision)
# ---------------------------------------------------------------------------
def _ref_conv(x, w_taps, scale_shift):
    w = w_taps.reshape(3, 3, w_taps.shape[1], w_taps.shape[2])
    y = jax.lax.conv_general_dilated(x, w, (1, 1), "SAME",
                                     dimension_numbers=("NHWC", "HWIO", "NHWC"),
                                     precision=jax.lax.Precision.HIGHEST)
    return jnp.maximum(y * scale_shift[0] + scale_shift[1], 0.0)


def _ref_pool(x):
    return jax.lax.reduce_window(x, -jnp.inf, jax.lax.max,
                                 (1, 2, 2, 1), (1, 2, 2, 1), "VALID")


def _ref_lin(x, w, b):
    return jax.nn.sigmoid(jnp.dot(x, w, precision=jax.lax.Precision.HIGHEST) + b)


def ref_forward(params, cfgs, x_nchw):
    x = jnp.transpose(x_nchw, (0, 2, 3, 1))

    def f(layer, cfg, x):
        ci = 0
        for dim in cfg:
            if dim == "M":
                x = _ref_pool(x)
            else:
                c = layer["convs"][ci]; ci += 1
                x = _ref_conv(x, c["w_taps"], c["scale_shift"])
        return x

    def inv(layer, t):
        return _ref_lin(t, layer["inv"]["w"], layer["inv"]["b"])

    s = f(params[0], cfgs[0], x)
    s = f(params[1], cfgs[1], s)
    s = f(params[2], cfgs[2], s)
    s = f(params[3], cfgs[3], s)
    flat = jnp.transpose(s, (0, 3, 1, 2)).reshape(s.shape[0], -1)
    t0 = _ref_lin(flat, params[3]["b1"]["w"], params[3]["b1"]["b"])
    t0 = _ref_lin(t0, params[3]["b2"]["w"], params[3]["b2"]["b"])
    t0 = inv(params[3], t0)
    t0 = inv(params[2], t0)
    t0 = inv(params[1], t0)
    t0 = inv(params[0], t0)
    return t0


# ---------------------------------------------------------------------------
if __name__ == "__main__":
    key = jax.random.PRNGKey(0)
    kx, kp = jax.random.split(key)
    N = 2
    x = jax.random.normal(kx, (N, IN_CH, SPATIAL, SPATIAL), jnp.float32)   # NCHW
    params = init_vgg_al(kp, IN_CH, SPATIAL, NUM_CLASSES, NEURON_SIZE, CFGS)

    fwd = jax.jit(lambda inp: vgg_al_forward(params, CFGS, inp))
    out = jax.block_until_ready(fwd(x))
    assert out.shape == (N, NUM_CLASSES), out.shape

    ref = jax.block_until_ready(ref_forward(params, CFGS, x))
    err = float(jnp.max(jnp.abs(out - ref)))
    # bf16 MXU operands in the conv stack -> looser tolerance than pure f32,
    # still tight enough to catch any layout / pooling / flatten bug.
    assert err < 5e-2, f"mismatch vs reference: {err}"

    print("KERNEL_OK")
</pallas_src>

<mosaic_0001>
module attributes {stable_mosaic.version = 11 : i64} {
  func.func @_vgg_al_kernel(%arg0: i32, %arg1: memref<1x3x1024xf32, #tpu.memory_space<vmem>>, %arg2: memref<6x32x288xbf16, #tpu.memory_space<vmem>>, %arg3: memref<6x32x1xf32, #tpu.memory_space<vmem>>, %arg4: memref<2x1088xf32, #tpu.memory_space<vmem>>, %arg5: memref<32x16xf32, #tpu.memory_space<vmem>>, %arg6: memref<4x32x50xf32, #tpu.memory_space<vmem>>, %arg7: memref<5x50x10xf32, #tpu.memory_space<vmem>>, %arg8: memref<6x50xf32, #tpu.memory_space<vmem>>, %arg9: memref<1x1x10xf32, #tpu.memory_space<vmem>>, %arg10: memref<32x1190xf32, #tpu.memory_space<vmem>>) attributes {dimension_semantics = [#tpu.dimension_semantics<parallel>], iteration_bounds = array<i64: 2>, scalar_prefetch = 0 : i64, scratch_operands = 1 : i64, tpu.core_type = #tpu.core_type<tc>, window_params = [{transform_indices = @transform_0, window_bounds = array<i64: 1, 3, 1024>}, {pipeline_mode = #tpu.pipeline_mode<synchronous>, transform_indices = @transform_1, window_bounds = array<i64: 6, 32, 288>}, {pipeline_mode = #tpu.pipeline_mode<synchronous>, transform_indices = @transform_2, window_bounds = array<i64: 6, 32, 1>}, {pipeline_mode = #tpu.pipeline_mode<synchronous>, transform_indices = @transform_3, window_bounds = array<i64: 2, 1088>}, {pipeline_mode = #tpu.pipeline_mode<synchronous>, transform_indices = @transform_4, window_bounds = array<i64: 32, 16>}, {pipeline_mode = #tpu.pipeline_mode<synchronous>, transform_indices = @transform_5, window_bounds = array<i64: 4, 32, 50>}, {pipeline_mode = #tpu.pipeline_mode<synchronous>, transform_indices = @transform_6, window_bounds = array<i64: 5, 50, 10>}, {pipeline_mode = #tpu.pipeline_mode<synchronous>, transform_indices = @transform_7, window_bounds = array<i64: 6, 50>}, {transform_indices = @transform_8, window_bounds = array<i64: 1, 1, 10>}]} {
    %cst = arith.constant 0.000000e+00 : f32
    %0 = vector.broadcast %cst : f32 to vector<8x1190xf32>
    %c0 = arith.constant 0 : index
    %c0_0 = arith.constant 0 : index
    %1 = vector.load %arg10[%c0, %c0_0] : memref<32x1190xf32, #tpu.memory_space<vmem>>, vector<8x1190xf32>
    tpu.vector_store %arg10[%c0, %c0_0], %0 {strides = array<i32>} : memref<32x1190xf32, #tpu.memory_space<vmem>>, vector<8x1190xf32>,
    %c0_1 = arith.constant 0 : index
    %c0_2 = arith.constant 0 : index
    %c0_3 = arith.constant 0 : index
    %2 = vector.load %arg1[%c0_1, %c0_2, %c0_3] : memref<1x3x1024xf32, #tpu.memory_space<vmem>>, vector<1x3x32xf32>
    %3 = vector.shape_cast %2 : vector<1x3x32xf32> to vector<3x32xf32>
    %c0_4 = arith.constant 0 : index
    %c35 = arith.constant 35 : index
    %4 = vector.load %arg10[%c0_4, %c35] : memref<32x1190xf32, #tpu.memory_space<vmem>>, vector<3x32xf32>
    tpu.vector_store %arg10[%c0_4, %c35], %3 {strides = array<i32>} : memref<32x1190xf32, #tpu.memory_space<vmem>>, vector<3x32xf32>,
    %c0_5 = arith.constant 0 : index
    %c0_6 = arith.constant 0 : index
    %c32 = arith.constant 32 : index
    %5 = vector.load %arg1[%c0_5, %c0_6, %c32] : memref<1x3x1024xf32, #tpu.memory_space<vmem>>, vector<1x3x32xf32>
    %6 = vector.shape_cast %5 : vector<1x3x32xf32> to vector<3x32xf32>
    %c0_7 = arith.constant 0 : index
    %c69 = arith.constant 69 : index
    %7 = vector.load %arg10[%c0_7, %c69] : memref<32x1190xf32, #tpu.memory_space<vmem>>, vector<3x32xf32>
    tpu.vector_store %arg10[%c0_7, %c69], %6 {strides = array<i32>} : memref<32x1190xf32, #tpu.memory_space<vmem>>, vector<3x32xf32>,
    %c0_8 = arith.constant 0 : index
    %c0_9 = arith.constant 0 : index
    %c64 = arith.constant 64 : index
    %8 = vector.load %arg1[%c0_8, %c0_9, %c64] : memref<1x3x1024xf32, #tpu.memory_space<vmem>>, vector<1x3x32xf32>
    %9 = vector.shape_cast %8 : vector<1x3x32xf32> to vector<3x32xf32>
    %c0_10 = arith.constant 0 : index
    %c103 = arith.constant 103 : index
    %10 = vector.load %arg10[%c0_10, %c103] : memref<32x1190xf32, #tpu.memory_space<vmem>>, vector<3x32xf32>
    tpu.vector_store %arg10[%c0_10, %c103], %9 {strides = array<i32>} : memref<32x1190xf32, #tpu.memory_space<vmem>>, vector<3x32xf32>,
    %c0_11 = arith.constant 0 : index
    %c0_12 = arith.constant 0 : index
    %c96 = arith.constant 96 : index
    %11 = vector.load %arg1[%c0_11, %c0_12, %c96] : memref<1x3x1024xf32, #tpu.memory_space<vmem>>, vector<1x3x32xf32>
    %12 = vector.shape_cast %11 : vector<1x3x32xf32> to vector<3x32xf32>
    %c0_13 = arith.constant 0 : index
    %c137 = arith.constant 137 : index
    %13 = vector.load %arg10[%c0_13, %c137] : memref<32x1190xf32, #tpu.memory_space<vmem>>, vector<3x32xf32>
    tpu.vector_store %arg10[%c0_13, %c137], %12 {strides = array<i32>} : memref<32x1190xf32, #tpu.memory_space<vmem>>, vector<3x32xf32>,
    %c0_14 = arith.constant 0 : index
    %c0_15 = arith.constant 0 : index
    %c128 = arith.constant 128 : index
    %14 = vector.load %arg1[%c0_14, %c0_15, %c128] : memref<1x3x1024xf32, #tpu.memory_space<vmem>>, vector<1x3x32xf32>
    %15 = vector.shape_cast %14 : vector<1x3x32xf32> to vector<3x32xf32>
    %c0_16 = arith.constant 0 : index
    %c171 = arith.constant 171 : index
    %16 = vector.load %arg10[%c0_16, %c171] : memref<32x1190xf32, #tpu.memory_space<vmem>>, vector<3x32xf32>
    tpu.vector_store %arg10[%c0_16, %c171], %15 {strides = array<i32>} : memref<32x1190xf32, #tpu.memory_space<vmem>>, vector<3x32xf32>,
    %c0_17 = arith.constant 0 : index
    %c0_18 = arith.constant 0 : index
    %c160 = arith.constant 160 : index
    %17 = vector.load %arg1[%c0_17, %c0_18, %c160] : memref<1x3x1024xf32, #tpu.memory_space<vmem>>, vector<1x3x32xf32>
    %18 = vector.shape_cast %17 : vector<1x3x32xf32> to vector<3x32xf32>
    %c0_19 = arith.constant 0 : index
    %c205 = arith.constant 205 : index
    %19 = vector.load %arg10[%c0_19, %c205] : memref<32x1190xf32, #tpu.memory_space<vmem>>, vector<3x32xf32>
    tpu.vector_store %arg10[%c0_19, %c205], %18 {strides = array<i32>} : memref<32x1190xf32, #tpu.memory_space<vmem>>, vector<3x32xf32>,
    %c0_20 = arith.constant 0 : index
    %c0_21 = arith.constant 0 : index
    %c192 = arith.constant 192 : index
    %20 = vector.load %arg1[%c0_20, %c0_21, %c192] : memref<1x3x1024xf32, #tpu.memory_space<vmem>>, vector<1x3x32xf32>
    %21 = vector.shape_cast %20 : vector<1x3x32xf32> to vector<3x32xf32>
    %c0_22 = arith.constant 0 : index
    %c239 = arith.constant 239 : index
    %22 = vector.load %arg10[%c0_22, %c239] : memref<32x1190xf32, #tpu.memory_space<vmem>>, vector<3x32xf32>
    tpu.vector_store %arg10[%c0_22, %c239], %21 {strides = array<i32>} : memref<32x1190xf32, #tpu.memory_space<vmem>>, vector<3x32xf32>,
    %c0_23 = arith.constant 0 : index
    %c0_24 = arith.constant 0 : index
    %c224 = arith.constant 224 : index
    %23 = vector.load %arg1[%c0_23, %c0_24, %c224] : memref<1x3x1024xf32, #tpu.memory_space<vmem>>, vector<1x3x32xf32>
    %24 = vector.shape_cast %23 : vector<1x3x32xf32> to vector<3x32xf32>
    %c0_25 = arith.constant 0 : index
    %c273 = arith.constant 273 : index
    %25 = vector.load %arg10[%c0_25, %c273] : memref<32x1190xf32, #tpu.memory_space<vmem>>, vector<3x32xf32>
    tpu.vector_store %arg10[%c0_25, %c273], %24 {strides = array<i32>} : memref<32x1190xf32, #tpu.memory_space<vmem>>, vector<3x32xf32>,
    %c0_26 = arith.constant 0 : index
    %c0_27 = arith.constant 0 : index
    %c256 = arith.constant 256 : index
    %26 = vector.load %arg1[%c0_26, %c0_27, %c256] : memref<1x3x1024xf32, #tpu.memory_space<vmem>>, vector<1x3x32xf32>
    %27 = vector.shape_cast %26 : vector<1x3x32xf32> to vector<3x32xf32>
    %c0_28 = arith.constant 0 : index
    %c307 = arith.constant 307 : index
    %28 = vector.load %arg10[%c0_28, %c307] : memref<32x1190xf32, #tpu.memory_space<vmem>>, vector<3x32xf32>
    tpu.vector_store %arg10[%c0_28, %c307], %27 {strides = array<i32>} : memref<32x1190xf32, #tpu.memory_space<vmem>>, vector<3x32xf32>,
    %c0_29 = arith.constant 0 : index
    %c0_30 = arith.constant 0 : index
    %c288 = arith.constant 288 : index
    %29 = vector.load %arg1[%c0_29, %c0_30, %c288] : memref<1x3x1024xf32, #tpu.memory_space<vmem>>, vector<1x3x32xf32>
    %30 = vector.shape_cast %29 : vector<1x3x32xf32> to vector<3x32xf32>
    %c0_31 = arith.constant 0 : index
    %c341 = arith.constant 341 : index
    %31 = vector.load %arg10[%c0_31, %c341] : memref<32x1190xf32, #tpu.memory_space<vmem>>, vector<3x32xf32>
    tpu.vector_store %arg10[%c0_31, %c341], %30 {strides = array<i32>} : memref<32x1190xf32, #tpu.memory_space<vmem>>, vector<3x32xf32>,
    %c0_32 = arith.constant 0 : index
    %c0_33 = arith.constant 0 : index
    %c320 = arith.constant 320 : index
    %32 = vector.load %arg1[%c0_32, %c0_33, %c320] : memref<1x3x1024xf32, #tpu.memory_space<vmem>>, vector<1x3x32xf32>
    %33 = vector.shape_cast %32 : vector<1x3x32xf32> to vector<3x32xf32>
    %c0_34 = arith.constant 0 : index
    %c375 = arith.constant 375 : index
    %34 = vector.load %arg10[%c0_34, %c375] : memref<32x1190xf32, #tpu.memory_space<vmem>>, vector<3x32xf32>
    tpu.vector_store %arg10[%c0_34, %c375], %33 {strides = array<i32>} : memref<32x1190xf32, #tpu.memory_space<vmem>>, vector<3x32xf32>,
    %c0_35 = arith.constant 0 : index
    %c0_36 = arith.constant 0 : index
    %c352 = arith.constant 352 : index
    %35 = vector.load %arg1[%c0_35, %c0_36, %c352] : memref<1x3x1024xf32, #tpu.memory_space<vmem>>, vector<1x3x32xf32>
    %36 = vector.shape_cast %35 : vector<1x3x32xf32> to vector<3x32xf32>
    %c0_37 = arith.constant 0 : index
    %c409 = arith.constant 409 : index
    %37 = vector.load %arg10[%c0_37, %c409] : memref<32x1190xf32, #tpu.memory_space<vmem>>, vector<3x32xf32>
    tpu.vector_store %arg10[%c0_37, %c409], %36 {strides = array<i32>} : memref<32x1190xf32, #tpu.memory_space<vmem>>, vector<3x32xf32>,
    %c0_38 = arith.constant 0 : index
    %c0_39 = arith.constant 0 : index
    %c384 = arith.constant 384 : index
    %38 = vector.load %arg1[%c0_38, %c0_39, %c384] : memref<1x3x1024xf32, #tpu.memory_space<vmem>>, vector<1x3x32xf32>
    %39 = vector.shape_cast %38 : vector<1x3x32xf32> to vector<3x32xf32>
    %c0_40 = arith.constant 0 : index
    %c443 = arith.constant 443 : index
    %40 = vector.load %arg10[%c0_40, %c443] : memref<32x1190xf32, #tpu.memory_space<vmem>>, vector<3x32xf32>
    tpu.vector_store %arg10[%c0_40, %c443], %39 {strides = array<i32>} : memref<32x1190xf32, #tpu.memory_space<vmem>>, vector<3x32xf32>,
    %c0_41 = arith.constant 0 : index
    %c0_42 = arith.constant 0 : index
    %c416 = arith.constant 416 : index
    %41 = vector.load %arg1[%c0_41, %c0_42, %c416] : memref<1x3x1024xf32, #tpu.memory_space<vmem>>, vector<1x3x32xf32>
    %42 = vector.shape_cast %41 : vector<1x3x32xf32> to vector<3x32xf32>
    %c0_43 = arith.constant 0 : index
    %c477 = arith.constant 477 : index
    %43 = vector.load %arg10[%c0_43, %c477] : memref<32x1190xf32, #tpu.memory_space<vmem>>, vector<3x32xf32>
    tpu.vector_store %arg10[%c0_43, %c477], %42 {strides = array<i32>} : memref<32x1190xf32, #tpu.memory_space<vmem>>, vector<3x32xf32>,
    %c0_44 = arith.constant 0 : index
    %c0_45 = arith.constant 0 : index
    %c448 = arith.constant 448 : index
    %44 = vector.load %arg1[%c0_44, %c0_45, %c448] : memref<1x3x1024xf32, #tpu.memory_space<vmem>>, vector<1x3x32xf32>
    %45 = vector.shape_cast %44 : vector<1x3x32xf32> to vector<3x32xf32>
    %c0_46 = arith.constant 0 : index
    %c511 = arith.constant 511 : index
    %46 = vector.load %arg10[%c0_46, %c511] : memref<32x1190xf32, #tpu.memory_space<vmem>>, vector<3x32xf32>
    tpu.vector_store %arg10[%c0_46, %c511], %45 {strides = array<i32>} : memref<32x1190xf32, #tpu.memory_space<vmem>>, vector<3x32xf32>,
    %c0_47 = arith.constant 0 : index
    %c0_48 = arith.constant 0 : index
    %c480 = arith.constant 480 : index
    %47 = vector.load %arg1[%c0_47, %c0_48, %c480] : memref<1x3x1024xf32, #tpu.memory_space<vmem>>, vector<1x3x32xf32>
    %48 = vector.shape_cast %47 : vector<1x3x32xf32> to vector<3x32xf32>
    %c0_49 = arith.constant 0 : index
    %c545 = arith.constant 545 : index
    %49 = vector.load %arg10[%c0_49, %c545] : memref<32x1190xf32, #tpu.memory_space<vmem>>, vector<3x32xf32>
    tpu.vector_store %arg10[%c0_49, %c545], %48 {strides = array<i32>} : memref<32x1190xf32, #tpu.memory_space<vmem>>, vector<3x32xf32>,
    %c0_50 = arith.constant 0 : index
    %c0_51 = arith.constant 0 : index
    %c512 = arith.constant 512 : index
    %50 = vector.load %arg1[%c0_50, %c0_51, %c512] : memref<1x3x1024xf32, #tpu.memory_space<vmem>>, vector<1x3x32xf32>
    %51 = vector.shape_cast %50 : vector<1x3x32xf32> to vector<3x32xf32>
    %c0_52 = arith.constant 0 : index
    %c579 = arith.constant 579 : index
    %52 = vector.load %arg10[%c0_52, %c579] : memref<32x1190xf32, #tpu.memory_space<vmem>>, vector<3x32xf32>
    tpu.vector_store %arg10[%c0_52, %c579], %51 {strides = array<i32>} : memref<32x1190xf32, #tpu.memory_space<vmem>>, vector<3x32xf32>,
    %c0_53 = arith.constant 0 : index
    %c0_54 = arith.constant 0 : index
    %c544 = arith.constant 544 : index
    %53 = vector.load %arg1[%c0_53, %c0_54, %c544] : memref<1x3x1024xf32, #tpu.memory_space<vmem>>, vector<1x3x32xf32>
    %54 = vector.shape_cast %53 : vector<1x3x32xf32> to vector<3x32xf32>
    %c0_55 = arith.constant 0 : index
    %c613 = arith.constant 613 : index
    %55 = vector.load %arg10[%c0_55, %c613] : memref<32x1190xf32, #tpu.memory_space<vmem>>, vector<3x32xf32>
    tpu.vector_store %arg10[%c0_55, %c613], %54 {strides = array<i32>} : memref<32x1190xf32, #tpu.memory_space<vmem>>, vector<3x32xf32>,
    %c0_56 = arith.constant 0 : index
    %c0_57 = arith.constant 0 : index
    %c576 = arith.constant 576 : index
    %56 = vector.load %arg1[%c0_56, %c0_57, %c576] : memref<1x3x1024xf32, #tpu.memory_space<vmem>>, vector<1x3x32xf32>
    %57 = vector.shape_cast %56 : vector<1x3x32xf32> to vector<3x32xf32>
    %c0_58 = arith.constant 0 : index
    %c647 = arith.constant 647 : index
    %58 = vector.load %arg10[%c0_58, %c647] : memref<32x1190xf32, #tpu.memory_space<vmem>>, vector<3x32xf32>
    tpu.vector_store %arg10[%c0_58, %c647], %57 {strides = array<i32>} : memref<32x1190xf32, #tpu.memory_space<vmem>>, vector<3x32xf32>,
    %c0_59 = arith.constant 0 : index
    %c0_60 = arith.constant 0 : index
    %c608 = arith.constant 608 : index
    %59 = vector.load %arg1[%c0_59, %c0_60, %c608] : memref<1x3x1024xf32, #tpu.memory_space<vmem>>, vector<1x3x32xf32>
    %60 = vector.shape_cast %59 : vector<1x3x32xf32> to vector<3x32xf32>
    %c0_61 = arith.constant 0 : index
    %c681 = arith.constant 681 : index
    %61 = vector.load %arg10[%c0_61, %c681] : memref<32x1190xf32, #tpu.memory_space<vmem>>, vector<3x32xf32>
    tpu.vector_store %arg10[%c0_61, %c681], %60 {strides = array<i32>} : memref<32x1190xf32, #tpu.memory_space<vmem>>, vector<3x32xf32>,
    %c0_62 = arith.constant 0 : index
    %c0_63 = arith.constant 0 : index
    %c640 = arith.constant 640 : index
    %62 = vector.load %arg1[%c0_62, %c0_63, %c640] : memref<1x3x1024xf32, #tpu.memory_space<vmem>>, vector<1x3x32xf32>
    %63 = vector.shape_cast %62 : vector<1x3x32xf32> to vector<3x32xf32>
    %c0_64 = arith.constant 0 : index
    %c715 = arith.constant 715 : index
    %64 = vector.load %arg10[%c0_64, %c715] : memref<32x1190xf32, #tpu.memory_space<vmem>>, vector<3x32xf32>
    tpu.vector_store %arg10[%c0_64, %c715], %63 {strides = array<i32>} : memref<32x1190xf32, #tpu.memory_space<vmem>>, vector<3x32xf32>,
    %c0_65 = arith.constant 0 : index
    %c0_66 = arith.constant 0 : index
    %c672 = arith.constant 672 : index
    %65 = vector.load %arg1[%c0_65, %c0_66, %c672] : memref<1x3x1024xf32, #tpu.memory_space<vmem>>, vector<1x3x32xf32>
    %66 = vector.shape_cast %65 : vector<1x3x32xf32> to vector<3x32xf32>
    %c0_67 = arith.constant 0 : index
    %c749 = arith.constant 749 : index
    %67 = vector.load %arg10[%c0_67, %c749] : memref<32x1190xf32, #tpu.memory_space<vmem>>, vector<3x32xf32>
    tpu.vector_store %arg10[%c0_67, %c749], %66 {strides = array<i32>} : memref<32x1190xf32, #tpu.memory_space<vmem>>, vector<3x32xf32>,
    %c0_68 = arith.constant 0 : index
    %c0_69 = arith.constant 0 : index
    %c704 = arith.constant 704 : index
    %68 = vector.load %arg1[%c0_68, %c0_69, %c704] : memref<1x3x1024xf32, #tpu.memory_space<vmem>>, vector<1x3x32xf32>
    %69 = vector.shape_cast %68 : vector<1x3x32xf32> to vector<3x32xf32>
    %c0_70 = arith.constant 0 : index
    %c783 = arith.constant 783 : index
    %70 = vector.load %arg10[%c0_70, %c783] : memref<32x1190xf32, #tpu.memory_space<vmem>>, vector<3x32xf32>
    tpu.vector_store %arg10[%c0_70, %c783], %69 {strides = array<i32>} : memref<32x1190xf32, #tpu.memory_space<vmem>>, vector<3x32xf32>,
    %c0_71 = arith.constant 0 : index
    %c0_72 = arith.constant 0 : index
    %c736 = arith.constant 736 : index
    %71 = vector.load %arg1[%c0_71, %c0_72, %c736] : memref<1x3x1024xf32, #tpu.memory_space<vmem>>, vector<1x3x32xf32>
    %72 = vector.shape_cast %71 : vector<1x3x32xf32> to vector<3x32xf32>
    %c0_73 = arith.constant 0 : index
    %c817 = arith.constant 817 : index
    %73 = vector.load %arg10[%c0_73, %c817] : memref<32x1190xf32, #tpu.memory_space<vmem>>, vector<3x32xf32>
    tpu.vector_store %arg10[%c0_73, %c817], %72 {strides = array<i32>} : memref<32x1190xf32, #tpu.memory_space<vmem>>, vector<3x32xf32>,
    %c0_74 = arith.constant 0 : index
    %c0_75 = arith.constant 0 : index
    %c768 = arith.constant 768 : index
    %74 = vector.load %arg1[%c0_74, %c0_75, %c768] : memref<1x3x1024xf32, #tpu.memory_space<vmem>>, vector<1x3x32xf32>
    %75 = vector.shape_cast %74 : vector<1x3x32xf32> to vector<3x32xf32>
    %c0_76 = arith.constant 0 : index
    %c851 = arith.constant 851 : index
    %76 = vector.load %arg10[%c0_76, %c851] : memref<32x1190xf32, #tpu.memory_space<vmem>>, vector<3x32xf32>
    tpu.vector_store %arg10[%c0_76, %c851], %75 {strides = array<i32>} : memref<32x1190xf32, #tpu.memory_space<vmem>>, vector<3x32xf32>,
    %c0_77 = arith.constant 0 : index
    %c0_78 = arith.constant 0 : index
    %c800 = arith.constant 800 : index
    %77 = vector.load %arg1[%c0_77, %c0_78, %c800] : memref<1x3x1024xf32, #tpu.memory_space<vmem>>, vector<1x3x32xf32>
    %78 = vector.shape_cast %77 : vector<1x3x32xf32> to vector<3x32xf32>
    %c0_79 = arith.constant 0 : index
    %c885 = arith.constant 885 : index
    %79 = vector.load %arg10[%c0_79, %c885] : memref<32x1190xf32, #tpu.memory_space<vmem>>, vector<3x32xf32>
    tpu.vector_store %arg10[%c0_79, %c885], %78 {strides = array<i32>} : memref<32x1190xf32, #tpu.memory_space<vmem>>, vector<3x32xf32>,
    %c0_80 = arith.constant 0 : index
    %c0_81 = arith.constant 0 : index
    %c832 = arith.constant 832 : index
    %80 = vector.load %arg1[%c0_80, %c0_81, %c832] : memref<1x3x1024xf32, #tpu.memory_space<vmem>>, vector<1x3x32xf32>
    %81 = vector.shape_cast %80 : vector<1x3x32xf32> to vector<3x32xf32>
    %c0_82 = arith.constant 0 : index
    %c919 = arith.constant 919 : index
    %82 = vector.load %arg10[%c0_82, %c919] : memref<32x1190xf32, #tpu.memory_space<vmem>>, vector<3x32xf32>
    tpu.vector_store %arg10[%c0_82, %c919], %81 {strides = array<i32>} : memref<32x1190xf32, #tpu.memory_space<vmem>>, vector<3x32xf32>,
    %c0_83 = arith.constant 0 : index
    %c0_84 = arith.constant 0 : index
    %c864 = arith.constant 864 : index
    %83 = vector.load %arg1[%c0_83, %c0_84, %c864] : memref<1x3x1024xf32, #tpu.memory_space<vmem>>, vector<1x3x32xf32>
    %84 = vector.shape_cast %83 : vector<1x3x32xf32> to vector<3x32xf32>
    %c0_85 = arith.constant 0 : index
    %c953 = arith.constant 953 : index
    %85 = vector.load %arg10[%c0_85, %c953] : memref<32x1190xf32, #tpu.memory_space<vmem>>, vector<3x32xf32>
    tpu.vector_store %arg10[%c0_85, %c953], %84 {strides = array<i32>} : memref<32x1190xf32, #tpu.memory_space<vmem>>, vector<3x32xf32>,
    %c0_86 = arith.constant 0 : index
    %c0_87 = arith.constant 0 : index
    %c896 = arith.constant 896 : index
    %86 = vector.load %arg1[%c0_86, %c0_87, %c896] : memref<1x3x1024xf32, #tpu.memory_space<vmem>>, vector<1x3x32xf32>
    %87 = vector.shape_cast %86 : vector<1x3x32xf32> to vector<3x32xf32>
    %c0_88 = arith.constant 0 : index
    %c987 = arith.constant 987 : index
    %88 = vector.load %arg10[%c0_88, %c987] : memref<32x1190xf32, #tpu.memory_space<vmem>>, vector<3x32xf32>
    tpu.vector_store %arg10[%c0_88, %c987], %87 {strides = array<i32>} : memref<32x1190xf32, #tpu.memory_space<vmem>>, vector<3x32xf32>,
    %c0_89 = arith.constant 0 : index
    %c0_90 = arith.constant 0 : index
    %c928 = arith.constant 928 : index
    %89 = vector.load %arg1[%c0_89, %c0_90, %c928] : memref<1x3x1024xf32, #tpu.memory_space<vmem>>, vector<1x3x32xf32>
    %90 = vector.shape_cast %89 : vector<1x3x32xf32> to vector<3x32xf32>
    %c0_91 = arith.constant 0 : index
    %c1021 = arith.constant 1021 : index
    %91 = vector.load %arg10[%c0_91, %c1021] : memref<32x1190xf32, #tpu.memory_space<vmem>>, vector<3x32xf32>
    tpu.vector_store %arg10[%c0_91, %c1021], %90 {strides = array<i32>} : memref<32x1190xf32, #tpu.memory_space<vmem>>, vector<3x32xf32>,
    %c0_92 = arith.constant 0 : index
    %c0_93 = arith.constant 0 : index
    %c960 = arith.constant 960 : index
    %92 = vector.load %arg1[%c0_92, %c0_93, %c960] : memref<1x3x1024xf32, #tpu.memory_space<vmem>>, vector<1x3x32xf32>
    %93 = vector.shape_cast %92 : vector<1x3x32xf32> to vector<3x32xf32>
    %c0_94 = arith.constant 0 : index
    %c1055 = arith.constant 1055 : index
    %94 = vector.load %arg10[%c0_94, %c1055] : memref<32x1190xf32, #tpu.memory_space<vmem>>, vector<3x32xf32>
    tpu.vector_store %arg10[%c0_94, %c1055], %93 {strides = array<i32>} : memref<32x1190xf32, #tpu.memory_space<vmem>>, vector<3x32xf32>,
    %c0_95 = arith.constant 0 : index
    %c0_96 = arith.constant 0 : index
    %c992 = arith.constant 992 : index
    %95 = vector.load %arg1[%c0_95, %c0_96, %c992] : memref<1x3x1024xf32, #tpu.memory_space<vmem>>, vector<1x3x32xf32>
    %96 = vector.shape_cast %95 : vector<1x3x32xf32> to vector<3x32xf32>
    %c0_97 = arith.constant 0 : index
    %c1089 = arith.constant 1089 : index
    %97 = vector.load %arg10[%c0_97, %c1089] : memref<32x1190xf32, #tpu.memory_space<vmem>>, vector<3x32xf32>
    tpu.vector_store %arg10[%c0_97, %c1089], %96 {strides = array<i32>} : memref<32x1190xf32, #tpu.memory_space<vmem>>, vector<3x32xf32>,
    %c0_98 = arith.constant 0 : index
    %c0_99 = arith.constant 0 : index
    %c0_100 = arith.constant 0 : index
    %98 = vector.load %arg2[%c0_98, %c0_99, %c0_100] : memref<6x32x288xbf16, #tpu.memory_space<vmem>>, vector<1x8x72xbf16>
    %99 = vector.shape_cast %98 : vector<1x8x72xbf16> to vector<8x72xbf16>
    %c0_101 = arith.constant 0 : index
    %c0_102 = arith.constant 0 : index
    %c0_103 = arith.constant 0 : index
    %100 = vector.load %arg3[%c0_101, %c0_102, %c0_103] : memref<6x32x1xf32, #tpu.memory_space<vmem>>, vector<1x8x1xf32>
    %101 = vector.shape_cast %100 : vector<1x8x1xf32> to vector<8x1xf32>
    "tpu.region"() ({
      %alloca = memref.alloca() : memref<72x1088xf32, #tpu.memory_space<vmem>>
      %c0_291 = arith.constant 0 : index
      %c0_292 = arith.constant 0 : index
      %340 = vector.load %arg10[%c0_291, %c0_292] : memref<32x1190xf32, #tpu.memory_space<vmem>>, vector<8x1088xf32>
      %c0_293 = arith.constant 0 : index
      %c0_294 = arith.constant 0 : index
      %341 = vector.load %alloca[%c0_293, %c0_294] : memref<72x1088xf32, #tpu.memory_space<vmem>>, vector<8x1088xf32>
      tpu.vector_store %alloca[%c0_293, %c0_294], %340 {strides = array<i32>} : memref<72x1088xf32, #tpu.memory_space<vmem>>, vector<8x1088xf32>,
      %c0_295 = arith.constant 0 : index
      %c1_296 = arith.constant 1 : index
      %342 = vector.load %arg10[%c0_295, %c1_296] : memref<32x1190xf32, #tpu.memory_space<vmem>>, vector<8x1088xf32>
      %c8_297 = arith.constant 8 : index
      %c0_298 = arith.constant 0 : index
      %343 = vector.load %alloca[%c8_297, %c0_298] : memref<72x1088xf32, #tpu.memory_space<vmem>>, vector<8x1088xf32>
      tpu.vector_store %alloca[%c8_297, %c0_298], %342 {strides = array<i32>} : memref<72x1088xf32, #tpu.memory_space<vmem>>, vector<8x1088xf32>,
      %c0_299 = arith.constant 0 : index
      %c2_300 = arith.constant 2 : index
      %344 = vector.load %arg10[%c0_299, %c2_300] : memref<32x1190xf32, #tpu.memory_space<vmem>>, vector<8x1088xf32>
      %c16 = arith.constant 16 : index
      %c0_301 = arith.constant 0 : index
      %345 = vector.load %alloca[%c16, %c0_301] : memref<72x1088xf32, #tpu.memory_space<vmem>>, vector<8x1088xf32>
      tpu.vector_store %alloca[%c16, %c0_301], %344 {strides = array<i32>} : memref<72x1088xf32, #tpu.memory_space<vmem>>, vector<8x1088xf32>,
      %c0_302 = arith.constant 0 : index
      %c34 = arith.constant 34 : index
      %346 = vector.load %arg10[%c0_302, %c34] : memref<32x1190xf32, #tpu.memory_space<vmem>>, vector<8x1088xf32>
      %c24 = arith.constant 24 : index
      %c0_303 = arith.constant 0 : index
      %347 = vector.load %alloca[%c24, %c0_303] : memref<72x1088xf32, #tpu.memory_space<vmem>>, vector<8x1088xf32>
      tpu.vector_store %alloca[%c24, %c0_303], %346 {strides = array<i32>} : memref<72x1088xf32, #tpu.memory_space<vmem>>, vector<8x1088xf32>,
      %c0_304 = arith.constant 0 : index
      %c35_305 = arith.constant 35 : index
      %348 = vector.load %arg10[%c0_304, %c35_305] : memref<32x1190xf32, #tpu.memory_space<vmem>>, vector<8x1088xf32>
      %c32_306 = arith.constant 32 : index
      %c0_307 = arith.constant 0 : index
      %349 = vector.load %alloca[%c32_306, %c0_307] : memref<72x1088xf32, #tpu.memory_space<vmem>>, vector<8x1088xf32>
      tpu.vector_store %alloca[%c32_306, %c0_307], %348 {strides = array<i32>} : memref<72x1088xf32, #tpu.memory_space<vmem>>, vector<8x1088xf32>,
      %c0_308 = arith.constant 0 : index
      %c36_309 = arith.constant 36 : index
      %350 = vector.load %arg10[%c0_308, %c36_309] : memref<32x1190xf32, #tpu.memory_space<vmem>>, vector<8x1088xf32>
      %c40 = arith.constant 40 : index
      %c0_310 = arith.constant 0 : index
      %351 = vector.load %alloca[%c40, %c0_310] : memref<72x1088xf32, #tpu.memory_space<vmem>>, vector<8x1088xf32>
      tpu.vector_store %alloca[%c40, %c0_310], %350 {strides = array<i32>} : memref<72x1088xf32, #tpu.memory_space<vmem>>, vector<8x1088xf32>,
      %c0_311 = arith.constant 0 : index
      %c68 = arith.constant 68 : index
      %352 = vector.load %arg10[%c0_311, %c68] : memref<32x1190xf32, #tpu.memory_space<vmem>>, vector<8x1088xf32>
      %c48 = arith.constant 48 : index
      %c0_312 = arith.constant 0 : index
      %353 = vector.load %alloca[%c48, %c0_312] : memref<72x1088xf32, #tpu.memory_space<vmem>>, vector<8x1088xf32>
      tpu.vector_store %alloca[%c48, %c0_312], %352 {strides = array<i32>} : memref<72x1088xf32, #tpu.memory_space<vmem>>, vector<8x1088xf32>,
      %c0_313 = arith.constant 0 : index
      %c69_314 = arith.constant 69 : index
      %354 = vector.load %arg10[%c0_313, %c69_314] : memref<32x1190xf32, #tpu.memory_space<vmem>>, vector<8x1088xf32>
      %c56 = arith.constant 56 : index
      %c0_315 = arith.constant 0 : index
      %355 = vector.load %alloca[%c56, %c0_315] : memref<72x1088xf32, #tpu.memory_space<vmem>>, vector<8x1088xf32>
      tpu.vector_store %alloca[%c56, %c0_315], %354 {strides = array<i32>} : memref<72x1088xf32, #tpu.memory_space<vmem>>, vector<8x1088xf32>,
      %c0_316 = arith.constant 0 : index
      %c70_317 = arith.constant 70 : index
      %356 = vector.load %arg10[%c0_316, %c70_317] : memref<32x1190xf32, #tpu.memory_space<vmem>>, vector<8x1088xf32>
      %c64_318 = arith.constant 64 : index
      %c0_319 = arith.constant 0 : index
      %357 = vector.load %alloca[%c64_318, %c0_319] : memref<72x1088xf32, #tpu.memory_space<vmem>>, vector<8x1088xf32>
      tpu.vector_store %alloca[%c64_318, %c0_319], %356 {strides = array<i32>} : memref<72x1088xf32, #tpu.memory_space<vmem>>, vector<8x1088xf32>,
      %c0_320 = arith.constant 0 : index
      %c0_321 = arith.constant 0 : index
      %358 = vector.load %alloca[%c0_320, %c0_321] : memref<72x1088xf32, #tpu.memory_space<vmem>>, vector<72x1088xf32>
      %359 = arith.truncf %358 : vector<72x1088xf32> to vector<72x1088xbf16>
      %cst_322 = arith.constant dense<0.000000e+00> : vector<8x1088xf32>
      %360 = tpu.matmul %99, %359, %cst_322 {dimension_numbers = #tpu.dot_dimension_numbers<[1], [0], [0], [1], [0, 0, 1, 1], [], []>} : vector<8x72xbf16>, vector<72x1088xbf16>, vector<8x1088xf32> -> vector<8x1088xf32>
      %361 = vector.broadcast %101 : vector<8x1xf32> to vector<8x1088xf32>
      %362 = arith.addf %360, %361 : vector<8x1088xf32>
      %cst_323 = arith.constant 0.000000e+00 : f32
      %363 = vector.broadcast %cst_323 : f32 to vector<8x1088xf32>
      %364 = arith.maximumf %362, %363 : vector<8x1088xf32>
      %c0_324 = arith.constant 0 : index
      %c0_325 = arith.constant 0 : index
      %365 = vector.load %arg4[%c0_324, %c0_325] : memref<2x1088xf32, #tpu.memory_space<vmem>>, vector<1x1088xf32>
      %366 = vector.broadcast %365 : vector<1x1088xf32> to vector<8x1088xf32>
      %367 = arith.mulf %364, %366 : vector<8x1088xf32>
      %cst_326 = arith.constant 0.000000e+00 : f32
      %368 = vector.broadcast %cst_326 : f32 to vector<8x1190xf32>
      %c0_327 = arith.constant 0 : index
      %c0_328 = arith.constant 0 : index
      %369 = vector.load %arg10[%c0_327, %c0_328] : memref<32x1190xf32, #tpu.memory_space<vmem>>, vector<8x1190xf32>
      tpu.vector_store %arg10[%c0_327, %c0_328], %368 {strides = array<i32>} : memref<32x1190xf32, #tpu.memory_space<vmem>>, vector<8x1190xf32>,
      %c0_329 = arith.constant 0 : index
      %c35_330 = arith.constant 35 : index
      %370 = vector.load %arg10[%c0_329, %c35_330] : memref<32x1190xf32, #tpu.memory_space<vmem>>, vector<8x1088xf32>
      tpu.vector_store %arg10[%c0_329, %c35_330], %367 {strides = array<i32>} : memref<32x1190xf32, #tpu.memory_space<vmem>>, vector<8x1088xf32>,
      tpu.yield
    }) : () -> ()
    %c1 = arith.constant 1 : index
    %c0_104 = arith.constant 0 : index
    %c0_105 = arith.constant 0 : index
    %102 = vector.load %arg2[%c1, %c0_104, %c0_105] : memref<6x32x288xbf16, #tpu.memory_space<vmem>>, vector<1x16x72xbf16>
    %103 = vector.shape_cast %102 : vector<1x16x72xbf16> to vector<16x72xbf16>
    %c1_106 = arith.constant 1 : index
    %c0_107 = arith.constant 0 : index
    %c0_108 = arith.constant 0 : index
    %104 = vector.load %arg3[%c1_106, %c0_107, %c0_108] : memref<6x32x1xf32, #tpu.memory_space<vmem>>, vector<1x16x1xf32>
    %105 = vector.shape_cast %104 : vector<1x16x1xf32> to vector<16x1xf32>
    "tpu.region"() ({
      %alloca = memref.alloca() : memref<72x1088xf32, #tpu.memory_space<vmem>>
      %c0_291 = arith.constant 0 : index
      %c0_292 = arith.constant 0 : index
      %340 = vector.load %arg10[%c0_291, %c0_292] : memref<32x1190xf32, #tpu.memory_space<vmem>>, vector<8x1088xf32>
      %c0_293 = arith.constant 0 : index
      %c0_294 = arith.constant 0 : index
      %341 = vector.load %alloca[%c0_293, %c0_294] : memref<72x1088xf32, #tpu.memory_space<vmem>>, vector<8x1088xf32>
      tpu.vector_store %alloca[%c0_293, %c0_294], %340 {strides = array<i32>} : memref<72x1088xf32, #tpu.memory_space<vmem>>, vector<8x1088xf32>,
      %c0_295 = arith.constant 0 : index
      %c1_296 = arith.constant 1 : index
      %342 = vector.load %arg10[%c0_295, %c1_296] : memref<32x1190xf32, #tpu.memory_space<vmem>>, vector<8x1088xf32>
      %c8_297 = arith.constant 8 : index
      %c0_298 = arith.constant 0 : index
      %343 = vector.load %alloca[%c8_297, %c0_298] : memref<72x1088xf32, #tpu.memory_space<vmem>>, vector<8x1088xf32>
      tpu.vector_store %alloca[%c8_297, %c0_298], %342 {strides = array<i32>} : memref<72x1088xf32, #tpu.memory_space<vmem>>, vector<8x1088xf32>,
      %c0_299 = arith.constant 0 : index
      %c2_300 = arith.constant 2 : index
      %344 = vector.load %arg10[%c0_299, %c2_300] : memref<32x1190xf32, #tpu.memory_space<vmem>>, vector<8x1088xf32>
      %c16 = arith.constant 16 : index
      %c0_301 = arith.constant 0 : index
      %345 = vector.load %alloca[%c16, %c0_301] : memref<72x1088xf32, #tpu.memory_space<vmem>>, vector<8x1088xf32>
      tpu.vector_store %alloca[%c16, %c0_301], %344 {strides = array<i32>} : memref<72x1088xf32, #tpu.memory_space<vmem>>, vector<8x1088xf32>,
      %c0_302 = arith.constant 0 : index
      %c34 = arith.constant 34 : index
      %346 = vector.load %arg10[%c0_302, %c34] : memref<32x1190xf32, #tpu.memory_space<vmem>>, vector<8x1088xf32>
      %c24 = arith.constant 24 : index
      %c0_303 = arith.constant 0 : index
      %347 = vector.load %alloca[%c24, %c0_303] : memref<72x1088xf32, #tpu.memory_space<vmem>>, vector<8x1088xf32>
      tpu.vector_store %alloca[%c24, %c0_303], %346 {strides = array<i32>} : memref<72x1088xf32, #tpu.memory_space<vmem>>, vector<8x1088xf32>,
      %c0_304 = arith.constant 0 : index
      %c35_305 = arith.constant 35 : index
      %348 = vector.load %arg10[%c0_304, %c35_305] : memref<32x1190xf32, #tpu.memory_space<vmem>>, vector<8x1088xf32>
      %c32_306 = arith.constant 32 : index
      %c0_307 = arith.constant 0 : index
      %349 = vector.load %alloca[%c32_306, %c0_307] : memref<72x1088xf32, #tpu.memory_space<vmem>>, vector<8x1088xf32>
      tpu.vector_store %alloca[%c32_306, %c0_307], %348 {strides = array<i32>} : memref<72x1088xf32, #tpu.memory_space<vmem>>, vector<8x1088xf32>,
      %c0_308 = arith.constant 0 : index
      %c36_309 = arith.constant 36 : index
      %350 = vector.load %arg10[%c0_308, %c36_309] : memref<32x1190xf32, #tpu.memory_space<vmem>>, vector<8x1088xf32>
      %c40 = arith.constant 40 : index
      %c0_310 = arith.constant 0 : index
      %351 = vector.load %alloca[%c40, %c0_310] : memref<72x1088xf32, #tpu.memory_space<vmem>>, vector<8x1088xf32>
      tpu.vector_store %alloca[%c40, %c0_310], %350 {strides = array<i32>} : memref<72x1088xf32, #tpu.memory_space<vmem>>, vector<8x1088xf32>,
      %c0_311 = arith.constant 0 : index
      %c68 = arith.constant 68 : index
      %352 = vector.load %arg10[%c0_311, %c68] : memref<32x1190xf32, #tpu.memory_space<vmem>>, vector<8x1088xf32>
      %c48 = arith.constant 48 : index
      %c0_312 = arith.constant 0 : index
      %353 = vector.load %alloca[%c48, %c0_312] : memref<72x1088xf32, #tpu.memory_space<vmem>>, vector<8x1088xf32>
      tpu.vector_store %alloca[%c48, %c0_312], %352 {strides = array<i32>} : memref<72x1088xf32, #tpu.memory_space<vmem>>, vector<8x1088xf32>,
      %c0_313 = arith.constant 0 : index
      %c69_314 = arith.constant 69 : index
      %354 = vector.load %arg10[%c0_313, %c69_314] : memref<32x1190xf32, #tpu.memory_space<vmem>>, vector<8x1088xf32>
      %c56 = arith.constant 56 : index
      %c0_315 = arith.constant 0 : index
      %355 = vector.load %alloca[%c56, %c0_315] : memref<72x1088xf32, #tpu.memory_space<vmem>>, vector<8x1088xf32>
      tpu.vector_store %alloca[%c56, %c0_315], %354 {strides = array<i32>} : memref<72x1088xf32, #tpu.memory_space<vmem>>, vector<8x1088xf32>,
      %c0_316 = arith.constant 0 : index
      %c70_317 = arith.constant 70 : index
      %356 = vector.load %arg10[%c0_316, %c70_317] : memref<32x1190xf32, #tpu.memory_space<vmem>>, vector<8x1088xf32>
      %c64_318 = arith.constant 64 : index
      %c0_319 = arith.constant 0 : index
      %357 = vector.load %alloca[%c64_318, %c0_319] : memref<72x1088xf32, #tpu.memory_space<vmem>>, vector<8x1088xf32>
      tpu.vector_store %alloca[%c64_318, %c0_319], %356 {strides = array<i32>} : memref<72x1088xf32, #tpu.memory_space<vmem>>, vector<8x1088xf32>,
      %c0_320 = arith.constant 0 : index
      %c0_321 = arith.constant 0 : index
      %358 = vector.load %alloca[%c0_320, %c0_321] : memref<72x1088xf32, #tpu.memory_space<vmem>>, vector<72x1088xf32>
      %359 = arith.truncf %358 : vector<72x1088xf32> to vector<72x1088xbf16>
      %cst_322 = arith.constant dense<0.000000e+00> : vector<16x1088xf32>
      %360 = tpu.matmul %103, %359, %cst_322 {dimension_numbers = #tpu.dot_dimension_numbers<[1], [0], [0], [1], [0, 0, 1, 1], [], []>} : vector<16x72xbf16>, vector<72x1088xbf16>, vector<16x1088xf32> -> vector<16x1088xf32>
      %361 = vector.broadcast %105 : vector<16x1xf32> to vector<16x1088xf32>
      %362 = arith.addf %360, %361 : vector<16x1088xf32>
      %cst_323 = arith.constant 0.000000e+00 : f32
      %363 = vector.broadcast %cst_323 : f32 to vector<16x1088xf32>
      %364 = arith.maximumf %362, %363 : vector<16x1088xf32>
      %c0_324 = arith.constant 0 : index
      %c35_325 = arith.constant 35 : index
      %365 = vector.load %arg10[%c0_324, %c35_325] : memref<32x1190xf32, #tpu.memory_space<vmem>>, vector<16x1088xf32>
      tpu.vector_store %arg10[%c0_324, %c35_325], %364 {strides = array<i32>} : memref<32x1190xf32, #tpu.memory_space<vmem>>, vector<16x1088xf32>,
      tpu.yield
    }) : () -> ()
    %c0_109 = arith.constant 0 : index
    %c35_110 = arith.constant 35 : index
    %106 = vector.load %arg10[%c0_109, %c35_110] : memref<32x1190xf32, #tpu.memory_space<vmem>>, vector<16x1052xf32>
    %c0_111 = arith.constant 0 : index
    %c36 = arith.constant 36 : index
    %107 = vector.load %arg10[%c0_111, %c36] : memref<32x1190xf32, #tpu.memory_space<vmem>>, vector<16x1052xf32>
    %c0_112 = arith.constant 0 : index
    %c69_113 = arith.constant 69 : index
    %108 = vector.load %arg10[%c0_112, %c69_113] : memref<32x1190xf32, #tpu.memory_space<vmem>>, vector<16x1052xf32>
    %c0_114 = arith.constant 0 : index
    %c70 = arith.constant 70 : index
    %109 = vector.load %arg10[%c0_114, %c70] : memref<32x1190xf32, #tpu.memory_space<vmem>>, vector<16x1052xf32>
    %110 = arith.maximumf %106, %107 : vector<16x1052xf32>
    %111 = arith.maximumf %108, %109 : vector<16x1052xf32>
    %112 = arith.maximumf %110, %111 : vector<16x1052xf32>
    %c0_115 = arith.constant 0 : index
    %c0_116 = arith.constant 0 : index
    %113 = vector.load %arg5[%c0_115, %c0_116] : memref<32x16xf32, #tpu.memory_space<vmem>>, vector<32x16xf32>
    %cst_117 = arith.constant 0.000000e+00 : f32
    %114 = vector.broadcast %cst_117 : f32 to vector<16x342xf32>
    %c0_118 = arith.constant 0 : index
    %c0_119 = arith.constant 0 : index
    %115 = vector.load %arg10[%c0_118, %c0_119] : memref<32x1190xf32, #tpu.memory_space<vmem>>, vector<16x342xf32>
    tpu.vector_store %arg10[%c0_118, %c0_119], %114 {strides = array<i32>} : memref<32x1190xf32, #tpu.memory_space<vmem>>, vector<16x342xf32>,
    %116 = vector.extract_strided_slice %112 {offsets = [0, 0], sizes = [16, 32], strides = [1, 1]} : vector<16x1052xf32> to vector<16x32xf32>
    %cst_120 = arith.constant dense<0.000000e+00> : vector<16x16xf32>
    %117 = tpu.matmul %116, %113, %cst_120 {dimension_numbers = #tpu.dot_dimension_numbers<[1], [0], [0], [1], [0, 0, 1, 1], [], []>} : vector<16x32xf32>, vector<32x16xf32>, vector<16x16xf32> -> vector<16x16xf32>
    %c0_121 = arith.constant 0 : index
    %c19 = arith.constant 19 : index
    %118 = vector.load %arg10[%c0_121, %c19] : memref<32x1190xf32, #tpu.memory_space<vmem>>, vector<16x16xf32>
    tpu.vector_store %arg10[%c0_121, %c19], %117 {strides = array<i32>} : memref<32x1190xf32, #tpu.memory_space<vmem>>, vector<16x16xf32>,
    %119 = vector.extract_strided_slice %112 {offsets = [0, 68], sizes = [16, 32], strides = [1, 1]} : vector<16x1052xf32> to vector<16x32xf32>
    %cst_122 = arith.constant dense<0.000000e+00> : vector<16x16xf32>
    %120 = tpu.matmul %119, %113, %cst_122 {dimension_numbers = #tpu.dot_dimension_numbers<[1], [0], [0], [1], [0, 0, 1, 1], [], []>} : vector<16x32xf32>, vector<32x16xf32>, vector<16x16xf32> -> vector<16x16xf32>
    %c0_123 = arith.constant 0 : index
    %c37 = arith.constant 37 : index
    %121 = vector.load %arg10[%c0_123, %c37] : memref<32x1190xf32, #tpu.memory_space<vmem>>, vector<16x16xf32>
    tpu.vector_store %arg10[%c0_123, %c37], %120 {strides = array<i32>} : memref<32x1190xf32, #tpu.memory_space<vmem>>, vector<16x16xf32>,
    %122 = vector.extract_strided_slice %112 {offsets = [0, 136], sizes = [16, 32], strides = [1, 1]} : vector<16x1052xf32> to vector<16x32xf32>
    %cst_124 = arith.constant dense<0.000000e+00> : vector<16x16xf32>
    %123 = tpu.matmul %122, %113, %cst_124 {dimension_numbers = #tpu.dot_dimension_numbers<[1], [0], [0], [1], [0, 0, 1, 1], [], []>} : vector<16x32xf32>, vector<32x16xf32>, vector<16x16xf32> -> vector<16x16xf32>
    %c0_125 = arith.constant 0 : index
    %c55 = arith.constant 55 : index
    %124 = vector.load %arg10[%c0_125, %c55] : memref<32x1190xf32, #tpu.memory_space<vmem>>, vector<16x16xf32>
    tpu.vector_store %arg10[%c0_125, %c55], %123 {strides = array<i32>} : memref<32x1190xf32, #tpu.memory_space<vmem>>, vector<16x16xf32>,
    %125 = vector.extract_strided_slice %112 {offsets = [0, 204], sizes = [16, 32], strides = [1, 1]} : vector<16x1052xf32> to vector<16x32xf32>
    %cst_126 = arith.constant dense<0.000000e+00> : vector<16x16xf32>
    %126 = tpu.matmul %125, %113, %cst_126 {dimension_numbers = #tpu.dot_dimension_numbers<[1], [0], [0], [1], [0, 0, 1, 1], [], []>} : vector<16x32xf32>, vector<32x16xf32>, vector<16x16xf32> -> vector<16x16xf32>
    %c0_127 = arith.constant 0 : index
    %c73 = arith.constant 73 : index
    %127 = vector.load %arg10[%c0_127, %c73] : memref<32x1190xf32, #tpu.memory_space<vmem>>, vector<16x16xf32>
    tpu.vector_store %arg10[%c0_127, %c73], %126 {strides = array<i32>} : memref<32x1190xf32, #tpu.memory_space<vmem>>, vector<16x16xf32>,
    %128 = vector.extract_strided_slice %112 {offsets = [0, 272], sizes = [16, 32], strides = [1, 1]} : vector<16x1052xf32> to vector<16x32xf32>
    %cst_128 = arith.constant dense<0.000000e+00> : vector<16x16xf32>
    %129 = tpu.matmul %128, %113, %cst_128 {dimension_numbers = #tpu.dot_dimension_numbers<[1], [0], [0], [1], [0, 0, 1, 1], [], []>} : vector<16x32xf32>, vector<32x16xf32>, vector<16x16xf32> -> vector<16x16xf32>
    %c0_129 = arith.constant 0 : index
    %c91 = arith.constant 91 : index
    %130 = vector.load %arg10[%c0_129, %c91] : memref<32x1190xf32, #tpu.memory_space<vmem>>, vector<16x16xf32>
    tpu.vector_store %arg10[%c0_129, %c91], %129 {strides = array<i32>} : memref<32x1190xf32, #tpu.memory_space<vmem>>, vector<16x16xf32>,
    %131 = vector.extract_strided_slice %112 {offsets = [0, 340], sizes = [16, 32], strides = [1, 1]} : vector<16x1052xf32> to vector<16x32xf32>
    %cst_130 = arith.constant dense<0.000000e+00> : vector<16x16xf32>
    %132 = tpu.matmul %131, %113, %cst_130 {dimension_numbers = #tpu.dot_dimension_numbers<[1], [0], [0], [1], [0, 0, 1, 1], [], []>} : vector<16x32xf32>, vector<32x16xf32>, vector<16x16xf32> -> vector<16x16xf32>
    %c0_131 = arith.constant 0 : index
    %c109 = arith.constant 109 : index
    %133 = vector.load %arg10[%c0_131, %c109] : memref<32x1190xf32, #tpu.memory_space<vmem>>, vector<16x16xf32>
    tpu.vector_store %arg10[%c0_131, %c109], %132 {strides = array<i32>} : memref<32x1190xf32, #tpu.memory_space<vmem>>, vector<16x16xf32>,
    %134 = vector.extract_strided_slice %112 {offsets = [0, 408], sizes = [16, 32], strides = [1, 1]} : vector<16x1052xf32> to vector<16x32xf32>
    %cst_132 = arith.constant dense<0.000000e+00> : vector<16x16xf32>
    %135 = tpu.matmul %134, %113, %cst_132 {dimension_numbers = #tpu.dot_dimension_numbers<[1], [0], [0], [1], [0, 0, 1, 1], [], []>} : vector<16x32xf32>, vector<32x16xf32>, vector<16x16xf32> -> vector<16x16xf32>
    %c0_133 = arith.constant 0 : index
    %c127 = arith.constant 127 : index
    %136 = vector.load %arg10[%c0_133, %c127] : memref<32x1190xf32, #tpu.memory_space<vmem>>, vector<16x16xf32>
    tpu.vector_store %arg10[%c0_133, %c127], %135 {strides = array<i32>} : memref<32x1190xf32, #tpu.memory_space<vmem>>, vector<16x16xf32>,
    %137 = vector.extract_strided_slice %112 {offsets = [0, 476], sizes = [16, 32], strides = [1, 1]} : vector<16x1052xf32> to vector<16x32xf32>
    %cst_134 = arith.constant dense<0.000000e+00> : vector<16x16xf32>
    %138 = tpu.matmul %137, %113, %cst_134 {dimension_numbers = #tpu.dot_dimension_numbers<[1], [0], [0], [1], [0, 0, 1, 1], [], []>} : vector<16x32xf32>, vector<32x16xf32>, vector<16x16xf32> -> vector<16x16xf32>
    %c0_135 = arith.constant 0 : index
    %c145 = arith.constant 145 : index
    %139 = vector.load %arg10[%c0_135, %c145] : memref<32x1190xf32, #tpu.memory_space<vmem>>, vector<16x16xf32>
    tpu.vector_store %arg10[%c0_135, %c145], %138 {strides = array<i32>} : memref<32x1190xf32, #tpu.memory_space<vmem>>, vector<16x16xf32>,
    %140 = vector.extract_strided_slice %112 {offsets = [0, 544], sizes = [16, 32], strides = [1, 1]} : vector<16x1052xf32> to vector<16x32xf32>
    %cst_136 = arith.constant dense<0.000000e+00> : vector<16x16xf32>
    %141 = tpu.matmul %140, %113, %cst_136 {dimension_numbers = #tpu.dot_dimension_numbers<[1], [0], [0], [1], [0, 0, 1, 1], [], []>} : vector<16x32xf32>, vector<32x16xf32>, vector<16x16xf32> -> vector<16x16xf32>
    %c0_137 = arith.constant 0 : index
    %c163 = arith.constant 163 : index
    %142 = vector.load %arg10[%c0_137, %c163] : memref<32x1190xf32, #tpu.memory_space<vmem>>, vector<16x16xf32>
    tpu.vector_store %arg10[%c0_137, %c163], %141 {strides = array<i32>} : memref<32x1190xf32, #tpu.memory_space<vmem>>, vector<16x16xf32>,
    %143 = vector.extract_strided_slice %112 {offsets = [0, 612], sizes = [16, 32], strides = [1, 1]} : vector<16x1052xf32> to vector<16x32xf32>
    %cst_138 = arith.constant dense<0.000000e+00> : vector<16x16xf32>
    %144 = tpu.matmul %143, %113, %cst_138 {dimension_numbers = #tpu.dot_dimension_numbers<[1], [0], [0], [1], [0, 0, 1, 1], [], []>} : vector<16x32xf32>, vector<32x16xf32>, vector<16x16xf32> -> vector<16x16xf32>
    %c0_139 = arith.constant 0 : index
    %c181 = arith.constant 181 : index
    %145 = vector.load %arg10[%c0_139, %c181] : memref<32x1190xf32, #tpu.memory_space<vmem>>, vector<16x16xf32>
    tpu.vector_store %arg10[%c0_139, %c181], %144 {strides = array<i32>} : memref<32x1190xf32, #tpu.memory_space<vmem>>, vector<16x16xf32>,
    %146 = vector.extract_strided_slice %112 {offsets = [0, 680], sizes = [16, 32], strides = [1, 1]} : vector<16x1052xf32> to vector<16x32xf32>
    %cst_140 = arith.constant dense<0.000000e+00> : vector<16x16xf32>
    %147 = tpu.matmul %146, %113, %cst_140 {dimension_numbers = #tpu.dot_dimension_numbers<[1], [0], [0], [1], [0, 0, 1, 1], [], []>} : vector<16x32xf32>, vector<32x16xf32>, vector<16x16xf32> -> vector<16x16xf32>
    %c0_141 = arith.constant 0 : index
    %c199 = arith.constant 199 : index
    %148 = vector.load %arg10[%c0_141, %c199] : memref<32x1190xf32, #tpu.memory_space<vmem>>, vector<16x16xf32>
    tpu.vector_store %arg10[%c0_141, %c199], %147 {strides = array<i32>} : memref<32x1190xf32, #tpu.memory_space<vmem>>, vector<16x16xf32>,
    %149 = vector.extract_strided_slice %112 {offsets = [0, 748], sizes = [16, 32], strides = [1, 1]} : vector<16x1052xf32> to vector<16x32xf32>
    %cst_142 = arith.constant dense<0.000000e+00> : vector<16x16xf32>
    %150 = tpu.matmul %149, %113, %cst_142 {dimension_numbers = #tpu.dot_dimension_numbers<[1], [0], [0], [1], [0, 0, 1, 1], [], []>} : vector<16x32xf32>, vector<32x16xf32>, vector<16x16xf32> -> vector<16x16xf32>
    %c0_143 = arith.constant 0 : index
    %c217 = arith.constant 217 : index
    %151 = vector.load %arg10[%c0_143, %c217] : memref<32x1190xf32, #tpu.memory_space<vmem>>, vector<16x16xf32>
    tpu.vector_store %arg10[%c0_143, %c217], %150 {strides = array<i32>} : memref<32x1190xf32, #tpu.memory_space<vmem>>, vector<16x16xf32>,
    %152 = vector.extract_strided_slice %112 {offsets = [0, 816], sizes = [16, 32], strides = [1, 1]} : vector<16x1052xf32> to vector<16x32xf32>
    %cst_144 = arith.constant dense<0.000000e+00> : vector<16x16xf32>
    %153 = tpu.matmul %152, %113, %cst_144 {dimension_numbers = #tpu.dot_dimension_numbers<[1], [0], [0], [1], [0, 0, 1, 1], [], []>} : vector<16x32xf32>, vector<32x16xf32>, vector<16x16xf32> -> vector<16x16xf32>
    %c0_145 = arith.constant 0 : index
    %c235 = arith.constant 235 : index
    %154 = vector.load %arg10[%c0_145, %c235] : memref<32x1190xf32, #tpu.memory_space<vmem>>, vector<16x16xf32>
    tpu.vector_store %arg10[%c0_145, %c235], %153 {strides = array<i32>} : memref<32x1190xf32, #tpu.memory_space<vmem>>, vector<16x16xf32>,
    %155 = vector.extract_strided_slice %112 {offsets = [0, 884], sizes = [16, 32], strides = [1, 1]} : vector<16x1052xf32> to vector<16x32xf32>
    %cst_146 = arith.constant dense<0.000000e+00> : vector<16x16xf32>
    %156 = tpu.matmul %155, %113, %cst_146 {dimension_numbers = #tpu.dot_dimension_numbers<[1], [0], [0], [1], [0, 0, 1, 1], [], []>} : vector<16x32xf32>, vector<32x16xf32>, vector<16x16xf32> -> vector<16x16xf32>
    %c0_147 = arith.constant 0 : index
    %c253 = arith.constant 253 : index
    %157 = vector.load %arg10[%c0_147, %c253] : memref<32x1190xf32, #tpu.memory_space<vmem>>, vector<16x16xf32>
    tpu.vector_store %arg10[%c0_147, %c253], %156 {strides = array<i32>} : memref<32x1190xf32, #tpu.memory_space<vmem>>, vector<16x16xf32>,
    %158 = vector.extract_strided_slice %112 {offsets = [0, 952], sizes = [16, 32], strides = [1, 1]} : vector<16x1052xf32> to vector<16x32xf32>
    %cst_148 = arith.constant dense<0.000000e+00> : vector<16x16xf32>
    %159 = tpu.matmul %158, %113, %cst_148 {dimension_numbers = #tpu.dot_dimension_numbers<[1], [0], [0], [1], [0, 0, 1, 1], [], []>} : vector<16x32xf32>, vector<32x16xf32>, vector<16x16xf32> -> vector<16x16xf32>
    %c0_149 = arith.constant 0 : index
    %c271 = arith.constant 271 : index
    %160 = vector.load %arg10[%c0_149, %c271] : memref<32x1190xf32, #tpu.memory_space<vmem>>, vector<16x16xf32>
    tpu.vector_store %arg10[%c0_149, %c271], %159 {strides = array<i32>} : memref<32x1190xf32, #tpu.memory_space<vmem>>, vector<16x16xf32>,
    %161 = vector.extract_strided_slice %112 {offsets = [0, 1020], sizes = [16, 32], strides = [1, 1]} : vector<16x1052xf32> to vector<16x32xf32>
    %cst_150 = arith.constant dense<0.000000e+00> : vector<16x16xf32>
    %162 = tpu.matmul %161, %113, %cst_150 {dimension_numbers = #tpu.dot_dimension_numbers<[1], [0], [0], [1], [0, 0, 1, 1], [], []>} : vector<16x32xf32>, vector<32x16xf32>, vector<16x16xf32> -> vector<16x16xf32>
    %c0_151 = arith.constant 0 : index
    %c289 = arith.constant 289 : index
    %163 = vector.load %arg10[%c0_151, %c289] : memref<32x1190xf32, #tpu.memory_space<vmem>>, vector<16x16xf32>
    tpu.vector_store %arg10[%c0_151, %c289], %162 {strides = array<i32>} : memref<32x1190xf32, #tpu.memory_space<vmem>>, vector<16x16xf32>,
    %c2 = arith.constant 2 : index
    %c0_152 = arith.constant 0 : index
    %c0_153 = arith.constant 0 : index
    %164 = vector.load %arg2[%c2, %c0_152, %c0_153] : memref<6x32x288xbf16, #tpu.memory_space<vmem>>, vector<1x16x144xbf16>
    %165 = vector.shape_cast %164 : vector<1x16x144xbf16> to vector<16x144xbf16>
    %c2_154 = arith.constant 2 : index
    %c0_155 = arith.constant 0 : index
    %c0_156 = arith.constant 0 : index
    %166 = vector.load %arg3[%c2_154, %c0_155, %c0_156] : memref<6x32x1xf32, #tpu.memory_space<vmem>>, vector<1x16x1xf32>
    %167 = vector.shape_cast %166 : vector<1x16x1xf32> to vector<16x1xf32>
    "tpu.region"() ({
      %alloca = memref.alloca() : memref<144x288xf32, #tpu.memory_space<vmem>>
      %c0_291 = arith.constant 0 : index
      %c0_292 = arith.constant 0 : index
      %340 = vector.load %arg10[%c0_291, %c0_292] : memref<32x1190xf32, #tpu.memory_space<vmem>>, vector<16x288xf32>
      %c0_293 = arith.constant 0 : index
      %c0_294 = arith.constant 0 : index
      %341 = vector.load %alloca[%c0_293, %c0_294] : memref<144x288xf32, #tpu.memory_space<vmem>>, vector<16x288xf32>
      tpu.vector_store %alloca[%c0_293, %c0_294], %340 {strides = array<i32>} : memref<144x288xf32, #tpu.memory_space<vmem>>, vector<16x288xf32>,
      %c0_295 = arith.constant 0 : index
      %c1_296 = arith.constant 1 : index
      %342 = vector.load %arg10[%c0_295, %c1_296] : memref<32x1190xf32, #tpu.memory_space<vmem>>, vector<16x288xf32>
      %c16 = arith.constant 16 : index
      %c0_297 = arith.constant 0 : index
      %343 = vector.load %alloca[%c16, %c0_297] : memref<144x288xf32, #tpu.memory_space<vmem>>, vector<16x288xf32>
      tpu.vector_store %alloca[%c16, %c0_297], %342 {strides = array<i32>} : memref<144x288xf32, #tpu.memory_space<vmem>>, vector<16x288xf32>,
      %c0_298 = arith.constant 0 : index
      %c2_299 = arith.constant 2 : index
      %344 = vector.load %arg10[%c0_298, %c2_299] : memref<32x1190xf32, #tpu.memory_space<vmem>>, vector<16x288xf32>
      %c32_300 = arith.constant 32 : index
      %c0_301 = arith.constant 0 : index
      %345 = vector.load %alloca[%c32_300, %c0_301] : memref<144x288xf32, #tpu.memory_space<vmem>>, vector<16x288xf32>
      tpu.vector_store %alloca[%c32_300, %c0_301], %344 {strides = array<i32>} : memref<144x288xf32, #tpu.memory_space<vmem>>, vector<16x288xf32>,
      %c0_302 = arith.constant 0 : index
      %c18 = arith.constant 18 : index
      %346 = vector.load %arg10[%c0_302, %c18] : memref<32x1190xf32, #tpu.memory_space<vmem>>, vector<16x288xf32>
      %c48 = arith.constant 48 : index
      %c0_303 = arith.constant 0 : index
      %347 = vector.load %alloca[%c48, %c0_303] : memref<144x288xf32, #tpu.memory_space<vmem>>, vector<16x288xf32>
      tpu.vector_store %alloca[%c48, %c0_303], %346 {strides = array<i32>} : memref<144x288xf32, #tpu.memory_space<vmem>>, vector<16x288xf32>,
      %c0_304 = arith.constant 0 : index
      %c19_305 = arith.constant 19 : index
      %348 = vector.load %arg10[%c0_304, %c19_305] : memref<32x1190xf32, #tpu.memory_space<vmem>>, vector<16x288xf32>
      %c64_306 = arith.constant 64 : index
      %c0_307 = arith.constant 0 : index
      %349 = vector.load %alloca[%c64_306, %c0_307] : memref<144x288xf32, #tpu.memory_space<vmem>>, vector<16x288xf32>
      tpu.vector_store %alloca[%c64_306, %c0_307], %348 {strides = array<i32>} : memref<144x288xf32, #tpu.memory_space<vmem>>, vector<16x288xf32>,
      %c0_308 = arith.constant 0 : index
      %c20_309 = arith.constant 20 : index
      %350 = vector.load %arg10[%c0_308, %c20_309] : memref<32x1190xf32, #tpu.memory_space<vmem>>, vector<16x288xf32>
      %c80 = arith.constant 80 : index
      %c0_310 = arith.constant 0 : index
      %351 = vector.load %alloca[%c80, %c0_310] : memref<144x288xf32, #tpu.memory_space<vmem>>, vector<16x288xf32>
      tpu.vector_store %alloca[%c80, %c0_310], %350 {strides = array<i32>} : memref<144x288xf32, #tpu.memory_space<vmem>>, vector<16x288xf32>,
      %c0_311 = arith.constant 0 : index
      %c36_312 = arith.constant 36 : index
      %352 = vector.load %arg10[%c0_311, %c36_312] : memref<32x1190xf32, #tpu.memory_space<vmem>>, vector<16x288xf32>
      %c96_313 = arith.constant 96 : index
      %c0_314 = arith.constant 0 : index
      %353 = vector.load %alloca[%c96_313, %c0_314] : memref<144x288xf32, #tpu.memory_space<vmem>>, vector<16x288xf32>
      tpu.vector_store %alloca[%c96_313, %c0_314], %352 {strides = array<i32>} : memref<144x288xf32, #tpu.memory_space<vmem>>, vector<16x288xf32>,
      %c0_315 = arith.constant 0 : index
      %c37_316 = arith.constant 37 : index
      %354 = vector.load %arg10[%c0_315, %c37_316] : memref<32x1190xf32, #tpu.memory_space<vmem>>, vector<16x288xf32>
      %c112 = arith.constant 112 : index
      %c0_317 = arith.constant 0 : index
      %355 = vector.load %alloca[%c112, %c0_317] : memref<144x288xf32, #tpu.memory_space<vmem>>, vector<16x288xf32>
      tpu.vector_store %alloca[%c112, %c0_317], %354 {strides = array<i32>} : memref<144x288xf32, #tpu.memory_space<vmem>>, vector<16x288xf32>,
      %c0_318 = arith.constant 0 : index
      %c38_319 = arith.constant 38 : index
      %356 = vector.load %arg10[%c0_318, %c38_319] : memref<32x1190xf32, #tpu.memory_space<vmem>>, vector<16x288xf32>
      %c128_320 = arith.constant 128 : index
      %c0_321 = arith.constant 0 : index
      %357 = vector.load %alloca[%c128_320, %c0_321] : memref<144x288xf32, #tpu.memory_space<vmem>>, vector<16x288xf32>
      tpu.vector_store %alloca[%c128_320, %c0_321], %356 {strides = array<i32>} : memref<144x288xf32, #tpu.memory_space<vmem>>, vector<16x288xf32>,
      %c0_322 = arith.constant 0 : index
      %c0_323 = arith.constant 0 : index
      %358 = vector.load %alloca[%c0_322, %c0_323] : memref<144x288xf32, #tpu.memory_space<vmem>>, vector<144x288xf32>
      %359 = arith.truncf %358 : vector<144x288xf32> to vector<144x288xbf16>
      %cst_324 = arith.constant dense<0.000000e+00> : vector<16x288xf32>
      %360 = tpu.matmul %165, %359, %cst_324 {dimension_numbers = #tpu.dot_dimension_numbers<[1], [0], [0], [1], [0, 0, 1, 1], [], []>} : vector<16x144xbf16>, vector<144x288xbf16>, vector<16x288xf32> -> vector<16x288xf32>
      %361 = vector.broadcast %167 : vector<16x1xf32> to vector<16x288xf32>
      %362 = arith.addf %360, %361 : vector<16x288xf32>
      %cst_325 = arith.constant 0.000000e+00 : f32
      %363 = vector.broadcast %cst_325 : f32 to vector<16x288xf32>
      %364 = arith.maximumf %362, %363 : vector<16x288xf32>
      %c1_326 = arith.constant 1 : index
      %c0_327 = arith.constant 0 : index
      %365 = vector.load %arg4[%c1_326, %c0_327] : memref<2x1088xf32, #tpu.memory_space<vmem>>, vector<1x288xf32>
      %366 = vector.broadcast %365 : vector<1x288xf32> to vector<16x288xf32>
      %367 = arith.mulf %364, %366 : vector<16x288xf32>
      %cst_328 = arith.constant 0.000000e+00 : f32
      %368 = vector.broadcast %cst_328 : f32 to vector<16x342xf32>
      %c0_329 = arith.constant 0 : index
      %c0_330 = arith.constant 0 : index
      %369 = vector.load %arg10[%c0_329, %c0_330] : memref<32x1190xf32, #tpu.memory_space<vmem>>, vector<16x342xf32>
      tpu.vector_store %arg10[%c0_329, %c0_330], %368 {strides = array<i32>} : memref<32x1190xf32, #tpu.memory_space<vmem>>, vector<16x342xf32>,
      %c0_331 = arith.constant 0 : index
      %c19_332 = arith.constant 19 : index
      %370 = vector.load %arg10[%c0_331, %c19_332] : memref<32x1190xf32, #tpu.memory_space<vmem>>, vector<16x288xf32>
      tpu.vector_store %arg10[%c0_331, %c19_332], %367 {strides = array<i32>} : memref<32x1190xf32, #tpu.memory_space<vmem>>, vector<16x288xf32>,
      tpu.yield
    }) : () -> ()
    %c3 = arith.constant 3 : index
    %c0_157 = arith.constant 0 : index
    %c0_158 = arith.constant 0 : index
    %168 = vector.load %arg2[%c3, %c0_157, %c0_158] : memref<6x32x288xbf16, #tpu.memory_space<vmem>>, vector<1x32x144xbf16>
    %169 = vector.shape_cast %168 : vector<1x32x144xbf16> to vector<32x144xbf16>
    %c3_159 = arith.constant 3 : index
    %c0_160 = arith.constant 0 : index
    %c0_161 = arith.constant 0 : index
    %170 = vector.load %arg3[%c3_159, %c0_160, %c0_161] : memref<6x32x1xf32, #tpu.memory_space<vmem>>, vector<1x32x1xf32>
    %171 = vector.shape_cast %170 : vector<1x32x1xf32> to vector<32x1xf32>
    "tpu.region"() ({
      %alloca = memref.alloca() : memref<144x288xf32, #tpu.memory_space<vmem>>
      %c0_291 = arith.constant 0 : index
      %c0_292 = arith.constant 0 : index
      %340 = vector.load %arg10[%c0_291, %c0_292] : memref<32x1190xf32, #tpu.memory_space<vmem>>, vector<16x288xf32>
      %c0_293 = arith.constant 0 : index
      %c0_294 = arith.constant 0 : index
      %341 = vector.load %alloca[%c0_293, %c0_294] : memref<144x288xf32, #tpu.memory_space<vmem>>, vector<16x288xf32>
      tpu.vector_store %alloca[%c0_293, %c0_294], %340 {strides = array<i32>} : memref<144x288xf32, #tpu.memory_space<vmem>>, vector<16x288xf32>,
      %c0_295 = arith.constant 0 : index
      %c1_296 = arith.constant 1 : index
      %342 = vector.load %arg10[%c0_295, %c1_296] : memref<32x1190xf32, #tpu.memory_space<vmem>>, vector<16x288xf32>
      %c16 = arith.constant 16 : index
      %c0_297 = arith.constant 0 : index
      %343 = vector.load %alloca[%c16, %c0_297] : memref<144x288xf32, #tpu.memory_space<vmem>>, vector<16x288xf32>
      tpu.vector_store %alloca[%c16, %c0_297], %342 {strides = array<i32>} : memref<144x288xf32, #tpu.memory_space<vmem>>, vector<16x288xf32>,
      %c0_298 = arith.constant 0 : index
      %c2_299 = arith.constant 2 : index
      %344 = vector.load %arg10[%c0_298, %c2_299] : memref<32x1190xf32, #tpu.memory_space<vmem>>, vector<16x288xf32>
      %c32_300 = arith.constant 32 : index
      %c0_301 = arith.constant 0 : index
      %345 = vector.load %alloca[%c32_300, %c0_301] : memref<144x288xf32, #tpu.memory_space<vmem>>, vector<16x288xf32>
      tpu.vector_store %alloca[%c32_300, %c0_301], %344 {strides = array<i32>} : memref<144x288xf32, #tpu.memory_space<vmem>>, vector<16x288xf32>,
      %c0_302 = arith.constant 0 : index
      %c18 = arith.constant 18 : index
      %346 = vector.load %arg10[%c0_302, %c18] : memref<32x1190xf32, #tpu.memory_space<vmem>>, vector<16x288xf32>
      %c48 = arith.constant 48 : index
      %c0_303 = arith.constant 0 : index
      %347 = vector.load %alloca[%c48, %c0_303] : memref<144x288xf32, #tpu.memory_space<vmem>>, vector<16x288xf32>
      tpu.vector_store %alloca[%c48, %c0_303], %346 {strides = array<i32>} : memref<144x288xf32, #tpu.memory_space<vmem>>, vector<16x288xf32>,
      %c0_304 = arith.constant 0 : index
      %c19_305 = arith.constant 19 : index
      %348 = vector.load %arg10[%c0_304, %c19_305] : memref<32x1190xf32, #tpu.memory_space<vmem>>, vector<16x288xf32>
      %c64_306 = arith.constant 64 : index
      %c0_307 = arith.constant 0 : index
      %349 = vector.load %alloca[%c64_306, %c0_307] : memref<144x288xf32, #tpu.memory_space<vmem>>, vector<16x288xf32>
      tpu.vector_store %alloca[%c64_306, %c0_307], %348 {strides = array<i32>} : memref<144x288xf32, #tpu.memory_space<vmem>>, vector<16x288xf32>,
      %c0_308 = arith.constant 0 : index
      %c20_309 = arith.constant 20 : index
      %350 = vector.load %arg10[%c0_308, %c20_309] : memref<32x1190xf32, #tpu.memory_space<vmem>>, vector<16x288xf32>
      %c80 = arith.constant 80 : index
      %c0_310 = arith.constant 0 : index
      %351 = vector.load %alloca[%c80, %c0_310] : memref<144x288xf32, #tpu.memory_space<vmem>>, vector<16x288xf32>
      tpu.vector_store %alloca[%c80, %c0_310], %350 {strides = array<i32>} : memref<144x288xf32, #tpu.memory_space<vmem>>, vector<16x288xf32>,
      %c0_311 = arith.constant 0 : index
      %c36_312 = arith.constant 36 : index
      %352 = vector.load %arg10[%c0_311, %c36_312] : memref<32x1190xf32, #tpu.memory_space<vmem>>, vector<16x288xf32>
      %c96_313 = arith.constant 96 : index
      %c0_314 = arith.constant 0 : index
      %353 = vector.load %alloca[%c96_313, %c0_314] : memref<144x288xf32, #tpu.memory_space<vmem>>, vector<16x288xf32>
      tpu.vector_store %alloca[%c96_313, %c0_314], %352 {strides = array<i32>} : memref<144x288xf32, #tpu.memory_space<vmem>>, vector<16x288xf32>,
      %c0_315 = arith.constant 0 : index
      %c37_316 = arith.constant 37 : index
      %354 = vector.load %arg10[%c0_315, %c37_316] : memref<32x1190xf32, #tpu.memory_space<vmem>>, vector<16x288xf32>
      %c112 = arith.constant 112 : index
      %c0_317 = arith.constant 0 : index
      %355 = vector.load %alloca[%c112, %c0_317] : memref<144x288xf32, #tpu.memory_space<vmem>>, vector<16x288xf32>
      tpu.vector_store %alloca[%c112, %c0_317], %354 {strides = array<i32>} : memref<144x288xf32, #tpu.memory_space<vmem>>, vector<16x288xf32>,
      %c0_318 = arith.constant 0 : index
      %c38_319 = arith.constant 38 : index
      %356 = vector.load %arg10[%c0_318, %c38_319] : memref<32x1190xf32, #tpu.memory_space<vmem>>, vector<16x288xf32>
      %c128_320 = arith.constant 128 : index
      %c0_321 = arith.constant 0 : index
      %357 = vector.load %alloca[%c128_320, %c0_321] : memref<144x288xf32, #tpu.memory_space<vmem>>, vector<16x288xf32>
      tpu.vector_store %alloca[%c128_320, %c0_321], %356 {strides = array<i32>} : memref<144x288xf32, #tpu.memory_space<vmem>>, vector<16x288xf32>,
      %c0_322 = arith.constant 0 : index
      %c0_323 = arith.constant 0 : index
      %358 = vector.load %alloca[%c0_322, %c0_323] : memref<144x288xf32, #tpu.memory_space<vmem>>, vector<144x288xf32>
      %359 = arith.truncf %358 : vector<144x288xf32> to vector<144x288xbf16>
      %cst_324 = arith.constant dense<0.000000e+00> : vector<32x288xf32>
      %360 = tpu.matmul %169, %359, %cst_324 {dimension_numbers = #tpu.dot_dimension_numbers<[1], [0], [0], [1], [0, 0, 1, 1], [], []>} : vector<32x144xbf16>, vector<144x288xbf16>, vector<32x288xf32> -> vector<32x288xf32>
      %361 = vector.broadcast %171 : vector<32x1xf32> to vector<32x288xf32>
      %362 = arith.addf %360, %361 : vector<32x288xf32>
      %cst_325 = arith.constant 0.000000e+00 : f32
      %363 = vector.broadcast %cst_325 : f32 to vector<32x288xf32>
      %364 = arith.maximumf %362, %363 : vector<32x288xf32>
      %c0_326 = arith.constant 0 : index
      %c19_327 = arith.constant 19 : index
      %365 = vector.load %arg10[%c0_326, %c19_327] : memref<32x1190xf32, #tpu.memory_space<vmem>>, vector<32x288xf32>
      tpu.vector_store %arg10[%c0_326, %c19_327], %364 {strides = array<i32>} : memref<32x1190xf32, #tpu.memory_space<vmem>>, vector<32x288xf32>,
      tpu.yield
    }) : () -> ()
    %c0_162 = arith.constant 0 : index
    %c19_163 = arith.constant 19 : index
    %172 = vector.load %arg10[%c0_162, %c19_163] : memref<32x1190xf32, #tpu.memory_space<vmem>>, vector<32x268xf32>
    %c0_164 = arith.constant 0 : index
    %c20 = arith.constant 20 : index
    %173 = vector.load %arg10[%c0_164, %c20] : memref<32x1190xf32, #tpu.memory_space<vmem>>, vector<32x268xf32>
    %c0_165 = arith.constant 0 : index
    %c37_166 = arith.constant 37 : index
    %174 = vector.load %arg10[%c0_165, %c37_166] : memref<32x1190xf32, #tpu.memory_space<vmem>>, vector<32x268xf32>
    %c0_167 = arith.constant 0 : index
    %c38 = arith.constant 38 : index
    %175 = vector.load %arg10[%c0_167, %c38] : memref<32x1190xf32, #tpu.memory_space<vmem>>, vector<32x268xf32>
    %176 = arith.maximumf %172, %173 : vector<32x268xf32>
    %177 = arith.maximumf %174, %175 : vector<32x268xf32>
    %178 = arith.maximumf %176, %177 : vector<32x268xf32>
    %c0_168 = arith.constant 0 : index
    %c0_169 = arith.constant 0 : index
    %179 = vector.load %arg5[%c0_168, %c0_169] : memref<32x16xf32, #tpu.memory_space<vmem>>, vector<16x8xf32>
    %cst_170 = arith.constant 0.000000e+00 : f32
    %180 = vector.broadcast %cst_170 : f32 to vector<32x110xf32>
    %c0_171 = arith.constant 0 : index
    %c0_172 = arith.constant 0 : index
    %181 = vector.load %arg10[%c0_171, %c0_172] : memref<32x1190xf32, #tpu.memory_space<vmem>>, vector<32x110xf32>
    tpu.vector_store %arg10[%c0_171, %c0_172], %180 {strides = array<i32>} : memref<32x1190xf32, #tpu.memory_space<vmem>>, vector<32x110xf32>,
    %182 = vector.extract_strided_slice %178 {offsets = [0, 0], sizes = [32, 16], strides = [1, 1]} : vector<32x268xf32> to vector<32x16xf32>
    %cst_173 = arith.constant dense<0.000000e+00> : vector<32x8xf32>
    %183 = tpu.matmul %182, %179, %cst_173 {dimension_numbers = #tpu.dot_dimension_numbers<[1], [0], [0], [1], [0, 0, 1, 1], [], []>} : vector<32x16xf32>, vector<16x8xf32>, vector<32x8xf32> -> vector<32x8xf32>
    %c0_174 = arith.constant 0 : index
    %c11 = arith.constant 11 : index
    %184 = vector.load %arg10[%c0_174, %c11] : memref<32x1190xf32, #tpu.memory_space<vmem>>, vector<32x8xf32>
    tpu.vector_store %arg10[%c0_174, %c11], %183 {strides = array<i32>} : memref<32x1190xf32, #tpu.memory_space<vmem>>, vector<32x8xf32>,
    %185 = vector.extract_strided_slice %178 {offsets = [0, 36], sizes = [32, 16], strides = [1, 1]} : vector<32x268xf32> to vector<32x16xf32>
    %cst_175 = arith.constant dense<0.000000e+00> : vector<32x8xf32>
    %186 = tpu.matmul %185, %179, %cst_175 {dimension_numbers = #tpu.dot_dimension_numbers<[1], [0], [0], [1], [0, 0, 1, 1], [], []>} : vector<32x16xf32>, vector<16x8xf32>, vector<32x8xf32> -> vector<32x8xf32>
    %c0_176 = arith.constant 0 : index
    %c21 = arith.constant 21 : index
    %187 = vector.load %arg10[%c0_176, %c21] : memref<32x1190xf32, #tpu.memory_space<vmem>>, vector<32x8xf32>
    tpu.vector_store %arg10[%c0_176, %c21], %186 {strides = array<i32>} : memref<32x1190xf32, #tpu.memory_space<vmem>>, vector<32x8xf32>,
    %188 = vector.extract_strided_slice %178 {offsets = [0, 72], sizes = [32, 16], strides = [1, 1]} : vector<32x268xf32> to vector<32x16xf32>
    %cst_177 = arith.constant dense<0.000000e+00> : vector<32x8xf32>
    %189 = tpu.matmul %188, %179, %cst_177 {dimension_numbers = #tpu.dot_dimension_numbers<[1], [0], [0], [1], [0, 0, 1, 1], [], []>} : vector<32x16xf32>, vector<16x8xf32>, vector<32x8xf32> -> vector<32x8xf32>
    %c0_178 = arith.constant 0 : index
    %c31 = arith.constant 31 : index
    %190 = vector.load %arg10[%c0_178, %c31] : memref<32x1190xf32, #tpu.memory_space<vmem>>, vector<32x8xf32>
    tpu.vector_store %arg10[%c0_178, %c31], %189 {strides = array<i32>} : memref<32x1190xf32, #tpu.memory_space<vmem>>, vector<32x8xf32>,
    %191 = vector.extract_strided_slice %178 {offsets = [0, 108], sizes = [32, 16], strides = [1, 1]} : vector<32x268xf32> to vector<32x16xf32>
    %cst_179 = arith.constant dense<0.000000e+00> : vector<32x8xf32>
    %192 = tpu.matmul %191, %179, %cst_179 {dimension_numbers = #tpu.dot_dimension_numbers<[1], [0], [0], [1], [0, 0, 1, 1], [], []>} : vector<32x16xf32>, vector<16x8xf32>, vector<32x8xf32> -> vector<32x8xf32>
    %c0_180 = arith.constant 0 : index
    %c41 = arith.constant 41 : index
    %193 = vector.load %arg10[%c0_180, %c41] : memref<32x1190xf32, #tpu.memory_space<vmem>>, vector<32x8xf32>
    tpu.vector_store %arg10[%c0_180, %c41], %192 {strides = array<i32>} : memref<32x1190xf32, #tpu.memory_space<vmem>>, vector<32x8xf32>,
    %194 = vector.extract_strided_slice %178 {offsets = [0, 144], sizes = [32, 16], strides = [1, 1]} : vector<32x268xf32> to vector<32x16xf32>
    %cst_181 = arith.constant dense<0.000000e+00> : vector<32x8xf32>
    %195 = tpu.matmul %194, %179, %cst_181 {dimension_numbers = #tpu.dot_dimension_numbers<[1], [0], [0], [1], [0, 0, 1, 1], [], []>} : vector<32x16xf32>, vector<16x8xf32>, vector<32x8xf32> -> vector<32x8xf32>
    %c0_182 = arith.constant 0 : index
    %c51 = arith.constant 51 : index
    %196 = vector.load %arg10[%c0_182, %c51] : memref<32x1190xf32, #tpu.memory_space<vmem>>, vector<32x8xf32>
    tpu.vector_store %arg10[%c0_182, %c51], %195 {strides = array<i32>} : memref<32x1190xf32, #tpu.memory_space<vmem>>, vector<32x8xf32>,
    %197 = vector.extract_strided_slice %178 {offsets = [0, 180], sizes = [32, 16], strides = [1, 1]} : vector<32x268xf32> to vector<32x16xf32>
    %cst_183 = arith.constant dense<0.000000e+00> : vector<32x8xf32>
    %198 = tpu.matmul %197, %179, %cst_183 {dimension_numbers = #tpu.dot_dimension_numbers<[1], [0], [0], [1], [0, 0, 1, 1], [], []>} : vector<32x16xf32>, vector<16x8xf32>, vector<32x8xf32> -> vector<32x8xf32>
    %c0_184 = arith.constant 0 : index
    %c61 = arith.constant 61 : index
    %199 = vector.load %arg10[%c0_184, %c61] : memref<32x1190xf32, #tpu.memory_space<vmem>>, vector<32x8xf32>
    tpu.vector_store %arg10[%c0_184, %c61], %198 {strides = array<i32>} : memref<32x1190xf32, #tpu.memory_space<vmem>>, vector<32x8xf32>,
    %200 = vector.extract_strided_slice %178 {offsets = [0, 216], sizes = [32, 16], strides = [1, 1]} : vector<32x268xf32> to vector<32x16xf32>
    %cst_185 = arith.constant dense<0.000000e+00> : vector<32x8xf32>
    %201 = tpu.matmul %200, %179, %cst_185 {dimension_numbers = #tpu.dot_dimension_numbers<[1], [0], [0], [1], [0, 0, 1, 1], [], []>} : vector<32x16xf32>, vector<16x8xf32>, vector<32x8xf32> -> vector<32x8xf32>
    %c0_186 = arith.constant 0 : index
    %c71 = arith.constant 71 : index
    %202 = vector.load %arg10[%c0_186, %c71] : memref<32x1190xf32, #tpu.memory_space<vmem>>, vector<32x8xf32>
    tpu.vector_store %arg10[%c0_186, %c71], %201 {strides = array<i32>} : memref<32x1190xf32, #tpu.memory_space<vmem>>, vector<32x8xf32>,
    %203 = vector.extract_strided_slice %178 {offsets = [0, 252], sizes = [32, 16], strides = [1, 1]} : vector<32x268xf32> to vector<32x16xf32>
    %cst_187 = arith.constant dense<0.000000e+00> : vector<32x8xf32>
    %204 = tpu.matmul %203, %179, %cst_187 {dimension_numbers = #tpu.dot_dimension_numbers<[1], [0], [0], [1], [0, 0, 1, 1], [], []>} : vector<32x16xf32>, vector<16x8xf32>, vector<32x8xf32> -> vector<32x8xf32>
    %c0_188 = arith.constant 0 : index
    %c81 = arith.constant 81 : index
    %205 = vector.load %arg10[%c0_188, %c81] : memref<32x1190xf32, #tpu.memory_space<vmem>>, vector<32x8xf32>
    tpu.vector_store %arg10[%c0_188, %c81], %204 {strides = array<i32>} : memref<32x1190xf32, #tpu.memory_space<vmem>>, vector<32x8xf32>,
    %c4 = arith.constant 4 : index
    %c0_189 = arith.constant 0 : index
    %c0_190 = arith.constant 0 : index
    %206 = vector.load %arg2[%c4, %c0_189, %c0_190] : memref<6x32x288xbf16, #tpu.memory_space<vmem>>, vector<1x32x288xbf16>
    %207 = vector.shape_cast %206 : vector<1x32x288xbf16> to vector<32x288xbf16>
    %c4_191 = arith.constant 4 : index
    %c0_192 = arith.constant 0 : index
    %c0_193 = arith.constant 0 : index
    %208 = vector.load %arg3[%c4_191, %c0_192, %c0_193] : memref<6x32x1xf32, #tpu.memory_space<vmem>>, vector<1x32x1xf32>
    %209 = vector.shape_cast %208 : vector<1x32x1xf32> to vector<32x1xf32>
    "tpu.region"() ({
      %alloca = memref.alloca() : memref<288x80xf32, #tpu.memory_space<vmem>>
      %c0_291 = arith.constant 0 : index
      %c0_292 = arith.constant 0 : index
      %340 = vector.load %arg10[%c0_291, %c0_292] : memref<32x1190xf32, #tpu.memory_space<vmem>>, vector<32x80xf32>
      %c0_293 = arith.constant 0 : index
      %c0_294 = arith.constant 0 : index
      %341 = vector.load %alloca[%c0_293, %c0_294] : memref<288x80xf32, #tpu.memory_space<vmem>>, vector<32x80xf32>
      tpu.vector_store %alloca[%c0_293, %c0_294], %340 {strides = array<i32>} : memref<288x80xf32, #tpu.memory_space<vmem>>, vector<32x80xf32>,
      %c0_295 = arith.constant 0 : index
      %c1_296 = arith.constant 1 : index
      %342 = vector.load %arg10[%c0_295, %c1_296] : memref<32x1190xf32, #tpu.memory_space<vmem>>, vector<32x80xf32>
      %c32_297 = arith.constant 32 : index
      %c0_298 = arith.constant 0 : index
      %343 = vector.load %alloca[%c32_297, %c0_298] : memref<288x80xf32, #tpu.memory_space<vmem>>, vector<32x80xf32>
      tpu.vector_store %alloca[%c32_297, %c0_298], %342 {strides = array<i32>} : memref<288x80xf32, #tpu.memory_space<vmem>>, vector<32x80xf32>,
      %c0_299 = arith.constant 0 : index
      %c2_300 = arith.constant 2 : index
      %344 = vector.load %arg10[%c0_299, %c2_300] : memref<32x1190xf32, #tpu.memory_space<vmem>>, vector<32x80xf32>
      %c64_301 = arith.constant 64 : index
      %c0_302 = arith.constant 0 : index
      %345 = vector.load %alloca[%c64_301, %c0_302] : memref<288x80xf32, #tpu.memory_space<vmem>>, vector<32x80xf32>
      tpu.vector_store %alloca[%c64_301, %c0_302], %344 {strides = array<i32>} : memref<288x80xf32, #tpu.memory_space<vmem>>, vector<32x80xf32>,
      %c0_303 = arith.constant 0 : index
      %c10 = arith.constant 10 : index
      %346 = vector.load %arg10[%c0_303, %c10] : memref<32x1190xf32, #tpu.memory_space<vmem>>, vector<32x80xf32>
      %c96_304 = arith.constant 96 : index
      %c0_305 = arith.constant 0 : index
      %347 = vector.load %alloca[%c96_304, %c0_305] : memref<288x80xf32, #tpu.memory_space<vmem>>, vector<32x80xf32>
      tpu.vector_store %alloca[%c96_304, %c0_305], %346 {strides = array<i32>} : memref<288x80xf32, #tpu.memory_space<vmem>>, vector<32x80xf32>,
      %c0_306 = arith.constant 0 : index
      %c11_307 = arith.constant 11 : index
      %348 = vector.load %arg10[%c0_306, %c11_307] : memref<32x1190xf32, #tpu.memory_space<vmem>>, vector<32x80xf32>
      %c128_308 = arith.constant 128 : index
      %c0_309 = arith.constant 0 : index
      %349 = vector.load %alloca[%c128_308, %c0_309] : memref<288x80xf32, #tpu.memory_space<vmem>>, vector<32x80xf32>
      tpu.vector_store %alloca[%c128_308, %c0_309], %348 {strides = array<i32>} : memref<288x80xf32, #tpu.memory_space<vmem>>, vector<32x80xf32>,
      %c0_310 = arith.constant 0 : index
      %c12_311 = arith.constant 12 : index
      %350 = vector.load %arg10[%c0_310, %c12_311] : memref<32x1190xf32, #tpu.memory_space<vmem>>, vector<32x80xf32>
      %c160_312 = arith.constant 160 : index
      %c0_313 = arith.constant 0 : index
      %351 = vector.load %alloca[%c160_312, %c0_313] : memref<288x80xf32, #tpu.memory_space<vmem>>, vector<32x80xf32>
      tpu.vector_store %alloca[%c160_312, %c0_313], %350 {strides = array<i32>} : memref<288x80xf32, #tpu.memory_space<vmem>>, vector<32x80xf32>,
      %c0_314 = arith.constant 0 : index
      %c20_315 = arith.constant 20 : index
      %352 = vector.load %arg10[%c0_314, %c20_315] : memref<32x1190xf32, #tpu.memory_space<vmem>>, vector<32x80xf32>
      %c192_316 = arith.constant 192 : index
      %c0_317 = arith.constant 0 : index
      %353 = vector.load %alloca[%c192_316, %c0_317] : memref<288x80xf32, #tpu.memory_space<vmem>>, vector<32x80xf32>
      tpu.vector_store %alloca[%c192_316, %c0_317], %352 {strides = array<i32>} : memref<288x80xf32, #tpu.memory_space<vmem>>, vector<32x80xf32>,
      %c0_318 = arith.constant 0 : index
      %c21_319 = arith.constant 21 : index
      %354 = vector.load %arg10[%c0_318, %c21_319] : memref<32x1190xf32, #tpu.memory_space<vmem>>, vector<32x80xf32>
      %c224_320 = arith.constant 224 : index
      %c0_321 = arith.constant 0 : index
      %355 = vector.load %alloca[%c224_320, %c0_321] : memref<288x80xf32, #tpu.memory_space<vmem>>, vector<32x80xf32>
      tpu.vector_store %alloca[%c224_320, %c0_321], %354 {strides = array<i32>} : memref<288x80xf32, #tpu.memory_space<vmem>>, vector<32x80xf32>,
      %c0_322 = arith.constant 0 : index
      %c22_323 = arith.constant 22 : index
      %356 = vector.load %arg10[%c0_322, %c22_323] : memref<32x1190xf32, #tpu.memory_space<vmem>>, vector<32x80xf32>
      %c256_324 = arith.constant 256 : index
      %c0_325 = arith.constant 0 : index
      %357 = vector.load %alloca[%c256_324, %c0_325] : memref<288x80xf32, #tpu.memory_space<vmem>>, vector<32x80xf32>
      tpu.vector_store %alloca[%c256_324, %c0_325], %356 {strides = array<i32>} : memref<288x80xf32, #tpu.memory_space<vmem>>, vector<32x80xf32>,
      %c0_326 = arith.constant 0 : index
      %c0_327 = arith.constant 0 : index
      %358 = vector.load %alloca[%c0_326, %c0_327] : memref<288x80xf32, #tpu.memory_space<vmem>>, vector<288x80xf32>
      %359 = arith.truncf %358 : vector<288x80xf32> to vector<288x80xbf16>
      %cst_328 = arith.constant dense<0.000000e+00> : vector<32x80xf32>
      %360 = tpu.matmul %207, %359, %cst_328 {dimension_numbers = #tpu.dot_dimension_numbers<[1], [0], [0], [1], [0, 0, 1, 1], [], []>} : vector<32x288xbf16>, vector<288x80xbf16>, vector<32x80xf32> -> vector<32x80xf32>
      %361 = vector.broadcast %209 : vector<32x1xf32> to vector<32x80xf32>
      %362 = arith.addf %360, %361 : vector<32x80xf32>
      %cst_329 = arith.constant 0.000000e+00 : f32
      %363 = vector.broadcast %cst_329 : f32 to vector<32x80xf32>
      %364 = arith.maximumf %362, %363 : vector<32x80xf32>
      %c0_330 = arith.constant 0 : index
      %c11_331 = arith.constant 11 : index
      %365 = vector.load %arg10[%c0_330, %c11_331] : memref<32x1190xf32, #tpu.memory_space<vmem>>, vector<32x80xf32>
      tpu.vector_store %arg10[%c0_330, %c11_331], %364 {strides = array<i32>} : memref<32x1190xf32, #tpu.memory_space<vmem>>, vector<32x80xf32>,
      tpu.yield
    }) : () -> ()
    %c0_194 = arith.constant 0 : index
    %c11_195 = arith.constant 11 : index
    %210 = vector.load %arg10[%c0_194, %c11_195] : memref<32x1190xf32, #tpu.memory_space<vmem>>, vector<32x68xf32>
    %c0_196 = arith.constant 0 : index
    %c12 = arith.constant 12 : index
    %211 = vector.load %arg10[%c0_196, %c12] : memref<32x1190xf32, #tpu.memory_space<vmem>>, vector<32x68xf32>
    %c0_197 = arith.constant 0 : index
    %c21_198 = arith.constant 21 : index
    %212 = vector.load %arg10[%c0_197, %c21_198] : memref<32x1190xf32, #tpu.memory_space<vmem>>, vector<32x68xf32>
    %c0_199 = arith.constant 0 : index
    %c22 = arith.constant 22 : index
    %213 = vector.load %arg10[%c0_199, %c22] : memref<32x1190xf32, #tpu.memory_space<vmem>>, vector<32x68xf32>
    %214 = arith.maximumf %210, %211 : vector<32x68xf32>
    %215 = arith.maximumf %212, %213 : vector<32x68xf32>
    %216 = arith.maximumf %214, %215 : vector<32x68xf32>
    %c0_200 = arith.constant 0 : index
    %c0_201 = arith.constant 0 : index
    %217 = vector.load %arg5[%c0_200, %c0_201] : memref<32x16xf32, #tpu.memory_space<vmem>>, vector<8x4xf32>
    %cst_202 = arith.constant 0.000000e+00 : f32
    %218 = vector.broadcast %cst_202 : f32 to vector<32x42xf32>
    %c0_203 = arith.constant 0 : index
    %c0_204 = arith.constant 0 : index
    %219 = vector.load %arg10[%c0_203, %c0_204] : memref<32x1190xf32, #tpu.memory_space<vmem>>, vector<32x42xf32>
    tpu.vector_store %arg10[%c0_203, %c0_204], %218 {strides = array<i32>} : memref<32x1190xf32, #tpu.memory_space<vmem>>, vector<32x42xf32>,
    %220 = vector.extract_strided_slice %216 {offsets = [0, 0], sizes = [32, 8], strides = [1, 1]} : vector<32x68xf32> to vector<32x8xf32>
    %cst_205 = arith.constant dense<0.000000e+00> : vector<32x4xf32>
    %221 = tpu.matmul %220, %217, %cst_205 {dimension_numbers = #tpu.dot_dimension_numbers<[1], [0], [0], [1], [0, 0, 1, 1], [], []>} : vector<32x8xf32>, vector<8x4xf32>, vector<32x4xf32> -> vector<32x4xf32>
    %c0_206 = arith.constant 0 : index
    %c7 = arith.constant 7 : index
    %222 = vector.load %arg10[%c0_206, %c7] : memref<32x1190xf32, #tpu.memory_space<vmem>>, vector<32x4xf32>
    tpu.vector_store %arg10[%c0_206, %c7], %221 {strides = array<i32>} : memref<32x1190xf32, #tpu.memory_space<vmem>>, vector<32x4xf32>,
    %223 = vector.extract_strided_slice %216 {offsets = [0, 20], sizes = [32, 8], strides = [1, 1]} : vector<32x68xf32> to vector<32x8xf32>
    %cst_207 = arith.constant dense<0.000000e+00> : vector<32x4xf32>
    %224 = tpu.matmul %223, %217, %cst_207 {dimension_numbers = #tpu.dot_dimension_numbers<[1], [0], [0], [1], [0, 0, 1, 1], [], []>} : vector<32x8xf32>, vector<8x4xf32>, vector<32x4xf32> -> vector<32x4xf32>
    %c0_208 = arith.constant 0 : index
    %c13 = arith.constant 13 : index
    %225 = vector.load %arg10[%c0_208, %c13] : memref<32x1190xf32, #tpu.memory_space<vmem>>, vector<32x4xf32>
    tpu.vector_store %arg10[%c0_208, %c13], %224 {strides = array<i32>} : memref<32x1190xf32, #tpu.memory_space<vmem>>, vector<32x4xf32>,
    %226 = vector.extract_strided_slice %216 {offsets = [0, 40], sizes = [32, 8], strides = [1, 1]} : vector<32x68xf32> to vector<32x8xf32>
    %cst_209 = arith.constant dense<0.000000e+00> : vector<32x4xf32>
    %227 = tpu.matmul %226, %217, %cst_209 {dimension_numbers = #tpu.dot_dimension_numbers<[1], [0], [0], [1], [0, 0, 1, 1], [], []>} : vector<32x8xf32>, vector<8x4xf32>, vector<32x4xf32> -> vector<32x4xf32>
    %c0_210 = arith.constant 0 : index
    %c19_211 = arith.constant 19 : index
    %228 = vector.load %arg10[%c0_210, %c19_211] : memref<32x1190xf32, #tpu.memory_space<vmem>>, vector<32x4xf32>
    tpu.vector_store %arg10[%c0_210, %c19_211], %227 {strides = array<i32>} : memref<32x1190xf32, #tpu.memory_space<vmem>>, vector<32x4xf32>,
    %229 = vector.extract_strided_slice %216 {offsets = [0, 60], sizes = [32, 8], strides = [1, 1]} : vector<32x68xf32> to vector<32x8xf32>
    %cst_212 = arith.constant dense<0.000000e+00> : vector<32x4xf32>
    %230 = tpu.matmul %229, %217, %cst_212 {dimension_numbers = #tpu.dot_dimension_numbers<[1], [0], [0], [1], [0, 0, 1, 1], [], []>} : vector<32x8xf32>, vector<8x4xf32>, vector<32x4xf32> -> vector<32x4xf32>
    %c0_213 = arith.constant 0 : index
    %c25 = arith.constant 25 : index
    %231 = vector.load %arg10[%c0_213, %c25] : memref<32x1190xf32, #tpu.memory_space<vmem>>, vector<32x4xf32>
    tpu.vector_store %arg10[%c0_213, %c25], %230 {strides = array<i32>} : memref<32x1190xf32, #tpu.memory_space<vmem>>, vector<32x4xf32>,
    %c5 = arith.constant 5 : index
    %c0_214 = arith.constant 0 : index
    %c0_215 = arith.constant 0 : index
    %232 = vector.load %arg2[%c5, %c0_214, %c0_215] : memref<6x32x288xbf16, #tpu.memory_space<vmem>>, vector<1x32x288xbf16>
    %233 = vector.shape_cast %232 : vector<1x32x288xbf16> to vector<32x288xbf16>
    %c5_216 = arith.constant 5 : index
    %c0_217 = arith.constant 0 : index
    %c0_218 = arith.constant 0 : index
    %234 = vector.load %arg3[%c5_216, %c0_217, %c0_218] : memref<6x32x1xf32, #tpu.memory_space<vmem>>, vector<1x32x1xf32>
    %235 = vector.shape_cast %234 : vector<1x32x1xf32> to vector<32x1xf32>
    "tpu.region"() ({
      %alloca = memref.alloca() : memref<288x24xf32, #tpu.memory_space<vmem>>
      %c0_291 = arith.constant 0 : index
      %c0_292 = arith.constant 0 : index
      %340 = vector.load %arg10[%c0_291, %c0_292] : memref<32x1190xf32, #tpu.memory_space<vmem>>, vector<32x24xf32>
      %c0_293 = arith.constant 0 : index
      %c0_294 = arith.constant 0 : index
      %341 = vector.load %alloca[%c0_293, %c0_294] : memref<288x24xf32, #tpu.memory_space<vmem>>, vector<32x24xf32>
      tpu.vector_store %alloca[%c0_293, %c0_294], %340 {strides = array<i32>} : memref<288x24xf32, #tpu.memory_space<vmem>>, vector<32x24xf32>,
      %c0_295 = arith.constant 0 : index
      %c1_296 = arith.constant 1 : index
      %342 = vector.load %arg10[%c0_295, %c1_296] : memref<32x1190xf32, #tpu.memory_space<vmem>>, vector<32x24xf32>
      %c32_297 = arith.constant 32 : index
      %c0_298 = arith.constant 0 : index
      %343 = vector.load %alloca[%c32_297, %c0_298] : memref<288x24xf32, #tpu.memory_space<vmem>>, vector<32x24xf32>
      tpu.vector_store %alloca[%c32_297, %c0_298], %342 {strides = array<i32>} : memref<288x24xf32, #tpu.memory_space<vmem>>, vector<32x24xf32>,
      %c0_299 = arith.constant 0 : index
      %c2_300 = arith.constant 2 : index
      %344 = vector.load %arg10[%c0_299, %c2_300] : memref<32x1190xf32, #tpu.memory_space<vmem>>, vector<32x24xf32>
      %c64_301 = arith.constant 64 : index
      %c0_302 = arith.constant 0 : index
      %345 = vector.load %alloca[%c64_301, %c0_302] : memref<288x24xf32, #tpu.memory_space<vmem>>, vector<32x24xf32>
      tpu.vector_store %alloca[%c64_301, %c0_302], %344 {strides = array<i32>} : memref<288x24xf32, #tpu.memory_space<vmem>>, vector<32x24xf32>,
      %c0_303 = arith.constant 0 : index
      %c6 = arith.constant 6 : index
      %346 = vector.load %arg10[%c0_303, %c6] : memref<32x1190xf32, #tpu.memory_space<vmem>>, vector<32x24xf32>
      %c96_304 = arith.constant 96 : index
      %c0_305 = arith.constant 0 : index
      %347 = vector.load %alloca[%c96_304, %c0_305] : memref<288x24xf32, #tpu.memory_space<vmem>>, vector<32x24xf32>
      tpu.vector_store %alloca[%c96_304, %c0_305], %346 {strides = array<i32>} : memref<288x24xf32, #tpu.memory_space<vmem>>, vector<32x24xf32>,
      %c0_306 = arith.constant 0 : index
      %c7_307 = arith.constant 7 : index
      %348 = vector.load %arg10[%c0_306, %c7_307] : memref<32x1190xf32, #tpu.memory_space<vmem>>, vector<32x24xf32>
      %c128_308 = arith.constant 128 : index
      %c0_309 = arith.constant 0 : index
      %349 = vector.load %alloca[%c128_308, %c0_309] : memref<288x24xf32, #tpu.memory_space<vmem>>, vector<32x24xf32>
      tpu.vector_store %alloca[%c128_308, %c0_309], %348 {strides = array<i32>} : memref<288x24xf32, #tpu.memory_space<vmem>>, vector<32x24xf32>,
      %c0_310 = arith.constant 0 : index
      %c8_311 = arith.constant 8 : index
      %350 = vector.load %arg10[%c0_310, %c8_311] : memref<32x1190xf32, #tpu.memory_space<vmem>>, vector<32x24xf32>
      %c160_312 = arith.constant 160 : index
      %c0_313 = arith.constant 0 : index
      %351 = vector.load %alloca[%c160_312, %c0_313] : memref<288x24xf32, #tpu.memory_space<vmem>>, vector<32x24xf32>
      tpu.vector_store %alloca[%c160_312, %c0_313], %350 {strides = array<i32>} : memref<288x24xf32, #tpu.memory_space<vmem>>, vector<32x24xf32>,
      %c0_314 = arith.constant 0 : index
      %c12_315 = arith.constant 12 : index
      %352 = vector.load %arg10[%c0_314, %c12_315] : memref<32x1190xf32, #tpu.memory_space<vmem>>, vector<32x24xf32>
      %c192_316 = arith.constant 192 : index
      %c0_317 = arith.constant 0 : index
      %353 = vector.load %alloca[%c192_316, %c0_317] : memref<288x24xf32, #tpu.memory_space<vmem>>, vector<32x24xf32>
      tpu.vector_store %alloca[%c192_316, %c0_317], %352 {strides = array<i32>} : memref<288x24xf32, #tpu.memory_space<vmem>>, vector<32x24xf32>,
      %c0_318 = arith.constant 0 : index
      %c13_319 = arith.constant 13 : index
      %354 = vector.load %arg10[%c0_318, %c13_319] : memref<32x1190xf32, #tpu.memory_space<vmem>>, vector<32x24xf32>
      %c224_320 = arith.constant 224 : index
      %c0_321 = arith.constant 0 : index
      %355 = vector.load %alloca[%c224_320, %c0_321] : memref<288x24xf32, #tpu.memory_space<vmem>>, vector<32x24xf32>
      tpu.vector_store %alloca[%c224_320, %c0_321], %354 {strides = array<i32>} : memref<288x24xf32, #tpu.memory_space<vmem>>, vector<32x24xf32>,
      %c0_322 = arith.constant 0 : index
      %c14_323 = arith.constant 14 : index
      %356 = vector.load %arg10[%c0_322, %c14_323] : memref<32x1190xf32, #tpu.memory_space<vmem>>, vector<32x24xf32>
      %c256_324 = arith.constant 256 : index
      %c0_325 = arith.constant 0 : index
      %357 = vector.load %alloca[%c256_324, %c0_325] : memref<288x24xf32, #tpu.memory_space<vmem>>, vector<32x24xf32>
      tpu.vector_store %alloca[%c256_324, %c0_325], %356 {strides = array<i32>} : memref<288x24xf32, #tpu.memory_space<vmem>>, vector<32x24xf32>,
      %c0_326 = arith.constant 0 : index
      %c0_327 = arith.constant 0 : index
      %358 = vector.load %alloca[%c0_326, %c0_327] : memref<288x24xf32, #tpu.memory_space<vmem>>, vector<288x24xf32>
      %359 = arith.truncf %358 : vector<288x24xf32> to vector<288x24xbf16>
      %cst_328 = arith.constant dense<0.000000e+00> : vector<32x24xf32>
      %360 = tpu.matmul %233, %359, %cst_328 {dimension_numbers = #tpu.dot_dimension_numbers<[1], [0], [0], [1], [0, 0, 1, 1], [], []>} : vector<32x288xbf16>, vector<288x24xbf16>, vector<32x24xf32> -> vector<32x24xf32>
      %361 = vector.broadcast %235 : vector<32x1xf32> to vector<32x24xf32>
      %362 = arith.addf %360, %361 : vector<32x24xf32>
      %cst_329 = arith.constant 0.000000e+00 : f32
      %363 = vector.broadcast %cst_329 : f32 to vector<32x24xf32>
      %364 = arith.maximumf %362, %363 : vector<32x24xf32>
      %c0_330 = arith.constant 0 : index
      %c7_331 = arith.constant 7 : index
      %365 = vector.load %arg10[%c0_330, %c7_331] : memref<32x1190xf32, #tpu.memory_space<vmem>>, vector<32x24xf32>
      tpu.vector_store %arg10[%c0_330, %c7_331], %364 {strides = array<i32>} : memref<32x1190xf32, #tpu.memory_space<vmem>>, vector<32x24xf32>,
      tpu.yield
    }) : () -> ()
    %c0_219 = arith.constant 0 : index
    %c7_220 = arith.constant 7 : index
    %236 = vector.load %arg10[%c0_219, %c7_220] : memref<32x1190xf32, #tpu.memory_space<vmem>>, vector<32x16xf32>
    %c0_221 = arith.constant 0 : index
    %c8 = arith.constant 8 : index
    %237 = vector.load %arg10[%c0_221, %c8] : memref<32x1190xf32, #tpu.memory_space<vmem>>, vector<32x16xf32>
    %c0_222 = arith.constant 0 : index
    %c13_223 = arith.constant 13 : index
    %238 = vector.load %arg10[%c0_222, %c13_223] : memref<32x1190xf32, #tpu.memory_space<vmem>>, vector<32x16xf32>
    %c0_224 = arith.constant 0 : index
    %c14 = arith.constant 14 : index
    %239 = vector.load %arg10[%c0_224, %c14] : memref<32x1190xf32, #tpu.memory_space<vmem>>, vector<32x16xf32>
    %240 = arith.maximumf %236, %237 : vector<32x16xf32>
    %241 = arith.maximumf %238, %239 : vector<32x16xf32>
    %242 = arith.maximumf %240, %241 : vector<32x16xf32>
    %243 = vector.extract_strided_slice %242 {offsets = [0, 0], sizes = [32, 1], strides = [1, 1]} : vector<32x16xf32> to vector<32x1xf32>
    %c0_225 = arith.constant 0 : index
    %c0_226 = arith.constant 0 : index
    %c0_227 = arith.constant 0 : index
    %244 = vector.load %arg6[%c0_225, %c0_226, %c0_227] : memref<4x32x50xf32, #tpu.memory_space<vmem>>, vector<1x32x50xf32>
    %245 = vector.shape_cast %244 : vector<1x32x50xf32> to vector<32x50xf32>
    %246 = vector.broadcast %243 : vector<32x1xf32> to vector<32x50xf32>
    %247 = arith.mulf %246, %245 : vector<32x50xf32>
    %248 = vector.extract_strided_slice %242 {offsets = [0, 2], sizes = [32, 1], strides = [1, 1]} : vector<32x16xf32> to vector<32x1xf32>
    %c1_228 = arith.constant 1 : index
    %c0_229 = arith.constant 0 : index
    %c0_230 = arith.constant 0 : index
    %249 = vector.load %arg6[%c1_228, %c0_229, %c0_230] : memref<4x32x50xf32, #tpu.memory_space<vmem>>, vector<1x32x50xf32>
    %250 = vector.shape_cast %249 : vector<1x32x50xf32> to vector<32x50xf32>
    %251 = vector.broadcast %248 : vector<32x1xf32> to vector<32x50xf32>
    %252 = arith.mulf %251, %250 : vector<32x50xf32>
    %253 = arith.addf %247, %252 : vector<32x50xf32>
    %254 = vector.extract_strided_slice %242 {offsets = [0, 12], sizes = [32, 1], strides = [1, 1]} : vector<32x16xf32> to vector<32x1xf32>
    %c2_231 = arith.constant 2 : index
    %c0_232 = arith.constant 0 : index
    %c0_233 = arith.constant 0 : index
    %255 = vector.load %arg6[%c2_231, %c0_232, %c0_233] : memref<4x32x50xf32, #tpu.memory_space<vmem>>, vector<1x32x50xf32>
    %256 = vector.shape_cast %255 : vector<1x32x50xf32> to vector<32x50xf32>
    %257 = vector.broadcast %254 : vector<32x1xf32> to vector<32x50xf32>
    %258 = arith.mulf %257, %256 : vector<32x50xf32>
    %259 = arith.addf %253, %258 : vector<32x50xf32>
    %260 = vector.extract_strided_slice %242 {offsets = [0, 14], sizes = [32, 1], strides = [1, 1]} : vector<32x16xf32> to vector<32x1xf32>
    %c3_234 = arith.constant 3 : index
    %c0_235 = arith.constant 0 : index
    %c0_236 = arith.constant 0 : index
    %261 = vector.load %arg6[%c3_234, %c0_235, %c0_236] : memref<4x32x50xf32, #tpu.memory_space<vmem>>, vector<1x32x50xf32>
    %262 = vector.shape_cast %261 : vector<1x32x50xf32> to vector<32x50xf32>
    %263 = vector.broadcast %260 : vector<32x1xf32> to vector<32x50xf32>
    %264 = arith.mulf %263, %262 : vector<32x50xf32>
    %265 = arith.addf %259, %264 : vector<32x50xf32>
    %cst_237 = arith.constant dense<0.000000e+00> : vector<50xf32>
    %266 = vector.multi_reduction <add>, %265, %cst_237 [0] : vector<32x50xf32> to vector<50xf32>
    %267 = vector.shape_cast %266 : vector<50xf32> to vector<1x50xf32>
    %c0_238 = arith.constant 0 : index
    %c0_239 = arith.constant 0 : index
    %268 = vector.load %arg8[%c0_238, %c0_239] : memref<6x50xf32, #tpu.memory_space<vmem>>, vector<1x50xf32>
    %269 = arith.addf %267, %268 : vector<1x50xf32>
    %cst_240 = arith.constant 0.000000e+00 : f32
    %270 = vector.broadcast %cst_240 : f32 to vector<1x50xf32>
    %271 = arith.subf %270, %269 : vector<1x50xf32>
    %272 = math.exp %271 : vector<1x50xf32>
    %cst_241 = arith.constant 1.000000e+00 : f32
    %273 = vector.broadcast %cst_241 : f32 to vector<1x50xf32>
    %274 = arith.addf %273, %272 : vector<1x50xf32>
    %cst_242 = arith.constant 1.000000e+00 : f32
    %275 = vector.broadcast %cst_242 : f32 to vector<1x50xf32>
    %276 = arith.divf %275, %274 : vector<1x50xf32>
    %c0_243 = arith.constant 0 : index
    %c0_244 = arith.constant 0 : index
    %c0_245 = arith.constant 0 : index
    %277 = vector.load %arg7[%c0_243, %c0_244, %c0_245] : memref<5x50x10xf32, #tpu.memory_space<vmem>>, vector<1x50x10xf32>
    %278 = vector.shape_cast %277 : vector<1x50x10xf32> to vector<50x10xf32>
    %cst_246 = arith.constant dense<0.000000e+00> : vector<1x10xf32>
    %279 = tpu.matmul %276, %278, %cst_246 {dimension_numbers = #tpu.dot_dimension_numbers<[1], [0], [0], [1], [0, 0, 1, 1], [], []>} : vector<1x50xf32>, vector<50x10xf32>, vector<1x10xf32> -> vector<1x10xf32>
    %c1_247 = arith.constant 1 : index
    %c0_248 = arith.constant 0 : index
    %280 = vector.load %arg8[%c1_247, %c0_248] : memref<6x50xf32, #tpu.memory_space<vmem>>, vector<1x10xf32>
    %281 = arith.addf %279, %280 : vector<1x10xf32>
    %cst_249 = arith.constant 0.000000e+00 : f32
    %282 = vector.broadcast %cst_249 : f32 to vector<1x10xf32>
    %283 = arith.subf %282, %281 : vector<1x10xf32>
    %284 = math.exp %283 : vector<1x10xf32>
    %cst_250 = arith.constant 1.000000e+00 : f32
    %285 = vector.broadcast %cst_250 : f32 to vector<1x10xf32>
    %286 = arith.addf %285, %284 : vector<1x10xf32>
    %cst_251 = arith.constant 1.000000e+00 : f32
    %287 = vector.broadcast %cst_251 : f32 to vector<1x10xf32>
    %288 = arith.divf %287, %286 : vector<1x10xf32>
    %c1_252 = arith.constant 1 : index
    %c0_253 = arith.constant 0 : index
    %c0_254 = arith.constant 0 : index
    %289 = vector.load %arg7[%c1_252, %c0_253, %c0_254] : memref<5x50x10xf32, #tpu.memory_space<vmem>>, vector<1x10x10xf32>
    %290 = vector.shape_cast %289 : vector<1x10x10xf32> to vector<10x10xf32>
    %cst_255 = arith.constant dense<0.000000e+00> : vector<1x10xf32>
    %291 = tpu.matmul %288, %290, %cst_255 {dimension_numbers = #tpu.dot_dimension_numbers<[1], [0], [0], [1], [0, 0, 1, 1], [], []>} : vector<1x10xf32>, vector<10x10xf32>, vector<1x10xf32> -> vector<1x10xf32>
    %c2_256 = arith.constant 2 : index
    %c0_257 = arith.constant 0 : index
    %292 = vector.load %arg8[%c2_256, %c0_257] : memref<6x50xf32, #tpu.memory_space<vmem>>, vector<1x10xf32>
    %293 = arith.addf %291, %292 : vector<1x10xf32>
    %cst_258 = arith.constant 0.000000e+00 : f32
    %294 = vector.broadcast %cst_258 : f32 to vector<1x10xf32>
    %295 = arith.subf %294, %293 : vector<1x10xf32>
    %296 = math.exp %295 : vector<1x10xf32>
    %cst_259 = arith.constant 1.000000e+00 : f32
    %297 = vector.broadcast %cst_259 : f32 to vector<1x10xf32>
    %298 = arith.addf %297, %296 : vector<1x10xf32>
    %cst_260 = arith.constant 1.000000e+00 : f32
    %299 = vector.broadcast %cst_260 : f32 to vector<1x10xf32>
    %300 = arith.divf %299, %298 : vector<1x10xf32>
    %c2_261 = arith.constant 2 : index
    %c0_262 = arith.constant 0 : index
    %c0_263 = arith.constant 0 : index
    %301 = vector.load %arg7[%c2_261, %c0_262, %c0_263] : memref<5x50x10xf32, #tpu.memory_space<vmem>>, vector<1x10x10xf32>
    %302 = vector.shape_cast %301 : vector<1x10x10xf32> to vector<10x10xf32>
    %cst_264 = arith.constant dense<0.000000e+00> : vector<1x10xf32>
    %303 = tpu.matmul %300, %302, %cst_264 {dimension_numbers = #tpu.dot_dimension_numbers<[1], [0], [0], [1], [0, 0, 1, 1], [], []>} : vector<1x10xf32>, vector<10x10xf32>, vector<1x10xf32> -> vector<1x10xf32>
    %c3_265 = arith.constant 3 : index
    %c0_266 = arith.constant 0 : index
    %304 = vector.load %arg8[%c3_265, %c0_266] : memref<6x50xf32, #tpu.memory_space<vmem>>, vector<1x10xf32>
    %305 = arith.addf %303, %304 : vector<1x10xf32>
    %cst_267 = arith.constant 0.000000e+00 : f32
    %306 = vector.broadcast %cst_267 : f32 to vector<1x10xf32>
    %307 = arith.subf %306, %305 : vector<1x10xf32>
    %308 = math.exp %307 : vector<1x10xf32>
    %cst_268 = arith.constant 1.000000e+00 : f32
    %309 = vector.broadcast %cst_268 : f32 to vector<1x10xf32>
    %310 = arith.addf %309, %308 : vector<1x10xf32>
    %cst_269 = arith.constant 1.000000e+00 : f32
    %311 = vector.broadcast %cst_269 : f32 to vector<1x10xf32>
    %312 = arith.divf %311, %310 : vector<1x10xf32>
    %c3_270 = arith.constant 3 : index
    %c0_271 = arith.constant 0 : index
    %c0_272 = arith.constant 0 : index
    %313 = vector.load %arg7[%c3_270, %c0_271, %c0_272] : memref<5x50x10xf32, #tpu.memory_space<vmem>>, vector<1x10x10xf32>
    %314 = vector.shape_cast %313 : vector<1x10x10xf32> to vector<10x10xf32>
    %cst_273 = arith.constant dense<0.000000e+00> : vector<1x10xf32>
    %315 = tpu.matmul %312, %314, %cst_273 {dimension_numbers = #tpu.dot_dimension_numbers<[1], [0], [0], [1], [0, 0, 1, 1], [], []>} : vector<1x10xf32>, vector<10x10xf32>, vector<1x10xf32> -> vector<1x10xf32>
    %c4_274 = arith.constant 4 : index
    %c0_275 = arith.constant 0 : index
    %316 = vector.load %arg8[%c4_274, %c0_275] : memref<6x50xf32, #tpu.memory_space<vmem>>, vector<1x10xf32>
    %317 = arith.addf %315, %316 : vector<1x10xf32>
    %cst_276 = arith.constant 0.000000e+00 : f32
    %318 = vector.broadcast %cst_276 : f32 to vector<1x10xf32>
    %319 = arith.subf %318, %317 : vector<1x10xf32>
    %320 = math.exp %319 : vector<1x10xf32>
    %cst_277 = arith.constant 1.000000e+00 : f32
    %321 = vector.broadcast %cst_277 : f32 to vector<1x10xf32>
    %322 = arith.addf %321, %320 : vector<1x10xf32>
    %cst_278 = arith.constant 1.000000e+00 : f32
    %323 = vector.broadcast %cst_278 : f32 to vector<1x10xf32>
    %324 = arith.divf %323, %322 : vector<1x10xf32>
    %c4_279 = arith.constant 4 : index
    %c0_280 = arith.constant 0 : index
    %c0_281 = arith.constant 0 : index
    %325 = vector.load %arg7[%c4_279, %c0_280, %c0_281] : memref<5x50x10xf32, #tpu.memory_space<vmem>>, vector<1x10x10xf32>
    %326 = vector.shape_cast %325 : vector<1x10x10xf32> to vector<10x10xf32>
    %cst_282 = arith.constant dense<0.000000e+00> : vector<1x10xf32>
    %327 = tpu.matmul %324, %326, %cst_282 {dimension_numbers = #tpu.dot_dimension_numbers<[1], [0], [0], [1], [0, 0, 1, 1], [], []>} : vector<1x10xf32>, vector<10x10xf32>, vector<1x10xf32> -> vector<1x10xf32>
    %c5_283 = arith.constant 5 : index
    %c0_284 = arith.constant 0 : index
    %328 = vector.load %arg8[%c5_283, %c0_284] : memref<6x50xf32, #tpu.memory_space<vmem>>, vector<1x10xf32>
    %329 = arith.addf %327, %328 : vector<1x10xf32>
    %cst_285 = arith.constant 0.000000e+00 : f32
    %330 = vector.broadcast %cst_285 : f32 to vector<1x10xf32>
    %331 = arith.subf %330, %329 : vector<1x10xf32>
    %332 = math.exp %331 : vector<1x10xf32>
    %cst_286 = arith.constant 1.000000e+00 : f32
    %333 = vector.broadcast %cst_286 : f32 to vector<1x10xf32>
    %334 = arith.addf %333, %332 : vector<1x10xf32>
    %cst_287 = arith.constant 1.000000e+00 : f32
    %335 = vector.broadcast %cst_287 : f32 to vector<1x10xf32>
    %336 = arith.divf %335, %334 : vector<1x10xf32>
    %c0_288 = arith.constant 0 : index
    %c0_289 = arith.constant 0 : index
    %c0_290 = arith.constant 0 : index
    %337 = vector.load %arg9[%c0_288, %c0_289, %c0_290] : memref<1x1x10xf32, #tpu.memory_space<vmem>>, vector<1x1x10xf32>
    %338 = vector.shape_cast %337 : vector<1x1x10xf32> to vector<1x10xf32>
    %339 = vector.shape_cast %336 : vector<1x10xf32> to vector<1x1x10xf32>
    tpu.vector_store %arg9[%c0_288, %c0_289, %c0_290], %339 {strides = array<i32>} : memref<1x1x10xf32, #tpu.memory_space<vmem>>, vector<1x1x10xf32>,
    return
  }
  func.func @transform_0(%arg0: i32) -> (i32, i32, i32) {
    %c0_i32 = arith.constant 0 : i32
    %c0_i32_0 = arith.constant 0 : i32
    %c0_i32_1 = arith.constant 0 : i32
    return %arg0, %c0_i32, %c0_i32_0 : i32, i32, i32
  }
  func.func @transform_1(%arg0: i32) -> (i32, i32, i32) {
    %c0_i32 = arith.constant 0 : i32
    %c0_i32_0 = arith.constant 0 : i32
    %c0_i32_1 = arith.constant 0 : i32
    %c0_i32_2 = arith.constant 0 : i32
    return %c0_i32, %c0_i32_0, %c0_i32_1 : i32, i32, i32
  }
  func.func @transform_2(%arg0: i32) -> (i32, i32, i32) {
    %c0_i32 = arith.constant 0 : i32
    %c0_i32_0 = arith.constant 0 : i32
    %c0_i32_1 = arith.constant 0 : i32
    %c0_i32_2 = arith.constant 0 : i32
    return %c0_i32, %c0_i32_0, %c0_i32_1 : i32, i32, i32
  }
  func.func @transform_3(%arg0: i32) -> (i32, i32) {
    %c0_i32 = arith.constant 0 : i32
    %c0_i32_0 = arith.constant 0 : i32
    %c0_i32_1 = arith.constant 0 : i32
    return %c0_i32, %c0_i32_0 : i32, i32
  }
  func.func @transform_4(%arg0: i32) -> (i32, i32) {
    %c0_i32 = arith.constant 0 : i32
    %c0_i32_0 = arith.constant 0 : i32
    %c0_i32_1 = arith.constant 0 : i32
    return %c0_i32, %c0_i32_0 : i32, i32
  }
  func.func @transform_5(%arg0: i32) -> (i32, i32, i32) {
    %c0_i32 = arith.constant 0 : i32
    %c0_i32_0 = arith.constant 0 : i32
    %c0_i32_1 = arith.constant 0 : i32
    %c0_i32_2 = arith.constant 0 : i32
    return %c0_i32, %c0_i32_0, %c0_i32_1 : i32, i32, i32
  }
  func.func @transform_6(%arg0: i32) -> (i32, i32, i32) {
    %c0_i32 = arith.constant 0 : i32
    %c0_i32_0 = arith.constant 0 : i32
    %c0_i32_1 = arith.constant 0 : i32
    %c0_i32_2 = arith.constant 0 : i32
    return %c0_i32, %c0_i32_0, %c0_i32_1 : i32, i32, i32
  }
  func.func @transform_7(%arg0: i32) -> (i32, i32) {
    %c0_i32 = arith.constant 0 : i32
    %c0_i32_0 = arith.constant 0 : i32
    %c0_i32_1 = arith.constant 0 : i32
    return %c0_i32, %c0_i32_0 : i32, i32
  }
  func.func @transform_8(%arg0: i32) -> (i32, i32, i32) {
    %c0_i32 = arith.constant 0 : i32
    %c0_i32_0 = arith.constant 0 : i32
    %c0_i32_1 = arith.constant 0 : i32
    return %arg0, %c0_i32, %c0_i32_0 : i32, i32, i32
  }
}

</mosaic_0001>

<bundles_post_ra>
// kernel: _lambda_.1
= control target key start
LH: loop header
LB: loop body
LE: loop exit
PB: predicated region body
PF: predicated region fallthrough
CT: control target
= control target key end

     0   :  { %s12896_s0 = inlined_call_operand.vmem [shape: f32[2,3,1024], index: 0, kind: input, shape index: {}]   ;;  %s12897_s1 = inlined_call_operand.vmem [shape: bf16[6,32,288], index: 1, kind: input, shape index: {}]   ;;  %s12898_s2 = inlined_call_operand.vmem [shape: f32[6,32,1], index: 2, kind: input, shape index: {}]   ;;  %s12899_s3 = inlined_call_operand.vmem [shape: f32[2,1088], index: 3, kind: input, shape index: {}]   ;;  %s12900_s4 = inlined_call_operand.vmem [shape: f32[32,16], index: 4, kind: input, shape index: {}]   ;;  %s12901_s5 = inlined_call_operand.vmem [shape: f32[4,32,50], index: 5, kind: input, shape index: {}]   ;;  %s12902_s6 = inlined_call_operand.vmem [shape: f32[5,50,10], index: 6, kind: input, shape index: {}]   ;;  %s12903_s7 = inlined_call_operand.vmem [shape: f32[6,50], index: 7, kind: input, shape index: {}]   ;;  %s12904_s8 = inlined_call_operand.hbm [shape: f32[2,1,10], index: 8, kind: output, shape index: {}]  }
   0x1   :  { %12954 = sst [smem:[#allocation13_spill]] %s12896_s0 }
   0x2   :  { %12955 = sst [smem:[#allocation14_spill]] %s12899_s3 }
   0x3   :  { %13 = vsyncpa [#allocation4], 0 }
   0x4   :  { %15 = vsyncpa [#allocation4 + $0x1], 0  ;;  %s10490_s27 = smov 0   ;;  %s10492_s28 = smov 0  }
   0x5   :  { %s10494_s29 = smov 0   ;;  %s10496_s30 = smov 0  }
   0x6 LB: > { %s10511_s9 = sadd.s32 4294967295, %s10313_s30   ;;  %s9001_s10 = sadd.s32 4294967294, %s10313_s30   ;;  %s10313_s30 = sphi %s10496_s30, %s12992_s30   ;;  %s10309_s29 = sphi %s10494_s29, %s12991_s29   ;;  %s10305_s28 = sphi %s10492_s28, %s12990_s28   ;;  %s10301_s27 = sphi %s10490_s27, %s12989_s27  }
   0x7   : > { %s10515_s11 = sadd.s32 1, %s10313_s30   ;;  %s201_s12 = sadd.s32 1, %s10309_s29 }
   0x8   : > { %s198_s13 = ssub.s32 %s10313_s30, %s10515_s11  ;;  %p211_p0 = scmp.ne.s32.totalorder %s10309_s29, %s10305_s28 }
   0x9   : > { %p199_p1 = scmp.eq.s32.totalorder %s198_s13, 0  ;;  %p212_p2 = scmp.eq.s32.totalorder %s10511_s9, 1 }
   0xa   : > { %p217_p3 = scmp.ne.s32.totalorder %s10305_s28, %s10301_s27  ;;  %p218_p4 = scmp.eq.s32.totalorder %s9001_s10, 1 }
   0xb   : > { %s10526_s14 = scalar_select %p199_p1, %s10309_s29, %s201_s12  }
   0xc   : > { %p10528_p5 = por %p212_p2, %p211_p0  ;;  %p10532_p6 = por %p218_p4, %p217_p3 }
   0xd   : > { %12956 = sst [smem:[#allocation12_spill]] %s10526_s14  ;;  %p9004_p7 = scmp.ge.s32.totalorder %s10313_s30, 1 }
   0xe   : > { %p265_p8 = scmp.lt.s32.totalorder %s10313_s30, 3 }
  0x10   : > { %p266_p9 = pnand %p9004_p7, %p265_p8 }
  0x11   : > { %p298_p10 = scmp.lt.s32.totalorder (!%p266_p9), %s10511_s9, 1  ;;  %vm313_vm0 = vcmask (!%p266_p9), 310272   ;;  %v10315_v0 = vmov (!%p266_p9), 0.0   ;;  %s12959_s0 = sld [smem:[#allocation13_spill]] (!%p266_p9)  ;;  %v10603_v27 = vld [vmem:[%s12897_s1] sm:$0xf] (!%p266_p9) }
  0x12   : > { %269 = sbr.rel (%p266_p9) target bundleno = 7544 (0x1d78), region = 52  ;;  %307 = vst [vmem:[#allocation2 + $0x18] sm:$0xff] (!%p266_p9), %v10315_v0  ;;  %304 = vst [vmem:[#allocation2] sm:$0xff] (!%p266_p9), %v10315_v0  ;;  %s12921_s22 = smov (!%p266_p9), 55   ;;  %v10608_v28 = vld [vmem:[%s12898_s2] sm:$0xff] (!%p266_p9)  ;;  %vm396_vm1 = vcmask (!%p266_p9), 182272  }
  0x13   : > { %305 = vst [vmem:[#allocation2 + $0x8] sm:$0xff] (!%p266_p9), %v10315_v0  ;;  %306 = vst [vmem:[#allocation2 + $0x10] sm:$0xff] (!%p266_p9), %v10315_v0  ;;  %s10317_s23 = smov (!%p266_p9), 39   ;;  %s12931_s24 = smov (!%p266_p9), 69   ;;  %vm336_vm2 = vcmask (!%p266_p9), 51200   ;;  %vm449_vm3 = vcmask (!%p266_p9), 34816  }
  0x14   : > { %308 = vst [vmem:[#allocation2 + $0x20] sm:$0xff] (!%p266_p9), %v10315_v0  ;;  %309 = vst [vmem:[#allocation2 + $0x28] sm:$0xff] (!%p266_p9), %v10315_v0  ;;  %s10319_s25 = smov (!%p266_p9), 47   ;;  %s10320_s26 = smov (!%p266_p9), 85   ;;  %vm366_vm4 = vcmask (!%p266_p9), 116736   ;;  %vm509_vm5 = vcmask (!%p266_p9), 165888  }
  0x15   : > { %310 = vst [vmem:[#allocation2 + $0x30] sm:$0xff] (!%p266_p9), %v10315_v0  ;;  %311 = vst [vmem:[#allocation2 + $0x38] sm:$0xff] (!%p266_p9), %v10315_v0  ;;  %s12942_s10 = smov (!%p266_p9), 77   ;;  %s10322_s12 = smov (!%p266_p9), 49   ;;  %vm479_vm6 = vcmask (!%p266_p9), 100352   ;;  %vm373_vm7 = vcmask (!%p266_p9), 395400  }
  0x16   : > { %312 = vst [vmem:[#allocation2 + $0x40] sm:$0xff] (!%p266_p9), %v10315_v0  ;;  %314 = vst.msk [vmem:[#allocation2 + $0x48] sm:$0xff] (!%p266_p9), %vm313_vm0, %v10315_v0  ;;  %s12905_s13 = smov (!%p266_p9), 41   ;;  %s10326_s19 = smov (!%p266_p9), 79   ;;  %vm343_vm8 = vcmask (!%p266_p9), 329800   ;;  %vm426_vm9 = vcmask (!%p266_p9), 247808  }
  0x17   : > { %s12913_s20 = smov (!%p266_p9), 71   ;;  %vm403_vm10 = vcmask (!%p266_p9), 461000   ;;  %vm486_vm11 = vcmask (!%p266_p9), 379000   ;;  %vm456_vm12 = vcmask (!%p266_p9), 313400   ;;  %vm516_vm13 = vcmask (!%p266_p9), 444600  }
  0x18   : > { %vm320_vm14 = vcmask (!%p266_p9), 543000   ;;  %vm350_vm15 = vcmask (!%p266_p9), 608600  }
  0x19   : > { %s299_s17 = scalar_select %p298_p10, %s10511_s9, 1 }
  0x1b   : > { %s9209_s18 = sshll.u32 %s299_s17, 5  ;;  %s10324_s17 = smov 63  }
  0x1c   : > { %s10554_s21 = scalar_lea.vmem %s12959_s0, %s9209_s18  ;;  %s12909_s18 = smov 57  }
  0x1d   : > { %v389_v1 = vld [vmem:[%s10554_s21 + $0x8] sm:$0x7]  ;;  %v329_v2 = vld [vmem:[%s10554_s21] sm:$0x7]  ;;  %v442_v3 = vld [vmem:[%s10554_s21 + $0x10] sm:$0x7] }
  0x1e   : > { %391 = vrot.lane.b32.xlu1 %v389_v1, %s12921_s22  ;;  %331 = vrot.lane.b32.xlu0 %v329_v2, %s10317_s23  ;;  %v359_v4 = vld [vmem:[%s10554_s21 + $0x4] sm:$0x7]  ;;  %v502_v5 = vld [vmem:[%s10554_s21 + $0x18] sm:$0x7]  ;;  %s10328_s23 = smov 87   ;;  %s12944_s22 = smov 97  }
  0x1f   : > { %v472_v6 = vld [vmem:[%s10554_s21 + $0x14] sm:$0x7]  ;;  %v368_v7 = vld [vmem:[%s10554_s21 + $0x4] sm:$0x7]  ;;  %v338_v8 = vld [vmem:[%s10554_s21] sm:$0x7] }
  0x20   : > { %v419_v9 = vld [vmem:[%s10554_s21 + $0xc] sm:$0x7]  ;;  %v398_v10 = vld [vmem:[%s10554_s21 + $0x8] sm:$0x7]  ;;  %v481_v11 = vld [vmem:[%s10554_s21 + $0x14] sm:$0x7] }
  0x21   : > { %v451_v12 = vld [vmem:[%s10554_s21 + $0x10] sm:$0x7]  ;;  %v511_v13 = vld [vmem:[%s10554_s21 + $0x18] sm:$0x7]  ;;  %v315_v14 = vld [vmem:[%s10554_s21] sm:$0x7] }
  0x22   : > { %444 = vrot.lane.b32.xlu1 %v442_v3, %s12931_s24  ;;  %361 = vrot.lane.b32.xlu0 %v359_v4, %s10319_s25  ;;  %s12917_s25 = smov 35   ;;  %v345_v15 = vld [vmem:[%s10554_s21 + $0x4] sm:$0x7]  ;;  %v375_v16 = vld [vmem:[%s10554_s21 + $0x8] sm:$0x7]  ;;  %s12934_s24 = smov 91  }
  0x23   : > { %v405_v17 = vld [vmem:[%s10554_s21 + $0xc] sm:$0x7]  ;;  %v458_v19 = vld [vmem:[%s10554_s21 + $0x10] sm:$0x7]  ;;  %v488_v20 = vld [vmem:[%s10554_s21 + $0x14] sm:$0x7] }
  0x24   : > { %v428_v18 = vld [vmem:[%s10554_s21 + $0xc] sm:$0x7]  ;;  %v518_v21 = vld [vmem:[%s10554_s21 + $0x18] sm:$0x7]  ;;  %v532_v22 = vld [vmem:[%s10554_s21 + $0x1c] sm:$0x7] }
  0x25   : > { %v322_v23 = vld [vmem:[%s10554_s21] sm:$0x7]  ;;  %v352_v24 = vld [vmem:[%s10554_s21 + $0x4] sm:$0x7]  ;;  %v382_v25 = vld [vmem:[%s10554_s21 + $0x8] sm:$0x7] }
  0x26   : > { %504 = vrot.lane.b32.xlu1 %v502_v5, %s10320_s26  ;;  %474 = vrot.lane.b32.xlu0 %v472_v6, %s12942_s10  ;;  %v412_v26 = vld [vmem:[%s10554_s21 + $0xc] sm:$0x7]  ;;  %v435_v29 = vld [vmem:[%s10554_s21 + $0x10] sm:$0x7] }
  0x27   : > { %v465_v30 = vld [vmem:[%s10554_s21 + $0x14] sm:$0x7]  ;;  %v495_v31 = vld [vmem:[%s10554_s21 + $0x18] sm:$0x7]  ;;  %v525_v32 = vld [vmem:[%s10554_s21 + $0x1c] sm:$0x7] }
  0x28   : > { %v541_v33 = vld [vmem:[%s10554_s21 + $0x1c] sm:$0x7] }
  0x29   : > { %v548_v34 = vld [vmem:[%s10554_s21 + $0x1c] sm:$0x7] }
  0x2a   : > { %370 = vrot.lane.b32.xlu1 %v368_v7, %s10322_s12  ;;  %340 = vrot.lane.b32.xlu0 %v338_v8, %s12905_s13  ;;  %s10330_s12 = smov 43   ;;  %s12919_s13 = smov 73  }
  0x2e   : > { %421 = vrot.lane.b32.xlu1 %v419_v9, %s10324_s17  ;;  %400 = vrot.lane.b32.xlu0 %v398_v10, %s12909_s18  ;;  %s12907_s17 = smov 51   ;;  %s12925_s18 = smov 45  }
  0x32   : > { %483 = vrot.lane.b32.xlu1 %v481_v11, %s10326_s19  ;;  %453 = vrot.lane.b32.xlu0 %v451_v12, %s12913_s20  ;;  %s10332_s19 = smov 59   ;;  %s12927_s20 = smov 53  }
  0x36   : > { %513 = vrot.lane.b32.xlu0 %v511_v13, %s10328_s23  ;;  %317 = vrot.lane.b32.xlu1 %v315_v14, %s12917_s25  ;;  %s10333_s23 = smov 65  }
  0x3a   : > { %347 = vrot.lane.b32.xlu0 %v345_v15, %s10330_s12  ;;  %377 = vrot.lane.b32.xlu1 %v375_v16, %s12907_s17  ;;  %s12911_s12 = smov 81   ;;  %s12915_s17 = smov 89  }
  0x3e   : > { %407 = vrot.lane.b32.xlu0 %v405_v17, %s10332_s19  ;;  %430 = vrot.lane.b32.xlu1 %v428_v18, %s10333_s23  ;;  %s12946_s19 = smov 93   ;;  %s12923_s23 = smov 37  }
  0x42   : > { %460 = vrot.lane.b32.xlu0 %v458_v19, %s12919_s13  ;;  %490 = vrot.lane.b32.xlu1 %v488_v20, %s12911_s12  ;;  %s12933_s12 = sand.u32 1, %s10305_s28   ;;  %s10346_s13 = smov 95  }
  0x43   : > { %s10644_s21 = scalar_lea.vmem [#allocation3], %s12933_s12 }
  0x46   : > { %520 = vrot.lane.b32.xlu0 %v518_v21, %s12915_s17  ;;  %534 = vrot.lane.b32.xlu1 %v532_v22, %s12946_s19  ;;  %s12929_s17 = smov 61  }
  0x4a   : > { %324 = vrot.lane.b32.xlu0 %v322_v23, %s12923_s23  ;;  %354 = vrot.lane.b32.xlu1 %v352_v24, %s12925_s18  ;;  %s10342_s18 = smov 67  }
  0x4e   : > { %384 = vrot.lane.b32.xlu0 %v382_v25, %s12927_s20  ;;  %414 = vrot.lane.b32.xlu1 %v412_v26, %s12929_s17  ;;  %s10343_s20 = smov 75   ;;  %s10344_s17 = smov 83  }
  0x52   : > { %437 = vrot.lane.b32.xlu0 %v435_v29, %s10342_s18  ;;  %467 = vrot.lane.b32.xlu1 %v465_v30, %s10343_s20 }
  0x56   : > { %497 = vrot.lane.b32.xlu0 %v495_v31, %s10344_s17  ;;  %527 = vrot.lane.b32.xlu1 %v525_v32, %s12934_s24 }
  0x5a   : > { %543 = vrot.lane.b32.xlu0 %v541_v33, %s10346_s13  ;;  %550 = vrot.lane.b32.xlu1 %v548_v34, %s12944_s22 }
  0x90   : > { %v10618_v35 = vpop.permute.xlu1 %391  ;;  %v10620_v36 = vpop.permute.xlu0 %331 }
  0x91   : > { %397 = vst.msk [vmem:[#allocation2 + $0x18] sm:$0x7] %vm396_vm1, %v10618_v35  ;;  %vm380_vm1 = vcmask 674200  }
  0x92   : > { %337 = vst.msk [vmem:[#allocation2 + $0x8] sm:$0x7] %vm336_vm2, %v10620_v36  ;;  %vm410_vm2 = vcmask 739800  }
  0x94   : > { %v10624_v37 = vpop.permute.xlu1 %444  ;;  %v10626_v38 = vpop.permute.xlu0 %361 }
  0x95   : > { %450 = vst.msk [vmem:[#allocation2 + $0x28] sm:$0x7] %vm449_vm3, %v10624_v37  ;;  %vm433_vm3 = vcmask 526600  }
  0x96   : > { %367 = vst.msk [vmem:[#allocation2 + $0x10] sm:$0x7] %vm366_vm4, %v10626_v38  ;;  %vm463_vm4 = vcmask 592200  }
  0x98   : > { %v10630_v39 = vpop.permute.xlu1 %504  ;;  %v10632_v40 = vpop.permute.xlu0 %474 }
  0x99   : > { %510 = vst.msk [vmem:[#allocation2 + $0x38] sm:$0x7] %vm509_vm5, %v10630_v39  ;;  %vm493_vm5 = vcmask 657800  }
  0x9a   : > { %480 = vst.msk [vmem:[#allocation2 + $0x30] sm:$0x7] %vm479_vm6, %v10632_v40  ;;  %vm523_vm6 = vcmask 723400  }
  0x9c   : > { %v371_v41 = vpop.permute.xlu1 %370  ;;  %v341_v42 = vpop.permute.xlu0 %340 }
  0x9d   : > { %374 = vst.msk [vmem:[#allocation2 + $0x10] sm:$0x7] %vm373_vm7, %v371_v41  ;;  %vm539_vm7 = vcmask 231424  }
  0x9e   : > { %344 = vst.msk [vmem:[#allocation2 + $0x8] sm:$0x7] %vm343_vm8, %v341_v42  ;;  %vm327_vm8 = vcmask 821800  }
  0xa0   : > { %v422_v43 = vpop.permute.xlu1 %421  ;;  %v401_v44 = vpop.permute.xlu0 %400 }
  0xa1   : > { %427 = vst.msk [vmem:[#allocation2 + $0x20] sm:$0x7] %vm426_vm9, %v422_v43  ;;  %vm357_vm9 = vcmask 887400  }
  0xa2   : > { %404 = vst.msk [vmem:[#allocation2 + $0x18] sm:$0x7] %vm403_vm10, %v401_v44  ;;  %vm334_vm10 = vcmask 1043256  }
  0xa4   : > { %v484_v45 = vpop.permute.xlu1 %483  ;;  %v454_v46 = vpop.permute.xlu0 %453 }
  0xa5   : > { %487 = vst.msk [vmem:[#allocation2 + $0x30] sm:$0x7] %vm486_vm11, %v484_v45  ;;  %vm364_vm11 = vcmask 1043320  }
  0xa6   : > { %457 = vst.msk [vmem:[#allocation2 + $0x28] sm:$0x7] %vm456_vm12, %v454_v46  ;;  %vm387_vm12 = vcmask 953000  }
  0xa8   : > { %v514_v47 = vpop.permute.xlu0 %513  ;;  %v318_v48 = vpop.permute.xlu1 %317 }
  0xa9   : > { %517 = vst.msk [vmem:[#allocation2 + $0x38] sm:$0x7] %vm516_vm13, %v514_v47  ;;  %vm417_vm13 = vcmask 1018600  }
  0xaa   : > { %321 = vst.msk [vmem:[#allocation2] sm:$0x7] %vm320_vm14, %v318_v48  ;;  %vm394_vm14 = vcmask 1043384  }
  0xac   : > { %v348_v49 = vpop.permute.xlu0 %347  ;;  %v378_v50 = vpop.permute.xlu1 %377 }
  0xad   : > { %351 = vst.msk [vmem:[#allocation2 + $0x8] sm:$0x7] %vm350_vm15, %v348_v49  ;;  %vm424_vm15 = vcmask 1043448  }
  0xae   : > { %381 = vst.msk [vmem:[#allocation2 + $0x10] sm:$0x7] %vm380_vm1, %v378_v50  ;;  %vm440_vm1 = vcmask 805400  }
  0xb0   : > { %v408_v51 = vpop.permute.xlu0 %407  ;;  %v431_v52 = vpop.permute.xlu1 %430 }
  0xb1   : > { %411 = vst.msk [vmem:[#allocation2 + $0x18] sm:$0x7] %vm410_vm2, %v408_v51  ;;  %vm470_vm2 = vcmask 871000  }
  0xb2   : > { %434 = vst.msk [vmem:[#allocation2 + $0x20] sm:$0x7] %vm433_vm3, %v431_v52  ;;  %vm447_vm3 = vcmask 1043240  }
  0xb4   : > { %v461_v53 = vpop.permute.xlu0 %460  ;;  %v491_v54 = vpop.permute.xlu1 %490 }
  0xb5   : > { %464 = vst.msk [vmem:[#allocation2 + $0x28] sm:$0x7] %vm463_vm4, %v461_v53  ;;  %vm477_vm4 = vcmask 1043304  }
  0xb6   : > { %494 = vst.msk [vmem:[#allocation2 + $0x30] sm:$0x7] %vm493_vm5, %v491_v54  ;;  %vm500_vm5 = vcmask 936600  }
  0xb8   : > { %v521_v55 = vpop.permute.xlu0 %520  ;;  %v535_v56 = vpop.permute.xlu1 %534 }
  0xb9   : > { %524 = vst.msk [vmem:[#allocation2 + $0x38] sm:$0x7] %vm523_vm6, %v521_v55  ;;  %vm530_vm6 = vcmask 1002200  }
  0xba   : > { %540 = vst.msk [vmem:[#allocation2 + $0x40] sm:$0x7] %vm539_vm7, %v535_v56  ;;  %vm507_vm7 = vcmask 1043368  }
  0xbc   : > { %v325_v57 = vpop.permute.xlu0 %324  ;;  %v355_v58 = vpop.permute.xlu1 %354 }
  0xbd   : > { %328 = vst.msk [vmem:[#allocation2] sm:$0x7] %vm327_vm8, %v325_v57  ;;  %vm537_vm8 = vcmask 1043432  }
  0xbe   : > { %358 = vst.msk [vmem:[#allocation2 + $0x8] sm:$0x7] %vm357_vm9, %v355_v58  ;;  %vm546_vm9 = vcmask 510200  }
  0xbf   : > { %335 = vst.msk [vmem:[#allocation2] sm:$0x7] %vm334_vm10, %v10620_v36  ;;  %vm553_vm10 = vcmask 789000  }
  0xc0   : > { %365 = vst.msk [vmem:[#allocation2 + $0x8] sm:$0x7] %vm364_vm11, %v10626_v38  ;;  %v385_v59 = vpop.permute.xlu0 %384  ;;  %v415_v60 = vpop.permute.xlu1 %414 }
  0xc1   : > { %388 = vst.msk [vmem:[#allocation2 + $0x10] sm:$0x7] %vm387_vm12, %v385_v59 }
  0xc2   : > { %418 = vst.msk [vmem:[#allocation2 + $0x18] sm:$0x7] %vm417_vm13, %v415_v60 }
  0xc3   : > { %395 = vst.msk [vmem:[#allocation2 + $0x10] sm:$0x7] %vm394_vm14, %v10618_v35 }
  0xc4   : > { %425 = vst.msk [vmem:[#allocation2 + $0x18] sm:$0x7] %vm424_vm15, %v422_v43  ;;  %v438_v61 = vpop.permute.xlu0 %437  ;;  %v468_v62 = vpop.permute.xlu1 %467 }
  0xc5   : > { %441 = vst.msk [vmem:[#allocation2 + $0x20] sm:$0x7] %vm440_vm1, %v438_v61 }
  0xc6   : > { %471 = vst.msk [vmem:[#allocation2 + $0x28] sm:$0x7] %vm470_vm2, %v468_v62 }
  0xc7   : > { %448 = vst.msk [vmem:[#allocation2 + $0x20] sm:$0x7] %vm447_vm3, %v10624_v37 }
  0xc8   : > { %478 = vst.msk [vmem:[#allocation2 + $0x28] sm:$0x7] %vm477_vm4, %v10632_v40  ;;  %v498_v63 = vpop.permute.xlu0 %497  ;;  %v528_v1 = vpop.permute.xlu1 %527 }
  0xc9   : > { %501 = vst.msk [vmem:[#allocation2 + $0x30] sm:$0x7] %vm500_vm5, %v498_v63 }
  0xca   : > { %531 = vst.msk [vmem:[#allocation2 + $0x38] sm:$0x7] %vm530_vm6, %v528_v1 }
  0xcb   : > { %508 = vst.msk [vmem:[#allocation2 + $0x30] sm:$0x7] %vm507_vm7, %v10630_v39 }
  0xcc   : > { %538 = vst.msk [vmem:[#allocation2 + $0x38] sm:$0x7] %vm537_vm8, %v535_v56  ;;  %v544_v2 = vpop.permute.xlu0 %543  ;;  %v551_v3 = vpop.permute.xlu1 %550 }
  0xcd   : > { %547 = vst.msk [vmem:[#allocation2 + $0x40] sm:$0x7] %vm546_vm9, %v544_v2 }
  0xce   : > { %554 = vst.msk [vmem:[#allocation2 + $0x40] sm:$0x7] %vm553_vm10, %v551_v3 }
  0xcf   : > { %v10646_v4 = vld [vmem:[#allocation2 + $0x8] sm:$0xff]  ;;  %v10648_v5 = vld [vmem:[#allocation2] sm:$0xff]  ;;  %v10650_v6 = vld [vmem:[#allocation2 + $0x10] sm:$0xff]  ;;  %s10348_s18 = smov 127   ;;  %s10349_s20 = smov 126   ;;  %v10353_v14 = vmov 0.0  }
  0xd0   : > { %596 = vrot.lane.b32.xlu0 %v10646_v4, %s10348_s18  ;;  %594 = vrot.lane.b32.xlu1 %v10648_v5, %s10348_s18  ;;  %v10656_v7 = vld [vmem:[#allocation2 + $0x18] sm:$0xff]  ;;  %v10658_v8 = vld [vmem:[#allocation2 + $0x20] sm:$0xff]  ;;  %v10660_v9 = vld [vmem:[#allocation2 + $0x28] sm:$0xff]  ;;  %s10350_s25 = smov 94   ;;  %s10351_s17 = smov 93   ;;  %1530 = vst [vmem:[#allocation2] sm:$0xff] %v10353_v14 }
  0xd1   : > { %s10352_s23 = smov 92   ;;  %v10688_v13 = vld [vmem:[#allocation2 + $0x48] sm:$0xff]  ;;  %s10354_s13 = smov 60   ;;  %v10357_v15 = vmov 0   ;;  %vm612_vm11 = vcmask 1039360   ;;  %vm675_vm12 = vcmask 1031168  }
  0xd2   : > { %v10662_v10 = vld [vmem:[#allocation2 + $0x30] sm:$0xff]  ;;  %1539 = vst.msk [vmem:[#allocation2 + $0x48] sm:$0xff] %vm313_vm0, %v10353_v14  ;;  %s10355_s12 = smov 59   ;;  %s10356_s24 = smov 58   ;;  %1290 = vmatprep.mubr.bf16.mxu0 %v10357_v15  ;;  %1331 = vmatprep.mubr.bf16.mxu1 %v10357_v15  ;;  %vm574_vm0 = vcmask 523264   ;;  %vm738_vm13 = vcmask 769024  }
  0xd3   : > { %v10664_v11 = vld [vmem:[#allocation2 + $0x38] sm:$0xff]  ;;  %10200 = vset.pattern.permute.xlu1 %v10357_v15  ;;  %10201 = vset.pattern.permute.xlu0 %v10357_v15  ;;  %vm801_vm14 = vcmask 760832   ;;  %vm864_vm15 = vcmask 752640   ;;  %vm931_vm1 = vcmask 490496   ;;  %vm999_vm2 = vcmask 482304   ;;  %s12960_s3 = sld [smem:[#allocation14_spill]] }
  0xd4   : > { %598 = vrot.lane.b32.xlu0 %v10650_v6, %s10348_s18  ;;  %659 = vrot.lane.b32.xlu1 %v10646_v4, %s10349_s20  ;;  %vm1067_vm3 = vcmask 474112   ;;  %vm1230_vm4 = vcmask 1043456   ;;  %vm1226_vm5 = vcmask 588800   ;;  %vm10358_vm6 = vmmov 0  }
  0xd5   : > { %v10686_v12 = vld [vmem:[#allocation2 + $0x40] sm:$0xff]  ;;  %vm1585_vm7 = vcmask 1047832   ;;  %vm1567_vm8 = vcmask 285696   ;;  %vm1594_vm9 = vcmask 809984  }
  0xd6   : > { %1538 = vst [vmem:[#allocation2 + $0x40] sm:$0xff] %v10353_v14  ;;  %575 = vst.msk [vmem:[#allocation5 + $0x40] sm:$0xff] %vm574_vm0, %v10686_v12 }
  0xd8   : > { %661 = vrot.lane.b32.xlu0 %v10650_v6, %s10349_s20  ;;  %722 = vrot.lane.b32.xlu1 %v10646_v4, %s10350_s25 }
  0xdc   : > { %724 = vrot.lane.b32.xlu0 %v10650_v6, %s10350_s25  ;;  %657 = vrot.lane.b32.xlu1 %v10648_v5, %s10349_s20 }
  0xe0   : > { %720 = vrot.lane.b32.xlu0 %v10648_v5, %s10350_s25  ;;  %785 = vrot.lane.b32.xlu1 %v10646_v4, %s10351_s17 }
  0xe4   : > { %787 = vrot.lane.b32.xlu0 %v10650_v6, %s10351_s17  ;;  %848 = vrot.lane.b32.xlu1 %v10646_v4, %s10352_s23 }
  0xe8   : > { %850 = vrot.lane.b32.xlu0 %v10650_v6, %s10352_s23  ;;  %783 = vrot.lane.b32.xlu1 %v10648_v5, %s10351_s17 }
  0xec   : > { %846 = vrot.lane.b32.xlu0 %v10648_v5, %s10352_s23  ;;  %913 = vrot.lane.b32.xlu1 %v10646_v4, %s10354_s13 }
  0xf0   : > { %915 = vrot.lane.b32.xlu0 %v10650_v6, %s10354_s13  ;;  %981 = vrot.lane.b32.xlu1 %v10646_v4, %s10355_s12 }
  0xf4   : > { %983 = vrot.lane.b32.xlu0 %v10650_v6, %s10355_s12  ;;  %911 = vrot.lane.b32.xlu1 %v10648_v5, %s10354_s13 }
  0xf8   : > { %979 = vrot.lane.b32.xlu0 %v10648_v5, %s10355_s12  ;;  %1047 = vrot.lane.b32.xlu1 %v10648_v5, %s10356_s24 }
  0xfc   : > { %1049 = vrot.lane.b32.xlu0 %v10646_v4, %s10356_s24  ;;  %1051 = vrot.lane.b32.xlu1 %v10650_v6, %s10356_s24 }
 0x100   : > { %600 = vrot.lane.b32.xlu0 %v10656_v7, %s10348_s18  ;;  %602 = vrot.lane.b32.xlu1 %v10658_v8, %s10348_s18 }
 0x104   : > { %604 = vrot.lane.b32.xlu0 %v10660_v9, %s10348_s18  ;;  %606 = vrot.lane.b32.xlu1 %v10662_v10, %s10348_s18 }
 0x108   : > { %663 = vrot.lane.b32.xlu0 %v10656_v7, %s10349_s20  ;;  %665 = vrot.lane.b32.xlu1 %v10658_v8, %s10349_s20 }
 0x10c   : > { %726 = vrot.lane.b32.xlu0 %v10656_v7, %s10350_s25  ;;  %728 = vrot.lane.b32.xlu1 %v10658_v8, %s10350_s25 }
 0x110   : > { %667 = vrot.lane.b32.xlu0 %v10660_v9, %s10349_s20  ;;  %669 = vrot.lane.b32.xlu1 %v10662_v10, %s10349_s20 }
 0x114   : > { %730 = vrot.lane.b32.xlu0 %v10660_v9, %s10350_s25  ;;  %732 = vrot.lane.b32.xlu1 %v10662_v10, %s10350_s25 }
 0x118   : > { %789 = vrot.lane.b32.xlu0 %v10656_v7, %s10351_s17  ;;  %791 = vrot.lane.b32.xlu1 %v10658_v8, %s10351_s17 }
 0x11c   : > { %852 = vrot.lane.b32.xlu0 %v10656_v7, %s10352_s23  ;;  %854 = vrot.lane.b32.xlu1 %v10658_v8, %s10352_s23 }
 0x120   : > { %793 = vrot.lane.b32.xlu0 %v10660_v9, %s10351_s17  ;;  %795 = vrot.lane.b32.xlu1 %v10662_v10, %s10351_s17 }
 0x124   : > { %856 = vrot.lane.b32.xlu0 %v10660_v9, %s10352_s23  ;;  %858 = vrot.lane.b32.xlu1 %v10662_v10, %s10352_s23 }
 0x128   : > { %917 = vrot.lane.b32.xlu0 %v10656_v7, %s10354_s13  ;;  %919 = vrot.lane.b32.xlu1 %v10658_v8, %s10354_s13 }
 0x12c   : > { %985 = vrot.lane.b32.xlu0 %v10656_v7, %s10355_s12  ;;  %987 = vrot.lane.b32.xlu1 %v10658_v8, %s10355_s12 }
 0x130   : > { %921 = vrot.lane.b32.xlu0 %v10660_v9, %s10354_s13  ;;  %923 = vrot.lane.b32.xlu1 %v10662_v10, %s10354_s13 }
 0x134   : > { %989 = vrot.lane.b32.xlu0 %v10660_v9, %s10355_s12  ;;  %991 = vrot.lane.b32.xlu1 %v10662_v10, %s10355_s12 }
 0x138   : > { %1053 = vrot.lane.b32.xlu0 %v10656_v7, %s10356_s24  ;;  %1055 = vrot.lane.b32.xlu1 %v10658_v8, %s10356_s24 }
 0x13c   : > { %1057 = vrot.lane.b32.xlu0 %v10660_v9, %s10356_s24  ;;  %1059 = vrot.lane.b32.xlu1 %v10662_v10, %s10356_s24 }
 0x140   : > { %608 = vrot.lane.b32.xlu0 %v10664_v11, %s10348_s18  ;;  %610 = vrot.lane.b32.xlu1 %v10686_v12, %s10348_s18  ;;  %s10359_s18 = smov 35  }
 0x142   : > { %v597_v16 = vpop.permute.xlu0 %596  ;;  %v595_v17 = vpop.permute.xlu1 %594 }
 0x143   : > { %v613_v18 = vsel %vm612_vm11, %v595_v17, %v597_v16 }
 0x144   : > { %671 = vrot.lane.b32.xlu0 %v10664_v11, %s10349_s20  ;;  %673 = vrot.lane.b32.xlu1 %v10686_v12, %s10349_s20  ;;  %v1176_v23 = vpack.c.bf16 %v613_v18, %v10648_v5 }
 0x146   : > { %v10797_v19 = vpop.permute.xlu0 %598  ;;  %v660_v20 = vpop.permute.xlu1 %659 }
 0x147   : > { %v614_v21 = vsel %vm612_vm11, %v597_v16, %v10797_v19 }
 0x148   : > { %734 = vrot.lane.b32.xlu0 %v10664_v11, %s10350_s25  ;;  %736 = vrot.lane.b32.xlu1 %v10686_v12, %s10350_s25  ;;  %v1177_v22 = vpack.c.bf16 %v614_v21, %v10646_v4 }
 0x14a   : > { %v10807_v24 = vpop.permute.xlu0 %661  ;;  %v723_v25 = vpop.permute.xlu1 %722  ;;  %1258 = vmatprep.subr.bf16.mxu0 %v1177_v22 }
 0x14b   : > { %v677_v26 = vsel %vm675_vm12, %v660_v20, %v10807_v24  ;;  %1259 = vmatpush1.bf16.msra.mxu0 %v1176_v23 }
 0x14c   : > { %797 = vrot.lane.b32.xlu0 %v10664_v11, %s10351_s17  ;;  %799 = vrot.lane.b32.xlu1 %v10686_v12, %s10351_s17 }
 0x14e   : > { %v10815_v29 = vpop.permute.xlu0 %724  ;;  %v658_v30 = vpop.permute.xlu1 %657 }
 0x14f   : > { %v740_v31 = vsel %vm738_vm13, %v723_v25, %v10815_v29  ;;  %v676_v32 = vsel %vm675_vm12, %v658_v30, %v660_v20 }
 0x150   : > { %860 = vrot.lane.b32.xlu0 %v10664_v11, %s10352_s23  ;;  %862 = vrot.lane.b32.xlu1 %v10686_v12, %s10352_s23  ;;  %v1186_v33 = vpack.c.bf16 %v740_v31, %v677_v26 }
 0x152   : > { %v721_v34 = vpop.permute.xlu0 %720  ;;  %v786_v35 = vpop.permute.xlu1 %785  ;;  %1260 = vmatprep.subr.bf16.mxu0 %v1186_v33 }
 0x153   : > { %v739_v36 = vsel %vm738_vm13, %v721_v34, %v723_v25 }
 0x154   : > { %925 = vrot.lane.b32.xlu0 %v10664_v11, %s10354_s13  ;;  %927 = vrot.lane.b32.xlu1 %v10686_v12, %s10354_s13  ;;  %v1185_v37 = vpack.c.bf16 %v739_v36, %v676_v32 }
 0x156   : > { %v10829_v38 = vpop.permute.xlu0 %787  ;;  %v849_v39 = vpop.permute.xlu1 %848  ;;  %1261 = vmatpush1.bf16.msra.mxu0 %v1185_v37 }
 0x157   : > { %v803_v40 = vsel %vm801_vm14, %v786_v35, %v10829_v38 }
 0x158   : > { %993 = vrot.lane.b32.xlu0 %v10664_v11, %s10355_s12  ;;  %995 = vrot.lane.b32.xlu1 %v10686_v12, %s10355_s12 }
 0x15a   : > { %v10837_v41 = vpop.permute.xlu0 %850  ;;  %v784_v42 = vpop.permute.xlu1 %783 }
 0x15b   : > { %v866_v43 = vsel %vm864_vm15, %v849_v39, %v10837_v41  ;;  %v802_v44 = vsel %vm801_vm14, %v784_v42, %v786_v35 }
 0x15c   : > { %929 = vrot.lane.b32.xlu0 %v10688_v13, %s10354_s13  ;;  %997 = vrot.lane.b32.xlu1 %v10688_v13, %s10355_s12  ;;  %v1195_v45 = vpack.c.bf16 %v866_v43, %v803_v40 }
 0x15e   : > { %v847_v46 = vpop.permute.xlu0 %846  ;;  %v914_v47 = vpop.permute.xlu1 %913  ;;  %1262 = vmatprep.subr.bf16.mxu0 %v1195_v45 }
 0x15f   : > { %v865_v48 = vsel %vm864_vm15, %v847_v46, %v849_v39 }
 0x160   : > { %1061 = vrot.lane.b32.xlu0 %v10664_v11, %s10356_s24  ;;  %1063 = vrot.lane.b32.xlu1 %v10686_v12, %s10356_s24  ;;  %v1194_v49 = vpack.c.bf16 %v865_v48, %v802_v44 }
 0x162   : > { %v10851_v50 = vpop.permute.xlu0 %915  ;;  %v982_v51 = vpop.permute.xlu1 %981  ;;  %1263 = vmatpush1.bf16.msra.mxu0 %v1194_v49 }
 0x163   : > { %v933_v52 = vsel %vm931_vm1, %v914_v47, %v10851_v50 }
 0x164   : > { %1065 = vrot.lane.b32.xlu0 %v10688_v13, %s10356_s24  ;;  %1223 = vperm.xlu1 %10200, %v10608_v28  }
 0x166   : > { %v10858_v53 = vpop.permute.xlu0 %983  ;;  %v912_v54 = vpop.permute.xlu1 %911 }
 0x167   : > { %v1001_v55 = vsel %vm999_vm2, %v982_v51, %v10858_v53  ;;  %v932_v56 = vsel %vm931_vm1, %v912_v54, %v914_v47 }
 0x168   : > { %v1204_v57 = vpack.c.bf16 %v1001_v55, %v933_v52 }
 0x16a   : > { %v980_v58 = vpop.permute.xlu0 %979  ;;  %v1048_v59 = vpop.permute.xlu1 %1047  ;;  %1264 = vmatprep.subr.bf16.mxu0 %v1204_v57 }
 0x16b   : > { %v1000_v60 = vsel %vm999_vm2, %v980_v58, %v982_v51 }
 0x16c   : > { %v1203_v61 = vpack.c.bf16 %v1000_v60, %v932_v56 }
 0x16e   : > { %v1050_v62 = vpop.permute.xlu0 %1049  ;;  %v10864_v63 = vpop.permute.xlu1 %1051  ;;  %1265 = vmatpush1.bf16.msra.mxu0 %v1203_v61 }
 0x16f   : > { %v1068_v28 = vsel %vm1067_vm3, %v1048_v59, %v1050_v62  ;;  %v1069_v1 = vsel %vm1067_vm3, %v1050_v62, %v10864_v63 }
 0x170   : > { %v1213_v2 = vpack.c.bf16 %v1069_v1, %v1069_v1  ;;  %v1212_v3 = vpack.c.bf16 %v1068_v28, %v1068_v28 }
 0x172   : > { %v601_v4 = vpop.permute.xlu0 %600  ;;  %v603_v5 = vpop.permute.xlu1 %602  ;;  %9007 = vmatprep.subr.msk.bf16.mxu0 %vm1230_vm4, %v1213_v2  ;;  %v1232_v12 = vsel %vm1230_vm4, %v1212_v3, 0 }
 0x173   : > { %v615_v13 = vsel %vm612_vm11, %v10797_v19, %v601_v4  ;;  %v616_v16 = vsel %vm612_vm11, %v601_v4, %v603_v5  ;;  %1267 = vmatpush1.bf16.msra.mxu0 %v1232_v12 }
 0x174   : > { %v1179_v17 = vpack.c.bf16 %v616_v16, %v10656_v7  ;;  %v1178_v18 = vpack.c.bf16 %v615_v13, %v10650_v6 }
 0x176   : > { %v605_v20 = vpop.permute.xlu0 %604  ;;  %v10876_v21 = vpop.permute.xlu1 %606  ;;  %1299 = vmatprep.subr.bf16.mxu1 %v1179_v17  ;;  %9008 = vmatmul.mubr.msk.bf16.vlgmr.msra.gmra.mrb[0].mxu0 %vm1226_vm5, %v10603_v27 }
 0x177   : > { %v617_v22 = vsel %vm612_vm11, %v603_v5, %v605_v20  ;;  %v618_v19 = vsel %vm612_vm11, %v605_v20, %v10876_v21  ;;  %1300 = vmatpush1.bf16.msra.mxu1 %v1178_v18  ;;  %1372 = vmatprep.mubr.bf16.mxu0 %v10357_v15 }
 0x178   : > { %v1181_v23 = vpack.c.bf16 %v618_v19, %v10660_v9  ;;  %v1180_v7 = vpack.c.bf16 %v617_v22, %v10658_v8 }
 0x17a   : > { %v664_v6 = vpop.permute.xlu0 %663  ;;  %v666_v25 = vpop.permute.xlu1 %665  ;;  %1340 = vmatprep.subr.bf16.mxu0 %v1181_v23 }
 0x17b   : > { %v678_v26 = vsel %vm675_vm12, %v10807_v24, %v664_v6  ;;  %v679_v30 = vsel %vm675_vm12, %v664_v6, %v666_v25  ;;  %1341 = vmatpush1.bf16.msra.mxu0 %v1180_v7 }
 0x17e   : > { %v727_v31 = vpop.permute.xlu0 %726  ;;  %v729_v32 = vpop.permute.xlu1 %728 }
 0x17f   : > { %v741_v33 = vsel %vm738_vm13, %v10815_v29, %v727_v31  ;;  %v742_v34 = vsel %vm738_vm13, %v727_v31, %v729_v32 }
 0x180   : > { %v1188_v35 = vpack.c.bf16 %v742_v34, %v679_v30  ;;  %v1187_v9 = vpack.c.bf16 %v741_v33, %v678_v26 }
 0x182   : > { %v668_v36 = vpop.permute.xlu0 %667  ;;  %v10892_v8 = vpop.permute.xlu1 %669  ;;  %1301 = vmatprep.subr.bf16.mxu1 %v1188_v35 }
 0x183   : > { %v680_v37 = vsel %vm675_vm12, %v666_v25, %v668_v36  ;;  %v681_v24 = vsel %vm675_vm12, %v668_v36, %v10892_v8  ;;  %1302 = vmatpush1.bf16.msra.mxu1 %v1187_v9 }
 0x186   : > { %v731_v39 = vpop.permute.xlu0 %730  ;;  %v10897_v40 = vpop.permute.xlu1 %732 }
 0x187   : > { %v743_v42 = vsel %vm738_vm13, %v729_v32, %v731_v39  ;;  %v744_v29 = vsel %vm738_vm13, %v731_v39, %v10897_v40 }
 0x188   : > { %v1190_v43 = vpack.c.bf16 %v744_v29, %v681_v24  ;;  %v1189_v44 = vpack.c.bf16 %v743_v42, %v680_v37 }
 0x18a   : > { %v790_v45 = vpop.permute.xlu0 %789  ;;  %v792_v46 = vpop.permute.xlu1 %791  ;;  %1342 = vmatprep.subr.bf16.mxu0 %v1190_v43 }
 0x18b   : > { %v804_v47 = vsel %vm801_vm14, %v10829_v38, %v790_v45  ;;  %v805_v48 = vsel %vm801_vm14, %v790_v45, %v792_v46  ;;  %1343 = vmatpush1.bf16.msra.mxu0 %v1189_v44 }
 0x18e   : > { %v853_v49 = vpop.permute.xlu0 %852  ;;  %v855_v51 = vpop.permute.xlu1 %854 }
 0x18f   : > { %v867_v52 = vsel %vm864_vm15, %v10837_v41, %v853_v49  ;;  %v868_v54 = vsel %vm864_vm15, %v853_v49, %v855_v51 }
 0x190   : > { %v1197_v55 = vpack.c.bf16 %v868_v54, %v805_v48  ;;  %v1196_v56 = vpack.c.bf16 %v867_v52, %v804_v47 }
 0x192   : > { %v794_v57 = vpop.permute.xlu0 %793  ;;  %v10908_v58 = vpop.permute.xlu1 %795  ;;  %1303 = vmatprep.subr.bf16.mxu1 %v1197_v55 }
 0x193   : > { %v806_v59 = vsel %vm801_vm14, %v792_v46, %v794_v57  ;;  %v807_v38 = vsel %vm801_vm14, %v794_v57, %v10908_v58  ;;  %1304 = vmatpush1.bf16.msra.mxu1 %v1196_v56 }
 0x196   : > { %v857_v60 = vpop.permute.xlu0 %856  ;;  %v10913_v61 = vpop.permute.xlu1 %858 }
 0x197   : > { %v869_v62 = vsel %vm864_vm15, %v855_v51, %v857_v60  ;;  %v870_v41 = vsel %vm864_vm15, %v857_v60, %v10913_v61 }
 0x198   : > { %v1199_v28 = vpack.c.bf16 %v870_v41, %v807_v38  ;;  %v1198_v1 = vpack.c.bf16 %v869_v62, %v806_v59 }
 0x19a   : > { %v918_v2 = vpop.permute.xlu0 %917  ;;  %v920_v3 = vpop.permute.xlu1 %919  ;;  %1344 = vmatprep.subr.bf16.mxu0 %v1199_v28 }
 0x19b   : > { %v934_v4 = vsel %vm931_vm1, %v10851_v50, %v918_v2  ;;  %v935_v5 = vsel %vm931_vm1, %v918_v2, %v920_v3  ;;  %1345 = vmatpush1.bf16.msra.mxu0 %v1198_v1 }
 0x19e   : > { %v986_v12 = vpop.permute.xlu0 %985  ;;  %v988_v13 = vpop.permute.xlu1 %987 }
 0x19f   : > { %v1002_v16 = vsel %vm999_vm2, %v10858_v53, %v986_v12  ;;  %v1003_v17 = vsel %vm999_vm2, %v986_v12, %v988_v13 }
 0x1a0   : > { %v1206_v18 = vpack.c.bf16 %v1003_v17, %v935_v5  ;;  %v1205_v20 = vpack.c.bf16 %v1002_v16, %v934_v4 }
 0x1a2   : > { %v922_v22 = vpop.permute.xlu0 %921  ;;  %v10924_v19 = vpop.permute.xlu1 %923  ;;  %1305 = vmatprep.subr.bf16.mxu1 %v1206_v18 }
 0x1a3   : > { %v936_v23 = vsel %vm931_vm1, %v920_v3, %v922_v22  ;;  %v937_v50 = vsel %vm931_vm1, %v922_v22, %v10924_v19  ;;  %1306 = vmatpush1.bf16.msra.mxu1 %v1205_v20 }
 0x1a6   : > { %v990_v7 = vpop.permute.xlu0 %989  ;;  %v10929_v6 = vpop.permute.xlu1 %991 }
 0x1a7   : > { %v1004_v25 = vsel %vm999_vm2, %v988_v13, %v990_v7  ;;  %v1005_v53 = vsel %vm999_vm2, %v990_v7, %v10929_v6 }
 0x1a8   : > { %v1208_v26 = vpack.c.bf16 %v1005_v53, %v937_v50  ;;  %v1207_v30 = vpack.c.bf16 %v1004_v25, %v936_v23 }
 0x1aa   : > { %v1054_v31 = vpop.permute.xlu0 %1053  ;;  %v1056_v32 = vpop.permute.xlu1 %1055  ;;  %1346 = vmatprep.subr.bf16.mxu0 %v1208_v26 }
 0x1ab   : > { %v1070_v33 = vsel %vm1067_vm3, %v10864_v63, %v1054_v31  ;;  %v1071_v34 = vsel %vm1067_vm3, %v1054_v31, %v1056_v32  ;;  %1347 = vmatpush1.bf16.msra.mxu0 %v1207_v30 }
 0x1ac   : > { %v1215_v35 = vpack.c.bf16 %v1071_v34, %v1071_v34  ;;  %v1214_v9 = vpack.c.bf16 %v1070_v33, %v1070_v33 }
 0x1ae   : > { %v1058_v36 = vpop.permute.xlu0 %1057  ;;  %v10937_v37 = vpop.permute.xlu1 %1059  ;;  %9009 = vmatprep.subr.msk.bf16.mxu1 %vm1230_vm4, %v1215_v35  ;;  %v1238_v24 = vsel %vm1230_vm4, %v1214_v9, 0 }
 0x1af   : > { %v1072_v39 = vsel %vm1067_vm3, %v1056_v32, %v1058_v36  ;;  %v1073_v42 = vsel %vm1067_vm3, %v1058_v36, %v10937_v37  ;;  %1308 = vmatpush1.bf16.msra.mxu1 %v1238_v24 }
 0x1b0   : > { %v1217_v29 = vpack.c.bf16 %v1073_v42, %v1073_v42  ;;  %v1216_v63 = vpack.c.bf16 %v1072_v39, %v1072_v39 }
 0x1b2   : > { %v609_v43 = vpop.permute.xlu0 %608  ;;  %v611_v44 = vpop.permute.xlu1 %610  ;;  %9011 = vmatprep.subr.msk.bf16.mxu0 %vm1230_vm4, %v1217_v29  ;;  %v1244_v45 = vsel %vm1230_vm4, %v1216_v63, 0  ;;  %9010 = vmatmul.mubr.msk.bf16.vlgmr.msra.gmra.mrb[0].mxu1 %vm1226_vm5, %v10603_v27 }
 0x1b3   : > { %v619_v46 = vsel %vm612_vm11, %v10876_v21, %v609_v43  ;;  %v620_v47 = vsel %vm612_vm11, %v609_v43, %v611_v44  ;;  %638 = vst.msk [vmem:[#allocation5 + $0x88] sm:$0xff] %vm574_vm0, %v611_v44  ;;  %1349 = vmatpush1.bf16.msra.mxu0 %v1244_v45  ;;  %1413 = vmatprep.mubr.bf16.mxu1 %v10357_v15 }
 0x1b4   : > { %v1183_v48 = vpack.c.bf16 %v620_v47, %v10664_v11  ;;  %9470 = vmatprep.subr.bf16.mxu0 %v10353_v14  ;;  %v1182_v49 = vpack.c.bf16 %v619_v46, %v10662_v10  ;;  %v1103_v11 = vld [vmem:[#allocation5 + $0x40] sm:$0xff]  ;;  %v1476_v47 = vlaneseq }
 0x1b6   : > { %v672_v51 = vpop.permute.xlu0 %671  ;;  %v674_v52 = vpop.permute.xlu1 %673  ;;  %1381 = vmatprep.subr.bf16.mxu1 %v1183_v48  ;;  %9012 = vmatmul.mubr.msk.bf16.vlgmr.msra.gmra.mrb[4].mxu0 %vm1226_vm5, %v10603_v27  ;;  %v11001_v48 = vshrl.u32 %v1476_v47, 7 }
 0x1b7   : > { %v682_v21 = vsel %vm675_vm12, %v10892_v8, %v672_v51  ;;  %v683_v54 = vsel %vm675_vm12, %v672_v51, %v674_v52  ;;  %701 = vst.msk [vmem:[#allocation5 + $0xd0] sm:$0xff] %vm574_vm0, %v674_v52  ;;  %1382 = vmatpush1.bf16.msra.mxu1 %v1182_v49  ;;  %9480 = vmatprep.mubr.msk.bf16.mxu0 %vm10358_vm6, %v10353_v14 }
 0x1b8   : > { %v11004_v49 = vsub.s32 0, %v11001_v48  ;;  %v1482_v52 = vsub.s32 1, %v11001_v48 }
 0x1ba   : > { %v735_v15 = vpop.permute.xlu0 %734  ;;  %v737_v10 = vpop.permute.xlu1 %736  ;;  %v1112_v55 = vld [vmem:[#allocation5 + $0x88] sm:$0xff] }
 0x1bb   : > { %v745_v56 = vsel %vm738_vm13, %v10897_v40, %v735_v15  ;;  %v746_v57 = vsel %vm738_vm13, %v735_v15, %v737_v10  ;;  %764 = vst.msk [vmem:[#allocation5 + $0x118] sm:$0xff] %vm574_vm0, %v737_v10  ;;  %v1184_v8 = vpack.c.bf16 %v1112_v55, %v1103_v11 }
 0x1bc   : > { %v1192_v59 = vpack.c.bf16 %v746_v57, %v683_v54  ;;  %v1191_v38 = vpack.c.bf16 %v745_v56, %v682_v21 }
 0x1bd   : > { %9471 = vmatpush3.bf16.msra.mxu0 %v1184_v8 }
 0x1be   : > { %v798_v60 = vpop.permute.xlu0 %797  ;;  %v800_v62 = vpop.permute.xlu1 %799  ;;  %9472 = vmatprep.subr.bf16.mxu0 %v10353_v14  ;;  %1383 = vmatprep.subr.bf16.mxu1 %v1192_v59  ;;  %v1121_v40 = vld [vmem:[#allocation5 + $0xd0] sm:$0xff] }
 0x1bf   : > { %v808_v41 = vsel %vm801_vm14, %v10908_v58, %v798_v60  ;;  %v809_v28 = vsel %vm801_vm14, %v798_v60, %v800_v62  ;;  %827 = vst.msk [vmem:[#allocation5 + $0x160] sm:$0xff] %vm574_vm0, %v800_v62  ;;  %1384 = vmatpush1.bf16.msra.mxu1 %v1191_v38  ;;  %v1486_v60 = vsub.s32 2, %v11001_v48  ;;  %v1490_v62 = vsub.s32 3, %v11001_v48 }
 0x1c2   : > { %v861_v1 = vpop.permute.xlu0 %860  ;;  %v863_v2 = vpop.permute.xlu1 %862  ;;  %v1130_v3 = vld [vmem:[#allocation5 + $0x118] sm:$0xff] }
 0x1c3   : > { %v871_v4 = vsel %vm864_vm15, %v10913_v61, %v861_v1  ;;  %v872_v5 = vsel %vm864_vm15, %v861_v1, %v863_v2  ;;  %890 = vst.msk [vmem:[#allocation5 + $0x1a8] sm:$0xff] %vm574_vm0, %v863_v2  ;;  %v1193_v12 = vpack.c.bf16 %v1130_v3, %v1121_v40  ;;  %v1494_v2 = vsub.s32 4, %v11001_v48 }
 0x1c4   : > { %v1201_v13 = vpack.c.bf16 %v872_v5, %v809_v28  ;;  %v1200_v16 = vpack.c.bf16 %v871_v4, %v808_v41 }
 0x1c5   : > { %9473 = vmatpush3.bf16.msra.mxu0 %v1193_v12  ;;  %v1498_v12 = vsub.s32 5, %v11001_v48 }
 0x1c6   : > { %v926_v58 = vpop.permute.xlu0 %925  ;;  %v928_v17 = vpop.permute.xlu1 %927  ;;  %9474 = vmatprep.subr.bf16.mxu0 %v10353_v14  ;;  %1385 = vmatprep.subr.bf16.mxu1 %v1201_v13  ;;  %v1139_v61 = vld [vmem:[#allocation5 + $0x160] sm:$0xff] }
 0x1c7   : > { %v938_v18 = vsel %vm931_vm1, %v10924_v19, %v926_v58  ;;  %v939_v20 = vsel %vm931_vm1, %v926_v58, %v928_v17  ;;  %1386 = vmatpush1.bf16.msra.mxu1 %v1200_v16 }
 0x1ca   : > { %v994_v22 = vpop.permute.xlu0 %993  ;;  %v996_v23 = vpop.permute.xlu1 %995  ;;  %v1148_v50 = vld [vmem:[#allocation5 + $0x1a8] sm:$0xff] }
 0x1cb   : > { %v1006_v7 = vsel %vm999_vm2, %v10929_v6, %v994_v22  ;;  %v1007_v25 = vsel %vm999_vm2, %v994_v22, %v996_v23  ;;  %v1202_v53 = vpack.c.bf16 %v1148_v50, %v1139_v61 }
 0x1cc   : > { %v1210_v26 = vpack.c.bf16 %v1007_v25, %v939_v20  ;;  %v1209_v30 = vpack.c.bf16 %v1006_v7, %v938_v18 }
 0x1cd   : > { %9475 = vmatpush3.bf16.msra.mxu0 %v1202_v53 }
 0x1ce   : > { %v930_v31 = vpop.permute.xlu0 %929  ;;  %v998_v32 = vpop.permute.xlu1 %997  ;;  %1387 = vmatprep.subr.bf16.mxu1 %v1210_v26  ;;  %9476 = vmatprep.subr.bf16.mxu0 %v10353_v14 }
 0x1cf   : > { %v940_v19 = vsel %vm931_vm1, %v928_v17, %v930_v31  ;;  %v1008_v33 = vsel %vm999_vm2, %v996_v23, %v998_v32  ;;  %1388 = vmatpush1.bf16.msra.mxu1 %v1209_v30 }
 0x1d0   : > { %958 = vst.msk [vmem:[#allocation5 + $0x1f0] sm:$0xff] %vm574_vm0, %v940_v19  ;;  %1026 = vst.msk [vmem:[#allocation5 + $0x238] sm:$0xff] %vm574_vm0, %v1008_v33  ;;  %v1502_v19 = vsub.s32 6, %v11001_v48  ;;  %v1506_v33 = vsub.s32 7, %v11001_v48 }
 0x1d2   : > { %v1062_v6 = vpop.permute.xlu0 %1061  ;;  %v1064_v34 = vpop.permute.xlu1 %1063 }
 0x1d3   : > { %v1074_v35 = vsel %vm1067_vm3, %v10937_v37, %v1062_v6  ;;  %v1075_v9 = vsel %vm1067_vm3, %v1062_v6, %v1064_v34 }
 0x1d4   : > { %v1219_v36 = vpack.c.bf16 %v1075_v9, %v1075_v9  ;;  %v1218_v24 = vpack.c.bf16 %v1074_v35, %v1074_v35 }
 0x1d6   : > { %v1066_v39 = vpop.permute.xlu0 %1065  ;;  %9013 = vmatprep.subr.msk.bf16.mxu1 %vm1230_vm4, %v1219_v36  ;;  %v1250_v42 = vsel %vm1230_vm4, %v1218_v24, 0 }
 0x1d7   : > { %v1076_v29 = vsel %vm1067_vm3, %v1064_v34, %v1066_v39  ;;  %v1157_v63 = vld [vmem:[#allocation5 + $0x1f0] sm:$0xff]  ;;  %v1166_v43 = vld [vmem:[#allocation5 + $0x238] sm:$0xff]  ;;  %1390 = vmatpush1.bf16.msra.mxu1 %v1250_v42 }
 0x1d8   : > { %1094 = vst.msk [vmem:[#allocation5 + $0x280] sm:$0xff] %vm574_vm0, %v1076_v29  ;;  %v1211_v44 = vpack.c.bf16 %v1166_v43, %v1157_v63 }
 0x1da   : > { %9477 = vmatpush3.bf16.msra.mxu0 %v1211_v44  ;;  %9014 = vmatmul.mubr.msk.bf16.vlgmr.msra.gmra.mrb[4].mxu1 %vm1226_vm5, %v10603_v27 }
 0x1db   : > { %9478 = vmatprep.subr.bf16.mxu0 %v10353_v14  ;;  %v1471_v14 = vld [vmem:[%s12960_s3] ss:$2 sm:$0xff] }
 0x1dc   : > { %v1479_v11 = vrot.slane %v1471_v14, %v11004_v49  ;;  %v1483_v10 = vrot.slane %v1471_v14, %v1482_v52  ;;  %v1487_v40 = vrot.slane %v1471_v14, %v1486_v60  ;;  %v1491_v4 = vrot.slane %v1471_v14, %v1490_v62 }
 0x1dd   : > { %v1495_v61 = vrot.slane %v1471_v14, %v1494_v2  ;;  %v1499_v7 = vrot.slane %v1471_v14, %v1498_v12  ;;  %v1503_v35 = vrot.slane %v1471_v14, %v1502_v19  ;;  %v1507_v24 = vrot.slane %v1471_v14, %v1506_v33  ;;  %v11063_v12 = vld [vmem:[%s12897_s1 + $0x3c] sm:$0xf] }
 0x1df   : > { %v1175_v37 = vld [vmem:[#allocation5 + $0x280] sm:$0xff] }
 0x1e0   : > { %v1220_v45 = vpack.c.bf16 %v1175_v37, %v1175_v37  ;;  %v9016_v37 = vld [vmem:[%s12960_s3 + $0x10] ss:$2 sm:$0x1] }
 0x1e1   : > { %v1511_v47 = vrot.slane %v9016_v37, %v11004_v49 }
 0x1e2   : > { %v1256_v46 = vsel %vm1230_vm4, %v1220_v45, 0 }
 0x1e3   : > { %9479 = vmatpush3.bf16.msra.mxu0 %v1256_v46  ;;  %v11006_v51 = vpop.permute.xlu1 %1223 }
 0x1e6   : > { %9481 = vmatmul.mubr.msk.bf16.vlgmr.msra.gmra.mrb[8].mxu0 %vm1226_vm5, %v10603_v27 }
 0x249   : > { %v1292_v21 = vpop.f32.mrb[0].mxu0 }
 0x24a   : > { %v1293_v54 = vadd.f32 %v1292_v21, %v11006_v51  ;;  %v1294_v27 = vpop.f32.mrb[1].mxu0 }
 0x24b   : > { %v1295_v15 = vadd.f32 %v1294_v27, %v11006_v51  ;;  %v1296_v55 = vpop.f32.mrb[2].mxu0 }
 0x24c   : > { %v1462_v56 = vmax.f32 %v1293_v54, 0.0  ;;  %v1297_v57 = vpop.f32.mrb[3].mxu0 }
 0x24d   : > { %v1463_v8 = vmax.f32 %v1295_v15, 0.0 }
 0x24e   : > { %v1521_v59 = vmul.f32 %v1479_v11, %v1462_v56 }
 0x24f   : > { %v1522_v38 = vmul.f32 %v1483_v10, %v1463_v8 }
 0x250   : > { %1549 = vrot.lane.b32.xlu0 %v1521_v59, %s10359_s18 }
 0x251   : > { %1551 = vrot.lane.b32.xlu1 %v1522_v38, %s10359_s18 }
 0x285   : > { %v1333_v41 = vpop.f32.mrb[0].mxu1 }
 0x286   : > { %v1334_v28 = vadd.f32 %v1333_v41, %v11006_v51  ;;  %v1335_v1 = vpop.f32.mrb[1].mxu1 }
 0x287   : > { %v1336_v3 = vadd.f32 %v1335_v1, %v11006_v51  ;;  %v1337_v5 = vpop.f32.mrb[2].mxu1 }
 0x288   : > { %v1464_v13 = vmax.f32 %v1334_v28, 0.0  ;;  %v1338_v16 = vpop.f32.mrb[3].mxu1  ;;  %v11058_v5 = vld [vmem:[%s12897_s1 + $0x30] sm:$0xf] }
 0x289   : > { %v1465_v58 = vmax.f32 %v1336_v3, 0.0  ;;  %v1374_v17 = vpop.f32.mrb[4].mxu0  ;;  %v11073_v16 = vld [vmem:[%s12898_s2 + $0x28] sm:$0xff] }
 0x28a   : > { %v1523_v18 = vmul.f32 %v1487_v40, %v1464_v13  ;;  %v1375_v20 = vadd.f32 %v1374_v17, %v11006_v51  ;;  %v1376_v22 = vpop.f32.mrb[5].mxu0  ;;  %v11068_v13 = vld [vmem:[%s12898_s2 + $0x20] sm:$0xff] }
 0x28b   : > { %v1524_v23 = vmul.f32 %v1491_v4, %v1465_v58  ;;  %v1377_v50 = vadd.f32 %v1376_v22, %v11006_v51  ;;  %v1378_v25 = vpop.f32.mrb[6].mxu0 }
 0x28c   : > { %1553 = vrot.lane.b32.xlu0 %v1523_v18, %s10359_s18  ;;  %v1466_v53 = vmax.f32 %v1375_v20, 0.0  ;;  %v1379_v26 = vpop.f32.mrb[7].mxu0 }
 0x28d   : > { %v1467_v30 = vmax.f32 %v1377_v50, 0.0  ;;  %1555 = vrot.lane.b32.xlu1 %v1524_v23, %s10359_s18 }
 0x28e   : > { %v1525_v31 = vmul.f32 %v1495_v61, %v1466_v53 }
 0x28f   : > { %v1526_v32 = vmul.f32 %v1499_v7, %v1467_v30 }
 0x290   : > { %1557 = vrot.lane.b32.xlu0 %v1525_v31, %s10359_s18 }
 0x291   : > { %1559 = vrot.lane.b32.xlu1 %v1526_v32, %s10359_s18 }
 0x2ad   : > { %v1415_v6 = vpop.f32.mrb[4].mxu1 }
 0x2ae   : > { %v1416_v34 = vadd.f32 %v1415_v6, %v11006_v51  ;;  %v1417_v9 = vpop.f32.mrb[5].mxu1 }
 0x2af   : > { %v1418_v36 = vadd.f32 %v1417_v9, %v11006_v51  ;;  %v1419_v39 = vpop.f32.mrb[6].mxu1 }
 0x2b0   : > { %v1468_v42 = vmax.f32 %v1416_v34, 0.0  ;;  %v1420_v29 = vpop.f32.mrb[7].mxu1 }
 0x2b1   : > { %v1469_v63 = vmax.f32 %v1418_v36, 0.0 }
 0x2b2   : > { %v1527_v43 = vmul.f32 %v1503_v35, %v1468_v42 }
 0x2b3   : > { %v1528_v44 = vmul.f32 %v1507_v24, %v1469_v63 }
 0x2b4   : > { %1561 = vrot.lane.b32.xlu0 %v1527_v43, %s10359_s18 }
 0x2b5   : > { %1563 = vrot.lane.b32.xlu1 %v1528_v44, %s10359_s18 }
 0x2b9   : > { %v1456_v45 = vpop.f32.mrb[8].mxu0 }
 0x2ba   : > { %v1457_v46 = vadd.f32 %v1456_v45, %v11006_v51  ;;  %v9482_v14 = vpop.f32.mrb[9].mxu0 }
 0x2bb   : > { %v1459_v21 = vpop.f32.mrb[10].mxu0 }
 0x2bc   : > { %v1470_v54 = vmax.f32 %v1457_v46, 0.0  ;;  %v9483_v11 = vpop.f32.mrb[11].mxu0 }
 0x2be   : > { %v1529_v27 = vmul.f32 %v1511_v47, %v1470_v54 }
 0x2c0   : > { %1565 = vrot.lane.b32.xlu0 %v1529_v27, %s10359_s18 }
 0x2c2   : > { %v1550_v15 = vpop.permute.xlu0 %1549 }
 0x2c3   : > { %1586 = vst.msk [vmem:[#allocation2] sm:$0xff] %vm1585_vm7, %v1550_v15  ;;  %v1552_v10 = vpop.permute.xlu1 %1551 }
 0x2c4   : > { %v1568_v55 = vsel %vm1567_vm8, %v1550_v15, %v1552_v10 }
 0x2c5   : > { %1587 = vst [vmem:[#allocation2 + $0x8] sm:$0xff] %v1568_v55 }
 0x2fe   : > { %v1554_v56 = vpop.permute.xlu0 %1553 }
 0x2ff   : > { %v1569_v51 = vsel %vm1567_vm8, %v1552_v10, %v1554_v56  ;;  %v1556_v57 = vpop.permute.xlu1 %1555 }
 0x300   : > { %1588 = vst [vmem:[#allocation2 + $0x10] sm:$0xff] %v1569_v51  ;;  %v1570_v8 = vsel %vm1567_vm8, %v1554_v56, %v1556_v57 }
 0x301   : > { %1589 = vst [vmem:[#allocation2 + $0x18] sm:$0xff] %v1570_v8 }
 0x302   : > { %v1558_v59 = vpop.permute.xlu0 %1557 }
 0x303   : > { %v1571_v38 = vsel %vm1567_vm8, %v1556_v57, %v1558_v59  ;;  %v1560_v62 = vpop.permute.xlu1 %1559 }
 0x304   : > { %1590 = vst [vmem:[#allocation2 + $0x20] sm:$0xff] %v1571_v38  ;;  %v1572_v41 = vsel %vm1567_vm8, %v1558_v59, %v1560_v62 }
 0x305   : > { %1591 = vst [vmem:[#allocation2 + $0x28] sm:$0xff] %v1572_v41 }
 0x326   : > { %v1562_v28 = vpop.permute.xlu0 %1561 }
 0x327   : > { %v1573_v40 = vsel %vm1567_vm8, %v1560_v62, %v1562_v28  ;;  %v1564_v1 = vpop.permute.xlu1 %1563 }
 0x328   : > { %1592 = vst [vmem:[#allocation2 + $0x30] sm:$0xff] %v1573_v40  ;;  %v1574_v2 = vsel %vm1567_vm8, %v1562_v28, %v1564_v1 }
 0x329   : > { %1593 = vst [vmem:[#allocation2 + $0x38] sm:$0xff] %v1574_v2 }
 0x332   : > { %v1566_v3 = vpop.permute.xlu0 %1565 }
 0x333   : > { %v1575_v4 = vsel %vm1567_vm8, %v1564_v1, %v1566_v3 }
 0x334   : > { %1595 = vst.msk [vmem:[#allocation2 + $0x40] sm:$0xff] %vm1594_vm9, %v1575_v4 }
 0x335   : > { %v11075_v58 = vld [vmem:[#allocation2 + $0x8] sm:$0xff]  ;;  %v11077_v17 = vld [vmem:[#allocation2] sm:$0xff]  ;;  %v11079_v18 = vld [vmem:[#allocation2 + $0x10] sm:$0xff]  ;;  %s10360_s17 = smov 127   ;;  %s10361_s23 = smov 126   ;;  %v10368_v25 = vmov 0  }
 0x336   : > { %1641 = vrot.lane.b32.xlu0 %v11075_v58, %s10360_s17  ;;  %1639 = vrot.lane.b32.xlu1 %v11077_v17, %s10360_s17  ;;  %v11085_v20 = vld [vmem:[#allocation2 + $0x18] sm:$0xff]  ;;  %v11087_v61 = vld [vmem:[#allocation2 + $0x20] sm:$0xff]  ;;  %v11089_v22 = vld [vmem:[#allocation2 + $0x28] sm:$0xff]  ;;  %s10362_s13 = smov 94   ;;  %s10363_s24 = smov 93   ;;  %vm10370_vm10 = vmmov 0  }
 0x337   : > { %v11091_v23 = vld [vmem:[#allocation2 + $0x30] sm:$0xff]  ;;  %v11093_v50 = vld [vmem:[#allocation2 + $0x38] sm:$0xff]  ;;  %s10364_s12 = smov 92   ;;  %s10365_s18 = smov 60   ;;  %2345 = vmatprep.mubr.bf16.mxu1 %v10368_v25  ;;  %2388 = vmatprep.mubr.bf16.mxu0 %v10368_v25  ;;  %v1945_v14 = vld [vmem:[#allocation2 + $0x48] sm:$0xff]  ;;  %vm3187_vm6 = vcmask 581048  }
 0x338   : > { %s10366_s20 = smov 59   ;;  %s10367_s25 = smov 58   ;;  %10202 = vset.pattern.permute.xlu1 %v10368_v25  ;;  %10203 = vset.pattern.permute.xlu0 %v10368_v25 }
 0x339   : > { %s10386_s0 = smov 33  }
 0x33a   : > { %1643 = vrot.lane.b32.xlu0 %v11079_v18, %s10360_s17  ;;  %1704 = vrot.lane.b32.xlu1 %v11075_v58, %s10361_s23 }
 0x33b   : > { %v11095_v7 = vld [vmem:[#allocation2 + $0x40] sm:$0xff] }
 0x33c   : > { %1620 = vst.msk [vmem:[#allocation6 + $0x40] sm:$0xff] %vm574_vm0, %v11095_v7 }
 0x33e   : > { %1706 = vrot.lane.b32.xlu0 %v11079_v18, %s10361_s23  ;;  %1767 = vrot.lane.b32.xlu1 %v11075_v58, %s10362_s13 }
 0x342   : > { %1769 = vrot.lane.b32.xlu0 %v11079_v18, %s10362_s13  ;;  %1702 = vrot.lane.b32.xlu1 %v11077_v17, %s10361_s23 }
 0x346   : > { %1765 = vrot.lane.b32.xlu0 %v11077_v17, %s10362_s13  ;;  %1830 = vrot.lane.b32.xlu1 %v11075_v58, %s10363_s24 }
 0x34a   : > { %1832 = vrot.lane.b32.xlu0 %v11079_v18, %s10363_s24  ;;  %1893 = vrot.lane.b32.xlu1 %v11075_v58, %s10364_s12 }
 0x34e   : > { %1895 = vrot.lane.b32.xlu0 %v11079_v18, %s10364_s12  ;;  %1828 = vrot.lane.b32.xlu1 %v11077_v17, %s10363_s24 }
 0x352   : > { %1891 = vrot.lane.b32.xlu0 %v11077_v17, %s10364_s12  ;;  %1958 = vrot.lane.b32.xlu1 %v11075_v58, %s10365_s18 }
 0x356   : > { %1960 = vrot.lane.b32.xlu0 %v11079_v18, %s10365_s18  ;;  %2026 = vrot.lane.b32.xlu1 %v11075_v58, %s10366_s20 }
 0x35a   : > { %2028 = vrot.lane.b32.xlu0 %v11079_v18, %s10366_s20  ;;  %1956 = vrot.lane.b32.xlu1 %v11077_v17, %s10365_s18 }
 0x35e   : > { %2024 = vrot.lane.b32.xlu0 %v11077_v17, %s10366_s20  ;;  %2092 = vrot.lane.b32.xlu1 %v11077_v17, %s10367_s25 }
 0x362   : > { %2094 = vrot.lane.b32.xlu0 %v11075_v58, %s10367_s25  ;;  %2096 = vrot.lane.b32.xlu1 %v11079_v18, %s10367_s25 }
 0x366   : > { %1645 = vrot.lane.b32.xlu0 %v11085_v20, %s10360_s17  ;;  %1647 = vrot.lane.b32.xlu1 %v11087_v61, %s10360_s17 }
 0x36a   : > { %1649 = vrot.lane.b32.xlu0 %v11089_v22, %s10360_s17  ;;  %1651 = vrot.lane.b32.xlu1 %v11091_v23, %s10360_s17 }
 0x36e   : > { %1708 = vrot.lane.b32.xlu0 %v11085_v20, %s10361_s23  ;;  %1710 = vrot.lane.b32.xlu1 %v11087_v61, %s10361_s23 }
 0x372   : > { %1771 = vrot.lane.b32.xlu0 %v11085_v20, %s10362_s13  ;;  %1773 = vrot.lane.b32.xlu1 %v11087_v61, %s10362_s13 }
 0x376   : > { %1712 = vrot.lane.b32.xlu0 %v11089_v22, %s10361_s23  ;;  %1714 = vrot.lane.b32.xlu1 %v11091_v23, %s10361_s23 }
 0x37a   : > { %1775 = vrot.lane.b32.xlu0 %v11089_v22, %s10362_s13  ;;  %1777 = vrot.lane.b32.xlu1 %v11091_v23, %s10362_s13 }
 0x37e   : > { %1834 = vrot.lane.b32.xlu0 %v11085_v20, %s10363_s24  ;;  %1836 = vrot.lane.b32.xlu1 %v11087_v61, %s10363_s24 }
 0x382   : > { %1897 = vrot.lane.b32.xlu0 %v11085_v20, %s10364_s12  ;;  %1899 = vrot.lane.b32.xlu1 %v11087_v61, %s10364_s12 }
 0x386   : > { %1838 = vrot.lane.b32.xlu0 %v11089_v22, %s10363_s24  ;;  %1840 = vrot.lane.b32.xlu1 %v11091_v23, %s10363_s24 }
 0x38a   : > { %1901 = vrot.lane.b32.xlu0 %v11089_v22, %s10364_s12  ;;  %1903 = vrot.lane.b32.xlu1 %v11091_v23, %s10364_s12 }
 0x38e   : > { %1962 = vrot.lane.b32.xlu0 %v11085_v20, %s10365_s18  ;;  %1964 = vrot.lane.b32.xlu1 %v11087_v61, %s10365_s18 }
 0x392   : > { %2030 = vrot.lane.b32.xlu0 %v11085_v20, %s10366_s20  ;;  %2032 = vrot.lane.b32.xlu1 %v11087_v61, %s10366_s20 }
 0x396   : > { %1966 = vrot.lane.b32.xlu0 %v11089_v22, %s10365_s18  ;;  %1968 = vrot.lane.b32.xlu1 %v11091_v23, %s10365_s18 }
 0x39a   : > { %2034 = vrot.lane.b32.xlu0 %v11089_v22, %s10366_s20  ;;  %2036 = vrot.lane.b32.xlu1 %v11091_v23, %s10366_s20 }
 0x39e   : > { %2098 = vrot.lane.b32.xlu0 %v11085_v20, %s10367_s25  ;;  %2100 = vrot.lane.b32.xlu1 %v11087_v61, %s10367_s25 }
 0x3a2   : > { %2102 = vrot.lane.b32.xlu0 %v11089_v22, %s10367_s25  ;;  %2104 = vrot.lane.b32.xlu1 %v11091_v23, %s10367_s25 }
 0x3a6   : > { %1653 = vrot.lane.b32.xlu0 %v11093_v50, %s10360_s17  ;;  %1655 = vrot.lane.b32.xlu1 %v11095_v7, %s10360_s17  ;;  %s10371_s17 = smov 35  }
 0x3a8   : > { %v1642_v53 = vpop.permute.xlu0 %1641  ;;  %v1640_v26 = vpop.permute.xlu1 %1639 }
 0x3a9   : > { %v1658_v30 = vsel %vm612_vm11, %v1640_v26, %v1642_v53 }
 0x3aa   : > { %1716 = vrot.lane.b32.xlu0 %v11093_v50, %s10361_s23  ;;  %1718 = vrot.lane.b32.xlu1 %v11095_v7, %s10361_s23  ;;  %v2221_v6 = vpack.c.bf16 %v1658_v30, %v11077_v17  ;;  %s12936_s23 = smov 127  }
 0x3ac   : > { %v11220_v31 = vpop.permute.xlu0 %1643  ;;  %v1705_v32 = vpop.permute.xlu1 %1704 }
 0x3ad   : > { %v1659_v19 = vsel %vm612_vm11, %v1642_v53, %v11220_v31 }
 0x3ae   : > { %1779 = vrot.lane.b32.xlu0 %v11093_v50, %s10362_s13  ;;  %1781 = vrot.lane.b32.xlu1 %v11095_v7, %s10362_s13  ;;  %v2222_v33 = vpack.c.bf16 %v1659_v19, %v11075_v58  ;;  %v11294_v19 = vcombine.low %v11058_v5, %v11063_v12  ;;  %s10373_s13 = smov 94  }
 0x3b0   : > { %v11230_v34 = vpop.permute.xlu0 %1706  ;;  %v1768_v35 = vpop.permute.xlu1 %1767  ;;  %2313 = vmatprep.subr.bf16.mxu1 %v2222_v33 }
 0x3b1   : > { %v1722_v9 = vsel %vm675_vm12, %v1705_v32, %v11230_v34  ;;  %2314 = vmatpush1.bf16.msra.mxu1 %v2221_v6 }
 0x3b2   : > { %1842 = vrot.lane.b32.xlu0 %v11093_v50, %s10363_s24  ;;  %1844 = vrot.lane.b32.xlu1 %v11095_v7, %s10363_s24  ;;  %s10375_s24 = smov 17  }
 0x3b4   : > { %v11238_v36 = vpop.permute.xlu0 %1769  ;;  %v1703_v24 = vpop.permute.xlu1 %1702 }
 0x3b5   : > { %v1785_v39 = vsel %vm738_vm13, %v1768_v35, %v11238_v36  ;;  %v1721_v42 = vsel %vm675_vm12, %v1703_v24, %v1705_v32 }
 0x3b6   : > { %1905 = vrot.lane.b32.xlu0 %v11093_v50, %s10364_s12  ;;  %1907 = vrot.lane.b32.xlu1 %v11095_v7, %s10364_s12  ;;  %v2231_v29 = vpack.c.bf16 %v1785_v39, %v1722_v9  ;;  %s10376_s12 = smov 9  }
 0x3b8   : > { %v1766_v63 = vpop.permute.xlu0 %1765  ;;  %v1831_v43 = vpop.permute.xlu1 %1830  ;;  %2315 = vmatprep.subr.bf16.mxu1 %v2231_v29 }
 0x3b9   : > { %v1784_v44 = vsel %vm738_vm13, %v1766_v63, %v1768_v35 }
 0x3ba   : > { %1970 = vrot.lane.b32.xlu0 %v11093_v50, %s10365_s18  ;;  %1972 = vrot.lane.b32.xlu1 %v11095_v7, %s10365_s18  ;;  %v2230_v37 = vpack.c.bf16 %v1784_v44, %v1721_v42 }
 0x3bc   : > { %v11252_v45 = vpop.permute.xlu0 %1832  ;;  %v1894_v46 = vpop.permute.xlu1 %1893  ;;  %2316 = vmatpush1.bf16.msra.mxu1 %v2230_v37 }
 0x3bd   : > { %v1848_v47 = vsel %vm801_vm14, %v1831_v43, %v11252_v45 }
 0x3be   : > { %2038 = vrot.lane.b32.xlu0 %v11093_v50, %s10366_s20  ;;  %2040 = vrot.lane.b32.xlu1 %v11095_v7, %s10366_s20 }
 0x3c0   : > { %v11260_v21 = vpop.permute.xlu0 %1895  ;;  %v1829_v54 = vpop.permute.xlu1 %1828 }
 0x3c1   : > { %v1911_v11 = vsel %vm864_vm15, %v1894_v46, %v11260_v21  ;;  %v1847_v27 = vsel %vm801_vm14, %v1829_v54, %v1831_v43 }
 0x3c2   : > { %1974 = vrot.lane.b32.xlu0 %v1945_v14, %s10365_s18  ;;  %2042 = vrot.lane.b32.xlu1 %v1945_v14, %s10366_s20  ;;  %v2240_v15 = vpack.c.bf16 %v1911_v11, %v1848_v47  ;;  %s12948_s18 = smov 1   ;;  %s12962_s20 = smov 61  }
 0x3c4   : > { %v1892_v10 = vpop.permute.xlu0 %1891  ;;  %v1959_v55 = vpop.permute.xlu1 %1958  ;;  %2317 = vmatprep.subr.bf16.mxu1 %v2240_v15 }
 0x3c5   : > { %v1910_v56 = vsel %vm864_vm15, %v1892_v10, %v1894_v46 }
 0x3c6   : > { %2106 = vrot.lane.b32.xlu0 %v11093_v50, %s10367_s25  ;;  %2108 = vrot.lane.b32.xlu1 %v11095_v7, %s10367_s25  ;;  %v2239_v51 = vpack.c.bf16 %v1910_v56, %v1847_v27 }
 0x3c8   : > { %v11272_v57 = vpop.permute.xlu0 %1960  ;;  %v2027_v8 = vpop.permute.xlu1 %2026  ;;  %2318 = vmatpush1.bf16.msra.mxu1 %v2239_v51 }
 0x3c9   : > { %v1978_v59 = vsel %vm931_vm1, %v1959_v55, %v11272_v57 }
 0x3ca   : > { %2110 = vrot.lane.b32.xlu0 %v1945_v14, %s10367_s25  ;;  %2268 = vperm.xlu1 %10202, %v11068_v13   ;;  %s10378_s25 = smov 121  }
 0x3cc   : > { %v11278_v38 = vpop.permute.xlu0 %2028  ;;  %v1957_v62 = vpop.permute.xlu1 %1956 }
 0x3cd   : > { %v2046_v41 = vsel %vm999_vm2, %v2027_v8, %v11278_v38  ;;  %v1977_v28 = vsel %vm931_vm1, %v1957_v62, %v1959_v55 }
 0x3ce   : > { %v2249_v40 = vpack.c.bf16 %v2046_v41, %v1978_v59  ;;  %2273 = vperm.xlu0 %10203, %v11073_v16  }
 0x3d0   : > { %v2025_v1 = vpop.permute.xlu0 %2024  ;;  %v2093_v2 = vpop.permute.xlu1 %2092  ;;  %2319 = vmatprep.subr.bf16.mxu1 %v2249_v40 }
 0x3d1   : > { %v2045_v3 = vsel %vm999_vm2, %v2025_v1, %v2027_v8 }
 0x3d2   : > { %v2248_v4 = vpack.c.bf16 %v2045_v3, %v1977_v28 }
 0x3d4   : > { %v2095_v58 = vpop.permute.xlu0 %2094  ;;  %v11285_v17 = vpop.permute.xlu1 %2096  ;;  %2320 = vmatpush1.bf16.msra.mxu1 %v2248_v4 }
 0x3d5   : > { %v2113_v13 = vsel %vm1067_vm3, %v2093_v2, %v2095_v58  ;;  %v2114_v7 = vsel %vm1067_vm3, %v2095_v58, %v11285_v17 }
 0x3d6   : > { %v2258_v53 = vpack.c.bf16 %v2114_v7, %v2114_v7  ;;  %v2257_v26 = vpack.c.bf16 %v2113_v13, %v2113_v13 }
 0x3d8   : > { %v1646_v30 = vpop.permute.xlu0 %1645  ;;  %v1648_v32 = vpop.permute.xlu1 %1647  ;;  %9022 = vmatprep.subr.msk.bf16.mxu1 %vm1230_vm4, %v2258_v53  ;;  %v2287_v16 = vsel %vm1230_vm4, %v2257_v26, 0 }
 0x3d9   : > { %v1660_v33 = vsel %vm612_vm11, %v11220_v31, %v1646_v30  ;;  %v1661_v6 = vsel %vm612_vm11, %v1646_v30, %v1648_v32  ;;  %2322 = vmatpush1.bf16.msra.mxu1 %v2287_v16 }
 0x3da   : > { %v2224_v35 = vpack.c.bf16 %v1661_v6, %v11085_v20  ;;  %v2223_v9 = vpack.c.bf16 %v1660_v33, %v11079_v18 }
 0x3dc   : > { %v1650_v24 = vpop.permute.xlu0 %1649  ;;  %v11301_v39 = vpop.permute.xlu1 %1651  ;;  %2356 = vmatprep.subr.bf16.mxu0 %v2224_v35  ;;  %9023 = vmatmul.mubr.msk.bf16.vlgmr.msra.gmra.mrb[8].mxu1 %vm1226_vm5, %v11294_v19 }
 0x3dd   : > { %v1662_v5 = vsel %vm612_vm11, %v1648_v32, %v1650_v24  ;;  %v1663_v12 = vsel %vm612_vm11, %v1650_v24, %v11301_v39  ;;  %2357 = vmatpush1.bf16.msra.mxu0 %v2223_v9  ;;  %2431 = vmatprep.mubr.bf16.mxu1 %v10368_v25 }
 0x3de   : > { %v2226_v31 = vpack.c.bf16 %v1663_v12, %v11089_v22  ;;  %v2225_v20 = vpack.c.bf16 %v1662_v5, %v11087_v61 }
 0x3e0   : > { %v1709_v18 = vpop.permute.xlu0 %1708  ;;  %v1711_v42 = vpop.permute.xlu1 %1710  ;;  %2399 = vmatprep.subr.bf16.mxu1 %v2226_v31 }
 0x3e1   : > { %v1723_v29 = vsel %vm675_vm12, %v11230_v34, %v1709_v18  ;;  %v1724_v63 = vsel %vm675_vm12, %v1709_v18, %v1711_v42  ;;  %2400 = vmatpush1.bf16.msra.mxu1 %v2225_v20 }
 0x3e4   : > { %v1772_v43 = vpop.permute.xlu0 %1771  ;;  %v1774_v44 = vpop.permute.xlu1 %1773 }
 0x3e5   : > { %v1786_v37 = vsel %vm738_vm13, %v11238_v36, %v1772_v43  ;;  %v1787_v46 = vsel %vm738_vm13, %v1772_v43, %v1774_v44 }
 0x3e6   : > { %v2233_v47 = vpack.c.bf16 %v1787_v46, %v1724_v63  ;;  %v2232_v22 = vpack.c.bf16 %v1786_v37, %v1723_v29 }
 0x3e8   : > { %v1713_v14 = vpop.permute.xlu0 %1712  ;;  %v11317_v61 = vpop.permute.xlu1 %1714  ;;  %2358 = vmatprep.subr.bf16.mxu0 %v2233_v47 }
 0x3e9   : > { %v1725_v54 = vsel %vm675_vm12, %v1711_v42, %v1713_v14  ;;  %v1726_v34 = vsel %vm675_vm12, %v1713_v14, %v11317_v61  ;;  %2359 = vmatpush1.bf16.msra.mxu0 %v2232_v22 }
 0x3ec   : > { %v1776_v11 = vpop.permute.xlu0 %1775  ;;  %v11322_v27 = vpop.permute.xlu1 %1777 }
 0x3ed   : > { %v1788_v15 = vsel %vm738_vm13, %v1774_v44, %v1776_v11  ;;  %v1789_v36 = vsel %vm738_vm13, %v1776_v11, %v11322_v27 }
 0x3ee   : > { %v2235_v10 = vpack.c.bf16 %v1789_v36, %v1726_v34  ;;  %v2234_v55 = vpack.c.bf16 %v1788_v15, %v1725_v54 }
 0x3f0   : > { %v1835_v56 = vpop.permute.xlu0 %1834  ;;  %v1837_v51 = vpop.permute.xlu1 %1836  ;;  %2401 = vmatprep.subr.bf16.mxu1 %v2235_v10 }
 0x3f1   : > { %v1849_v8 = vsel %vm801_vm14, %v11252_v45, %v1835_v56  ;;  %v1850_v59 = vsel %vm801_vm14, %v1835_v56, %v1837_v51  ;;  %2402 = vmatpush1.bf16.msra.mxu1 %v2234_v55 }
 0x3f4   : > { %v1898_v62 = vpop.permute.xlu0 %1897  ;;  %v1900_v41 = vpop.permute.xlu1 %1899 }
 0x3f5   : > { %v1912_v28 = vsel %vm864_vm15, %v11260_v21, %v1898_v62  ;;  %v1913_v40 = vsel %vm864_vm15, %v1898_v62, %v1900_v41 }
 0x3f6   : > { %v2242_v1 = vpack.c.bf16 %v1913_v40, %v1850_v59  ;;  %v2241_v2 = vpack.c.bf16 %v1912_v28, %v1849_v8  ;;  %v10369_v40 = vmov 0.0  }
 0x3f8   : > { %v1839_v3 = vpop.permute.xlu0 %1838  ;;  %v11333_v4 = vpop.permute.xlu1 %1840  ;;  %2360 = vmatprep.subr.bf16.mxu0 %v2242_v1 }
 0x3f9   : > { %v1851_v58 = vsel %vm801_vm14, %v1837_v51, %v1839_v3  ;;  %v1852_v45 = vsel %vm801_vm14, %v1839_v3, %v11333_v4  ;;  %2361 = vmatpush1.bf16.msra.mxu0 %v2241_v2 }
 0x3fc   : > { %v1902_v13 = vpop.permute.xlu0 %1901  ;;  %v11338_v7 = vpop.permute.xlu1 %1903 }
 0x3fd   : > { %v1914_v53 = vsel %vm864_vm15, %v1900_v41, %v1902_v13  ;;  %v1915_v21 = vsel %vm864_vm15, %v1902_v13, %v11338_v7 }
 0x3fe   : > { %v2244_v26 = vpack.c.bf16 %v1915_v21, %v1852_v45  ;;  %v2243_v30 = vpack.c.bf16 %v1914_v53, %v1851_v58 }
 0x400   : > { %v1963_v32 = vpop.permute.xlu0 %1962  ;;  %v1965_v16 = vpop.permute.xlu1 %1964  ;;  %2403 = vmatprep.subr.bf16.mxu1 %v2244_v26 }
 0x401   : > { %v1979_v33 = vsel %vm931_vm1, %v11272_v57, %v1963_v32  ;;  %v1980_v6 = vsel %vm931_vm1, %v1963_v32, %v1965_v16  ;;  %2404 = vmatpush1.bf16.msra.mxu1 %v2243_v30 }
 0x404   : > { %v2031_v35 = vpop.permute.xlu0 %2030  ;;  %v2033_v9 = vpop.permute.xlu1 %2032 }
 0x405   : > { %v2047_v24 = vsel %vm999_vm2, %v11278_v38, %v2031_v35  ;;  %v2048_v5 = vsel %vm999_vm2, %v2031_v35, %v2033_v9 }
 0x406   : > { %v2251_v12 = vpack.c.bf16 %v2048_v5, %v1980_v6  ;;  %v2250_v31 = vpack.c.bf16 %v2047_v24, %v1979_v33 }
 0x408   : > { %v1967_v20 = vpop.permute.xlu0 %1966  ;;  %v11349_v18 = vpop.permute.xlu1 %1968  ;;  %2362 = vmatprep.subr.bf16.mxu0 %v2251_v12 }
 0x409   : > { %v1981_v42 = vsel %vm931_vm1, %v1965_v16, %v1967_v20  ;;  %v1982_v57 = vsel %vm931_vm1, %v1967_v20, %v11349_v18  ;;  %2363 = vmatpush1.bf16.msra.mxu0 %v2250_v31 }
 0x40c   : > { %v2035_v29 = vpop.permute.xlu0 %2034  ;;  %v11354_v63 = vpop.permute.xlu1 %2036 }
 0x40d   : > { %v2049_v43 = vsel %vm999_vm2, %v2033_v9, %v2035_v29  ;;  %v2050_v38 = vsel %vm999_vm2, %v2035_v29, %v11354_v63 }
 0x40e   : > { %v2253_v44 = vpack.c.bf16 %v2050_v38, %v1982_v57  ;;  %v2252_v37 = vpack.c.bf16 %v2049_v43, %v1981_v42 }
 0x410   : > { %v2099_v46 = vpop.permute.xlu0 %2098  ;;  %v2101_v47 = vpop.permute.xlu1 %2100  ;;  %2405 = vmatprep.subr.bf16.mxu1 %v2253_v44 }
 0x411   : > { %v2115_v22 = vsel %vm1067_vm3, %v11285_v17, %v2099_v46  ;;  %v2116_v14 = vsel %vm1067_vm3, %v2099_v46, %v2101_v47  ;;  %2406 = vmatpush1.bf16.msra.mxu1 %v2252_v37 }
 0x412   : > { %v2260_v54 = vpack.c.bf16 %v2116_v14, %v2116_v14  ;;  %v2259_v34 = vpack.c.bf16 %v2115_v22, %v2115_v22 }
 0x414   : > { %v2103_v11 = vpop.permute.xlu0 %2102  ;;  %v11362_v15 = vpop.permute.xlu1 %2104  ;;  %9024 = vmatprep.subr.msk.bf16.mxu0 %vm1230_vm4, %v2260_v54  ;;  %v2293_v36 = vsel %vm1230_vm4, %v2259_v34, 0 }
 0x415   : > { %v2117_v10 = vsel %vm1067_vm3, %v2101_v47, %v2103_v11  ;;  %v2118_v55 = vsel %vm1067_vm3, %v2103_v11, %v11362_v15  ;;  %2365 = vmatpush1.bf16.msra.mxu0 %v2293_v36 }
 0x416   : > { %v2262_v56 = vpack.c.bf16 %v2118_v55, %v2118_v55  ;;  %v2261_v17 = vpack.c.bf16 %v2117_v10, %v2117_v10 }
 0x418   : > { %v1654_v51 = vpop.permute.xlu0 %1653  ;;  %v1656_v8 = vpop.permute.xlu1 %1655  ;;  %9026 = vmatprep.subr.msk.bf16.mxu1 %vm1230_vm4, %v2262_v56  ;;  %9025 = vmatmul.mubr.msk.bf16.vlgmr.msra.gmra.mrb[12].mxu0 %vm1226_vm5, %v11294_v19  ;;  %v2299_v59 = vsel %vm1230_vm4, %v2261_v17, 0 }
 0x419   : > { %v1664_v62 = vsel %vm612_vm11, %v11301_v39, %v1654_v51  ;;  %v1665_v41 = vsel %vm612_vm11, %v1654_v51, %v1656_v8  ;;  %1683 = vst.msk [vmem:[#allocation6 + $0x88] sm:$0xff] %vm574_vm0, %v1656_v8  ;;  %2408 = vmatpush1.bf16.msra.mxu1 %v2299_v59  ;;  %2474 = vmatprep.mubr.bf16.mxu0 %v10368_v25 }
 0x41a   : > { %v2228_v28 = vpack.c.bf16 %v1665_v41, %v11093_v50  ;;  %9484 = vmatprep.subr.bf16.mxu1 %v10369_v40  ;;  %v2227_v1 = vpack.c.bf16 %v1664_v62, %v11091_v23  ;;  %v2148_v50 = vld [vmem:[#allocation6 + $0x40] sm:$0xff] }
 0x41c   : > { %v1717_v2 = vpop.permute.xlu0 %1716  ;;  %v1719_v3 = vpop.permute.xlu1 %1718  ;;  %2442 = vmatprep.subr.bf16.mxu0 %v2228_v28  ;;  %9027 = vmatmul.mubr.msk.bf16.vlgmr.msra.gmra.mrb[12].mxu1 %vm1226_vm5, %v11294_v19 }
 0x41d   : > { %v1727_v39 = vsel %vm675_vm12, %v11317_v61, %v1717_v2  ;;  %v1728_v58 = vsel %vm675_vm12, %v1717_v2, %v1719_v3  ;;  %1746 = vst.msk [vmem:[#allocation6 + $0xd0] sm:$0xff] %vm574_vm0, %v1719_v3  ;;  %2443 = vmatpush1.bf16.msra.mxu0 %v2227_v1  ;;  %9494 = vmatprep.mubr.msk.bf16.mxu1 %vm10370_vm10, %v10369_v40  ;;  %vm3581_vm10 = vcmask 1048568  }
 0x420   : > { %v1780_v25 = vpop.permute.xlu0 %1779  ;;  %v1782_v23 = vpop.permute.xlu1 %1781  ;;  %v2157_v45 = vld [vmem:[#allocation6 + $0x88] sm:$0xff] }
 0x421   : > { %v1790_v13 = vsel %vm738_vm13, %v11322_v27, %v1780_v25  ;;  %v1791_v53 = vsel %vm738_vm13, %v1780_v25, %v1782_v23  ;;  %1809 = vst.msk [vmem:[#allocation6 + $0x118] sm:$0xff] %vm574_vm0, %v1782_v23  ;;  %v2229_v61 = vpack.c.bf16 %v2157_v45, %v2148_v50 }
 0x422   : > { %v2237_v21 = vpack.c.bf16 %v1791_v53, %v1728_v58  ;;  %v2236_v26 = vpack.c.bf16 %v1790_v13, %v1727_v39 }
 0x423   : > { %9485 = vmatpush3.bf16.msra.mxu1 %v2229_v61 }
 0x424   : > { %v1843_v30 = vpop.permute.xlu0 %1842  ;;  %v1845_v32 = vpop.permute.xlu1 %1844  ;;  %9486 = vmatprep.subr.bf16.mxu1 %v10369_v40  ;;  %2444 = vmatprep.subr.bf16.mxu0 %v2237_v21  ;;  %v2166_v27 = vld [vmem:[#allocation6 + $0xd0] sm:$0xff] }
 0x425   : > { %v1853_v16 = vsel %vm801_vm14, %v11333_v4, %v1843_v30  ;;  %v1854_v33 = vsel %vm801_vm14, %v1843_v30, %v1845_v32  ;;  %1872 = vst.msk [vmem:[#allocation6 + $0x160] sm:$0xff] %vm574_vm0, %v1845_v32  ;;  %2445 = vmatpush1.bf16.msra.mxu0 %v2236_v26  ;;  %vm3200_vm14 = vcmask 138240  }
 0x428   : > { %v1906_v6 = vpop.permute.xlu0 %1905  ;;  %v1908_v35 = vpop.permute.xlu1 %1907  ;;  %v2175_v9 = vld [vmem:[#allocation6 + $0x118] sm:$0xff] }
 0x429   : > { %v1916_v24 = vsel %vm864_vm15, %v11338_v7, %v1906_v6  ;;  %v1917_v5 = vsel %vm864_vm15, %v1906_v6, %v1908_v35  ;;  %1935 = vst.msk [vmem:[#allocation6 + $0x1a8] sm:$0xff] %vm574_vm0, %v1908_v35  ;;  %v2238_v12 = vpack.c.bf16 %v2175_v9, %v2166_v27 }
 0x42a   : > { %v2246_v31 = vpack.c.bf16 %v1917_v5, %v1854_v33  ;;  %v2245_v20 = vpack.c.bf16 %v1916_v24, %v1853_v16 }
 0x42b   : > { %9487 = vmatpush3.bf16.msra.mxu1 %v2238_v12 }
 0x42c   : > { %v1971_v4 = vpop.permute.xlu0 %1970  ;;  %v1973_v42 = vpop.permute.xlu1 %1972  ;;  %9488 = vmatprep.subr.bf16.mxu1 %v10369_v40  ;;  %2446 = vmatprep.subr.bf16.mxu0 %v2246_v31  ;;  %v2184_v7 = vld [vmem:[#allocation6 + $0x160] sm:$0xff] }
 0x42d   : > { %v1983_v57 = vsel %vm931_vm1, %v11349_v18, %v1971_v4  ;;  %v1984_v29 = vsel %vm931_vm1, %v1971_v4, %v1973_v42  ;;  %2447 = vmatpush1.bf16.msra.mxu0 %v2245_v20 }
 0x430   : > { %v2039_v43 = vpop.permute.xlu0 %2038  ;;  %v2041_v38 = vpop.permute.xlu1 %2040  ;;  %v2193_v44 = vld [vmem:[#allocation6 + $0x1a8] sm:$0xff] }
 0x431   : > { %v2051_v37 = vsel %vm999_vm2, %v11354_v63, %v2039_v43  ;;  %v2052_v46 = vsel %vm999_vm2, %v2039_v43, %v2041_v38  ;;  %v2247_v47 = vpack.c.bf16 %v2193_v44, %v2184_v7 }
 0x432   : > { %v2255_v22 = vpack.c.bf16 %v2052_v46, %v1984_v29  ;;  %v2254_v14 = vpack.c.bf16 %v2051_v37, %v1983_v57 }
 0x433   : > { %9489 = vmatpush3.bf16.msra.mxu1 %v2247_v47 }
 0x434   : > { %v1975_v54 = vpop.permute.xlu0 %1974  ;;  %v2043_v34 = vpop.permute.xlu1 %2042  ;;  %2448 = vmatprep.subr.bf16.mxu0 %v2255_v22  ;;  %9490 = vmatprep.subr.bf16.mxu1 %v10369_v40 }
 0x435   : > { %v1985_v18 = vsel %vm931_vm1, %v1973_v42, %v1975_v54  ;;  %v2053_v11 = vsel %vm999_vm2, %v2041_v38, %v2043_v34  ;;  %2449 = vmatpush1.bf16.msra.mxu0 %v2254_v14  ;;  %vm3397_vm1 = vcmask 72704   ;;  %vm3597_vm2 = vcmask 7168  }
 0x436   : > { %2003 = vst.msk [vmem:[#allocation6 + $0x1f0] sm:$0xff] %vm574_vm0, %v1985_v18  ;;  %2071 = vst.msk [vmem:[#allocation6 + $0x238] sm:$0xff] %vm574_vm0, %v2053_v11 }
 0x438   : > { %v2107_v63 = vpop.permute.xlu0 %2106  ;;  %v2109_v36 = vpop.permute.xlu1 %2108 }
 0x439   : > { %v2119_v10 = vsel %vm1067_vm3, %v11362_v15, %v2107_v63  ;;  %v2120_v55 = vsel %vm1067_vm3, %v2107_v63, %v2109_v36 }
 0x43a   : > { %v2264_v56 = vpack.c.bf16 %v2120_v55, %v2120_v55  ;;  %v2263_v17 = vpack.c.bf16 %v2119_v10, %v2119_v10 }
 0x43c   : > { %v2111_v51 = vpop.permute.xlu0 %2110  ;;  %9028 = vmatprep.subr.msk.bf16.mxu0 %vm1230_vm4, %v2264_v56  ;;  %v2305_v8 = vsel %vm1230_vm4, %v2263_v17, 0 }
 0x43d   : > { %v2121_v59 = vsel %vm1067_vm3, %v2109_v36, %v2111_v51  ;;  %v2202_v62 = vld [vmem:[#allocation6 + $0x1f0] sm:$0xff]  ;;  %v2211_v41 = vld [vmem:[#allocation6 + $0x238] sm:$0xff]  ;;  %2451 = vmatpush1.bf16.msra.mxu0 %v2305_v8  ;;  %vm2891_vm3 = vcmask 703488  }
 0x43e   : > { %2139 = vst.msk [vmem:[#allocation6 + $0x280] sm:$0xff] %vm574_vm0, %v2121_v59  ;;  %v2256_v28 = vpack.c.bf16 %v2211_v41, %v2202_v62  ;;  %vm2902_vm0 = vcmask 261120  }
 0x440   : > { %9491 = vmatpush3.bf16.msra.mxu1 %v2256_v28  ;;  %9029 = vmatmul.mubr.msk.bf16.vlgmr.msra.gmra.mrb[16].mxu0 %vm1226_vm5, %v11294_v19 }
 0x441   : > { %9492 = vmatprep.subr.bf16.mxu1 %v10369_v40 }
 0x445   : > { %v2220_v15 = vld [vmem:[#allocation6 + $0x280] sm:$0xff] }
 0x446   : > { %v2265_v1 = vpack.c.bf16 %v2220_v15, %v2220_v15 }
 0x448   : > { %v2311_v2 = vsel %vm1230_vm4, %v2265_v1, 0  ;;  %vm2990_vm4 = vcmask 285848  }
 0x449   : > { %9493 = vmatpush3.bf16.msra.mxu1 %v2311_v2  ;;  %v11426_v3 = vpop.permute.xlu1 %2268 }
 0x44c   : > { %9495 = vmatmul.mubr.msk.bf16.vlgmr.msra.gmra.mrb[16].mxu1 %vm1226_vm5, %v11294_v19  ;;  %vm3093_vm5 = vcmask 433448  }
 0x44d   : > { %v2274_v53 = vpop.permute.xlu0 %2273 }
 0x4af   : > { %v2347_v39 = vpop.f32.mrb[8].mxu1 }
 0x4b0   : > { %v2348_v58 = vadd.f32 %v2347_v39, %v11426_v3  ;;  %v2349_v50 = vpop.f32.mrb[9].mxu1 }
 0x4b1   : > { %v2350_v25 = vadd.f32 %v2349_v50, %v11426_v3  ;;  %v2351_v23 = vpop.f32.mrb[10].mxu1 }
 0x4b2   : > { %v2526_v45 = vmax.f32 %v2348_v58, 0.0  ;;  %v2353_v13 = vpop.f32.mrb[11].mxu1  ;;  %v2352_v32 = vadd.f32 %v2351_v23, %v2274_v53 }
 0x4b3   : > { %v2527_v40 = vmax.f32 %v2350_v25, 0.0  ;;  %v2354_v26 = vadd.f32 %v2353_v13, %v2274_v53 }
 0x4b4   : > { %2562 = vrot.lane.b32.xlu1 %v2526_v45, %s10371_s17  ;;  %v2535_v12 = vmax.f32 %v2352_v32, 0.0 }
 0x4b5   : > { %v2536_v9 = vmax.f32 %v2354_v26, 0.0 }
 0x4b8   : > { %2564 = vrot.lane.b32.xlu1 %v2527_v40, %s10371_s17 }
 0x4eb   : > { %v2390_v61 = vpop.f32.mrb[12].mxu0 }
 0x4ec   : > { %v2391_v19 = vadd.f32 %v2390_v61, %v11426_v3  ;;  %v2392_v21 = vpop.f32.mrb[13].mxu0 }
 0x4ed   : > { %v2393_v30 = vadd.f32 %v2392_v21, %v11426_v3  ;;  %v2394_v16 = vpop.f32.mrb[14].mxu0 }
 0x4ee   : > { %v2528_v33 = vmax.f32 %v2391_v19, 0.0  ;;  %v2396_v27 = vpop.f32.mrb[15].mxu0  ;;  %v2395_v31 = vadd.f32 %v2394_v16, %v2274_v53 }
 0x4ef   : > { %v2529_v6 = vmax.f32 %v2393_v30, 0.0  ;;  %v2433_v35 = vpop.f32.mrb[12].mxu1  ;;  %v2397_v24 = vadd.f32 %v2396_v27, %v2274_v53 }
 0x4f0   : > { %2566 = vrot.lane.b32.xlu0 %v2528_v33, %s10371_s17  ;;  %v2435_v5 = vpop.f32.mrb[13].mxu1  ;;  %v2434_v57 = vadd.f32 %v2433_v35, %v11426_v3  ;;  %v2537_v29 = vmax.f32 %v2395_v31, 0.0 }
 0x4f1   : > { %2568 = vrot.lane.b32.xlu1 %v2529_v6, %s10371_s17  ;;  %v2437_v20 = vpop.f32.mrb[14].mxu1  ;;  %v2538_v42 = vmax.f32 %v2397_v24, 0.0  ;;  %v2436_v7 = vadd.f32 %v2435_v5, %v11426_v3 }
 0x4f2   : > { %v2439_v4 = vpop.f32.mrb[15].mxu1  ;;  %v2530_v43 = vmax.f32 %v2434_v57, 0.0  ;;  %v2438_v18 = vadd.f32 %v2437_v20, %v2274_v53 }
 0x4f3   : > { %v2531_v38 = vmax.f32 %v2436_v7, 0.0  ;;  %v2440_v14 = vadd.f32 %v2439_v4, %v2274_v53 }
 0x4f4   : > { %2582 = vrot.lane.b32.xlu0 %v2536_v9, %s10371_s17  ;;  %v2539_v36 = vmax.f32 %v2438_v18, 0.0 }
 0x4f5   : > { %2580 = vrot.lane.b32.xlu1 %v2535_v12, %s10371_s17  ;;  %v2540_v63 = vmax.f32 %v2440_v14, 0.0 }
 0x4f8   : > { %2586 = vrot.lane.b32.xlu0 %v2538_v42, %s10371_s17 }
 0x4f9   : > { %2584 = vrot.lane.b32.xlu1 %v2537_v29, %s10371_s17 }
 0x4fc   : > { %2570 = vrot.lane.b32.xlu0 %v2530_v43, %s10371_s17 }
 0x4fd   : > { %2572 = vrot.lane.b32.xlu1 %v2531_v38, %s10371_s17 }
 0x513   : > { %v2476_v44 = vpop.f32.mrb[16].mxu0 }
 0x514   : > { %v2477_v37 = vadd.f32 %v2476_v44, %v11426_v3  ;;  %v2478_v46 = vpop.f32.mrb[17].mxu0 }
 0x515   : > { %v2479_v47 = vadd.f32 %v2478_v46, %v11426_v3  ;;  %v2480_v22 = vpop.f32.mrb[18].mxu0 }
 0x516   : > { %v2532_v54 = vmax.f32 %v2477_v37, 0.0  ;;  %v2482_v34 = vpop.f32.mrb[19].mxu0  ;;  %v2481_v10 = vadd.f32 %v2480_v22, %v2274_v53 }
 0x517   : > { %v2533_v11 = vmax.f32 %v2479_v47, 0.0  ;;  %v2483_v59 = vadd.f32 %v2482_v34, %v2274_v53 }
 0x518   : > { %2574 = vrot.lane.b32.xlu0 %v2532_v54, %s10371_s17  ;;  %v2541_v55 = vmax.f32 %v2481_v10, 0.0 }
 0x519   : > { %2576 = vrot.lane.b32.xlu1 %v2533_v11, %s10371_s17  ;;  %v2542_v1 = vmax.f32 %v2483_v59, 0.0 }
 0x51c   : > { %2590 = vrot.lane.b32.xlu0 %v2540_v63, %s10371_s17 }
 0x51d   : > { %2588 = vrot.lane.b32.xlu1 %v2539_v36, %s10371_s17 }
 0x51f   : > { %v2519_v56 = vpop.f32.mrb[16].mxu1 }
 0x520   : > { %v2520_v17 = vadd.f32 %v2519_v56, %v11426_v3  ;;  %v9496_v51 = vpop.f32.mrb[17].mxu1 }
 0x521   : > { %v2522_v8 = vpop.f32.mrb[18].mxu1  ;;  %2592 = vrot.lane.b32.xlu1 %v2541_v55, %s10371_s17 }
 0x522   : > { %v2534_v62 = vmax.f32 %v2520_v17, 0.0  ;;  %v2523_v41 = vadd.f32 %v2522_v8, %v2274_v53  ;;  %v9497_v28 = vpop.f32.mrb[19].mxu1 }
 0x524   : > { %v2543_v15 = vmax.f32 %v2523_v41, 0.0  ;;  %2578 = vrot.lane.b32.xlu0 %v2534_v62, %s10371_s17 }
 0x526   : > { %2596 = vrot.lane.b32.xlu1 %v2543_v15, %s10371_s17  ;;  %v2563_v2 = vpop.permute.xlu1 %2562 }
 0x527   : > { %2634 = vst.msk [vmem:[#allocation2] sm:$0xff] %vm1585_vm7, %v2563_v2 }
 0x528   : > { %2594 = vrot.lane.b32.xlu0 %v2542_v1, %s10371_s17  ;;  %s12963_s17 = smov 53  }
 0x52a   : > { %v2565_v3 = vpop.permute.xlu1 %2564 }
 0x52b   : > { %v2599_v39 = vsel %vm1567_vm8, %v2563_v2, %v2565_v3 }
 0x52c   : > { %2635 = vst [vmem:[#allocation2 + $0x8] sm:$0xff] %v2599_v39 }
 0x52e   : > { %v2653_v44 = vld [vmem:[#allocation2] sm:$0xff] }
 0x52f   : > { %2689 = vrot.lane.b32.xlu0 %v2653_v44, %s12936_s23  ;;  %2889 = vst [vmem:[#allocation2] sm:$0xff] %v10315_v0 }
 0x533   : > { %v2654_v37 = vld [vmem:[#allocation2 + $0x8] sm:$0xff] }
 0x534   : > { %2890 = vst [vmem:[#allocation2 + $0x8] sm:$0xff] %v10315_v0  ;;  %2691 = vrot.lane.b32.xlu0 %v2654_v37, %s12936_s23 }
 0x562   : > { %v2567_v58 = vpop.permute.xlu0 %2566 }
 0x563   : > { %v2569_v50 = vpop.permute.xlu1 %2568  ;;  %v2600_v25 = vsel %vm1567_vm8, %v2565_v3, %v2567_v58 }
 0x564   : > { %v2601_v23 = vsel %vm1567_vm8, %v2567_v58, %v2569_v50  ;;  %2636 = vst [vmem:[#allocation2 + $0x10] sm:$0xff] %v2600_v25 }
 0x565   : > { %2637 = vst [vmem:[#allocation2 + $0x18] sm:$0xff] %v2601_v23 }
 0x566   : > { %v2583_v45 = vpop.permute.xlu0 %2582 }
 0x567   : > { %v2581_v13 = vpop.permute.xlu1 %2580 }
 0x568   : > { %2644 = vst.msk [vmem:[#allocation2 + $0x50] sm:$0xff] %vm1585_vm7, %v2581_v13  ;;  %v2607_v40 = vsel %vm1567_vm8, %v2581_v13, %v2583_v45  ;;  %vm3290_vm7 = vcmask 728648  }
 0x569   : > { %2645 = vst [vmem:[#allocation2 + $0x58] sm:$0xff] %v2607_v40 }
 0x56a   : > { %v2587_v53 = vpop.permute.xlu0 %2586 }
 0x56b   : > { %v2585_v61 = vpop.permute.xlu1 %2584  ;;  %v2655_v38 = vld [vmem:[#allocation2 + $0x10] sm:$0xff] }
 0x56c   : > { %v2608_v19 = vsel %vm1567_vm8, %v2583_v45, %v2585_v61  ;;  %v2609_v21 = vsel %vm1567_vm8, %v2585_v61, %v2587_v53  ;;  %2693 = vrot.lane.b32.xlu1 %v2655_v38, %s12936_s23  ;;  %v11478_v22 = vld [vmem:[#allocation2 + $0x18] sm:$0xff]  ;;  %2892 = vst.msk [vmem:[#allocation2 + $0x10] sm:$0xff] %vm2891_vm3, %v10315_v0 }
 0x56d   : > { %2646 = vst [vmem:[#allocation2 + $0x60] sm:$0xff] %v2608_v19  ;;  %2647 = vst [vmem:[#allocation2 + $0x68] sm:$0xff] %v2609_v21 }
 0x56e   : > { %v2571_v26 = vpop.permute.xlu0 %2570 }
 0x56f   : > { %v2602_v30 = vsel %vm1567_vm8, %v2569_v50, %v2571_v26  ;;  %v2573_v32 = vpop.permute.xlu1 %2572  ;;  %v2662_v47 = vld [vmem:[#allocation2 + $0x50] sm:$0xff] }
 0x570   : > { %2638 = vst [vmem:[#allocation2 + $0x20] sm:$0xff] %v2602_v30  ;;  %v2603_v16 = vsel %vm1567_vm8, %v2571_v26, %v2573_v32  ;;  %v2663_v46 = vld [vmem:[#allocation2 + $0x58] sm:$0xff]  ;;  %2893 = vst [vmem:[#allocation2 + $0x50] sm:$0xff] %v10315_v0  ;;  %2695 = vrot.lane.b32.xlu1 %v11478_v22, %s12936_s23  ;;  %2707 = vrot.lane.b32.xlu0 %v2662_v47, %s12936_s23 }
 0x571   : > { %2639 = vst [vmem:[#allocation2 + $0x28] sm:$0xff] %v2603_v16  ;;  %2894 = vst [vmem:[#allocation2 + $0x58] sm:$0xff] %v10315_v0 }
 0x574   : > { %2709 = vrot.lane.b32.xlu1 %v2663_v46, %s12936_s23  ;;  %v2665_v14 = vld [vmem:[#allocation2 + $0x68] sm:$0xff]  ;;  %v2664_v54 = vld [vmem:[#allocation2 + $0x60] sm:$0xff] }
 0x575   : > { %2711 = vrot.lane.b32.xlu0 %v2664_v54, %s12936_s23  ;;  %2895 = vst.msk [vmem:[#allocation2 + $0x60] sm:$0xff] %vm2891_vm3, %v10315_v0 }
 0x577   : > { %v2657_v18 = vld [vmem:[#allocation2 + $0x20] sm:$0xff] }
 0x578   : > { %2713 = vrot.lane.b32.xlu1 %v2665_v14, %s12936_s23  ;;  %v11494_v63 = vld [vmem:[#allocation2 + $0x28] sm:$0xff] }
 0x579   : > { %2697 = vrot.lane.b32.xlu0 %v2657_v18, %s12936_s23 }
 0x57d   : > { %2699 = vrot.lane.b32.xlu0 %v11494_v63, %s12936_s23 }
 0x58a   : > { %v2575_v33 = vpop.permute.xlu0 %2574 }
 0x58b   : > { %v2604_v27 = vsel %vm1567_vm8, %v2573_v32, %v2575_v33  ;;  %v2577_v6 = vpop.permute.xlu1 %2576 }
 0x58c   : > { %2640 = vst [vmem:[#allocation2 + $0x30] sm:$0xff] %v2604_v27  ;;  %v2605_v35 = vsel %vm1567_vm8, %v2575_v33, %v2577_v6 }
 0x58d   : > { %2641 = vst [vmem:[#allocation2 + $0x38] sm:$0xff] %v2605_v35 }
 0x58e   : > { %v2591_v9 = vpop.permute.xlu0 %2590 }
 0x58f   : > { %v2589_v24 = vpop.permute.xlu1 %2588 }
 0x590   : > { %v2610_v5 = vsel %vm1567_vm8, %v2587_v53, %v2589_v24  ;;  %v2611_v12 = vsel %vm1567_vm8, %v2589_v24, %v2591_v9 }
 0x591   : > { %2648 = vst [vmem:[#allocation2 + $0x70] sm:$0xff] %v2610_v5  ;;  %2649 = vst [vmem:[#allocation2 + $0x78] sm:$0xff] %v2611_v12 }
 0x593   : > { %v2593_v31 = vpop.permute.xlu1 %2592  ;;  %v11502_v10 = vld [vmem:[#allocation2 + $0x30] sm:$0xff] }
 0x594   : > { %v2612_v20 = vsel %vm1567_vm8, %v2591_v9, %v2593_v31  ;;  %2701 = vrot.lane.b32.xlu0 %v11502_v10, %s12936_s23  ;;  %v11510_v56 = vld [vmem:[#allocation2 + $0x38] sm:$0xff] }
 0x595   : > { %2650 = vst [vmem:[#allocation2 + $0x80] sm:$0xff] %v2612_v20 }
 0x596   : > { %v2579_v4 = vpop.permute.xlu0 %2578 }
 0x597   : > { %v2606_v42 = vsel %vm1567_vm8, %v2577_v6, %v2579_v4 }
 0x598   : > { %2643 = vst.msk [vmem:[#allocation2 + $0x40] sm:$0xff] %vm1594_vm9, %v2606_v42  ;;  %v2597_v29 = vpop.permute.xlu1 %2596  ;;  %v2666_v34 = vld [vmem:[#allocation2 + $0x70] sm:$0xff]  ;;  %v11492_v11 = vld [vmem:[#allocation2 + $0x78] sm:$0xff]  ;;  %2703 = vrot.lane.b32.xlu0 %v11510_v56, %s12936_s23 }
 0x599   : > { %2715 = vrot.lane.b32.xlu1 %v2666_v34, %s12936_s23 }
 0x59a   : > { %v2595_v57 = vpop.permute.xlu0 %2594 }
 0x59b   : > { %v2613_v7 = vsel %vm1567_vm8, %v2593_v31, %v2595_v57  ;;  %v2614_v43 = vsel %vm1567_vm8, %v2595_v57, %v2597_v29  ;;  %vm3384_vm8 = vcmask 876248  }
 0x59c   : > { %2651 = vst [vmem:[#allocation2 + $0x88] sm:$0xff] %v2613_v7  ;;  %2652 = vst.msk [vmem:[#allocation2 + $0x90] sm:$0xff] %vm1594_vm9, %v2614_v43  ;;  %v11500_v36 = vld [vmem:[#allocation2 + $0x80] sm:$0xff]  ;;  %vm3487_vm9 = vcmask 1023848  }
 0x59d   : > { %2717 = vrot.lane.b32.xlu1 %v11492_v11, %s12936_s23 }
 0x59f   : > { %v2661_v51 = vld [vmem:[#allocation2 + $0x40] sm:$0xff] }
 0x5a0   : > { %2705 = vrot.lane.b32.xlu0 %v2661_v51, %s12936_s23 }
 0x5a1   : > { %2719 = vrot.lane.b32.xlu1 %v11500_v36, %s12936_s23  ;;  %v2690_v59 = vpop.permute.xlu0 %2689 }
 0x5a3   : > { %v11508_v55 = vld [vmem:[#allocation2 + $0x88] sm:$0xff]  ;;  %v2670_v17 = vld [vmem:[#allocation2 + $0x90] sm:$0xff] }
 0x5a5   : > { %2721 = vrot.lane.b32.xlu1 %v11508_v55, %s12936_s23 }
 0x5a6   : > { %v2692_v41 = vpop.permute.xlu0 %2691 }
 0x5a7   : > { %v2726_v28 = vsel %vm612_vm11, %v2690_v59, %v2692_v41 }
 0x5a8   : > { %v11522_v2 = vmax.f32 %v2653_v44, %v2726_v28 }
 0x5a9   : > { %2723 = vrot.lane.b32.xlu1 %v2670_v17, %s12936_s23  ;;  %s12938_s23 = smov 25  }
 0x5aa   : > { %2796 = vrot.lane.b32.xlu0 %v11522_v2, %s10373_s13 }
 0x5de   : > { %v2694_v8 = vpop.permute.xlu1 %2693 }
 0x5df   : > { %v2727_v15 = vsel %vm612_vm11, %v2692_v41, %v2694_v8 }
 0x5e0   : > { %v11520_v1 = vmax.f32 %v2654_v37, %v2727_v15 }
 0x5e2   : > { %v2696_v62 = vpop.permute.xlu1 %2695  ;;  %2798 = vrot.lane.b32.xlu1 %v11520_v1, %s10373_s13  ;;  %v2708_v58 = vpop.permute.xlu0 %2707 }
 0x5e3   : > { %v2728_v3 = vsel %vm612_vm11, %v2694_v8, %v2696_v62 }
 0x5e4   : > { %v11532_v23 = vmax.f32 %v2655_v38, %v2728_v3 }
 0x5e6   : > { %v2710_v39 = vpop.permute.xlu1 %2709  ;;  %2800 = vrot.lane.b32.xlu0 %v11532_v23, %s10373_s13 }
 0x5e7   : > { %v2734_v50 = vsel %vm612_vm11, %v2708_v58, %v2710_v39  ;;  %v2712_v13 = vpop.permute.xlu0 %2711 }
 0x5e8   : > { %v11530_v25 = vmax.f32 %v2662_v47, %v2734_v50  ;;  %v2735_v40 = vsel %vm612_vm11, %v2710_v39, %v2712_v13 }
 0x5e9   : > { %v11542_v19 = vmax.f32 %v2663_v46, %v2735_v40 }
 0x5ea   : > { %v2714_v45 = vpop.permute.xlu1 %2713  ;;  %2814 = vrot.lane.b32.xlu1 %v11530_v25, %s10373_s13 }
 0x5eb   : > { %v2736_v53 = vsel %vm612_vm11, %v2712_v13, %v2714_v45  ;;  %2816 = vrot.lane.b32.xlu0 %v11542_v19, %s10373_s13  ;;  %v2698_v26 = vpop.permute.xlu0 %2697 }
 0x5ec   : > { %v11540_v61 = vmax.f32 %v2664_v54, %v2736_v53  ;;  %v2729_v32 = vsel %vm612_vm11, %v2696_v62, %v2698_v26 }
 0x5ed   : > { %v11553_v33 = vmax.f32 %v11478_v22, %v2729_v32 }
 0x5ee   : > { %2818 = vrot.lane.b32.xlu1 %v11540_v61, %s10373_s13 }
 0x5ef   : > { %2802 = vrot.lane.b32.xlu0 %v11553_v33, %s10373_s13  ;;  %v2700_v6 = vpop.permute.xlu0 %2699 }
 0x5f0   : > { %v2730_v9 = vsel %vm612_vm11, %v2698_v26, %v2700_v6 }
 0x5f1   : > { %v11563_v5 = vmax.f32 %v2657_v18, %v2730_v9 }
 0x5f3   : > { %2804 = vrot.lane.b32.xlu0 %v11563_v5, %s10373_s13 }
 0x606   : > { %v2702_v31 = vpop.permute.xlu0 %2701 }
 0x607   : > { %v2731_v4 = vsel %vm612_vm11, %v2700_v6, %v2702_v31 }
 0x608   : > { %v11575_v57 = vmax.f32 %v11494_v63, %v2731_v4  ;;  %v2885_v63 = vld [vmem:[%s12900_s4] sm:$0xff] }
 0x60a   : > { %2806 = vrot.lane.b32.xlu0 %v11575_v57, %s10373_s13  ;;  %v2704_v7 = vpop.permute.xlu0 %2703 }
 0x60b   : > { %v2716_v21 = vpop.permute.xlu1 %2715  ;;  %v2732_v38 = vsel %vm612_vm11, %v2702_v31, %v2704_v7 }
 0x60c   : > { %v2737_v30 = vsel %vm612_vm11, %v2714_v45, %v2716_v21 }
 0x60d   : > { %v11550_v16 = vmax.f32 %v2665_v14, %v2737_v30  ;;  %v11591_v14 = vmax.f32 %v11502_v10, %v2732_v38 }
 0x60f   : > { %v2718_v27 = vpop.permute.xlu1 %2717  ;;  %2820 = vrot.lane.b32.xlu1 %v11550_v16, %s10373_s13 }
 0x610   : > { %v2738_v35 = vsel %vm612_vm11, %v2716_v21, %v2718_v27 }
 0x611   : > { %v11561_v24 = vmax.f32 %v2666_v34, %v2738_v35 }
 0x612   : > { %v2706_v37 = vpop.permute.xlu0 %2705 }
 0x613   : > { %v2720_v12 = vpop.permute.xlu1 %2719  ;;  %2822 = vrot.lane.b32.xlu1 %v11561_v24, %s10373_s13  ;;  %v11585_v47 = vmax.f32 %v2661_v51, %v2706_v37  ;;  %v2733_v34 = vsel %vm612_vm11, %v2704_v7, %v2706_v37 }
 0x614   : > { %v2739_v20 = vsel %vm612_vm11, %v2718_v27, %v2720_v12 }
 0x615   : > { %v11572_v42 = vmax.f32 %v11492_v11, %v2739_v20  ;;  %2812 = vrot.lane.b32.xlu0 %v11585_v47, %s10373_s13  ;;  %v11603_v11 = vmax.f32 %v11510_v56, %v2733_v34  ;;  %v2888_v56 = vld [vmem:[%s12900_s4 + $0x18] sm:$0xff] }
 0x617   : > { %v2722_v29 = vpop.permute.xlu1 %2721  ;;  %2824 = vrot.lane.b32.xlu1 %v11572_v42, %s10373_s13 }
 0x618   : > { %v2740_v43 = vsel %vm612_vm11, %v2720_v12, %v2722_v29 }
 0x619   : > { %v11588_v22 = vmax.f32 %v11500_v36, %v2740_v43  ;;  %2808 = vrot.lane.b32.xlu0 %v11591_v14, %s10373_s13  ;;  %v2886_v36 = vld [vmem:[%s12900_s4 + $0x8] sm:$0xff] }
 0x61a   : > { %v11619_v10 = vpack.c.bf16 %v2886_v36, %v2885_v63 }
 0x61b   : > { %v2724_v44 = vpop.permute.xlu1 %2723 }
 0x61c   : > { %v11583_v46 = vmax.f32 %v2670_v17, %v2724_v44  ;;  %v2741_v54 = vsel %vm612_vm11, %v2722_v29, %v2724_v44  ;;  %9848 = vmatprep.subr.bf16.mxu0 %v11619_v10  ;;  %9856 = vmatprep.subr.bf16.mxu1 %v11619_v10  ;;  %v2797_v8 = vpop.permute.xlu0 %2796 }
 0x61d   : > { %v11600_v18 = vmax.f32 %v11508_v55, %v2741_v54  ;;  %2810 = vrot.lane.b32.xlu0 %v11603_v11, %s10373_s13  ;;  %9850 = vmatpush3.bf16.msra.mxu0 %v11619_v10  ;;  %v2887_v55 = vld [vmem:[%s12900_s4 + $0x10] sm:$0xff] }
 0x61e   : > { %2830 = vrot.lane.b32.xlu1 %v11583_v46, %s10373_s13  ;;  %9858 = vmatpush3.bf16.msra.mxu1 %v11619_v10  ;;  %v11631_v17 = vpack.c.bf16 %v2888_v56, %v2887_v55 }
 0x620   : > { %9852 = vmatprep.subr.bf16.mxu0 %v11631_v17  ;;  %9860 = vmatprep.subr.bf16.mxu1 %v11631_v17 }
 0x621   : > { %9854 = vmatpush3.bf16.msra.mxu0 %v11631_v17 }
 0x622   : > { %2826 = vrot.lane.b32.xlu1 %v11588_v22, %s10373_s13  ;;  %9862 = vmatpush3.bf16.msra.mxu1 %v11631_v17 }
 0x623   : > { %9864 = vmatprep.subr.bf16.mxu0 %v11619_v10  ;;  %9872 = vmatprep.subr.bf16.mxu1 %v11619_v10 }
 0x626   : > { %2828 = vrot.lane.b32.xlu1 %v11600_v18, %s10373_s13  ;;  %s12952_s13 = smov 113  }
 0x654   : > { %v2799_v51 = vpop.permute.xlu1 %2798 }
 0x655   : > { %v2833_v59 = vsel %vm738_vm13, %v2797_v8, %v2799_v51 }
 0x656   : > { %v2867_v62 = vmax.f32 %v11522_v2, %v2833_v59 }
 0x658   : > { %2995 = vrot.lane.b32.xlu1 %v2867_v62, %s12938_s23  ;;  %2898 = vrot.lane.b32.xlu0 %v2867_v62, %s12946_s19  ;;  %v2801_v28 = vpop.permute.xlu0 %2800 }
 0x659   : > { %v2834_v15 = vsel %vm738_vm13, %v2799_v51, %v2801_v28 }
 0x65a   : > { %v2868_v3 = vmax.f32 %v11520_v1, %v2834_v15 }
 0x65c   : > { %v2815_v41 = vpop.permute.xlu1 %2814  ;;  %2997 = vrot.lane.b32.xlu0 %v2868_v3, %s12938_s23 }
 0x65d   : > { %v2817_v58 = vpop.permute.xlu0 %2816 }
 0x65e   : > { %v2841_v50 = vsel %vm738_vm13, %v2815_v41, %v2817_v58 }
 0x65f   : > { %v2876_v45 = vmax.f32 %v11530_v25, %v2841_v50 }
 0x660   : > { %v2819_v39 = vpop.permute.xlu1 %2818 }
 0x661   : > { %v2842_v2 = vsel %vm738_vm13, %v2817_v58, %v2819_v39  ;;  %2999 = vrot.lane.b32.xlu0 %v2876_v45, %s12938_s23  ;;  %2900 = vrot.lane.b32.xlu1 %v2876_v45, %s12946_s19  ;;  %v2803_v13 = vpop.permute.xlu0 %2802  ;;  %s10384_s19 = smov 125  }
 0x662   : > { %v2877_v40 = vmax.f32 %v11542_v19, %v2842_v2  ;;  %v2835_v53 = vsel %vm738_vm13, %v2801_v28, %v2803_v13 }
 0x663   : > { %v2869_v1 = vmax.f32 %v11532_v23, %v2835_v53 }
 0x665   : > { %3096 = vrot.lane.b32.xlu0 %v2868_v3, %s10320_s26  ;;  %3001 = vrot.lane.b32.xlu1 %v2877_v40, %s12938_s23  ;;  %v2805_v26 = vpop.permute.xlu0 %2804  ;;  %s12967_s23 = smov 73  }
 0x666   : > { %v2836_v30 = vsel %vm738_vm13, %v2803_v13, %v2805_v26 }
 0x667   : > { %v2870_v23 = vmax.f32 %v11553_v33, %v2836_v30 }
 0x669   : > { %3192 = vrot.lane.b32.xlu1 %v2868_v3, %s10375_s24  ;;  %3194 = vrot.lane.b32.xlu0 %v2869_v1, %s10375_s24 }
 0x66d   : > { %3098 = vrot.lane.b32.xlu1 %v2877_v40, %s10320_s26  ;;  %3196 = vrot.lane.b32.xlu0 %v2877_v40, %s10375_s24  ;;  %s12961_s26 = smov 69  }
 0x671   : > { %3293 = vrot.lane.b32.xlu0 %v2869_v1, %s12942_s10 }
 0x675   : > { %3391 = vrot.lane.b32.xlu0 %v2870_v23, %s10376_s12 }
 0x67c   : > { %v2807_v6 = vpop.permute.xlu0 %2806 }
 0x67d   : > { %v2837_v35 = vsel %vm738_vm13, %v2805_v26, %v2807_v6 }
 0x67e   : > { %v2871_v33 = vmax.f32 %v11563_v5, %v2837_v35 }
 0x681   : > { %v2821_v21 = vpop.permute.xlu1 %2820 }
 0x682   : > { %v2843_v25 = vsel %vm738_vm13, %v2819_v39, %v2821_v21 }
 0x683   : > { %v2878_v19 = vmax.f32 %v11540_v61, %v2843_v25 }
 0x685   : > { %3198 = vrot.lane.b32.xlu1 %v2878_v19, %s10375_s24  ;;  %v2823_v32 = vpop.permute.xlu1 %2822  ;;  %3393 = vrot.lane.b32.xlu0 %v2878_v19, %s10376_s12 }
 0x686   : > { %v2844_v27 = vsel %vm738_vm13, %v2821_v21, %v2823_v32 }
 0x687   : > { %v2879_v61 = vmax.f32 %v11550_v16, %v2844_v27  ;;  %v2813_v12 = vpop.permute.xlu0 %2812 }
 0x689   : > { %3389 = vrot.lane.b32.xlu1 %v2869_v1, %s10376_s12  ;;  %3490 = vrot.lane.b32.xlu0 %v2870_v23, %s12961_s26  ;;  %v2825_v9 = vpop.permute.xlu1 %2824 }
 0x68a   : > { %v2845_v20 = vsel %vm738_vm13, %v2823_v32, %v2825_v9 }
 0x68b   : > { %v2809_v16 = vpop.permute.xlu0 %2808  ;;  %v2880_v4 = vmax.f32 %v11561_v24, %v2845_v20 }
 0x68c   : > { %v2838_v7 = vsel %vm738_vm13, %v2807_v6, %v2809_v16 }
 0x68d   : > { %3295 = vrot.lane.b32.xlu1 %v2878_v19, %s12942_s10  ;;  %3591 = vrot.lane.b32.xlu0 %v2871_v33, %s12948_s18  ;;  %v2872_v43 = vmax.f32 %v11575_v57, %v2838_v7  ;;  %s12950_s10 = smov 109  }
 0x68f   : > { %v2811_v38 = vpop.permute.xlu0 %2810 }
 0x690   : > { %v2831_v31 = vpop.permute.xlu1 %2830  ;;  %v2839_v24 = vsel %vm738_vm13, %v2809_v16, %v2811_v38  ;;  %v2840_v63 = vsel %vm738_vm13, %v2811_v38, %v2813_v12 }
 0x691   : > { %3395 = vrot.lane.b32.xlu1 %v2879_v61, %s10376_s12  ;;  %3593 = vrot.lane.b32.xlu0 %v2879_v61, %s12948_s18  ;;  %v2873_v34 = vmax.f32 %v11591_v14, %v2839_v24  ;;  %s12964_s12 = smov 45   ;;  %v2874_v36 = vmax.f32 %v11603_v11, %v2840_v63  ;;  %v2884_v55 = vmax.f32 %v11583_v46, %v2831_v31 }
 0x694   : > { %v2827_v29 = vpop.permute.xlu1 %2826 }
 0x695   : > { %3589 = vrot.lane.b32.xlu1 %v2870_v23, %s12948_s18  ;;  %3690 = vrot.lane.b32.xlu0 %v2871_v33, %s12962_s20  ;;  %v2846_v5 = vsel %vm738_vm13, %v2825_v9, %v2827_v29 }
 0x696   : > { %v2881_v44 = vmax.f32 %v11572_v42, %v2846_v5 }
 0x698   : > { %v2829_v37 = vpop.permute.xlu1 %2828 }
 0x699   : > { %3492 = vrot.lane.b32.xlu1 %v2879_v61, %s12961_s26  ;;  %3786 = vrot.lane.b32.xlu0 %v2872_v43, %s10378_s25  ;;  %v2847_v54 = vsel %vm738_vm13, %v2827_v29, %v2829_v37  ;;  %v2848_v42 = vsel %vm738_vm13, %v2829_v37, %v2831_v31  ;;  %s10380_s26 = smov 105   ;;  %vm3003_vm13 = vcmask 203776  }
 0x69a   : > { %v2882_v57 = vmax.f32 %v11588_v22, %v2847_v54  ;;  %v2883_v14 = vmax.f32 %v11600_v18, %v2848_v42  ;;  %v2875_v22 = vmax.f32 %v11585_v47, %v2813_v12 }
 0x69d   : > { %3595 = vrot.lane.b32.xlu1 %v2880_v4, %s12948_s18  ;;  %3880 = vrot.lane.b32.xlu0 %v2872_v43, %s12963_s17 }
 0x6a1   : > { %3692 = vrot.lane.b32.xlu1 %v2880_v4, %s12962_s20  ;;  %3976 = vrot.lane.b32.xlu0 %v2873_v34, %s12952_s13 }
 0x6a5   : > { %3788 = vrot.lane.b32.xlu1 %v2881_v44, %s10378_s25  ;;  %4070 = vrot.lane.b32.xlu0 %v2873_v34, %s12964_s12  ;;  %s12965_s25 = smov 37  }
 0x6a9   : > { %3882 = vrot.lane.b32.xlu1 %v2881_v44, %s12963_s17  ;;  %4166 = vrot.lane.b32.xlu0 %v2874_v36, %s10380_s26 }
 0x6ad   : > { %3978 = vrot.lane.b32.xlu1 %v2882_v57, %s12952_s13  ;;  %4263 = vrot.lane.b32.xlu0 %v2874_v36, %s12965_s25 }
 0x6b1   : > { %4072 = vrot.lane.b32.xlu1 %v2882_v57, %s12964_s12  ;;  %4359 = vrot.lane.b32.xlu0 %v2875_v22, %s12944_s22  ;;  %s12940_s12 = smov 19  }
 0x6b5   : > { %4168 = vrot.lane.b32.xlu1 %v2883_v14, %s10380_s26  ;;  %s12966_s26 = smov 55  }
 0x6b9   : > { %4265 = vrot.lane.b32.xlu1 %v2883_v14, %s12965_s25 }
 0x6bd   : > { %4361 = vrot.lane.b32.xlu1 %v2884_v55, %s12944_s22 }
 0x6ca   : > { %v2899_v11 = vpop.permute.xlu0 %2898  ;;  %v2996_v56 = vpop.permute.xlu1 %2995 }
 0x6cb   : > { %9506 = vmatprep.mubr.msk.f32.mxu0 %vm2902_vm0, %v2899_v11 }
 0x6ce   : > { %v2998_v18 = vpop.permute.xlu0 %2997 }
 0x6cf   : > { %v3004_v51 = vsel %vm3003_vm13, %v2996_v56, %v2998_v18 }
 0x6d0   : > { %9517 = vmatprep.mubr.msk.f32.mxu1 %vm2902_vm0, %v3004_v51 }
 0x6d3   : > { %v2901_v8 = vpop.permute.xlu1 %2900  ;;  %v3000_v47 = vpop.permute.xlu0 %2999 }
 0x6d4   : > { %9507 = vmatmul.mubr.msk.f32.vlgmr.msra.gmra.mrb[20].mxu0 %vm2902_vm0, %v2901_v8 }
 0x6d5   : > { %9866 = vmatpush3.bf16.msra.mxu0 %v11619_v10 }
 0x6d6   : > { %9868 = vmatprep.subr.bf16.mxu0 %v11631_v17 }
 0x6d7   : > { %v3002_v46 = vpop.permute.xlu1 %3001  ;;  %v3097_v59 = vpop.permute.xlu0 %3096 }
 0x6d8   : > { %v3005_v62 = vsel %vm3003_vm13, %v3000_v47, %v3002_v46  ;;  %9528 = vmatprep.mubr.msk.f32.mxu0 %vm2902_vm0, %v3097_v59  ;;  %vm3583_vm13 = vcmask 121856  }
 0x6d9   : > { %9518 = vmatmul.mubr.msk.f32.vlgmr.msra.gmra.mrb[20].mxu1 %vm2902_vm0, %v3005_v62  ;;  %9870 = vmatpush3.bf16.msra.mxu0 %v11631_v17 }
 0x6da   : > { %9874 = vmatpush3.bf16.msra.mxu1 %v11619_v10  ;;  %9880 = vmatprep.subr.bf16.mxu0 %v11619_v10 }
 0x6db   : > { %v3193_v41 = vpop.permute.xlu1 %3192  ;;  %v3195_v28 = vpop.permute.xlu0 %3194  ;;  %9876 = vmatprep.subr.bf16.mxu1 %v11631_v17 }
 0x6dc   : > { %v3201_v15 = vsel %vm3200_vm14, %v3193_v41, %v3195_v28 }
 0x6dd   : > { %9539 = vmatprep.mubr.msk.f32.mxu1 %vm2902_vm0, %v3201_v15 }
 0x6de   : > { %9878 = vmatpush3.bf16.msra.mxu1 %v11631_v17 }
 0x6df   : > { %v3099_v3 = vpop.permute.xlu1 %3098  ;;  %v3197_v39 = vpop.permute.xlu0 %3196  ;;  %9888 = vmatprep.subr.bf16.mxu1 %v11619_v10 }
 0x6e0   : > { %9529 = vmatmul.mubr.msk.f32.vlgmr.msra.gmra.mrb[22].mxu0 %vm2902_vm0, %v3099_v3 }
 0x6e1   : > { %9882 = vmatpush3.bf16.msra.mxu0 %v11619_v10 }
 0x6e2   : > { %9884 = vmatprep.subr.bf16.mxu0 %v11631_v17 }
 0x6e3   : > { %v3294_v50 = vpop.permute.xlu0 %3293 }
 0x6e4   : > { %9550 = vmatprep.mubr.msk.f32.mxu0 %vm2902_vm0, %v3294_v50  ;;  %v11828_v50 = vld [vmem:[%s12897_s1 + $0x60] sm:$0xff] }
 0x6e5   : > { %9886 = vmatpush3.bf16.msra.mxu0 %v11631_v17 }
 0x6e6   : > { %9896 = vmatprep.subr.bf16.mxu0 %v11619_v10 }
 0x6e7   : > { %v3392_v13 = vpop.permute.xlu0 %3391 }
 0x6f7   : > { %v3199_v58 = vpop.permute.xlu1 %3198  ;;  %v3394_v1 = vpop.permute.xlu0 %3393 }
 0x6f8   : > { %v3202_v45 = vsel %vm3200_vm14, %v3197_v39, %v3199_v58  ;;  %vm3687_vm14 = vcmask 269448  }
 0x6f9   : > { %9540 = vmatmul.mubr.msk.f32.vlgmr.msra.gmra.mrb[22].mxu1 %vm2902_vm0, %v3202_v45  ;;  %v11833_v45 = vld [vmem:[%s12897_s1 + $0x6c] sm:$0xff] }
 0x6fa   : > { %9890 = vmatpush3.bf16.msra.mxu1 %v11619_v10 }
 0x6fb   : > { %v3390_v2 = vpop.permute.xlu1 %3389  ;;  %9892 = vmatprep.subr.bf16.mxu1 %v11631_v17  ;;  %v3491_v26 = vpop.permute.xlu0 %3490 }
 0x6fc   : > { %v3398_v40 = vsel %vm3397_vm1, %v3390_v2, %v3392_v13  ;;  %v11838_v2 = vld [vmem:[%s12898_s2 + $0x40] sm:$0xff]  ;;  %v11843_v13 = vld [vmem:[%s12898_s2 + $0x48] sm:$0xff] }
 0x6fd   : > { %9561 = vmatprep.mubr.msk.f32.mxu1 %vm2902_vm0, %v3398_v40 }
 0x6fe   : > { %9894 = vmatpush3.bf16.msra.mxu1 %v11631_v17 }
 0x6ff   : > { %v3296_v53 = vpop.permute.xlu1 %3295  ;;  %9904 = vmatprep.subr.bf16.mxu1 %v11619_v10  ;;  %v3592_v30 = vpop.permute.xlu0 %3591 }
 0x700   : > { %9551 = vmatmul.mubr.msk.f32.vlgmr.msra.gmra.mrb[24].mxu0 %vm2902_vm0, %v3296_v53 }
 0x701   : > { %9898 = vmatpush3.bf16.msra.mxu0 %v11619_v10  ;;  %9572 = vmatprep.mubr.msk.f32.mxu0 %vm2902_vm0, %v3491_v26 }
 0x702   : > { %9900 = vmatprep.subr.bf16.mxu0 %v11631_v17 }
 0x703   : > { %v3396_v21 = vpop.permute.xlu1 %3395  ;;  %v3594_v27 = vpop.permute.xlu0 %3593 }
 0x704   : > { %v3399_v25 = vsel %vm3397_vm1, %v3394_v1, %v3396_v21  ;;  %vm3781_vm1 = vcmask 417048  }
 0x705   : > { %9562 = vmatmul.mubr.msk.f32.vlgmr.msra.gmra.mrb[24].mxu1 %vm2902_vm0, %v3399_v25  ;;  %9902 = vmatpush3.bf16.msra.mxu0 %v11631_v17 }
 0x706   : > { %9906 = vmatpush3.bf16.msra.mxu1 %v11619_v10  ;;  %9912 = vmatprep.subr.bf16.mxu0 %v11619_v10 }
 0x707   : > { %v3590_v19 = vpop.permute.xlu1 %3589  ;;  %9908 = vmatprep.subr.bf16.mxu1 %v11631_v17  ;;  %v3691_v35 = vpop.permute.xlu0 %3690 }
 0x708   : > { %v3598_v23 = vsel %vm3597_vm2, %v3590_v19, %v3592_v30 }
 0x709   : > { %9583 = vmatprep.mubr.msk.f32.mxu1 %vm2902_vm0, %v3598_v23 }
 0x70a   : > { %9910 = vmatpush3.bf16.msra.mxu1 %v11631_v17 }
 0x70b   : > { %v3493_v32 = vpop.permute.xlu1 %3492  ;;  %9920 = vmatprep.subr.bf16.mxu1 %v11619_v10  ;;  %v3787_v33 = vpop.permute.xlu0 %3786 }
 0x70c   : > { %9573 = vmatmul.mubr.msk.f32.vlgmr.msra.gmra.mrb[26].mxu0 %vm2902_vm0, %v3493_v32 }
 0x70d   : > { %9914 = vmatpush3.bf16.msra.mxu0 %v11619_v10  ;;  %9594 = vmatprep.mubr.msk.f32.mxu0 %vm2902_vm0, %v3691_v35 }
 0x70e   : > { %9916 = vmatprep.subr.bf16.mxu0 %v11631_v17 }
 0x70f   : > { %v3596_v6 = vpop.permute.xlu1 %3595  ;;  %v3881_v31 = vpop.permute.xlu0 %3880 }
 0x710   : > { %v3599_v61 = vsel %vm3597_vm2, %v3594_v27, %v3596_v6 }
 0x711   : > { %9584 = vmatmul.mubr.msk.f32.vlgmr.msra.gmra.mrb[26].mxu1 %vm2902_vm0, %v3599_v61  ;;  %9918 = vmatpush3.bf16.msra.mxu0 %v11631_v17 }
 0x712   : > { %9922 = vmatpush3.bf16.msra.mxu1 %v11619_v10  ;;  %9928 = vmatprep.subr.bf16.mxu0 %v11619_v10 }
 0x713   : > { %v3693_v9 = vpop.permute.xlu1 %3692  ;;  %9924 = vmatprep.subr.bf16.mxu1 %v11631_v17  ;;  %9605 = vmatprep.mubr.msk.f32.mxu1 %vm2902_vm0, %v3787_v33  ;;  %v3977_v16 = vpop.permute.xlu0 %3976 }
 0x714   : > { %9595 = vmatmul.mubr.msk.f32.vlgmr.msra.gmra.mrb[28].mxu0 %vm2902_vm0, %v3693_v9 }
 0x715   : > { %9930 = vmatpush3.bf16.msra.mxu0 %v11619_v10  ;;  %9616 = vmatprep.mubr.msk.f32.mxu0 %vm2902_vm0, %v3881_v31 }
 0x716   : > { %9926 = vmatpush3.bf16.msra.mxu1 %v11631_v17  ;;  %9932 = vmatprep.subr.bf16.mxu0 %v11631_v17 }
 0x717   : > { %v3789_v12 = vpop.permute.xlu1 %3788  ;;  %9936 = vmatprep.subr.bf16.mxu1 %v11619_v10  ;;  %v4071_v29 = vpop.permute.xlu0 %4070 }
 0x719   : > { %9606 = vmatmul.mubr.msk.f32.vlgmr.msra.gmra.mrb[28].mxu1 %vm2902_vm0, %v3789_v12  ;;  %9934 = vmatpush3.bf16.msra.mxu0 %v11631_v17 }
 0x71a   : > { %9938 = vmatpush3.bf16.msra.mxu1 %v11619_v10  ;;  %9944 = vmatprep.subr.bf16.mxu0 %v11619_v10 }
 0x71b   : > { %v3883_v20 = vpop.permute.xlu1 %3882  ;;  %9940 = vmatprep.subr.bf16.mxu1 %v11631_v17  ;;  %9627 = vmatprep.mubr.msk.f32.mxu1 %vm2902_vm0, %v3977_v16  ;;  %v4167_v5 = vpop.permute.xlu0 %4166 }
 0x71c   : > { %9617 = vmatmul.mubr.msk.f32.vlgmr.msra.gmra.mrb[30].mxu0 %vm2902_vm0, %v3883_v20 }
 0x71d   : > { %9946 = vmatpush3.bf16.msra.mxu0 %v11619_v10  ;;  %9638 = vmatprep.mubr.msk.f32.mxu0 %vm2902_vm0, %v4071_v29 }
 0x71e   : > { %9942 = vmatpush3.bf16.msra.mxu1 %v11631_v17  ;;  %9948 = vmatprep.subr.bf16.mxu0 %v11631_v17 }
 0x71f   : > { %v3979_v4 = vpop.permute.xlu1 %3978  ;;  %9952 = vmatprep.subr.bf16.mxu1 %v11619_v10  ;;  %v4264_v38 = vpop.permute.xlu0 %4263 }
 0x721   : > { %9628 = vmatmul.mubr.msk.f32.vlgmr.msra.gmra.mrb[30].mxu1 %vm2902_vm0, %v3979_v4  ;;  %9950 = vmatpush3.bf16.msra.mxu0 %v11631_v17 }
 0x722   : > { %9954 = vmatpush3.bf16.msra.mxu1 %v11619_v10  ;;  %9960 = vmatprep.subr.bf16.mxu0 %v11619_v10 }
 0x723   : > { %v4073_v7 = vpop.permute.xlu1 %4072  ;;  %9956 = vmatprep.subr.bf16.mxu1 %v11631_v17  ;;  %9649 = vmatprep.mubr.msk.f32.mxu1 %vm2902_vm0, %v4167_v5  ;;  %v4360_v37 = vpop.permute.xlu0 %4359 }
 0x724   : > { %9639 = vmatmul.mubr.msk.f32.vlgmr.msra.gmra.mrb[32].mxu0 %vm2902_vm0, %v4073_v7 }
 0x725   : > { %9962 = vmatpush3.bf16.msra.mxu0 %v11619_v10  ;;  %9660 = vmatprep.mubr.msk.f32.mxu0 %vm2902_vm0, %v4264_v38 }
 0x726   : > { %9958 = vmatpush3.bf16.msra.mxu1 %v11631_v17  ;;  %9964 = vmatprep.subr.bf16.mxu0 %v11631_v17 }
 0x727   : > { %v4169_v43 = vpop.permute.xlu1 %4168  ;;  %9968 = vmatprep.subr.bf16.mxu1 %v11619_v10 }
 0x729   : > { %9650 = vmatmul.mubr.msk.f32.vlgmr.msra.gmra.mrb[32].mxu1 %vm2902_vm0, %v4169_v43  ;;  %9966 = vmatpush3.bf16.msra.mxu0 %v11631_v17 }
 0x72a   : > { %9970 = vmatpush3.bf16.msra.mxu1 %v11619_v10  ;;  %9671 = vmatprep.mubr.msk.f32.mxu1 %vm2902_vm0, %v4360_v37 }
 0x72b   : > { %v4266_v44 = vpop.permute.xlu1 %4265  ;;  %9972 = vmatprep.subr.bf16.mxu1 %v11631_v17 }
 0x72c   : > { %9661 = vmatmul.mubr.msk.f32.vlgmr.msra.gmra.mrb[34].mxu0 %vm2902_vm0, %v4266_v44 }
 0x72e   : > { %9974 = vmatpush3.bf16.msra.mxu1 %v11631_v17 }
 0x72f   : > { %v4362_v24 = vpop.permute.xlu1 %4361 }
 0x731   : > { %9672 = vmatmul.mubr.msk.f32.vlgmr.msra.gmra.mrb[34].mxu1 %vm2902_vm0, %v4362_v24 }
 0x7a7   : > { %v9508_v54 = vpop.f32.mrb[20].mxu0 }
 0x7a8   : > { %2986 = vrot.lane.b32.xlu1 %v9508_v54, %s12940_s12  ;;  %v2973_v34 = vpop.f32.mrb[21].mxu0 }
 0x7a9   : > { %2984 = vrot.lane.b32.xlu0 %v2973_v34, %s12940_s12  ;;  %s12968_s12 = smov 91  }
 0x7ac   : > { %v9519_v10 = vpop.f32.mrb[20].mxu1 }
 0x7ad   : > { %3089 = vrot.lane.b32.xlu1 %v9519_v10, %s12965_s25  ;;  %v3076_v57 = vpop.f32.mrb[21].mxu1 }
 0x7ae   : > { %3087 = vrot.lane.b32.xlu0 %v3076_v57, %s12965_s25 }
 0x7b3   : > { %v9530_v63 = vpop.f32.mrb[22].mxu0 }
 0x7b4   : > { %3183 = vrot.lane.b32.xlu1 %v9530_v63, %s12966_s26  ;;  %v3170_v17 = vpop.f32.mrb[23].mxu0 }
 0x7b5   : > { %3181 = vrot.lane.b32.xlu0 %v3170_v17, %s12966_s26  ;;  %s12969_s26 = smov 127  }
 0x7cc   : > { %v9541_v42 = vpop.f32.mrb[22].mxu1 }
 0x7cd   : > { %3286 = vrot.lane.b32.xlu1 %v9541_v42, %s12967_s23  ;;  %v3273_v36 = vpop.f32.mrb[23].mxu1 }
 0x7ce   : > { %3284 = vrot.lane.b32.xlu0 %v3273_v36, %s12967_s23 }
 0x7d3   : > { %v9552_v14 = vpop.f32.mrb[24].mxu0 }
 0x7d4   : > { %3380 = vrot.lane.b32.xlu1 %v9552_v14, %s12968_s12  ;;  %v3367_v22 = vpop.f32.mrb[25].mxu0 }
 0x7d5   : > { %3378 = vrot.lane.b32.xlu0 %v3367_v22, %s12968_s12  ;;  %s12970_s12 = smov 35  }
 0x7d8   : > { %v9563_v55 = vpop.f32.mrb[24].mxu1 }
 0x7d9   : > { %3483 = vrot.lane.b32.xlu1 %v9563_v55, %s12950_s10  ;;  %v3470_v11 = vpop.f32.mrb[25].mxu1 }
 0x7da   : > { %3481 = vrot.lane.b32.xlu0 %v3470_v11, %s12950_s10  ;;  %s10385_s10 = smov 15  }
 0x7df   : > { %v9574_v56 = vpop.f32.mrb[26].mxu0 }
 0x7e0   : > { %3577 = vrot.lane.b32.xlu1 %v9574_v56, %s12969_s26  ;;  %v3564_v18 = vpop.f32.mrb[27].mxu0 }
 0x7e1   : > { %3575 = vrot.lane.b32.xlu0 %v3564_v18, %s12969_s26 }
 0x7e4   : > { %v9585_v51 = vpop.f32.mrb[26].mxu1 }
 0x7e5   : > { %3683 = vrot.lane.b32.xlu1 %v9585_v51, %s10375_s24  ;;  %v3670_v8 = vpop.f32.mrb[27].mxu1 }
 0x7e6   : > { %3681 = vrot.lane.b32.xlu0 %v3670_v8, %s10375_s24  ;;  %s12971_s24 = smov 71  }
 0x7e7   : > { %v9596_v47 = vpop.f32.mrb[28].mxu0 }
 0x7e8   : > { %v3764_v46 = vpop.f32.mrb[29].mxu0 }
 0x7e9   : > { %3777 = vrot.lane.b32.xlu1 %v9596_v47, %s12970_s12 }
 0x7ea   : > { %3775 = vrot.lane.b32.xlu0 %v3764_v46, %s12970_s12  ;;  %s12972_s12 = smov 89  }
 0x7ec   : > { %v9607_v59 = vpop.f32.mrb[28].mxu1 }
 0x7ed   : > { %v3860_v62 = vpop.f32.mrb[29].mxu1  ;;  %3873 = vrot.lane.b32.xlu1 %v9607_v59, %s12963_s17 }
 0x7ee   : > { %3871 = vrot.lane.b32.xlu0 %v3860_v62, %s12963_s17  ;;  %s10383_s17 = smov 107  }
 0x7ef   : > { %v9618_v41 = vpop.f32.mrb[30].mxu0 }
 0x7f0   : > { %v3954_v28 = vpop.f32.mrb[31].mxu0 }
 0x7f1   : > { %3967 = vrot.lane.b32.xlu1 %v9618_v41, %s12971_s24 }
 0x7f2   : > { %3965 = vrot.lane.b32.xlu0 %v3954_v28, %s12971_s24 }
 0x7f4   : > { %v9629_v15 = vpop.f32.mrb[30].mxu1 }
 0x7f5   : > { %v4050_v3 = vpop.f32.mrb[31].mxu1  ;;  %4063 = vrot.lane.b32.xlu1 %v9629_v15, %s12972_s12 }
 0x7f6   : > { %4061 = vrot.lane.b32.xlu0 %v4050_v3, %s12972_s12 }
 0x7f7   : > { %v9640_v39 = vpop.f32.mrb[32].mxu0 }
 0x7f8   : > { %v4144_v58 = vpop.f32.mrb[33].mxu0 }
 0x7f9   : > { %4157 = vrot.lane.b32.xlu1 %v9640_v39, %s10383_s17 }
 0x7fa   : > { %4155 = vrot.lane.b32.xlu0 %v4144_v58, %s10383_s17 }
 0x7fc   : > { %v9651_v40 = vpop.f32.mrb[32].mxu1 }
 0x7fd   : > { %v4240_v53 = vpop.f32.mrb[33].mxu1  ;;  %4253 = vrot.lane.b32.xlu1 %v9651_v40, %s10384_s19 }
 0x7fe   : > { %4251 = vrot.lane.b32.xlu0 %v4240_v53, %s10384_s19 }
 0x7ff   : > { %v9662_v1 = vpop.f32.mrb[34].mxu0 }
 0x800   : > { %v4337_v21 = vpop.f32.mrb[35].mxu0 }
 0x801   : > { %4350 = vrot.lane.b32.xlu1 %v9662_v1, %s10385_s10 }
 0x802   : > { %4348 = vrot.lane.b32.xlu0 %v4337_v21, %s10385_s10 }
 0x804   : > { %v9673_v25 = vpop.f32.mrb[34].mxu1 }
 0x805   : > { %v4433_v26 = vpop.f32.mrb[35].mxu1  ;;  %4446 = vrot.lane.b32.xlu1 %v9673_v25, %s10386_s0 }
 0x806   : > { %4444 = vrot.lane.b32.xlu0 %v4433_v26, %s10386_s0 }
 0x81a   : > { %v2987_v19 = vpop.permute.xlu1 %2986 }
 0x81b   : > { %2992 = vst.msk [vmem:[#allocation2 + $0x50] sm:$0xff] %vm2990_vm4, %v2987_v19  ;;  %v2985_v30 = vpop.permute.xlu0 %2984 }
 0x81c   : > { %2991 = vst.msk [vmem:[#allocation2] sm:$0xff] %vm2990_vm4, %v2985_v30  ;;  %vm3877_vm4 = vcmask 564648  }
 0x81f   : > { %v3090_v23 = vpop.permute.xlu1 %3089 }
 0x820   : > { %3095 = vst.msk [vmem:[#allocation2 + $0x50] sm:$0xff] %vm3093_vm5, %v3090_v23  ;;  %v3088_v32 = vpop.permute.xlu0 %3087 }
 0x821   : > { %3094 = vst.msk [vmem:[#allocation2] sm:$0xff] %vm3093_vm5, %v3088_v32  ;;  %vm3971_vm5 = vcmask 712248  }
 0x826   : > { %v3184_v27 = vpop.permute.xlu1 %3183 }
 0x827   : > { %3189 = vst.msk [vmem:[#allocation2 + $0x50] sm:$0xff] %vm3187_vm6, %v3184_v27  ;;  %v3182_v6 = vpop.permute.xlu0 %3181 }
 0x828   : > { %3188 = vst.msk [vmem:[#allocation2] sm:$0xff] %vm3187_vm6, %v3182_v6  ;;  %vm4067_vm6 = vcmask 859848  }
 0x83f   : > { %v3287_v61 = vpop.permute.xlu1 %3286 }
 0x840   : > { %3292 = vst.msk [vmem:[#allocation2 + $0x50] sm:$0xff] %vm3290_vm7, %v3287_v61  ;;  %v3285_v35 = vpop.permute.xlu0 %3284 }
 0x841   : > { %3291 = vst.msk [vmem:[#allocation2] sm:$0xff] %vm3290_vm7, %v3285_v35  ;;  %vm4161_vm7 = vcmask 1007448  }
 0x846   : > { %v3381_v9 = vpop.permute.xlu1 %3380 }
 0x847   : > { %3386 = vst.msk [vmem:[#allocation2 + $0x50] sm:$0xff] %vm3384_vm8, %v3381_v9  ;;  %v3379_v33 = vpop.permute.xlu0 %3378 }
 0x848   : > { %3385 = vst.msk [vmem:[#allocation2] sm:$0xff] %vm3384_vm8, %v3379_v33  ;;  %vm4257_vm8 = vcmask 1048552  }
 0x84b   : > { %v3484_v12 = vpop.permute.xlu1 %3483 }
 0x84c   : > { %3489 = vst.msk [vmem:[#allocation2 + $0x50] sm:$0xff] %vm3487_vm9, %v3484_v12  ;;  %v3482_v31 = vpop.permute.xlu0 %3481 }
 0x84d   : > { %3488 = vst.msk [vmem:[#allocation2] sm:$0xff] %vm3487_vm9, %v3482_v31  ;;  %vm4259_vm9 = vcmask 105472  }
 0x852   : > { %v3578_v20 = vpop.permute.xlu1 %3577 }
 0x853   : > { %3585 = vst.msk [vmem:[#allocation2 + $0x50] sm:$0xff] %vm3581_vm10, %v3578_v20  ;;  %v3576_v16 = vpop.permute.xlu0 %3575 }
 0x854   : > { %3586 = vst.msk [vmem:[#allocation2 + $0x58] sm:$0xff] %vm3583_vm13, %v3578_v20  ;;  %3584 = vst.msk [vmem:[#allocation2 + $0x8] sm:$0xff] %vm3583_vm13, %v3576_v16  ;;  %vm4450_vm13 = vcmask 400648  }
 0x855   : > { %3582 = vst.msk [vmem:[#allocation2] sm:$0xff] %vm3581_vm10, %v3576_v16  ;;  %vm4354_vm10 = vcmask 253048  }
 0x857   : > { %v3684_v4 = vpop.permute.xlu1 %3683 }
 0x858   : > { %3689 = vst.msk [vmem:[#allocation2 + $0x58] sm:$0xff] %vm3687_vm14, %v3684_v4  ;;  %v3682_v29 = vpop.permute.xlu0 %3681 }
 0x859   : > { %3688 = vst.msk [vmem:[#allocation2 + $0x8] sm:$0xff] %vm3687_vm14, %v3682_v29 }
 0x85b   : > { %v3778_v7 = vpop.permute.xlu1 %3777 }
 0x85c   : > { %3783 = vst.msk [vmem:[#allocation2 + $0x58] sm:$0xff] %vm3781_vm1, %v3778_v7  ;;  %v3776_v5 = vpop.permute.xlu0 %3775 }
 0x85d   : > { %3782 = vst.msk [vmem:[#allocation2 + $0x8] sm:$0xff] %vm3781_vm1, %v3776_v5 }
 0x85f   : > { %v3874_v43 = vpop.permute.xlu1 %3873 }
 0x860   : > { %3879 = vst.msk [vmem:[#allocation2 + $0x58] sm:$0xff] %vm3877_vm4, %v3874_v43  ;;  %v3872_v38 = vpop.permute.xlu0 %3871 }
 0x861   : > { %3878 = vst.msk [vmem:[#allocation2 + $0x8] sm:$0xff] %vm3877_vm4, %v3872_v38 }
 0x863   : > { %v3968_v44 = vpop.permute.xlu1 %3967 }
 0x864   : > { %3973 = vst.msk [vmem:[#allocation2 + $0x58] sm:$0xff] %vm3971_vm5, %v3968_v44  ;;  %v3966_v37 = vpop.permute.xlu0 %3965 }
 0x865   : > { %3972 = vst.msk [vmem:[#allocation2 + $0x8] sm:$0xff] %vm3971_vm5, %v3966_v37 }
 0x867   : > { %v4064_v24 = vpop.permute.xlu1 %4063 }
 0x868   : > { %4069 = vst.msk [vmem:[#allocation2 + $0x58] sm:$0xff] %vm4067_vm6, %v4064_v24  ;;  %v4062_v54 = vpop.permute.xlu0 %4061 }
 0x869   : > { %4068 = vst.msk [vmem:[#allocation2 + $0x8] sm:$0xff] %vm4067_vm6, %v4062_v54 }
 0x86b   : > { %v4158_v34 = vpop.permute.xlu1 %4157 }
 0x86c   : > { %4163 = vst.msk [vmem:[#allocation2 + $0x58] sm:$0xff] %vm4161_vm7, %v4158_v34  ;;  %v4156_v10 = vpop.permute.xlu0 %4155 }
 0x86d   : > { %4162 = vst.msk [vmem:[#allocation2 + $0x8] sm:$0xff] %vm4161_vm7, %v4156_v10 }
 0x86f   : > { %v4254_v57 = vpop.permute.xlu1 %4253 }
 0x870   : > { %4261 = vst.msk [vmem:[#allocation2 + $0x58] sm:$0xff] %vm4257_vm8, %v4254_v57  ;;  %v4252_v63 = vpop.permute.xlu0 %4251 }
 0x871   : > { %4262 = vst.msk [vmem:[#allocation2 + $0x60] sm:$0xff] %vm4259_vm9, %v4254_v57  ;;  %4260 = vst.msk [vmem:[#allocation2 + $0x10] sm:$0xff] %vm4259_vm9, %v4252_v63 }
 0x872   : > { %4258 = vst.msk [vmem:[#allocation2 + $0x8] sm:$0xff] %vm4257_vm8, %v4252_v63 }
 0x873   : > { %v4351_v17 = vpop.permute.xlu1 %4350 }
 0x874   : > { %4356 = vst.msk [vmem:[#allocation2 + $0x60] sm:$0xff] %vm4354_vm10, %v4351_v17  ;;  %v4349_v42 = vpop.permute.xlu0 %4348 }
 0x875   : > { %4355 = vst.msk [vmem:[#allocation2 + $0x10] sm:$0xff] %vm4354_vm10, %v4349_v42 }
 0x877   : > { %v4447_v36 = vpop.permute.xlu1 %4446 }
 0x878   : > { %4452 = vst.msk [vmem:[#allocation2 + $0x60] sm:$0xff] %vm4450_vm13, %v4447_v36  ;;  %v4445_v14 = vpop.permute.xlu0 %4444 }
 0x879   : > { %4451 = vst.msk [vmem:[#allocation2 + $0x10] sm:$0xff] %vm4450_vm13, %v4445_v14 }
 0x87a   : > { %v11845_v22 = vld [vmem:[#allocation2 + $0x58] sm:$0xff]  ;;  %v11847_v55 = vld [vmem:[#allocation2 + $0x8] sm:$0xff]  ;;  %s10387_s14 = smov 127   ;;  %v11855_v18 = vld [vmem:[#allocation2 + $0x50] sm:$0xff]  ;;  %v10388_v47 = vmov 0   ;;  %s10389_s22 = smov 126   ;;  %v9068_v28 = vcombine.high %v11828_v50, %v11833_v45 }
 0x87b   : > { %4491 = vrot.lane.b32.xlu1 %v11845_v22, %s10387_s14  ;;  %4485 = vrot.lane.b32.xlu0 %v11847_v55, %s10387_s14  ;;  %v11857_v51 = vld [vmem:[#allocation2] sm:$0xff]  ;;  %v4853_v8 = vpack.c.bf16 %v11845_v22, %v11847_v55  ;;  %s10390_s18 = smov 110   ;;  %s10391_s13 = smov 109   ;;  %vm4898_vm14 = vcmask 130048   ;;  %vm4576_vm1 = vcmask 900096   ;;  %vm4617_vm4 = vcmask 891904  }
 0x87c   : > { %4945 = vmatprep.subr.bf16.mxu1 %v10388_v47  ;;  %v4852_v46 = vpack.c.bf16 %v11855_v18, %v11857_v51  ;;  %10204 = vset.pattern.permute.xlu0 %v10388_v47  ;;  %s10392_s17 = smov 108   ;;  %s10393_s12 = smov 92   ;;  %vm4658_vm5 = vcmask 883712   ;;  %vm4740_vm6 = vcmask 744448   ;;  %vm4781_vm7 = vcmask 736256  }
 0x87d   : > { %4902 = vmatprep.subr.bf16.mxu0 %v4853_v8  ;;  %10205 = vset.pattern.permute.xlu1 %v10388_v47  ;;  %s10394_s19 = smov 91   ;;  %s10395_s10 = smov 90   ;;  %vm5054_vm8 = vcmask 416768   ;;  %vm5051_vm9 = vcmask 1047704  }
 0x87e   : > { %4903 = vmatpush1.bf16.msra.mxu0 %v4852_v46  ;;  %9070 = vmatprep.mubr.msk.bf16.mxu1 %vm4898_vm14, %v9068_v28 }
 0x87f   : > { %v11849_v11 = vld [vmem:[#allocation2 + $0x60] sm:$0xff]  ;;  %9069 = vmatprep.mubr.msk.bf16.mxu0 %vm4898_vm14, %v9068_v28 }
 0x880   : > { %v11853_v56 = vld [vmem:[#allocation2 + $0x10] sm:$0xff]  ;;  %4470 = vst.msk [vmem:[#allocation7 + $0x28] sm:$0xff] %vm2902_vm0, %v11849_v11  ;;  %4493 = vrot.lane.b32.xlu1 %v11849_v11, %s10387_s14 }
 0x881   : > { %4467 = vst.msk [vmem:[#allocation7 + $0x10] sm:$0xff] %vm2902_vm0, %v11853_v56  ;;  %4487 = vrot.lane.b32.xlu0 %v11853_v56, %s10387_s14 }
 0x884   : > { %4489 = vrot.lane.b32.xlu1 %v11855_v18, %s10387_s14 }
 0x885   : > { %4483 = vrot.lane.b32.xlu0 %v11857_v51, %s10387_s14 }
 0x887   : > { %v4803_v59 = vld [vmem:[#allocation7 + $0x28] sm:$0xff] }
 0x888   : > { %v4800_v62 = vld [vmem:[#allocation7 + $0x10] sm:$0xff]  ;;  %4527 = vrot.lane.b32.xlu1 %v11853_v56, %s10389_s22 }
 0x889   : > { %v4854_v41 = vpack.c.bf16 %v4803_v59, %v4800_v62  ;;  %4525 = vrot.lane.b32.xlu0 %v11847_v55, %s10389_s22 }
 0x88b   : > { %4946 = vmatpush1.bf16.msra.mxu1 %v4854_v41 }
 0x88c   : > { %4947 = vmatprep.subr.bf16.mxu1 %v10388_v47  ;;  %4533 = vrot.lane.b32.xlu1 %v11849_v11, %s10389_s22 }
 0x88d   : > { %4531 = vrot.lane.b32.xlu0 %v11845_v22, %s10389_s22 }
 0x890   : > { %4529 = vrot.lane.b32.xlu1 %v11855_v18, %s10389_s22 }
 0x891   : > { %4523 = vrot.lane.b32.xlu0 %v11857_v51, %s10389_s22  ;;  %s10397_s22 = smov 19  }
 0x894   : > { %4568 = vrot.lane.b32.xlu1 %v11853_v56, %s10390_s18 }
 0x895   : > { %4566 = vrot.lane.b32.xlu0 %v11847_v55, %s10390_s18 }
 0x898   : > { %4574 = vrot.lane.b32.xlu1 %v11849_v11, %s10390_s18 }
 0x899   : > { %4572 = vrot.lane.b32.xlu0 %v11845_v22, %s10390_s18 }
 0x89c   : > { %4570 = vrot.lane.b32.xlu1 %v11855_v18, %s10390_s18 }
 0x89d   : > { %4564 = vrot.lane.b32.xlu0 %v11857_v51, %s10390_s18 }
 0x8a0   : > { %4609 = vrot.lane.b32.xlu1 %v11853_v56, %s10391_s13 }
 0x8a1   : > { %4607 = vrot.lane.b32.xlu0 %v11847_v55, %s10391_s13 }
 0x8a4   : > { %4615 = vrot.lane.b32.xlu1 %v11849_v11, %s10391_s13 }
 0x8a5   : > { %4613 = vrot.lane.b32.xlu0 %v11845_v22, %s10391_s13 }
 0x8a8   : > { %4611 = vrot.lane.b32.xlu1 %v11855_v18, %s10391_s13 }
 0x8a9   : > { %4605 = vrot.lane.b32.xlu0 %v11857_v51, %s10391_s13 }
 0x8ac   : > { %4650 = vrot.lane.b32.xlu1 %v11853_v56, %s10392_s17 }
 0x8ad   : > { %4648 = vrot.lane.b32.xlu0 %v11847_v55, %s10392_s17 }
 0x8b0   : > { %4656 = vrot.lane.b32.xlu1 %v11849_v11, %s10392_s17 }
 0x8b1   : > { %4654 = vrot.lane.b32.xlu0 %v11845_v22, %s10392_s17 }
 0x8b4   : > { %4652 = vrot.lane.b32.xlu1 %v11855_v18, %s10392_s17 }
 0x8b5   : > { %4646 = vrot.lane.b32.xlu0 %v11857_v51, %s10392_s17 }
 0x8b8   : > { %4691 = vrot.lane.b32.xlu1 %v11853_v56, %s10393_s12 }
 0x8b9   : > { %4689 = vrot.lane.b32.xlu0 %v11847_v55, %s10393_s12 }
 0x8bc   : > { %4697 = vrot.lane.b32.xlu1 %v11849_v11, %s10393_s12 }
 0x8bd   : > { %4695 = vrot.lane.b32.xlu0 %v11845_v22, %s10393_s12 }
 0x8c0   : > { %4693 = vrot.lane.b32.xlu1 %v11855_v18, %s10393_s12 }
 0x8c1   : > { %4687 = vrot.lane.b32.xlu0 %v11857_v51, %s10393_s12 }
 0x8c4   : > { %4732 = vrot.lane.b32.xlu1 %v11853_v56, %s10394_s19 }
 0x8c5   : > { %4730 = vrot.lane.b32.xlu0 %v11847_v55, %s10394_s19 }
 0x8c8   : > { %4738 = vrot.lane.b32.xlu1 %v11849_v11, %s10394_s19 }
 0x8c9   : > { %4736 = vrot.lane.b32.xlu0 %v11845_v22, %s10394_s19 }
 0x8cc   : > { %4734 = vrot.lane.b32.xlu1 %v11855_v18, %s10394_s19 }
 0x8cd   : > { %4728 = vrot.lane.b32.xlu0 %v11857_v51, %s10394_s19 }
 0x8d0   : > { %4773 = vrot.lane.b32.xlu1 %v11853_v56, %s10395_s10 }
 0x8d1   : > { %4771 = vrot.lane.b32.xlu0 %v11847_v55, %s10395_s10 }
 0x8d4   : > { %4779 = vrot.lane.b32.xlu1 %v11849_v11, %s10395_s10 }
 0x8d5   : > { %4777 = vrot.lane.b32.xlu0 %v11845_v22, %s10395_s10 }
 0x8d8   : > { %4775 = vrot.lane.b32.xlu1 %v11855_v18, %s10395_s10 }
 0x8d9   : > { %4769 = vrot.lane.b32.xlu0 %v11857_v51, %s10395_s10 }
 0x8dc   : > { %4886 = vperm.xlu1 %10205, %v11843_v13  }
 0x8dd   : > { %4881 = vperm.xlu0 %10204, %v11838_v2  }
 0x8ed   : > { %v4492_v15 = vpop.permute.xlu1 %4491  ;;  %v4486_v3 = vpop.permute.xlu0 %4485 }
 0x8f2   : > { %v4494_v39 = vpop.permute.xlu1 %4493 }
 0x8f3   : > { %v4488_v58 = vpop.permute.xlu0 %4487  ;;  %v4498_v40 = vsel %vm612_vm11, %v4492_v15, %v4494_v39  ;;  %4510 = vst.msk [vmem:[#allocation7 + $0x58] sm:$0xff] %vm2902_vm0, %v4494_v39 }
 0x8f4   : > { %v4496_v53 = vsel %vm612_vm11, %v4486_v3, %v4488_v58  ;;  %4507 = vst.msk [vmem:[#allocation7 + $0x40] sm:$0xff] %vm2902_vm0, %v4488_v58 }
 0x8f5   : > { %v4856_v1 = vpack.c.bf16 %v4498_v40, %v4496_v53 }
 0x8f6   : > { %v4490_v21 = vpop.permute.xlu1 %4489 }
 0x8f7   : > { %v4484_v25 = vpop.permute.xlu0 %4483  ;;  %4904 = vmatprep.subr.bf16.mxu0 %v4856_v1  ;;  %v4497_v2 = vsel %vm612_vm11, %v4490_v21, %v4492_v15 }
 0x8f8   : > { %v4495_v13 = vsel %vm612_vm11, %v4484_v25, %v4486_v3 }
 0x8f9   : > { %v4855_v26 = vpack.c.bf16 %v4497_v2, %v4495_v13 }
 0x8fa   : > { %v4528_v19 = vpop.permute.xlu1 %4527  ;;  %v4809_v32 = vld [vmem:[#allocation7 + $0x58] sm:$0xff] }
 0x8fb   : > { %v4526_v30 = vpop.permute.xlu0 %4525  ;;  %v4806_v23 = vld [vmem:[#allocation7 + $0x40] sm:$0xff]  ;;  %4905 = vmatpush1.bf16.msra.mxu0 %v4855_v26  ;;  %4548 = vst.msk [vmem:[#allocation7 + $0x70] sm:$0xff] %vm2902_vm0, %v4528_v19 }
 0x8fc   : > { %v4537_v27 = vsel %vm675_vm12, %v4526_v30, %v4528_v19  ;;  %v4857_v6 = vpack.c.bf16 %v4809_v32, %v4806_v23 }
 0x8fe   : > { %4948 = vmatpush1.bf16.msra.mxu1 %v4857_v6  ;;  %v4534_v61 = vpop.permute.xlu1 %4533 }
 0x8ff   : > { %v4532_v35 = vpop.permute.xlu0 %4531  ;;  %4949 = vmatprep.subr.bf16.mxu1 %v10388_v47  ;;  %4551 = vst.msk [vmem:[#allocation7 + $0x88] sm:$0xff] %vm2902_vm0, %v4534_v61 }
 0x900   : > { %v4539_v9 = vsel %vm675_vm12, %v4532_v35, %v4534_v61 }
 0x901   : > { %v4859_v33 = vpack.c.bf16 %v4539_v9, %v4537_v27 }
 0x902   : > { %v4530_v12 = vpop.permute.xlu1 %4529  ;;  %v4812_v5 = vld [vmem:[#allocation7 + $0x70] sm:$0xff] }
 0x903   : > { %v4524_v31 = vpop.permute.xlu0 %4523  ;;  %4906 = vmatprep.subr.bf16.mxu0 %v4859_v33  ;;  %v4538_v20 = vsel %vm675_vm12, %v4530_v12, %v4532_v35 }
 0x904   : > { %v4536_v16 = vsel %vm675_vm12, %v4524_v31, %v4526_v30 }
 0x905   : > { %v4858_v4 = vpack.c.bf16 %v4538_v20, %v4536_v16 }
 0x906   : > { %v4569_v29 = vpop.permute.xlu1 %4568  ;;  %v4815_v43 = vld [vmem:[#allocation7 + $0x88] sm:$0xff] }
 0x907   : > { %v4567_v7 = vpop.permute.xlu0 %4566  ;;  %4907 = vmatpush1.bf16.msra.mxu0 %v4858_v4  ;;  %4589 = vst.msk [vmem:[#allocation7 + $0xa0] sm:$0xff] %vm2902_vm0, %v4569_v29  ;;  %v4860_v44 = vpack.c.bf16 %v4815_v43, %v4812_v5 }
 0x908   : > { %v4578_v38 = vsel %vm4576_vm1, %v4567_v7, %v4569_v29 }
 0x909   : > { %4950 = vmatpush1.bf16.msra.mxu1 %v4860_v44 }
 0x90a   : > { %v4575_v37 = vpop.permute.xlu1 %4574  ;;  %4951 = vmatprep.subr.bf16.mxu1 %v10388_v47 }
 0x90b   : > { %v4573_v24 = vpop.permute.xlu0 %4572  ;;  %4592 = vst.msk [vmem:[#allocation7 + $0xb8] sm:$0xff] %vm2902_vm0, %v4575_v37 }
 0x90c   : > { %v4580_v54 = vsel %vm4576_vm1, %v4573_v24, %v4575_v37 }
 0x90d   : > { %v4862_v34 = vpack.c.bf16 %v4580_v54, %v4578_v38 }
 0x90e   : > { %v4571_v10 = vpop.permute.xlu1 %4570  ;;  %v4818_v22 = vld [vmem:[#allocation7 + $0xa0] sm:$0xff] }
 0x90f   : > { %v4565_v57 = vpop.permute.xlu0 %4564  ;;  %4908 = vmatprep.subr.bf16.mxu0 %v4862_v34  ;;  %v4579_v63 = vsel %vm4576_vm1, %v4571_v10, %v4573_v24 }
 0x910   : > { %v4577_v17 = vsel %vm4576_vm1, %v4565_v57, %v4567_v7 }
 0x911   : > { %v4861_v42 = vpack.c.bf16 %v4579_v63, %v4577_v17 }
 0x912   : > { %v4610_v36 = vpop.permute.xlu1 %4609  ;;  %v4821_v55 = vld [vmem:[#allocation7 + $0xb8] sm:$0xff] }
 0x913   : > { %v4608_v14 = vpop.permute.xlu0 %4607  ;;  %4909 = vmatpush1.bf16.msra.mxu0 %v4861_v42  ;;  %4630 = vst.msk [vmem:[#allocation7 + $0xd0] sm:$0xff] %vm2902_vm0, %v4610_v36  ;;  %v4863_v56 = vpack.c.bf16 %v4821_v55, %v4818_v22 }
 0x914   : > { %v4619_v11 = vsel %vm4617_vm4, %v4608_v14, %v4610_v36 }
 0x915   : > { %4952 = vmatpush1.bf16.msra.mxu1 %v4863_v56 }
 0x916   : > { %v4616_v18 = vpop.permute.xlu1 %4615  ;;  %4953 = vmatprep.subr.bf16.mxu1 %v10388_v47 }
 0x917   : > { %v4614_v51 = vpop.permute.xlu0 %4613  ;;  %4633 = vst.msk [vmem:[#allocation7 + $0xe8] sm:$0xff] %vm2902_vm0, %v4616_v18 }
 0x918   : > { %v4621_v8 = vsel %vm4617_vm4, %v4614_v51, %v4616_v18 }
 0x919   : > { %v4865_v46 = vpack.c.bf16 %v4621_v8, %v4619_v11 }
 0x91a   : > { %v4612_v59 = vpop.permute.xlu1 %4611  ;;  %v4824_v58 = vld [vmem:[#allocation7 + $0xd0] sm:$0xff] }
 0x91b   : > { %v4606_v62 = vpop.permute.xlu0 %4605  ;;  %4910 = vmatprep.subr.bf16.mxu0 %v4865_v46  ;;  %v4620_v41 = vsel %vm4617_vm4, %v4612_v59, %v4614_v51 }
 0x91c   : > { %v4618_v28 = vsel %vm4617_vm4, %v4606_v62, %v4608_v14 }
 0x91d   : > { %v4864_v15 = vpack.c.bf16 %v4620_v41, %v4618_v28 }
 0x91e   : > { %v4651_v3 = vpop.permute.xlu1 %4650  ;;  %v4827_v40 = vld [vmem:[#allocation7 + $0xe8] sm:$0xff] }
 0x91f   : > { %v4649_v39 = vpop.permute.xlu0 %4648  ;;  %4911 = vmatpush1.bf16.msra.mxu0 %v4864_v15  ;;  %4671 = vst.msk [vmem:[#allocation7 + $0x100] sm:$0xff] %vm2902_vm0, %v4651_v3  ;;  %v4866_v1 = vpack.c.bf16 %v4827_v40, %v4824_v58 }
 0x920   : > { %v4660_v53 = vsel %vm4658_vm5, %v4649_v39, %v4651_v3 }
 0x921   : > { %4954 = vmatpush1.bf16.msra.mxu1 %v4866_v1 }
 0x922   : > { %v4657_v21 = vpop.permute.xlu1 %4656  ;;  %4955 = vmatprep.subr.bf16.mxu1 %v10388_v47 }
 0x923   : > { %v4655_v25 = vpop.permute.xlu0 %4654  ;;  %4674 = vst.msk [vmem:[#allocation7 + $0x118] sm:$0xff] %vm2902_vm0, %v4657_v21 }
 0x924   : > { %v4662_v2 = vsel %vm4658_vm5, %v4655_v25, %v4657_v21 }
 0x925   : > { %v4868_v13 = vpack.c.bf16 %v4662_v2, %v4660_v53  ;;  %v9067_v53 = vcombine.low %v11828_v50, %v11833_v45 }
 0x926   : > { %v4653_v26 = vpop.permute.xlu1 %4652  ;;  %v4830_v61 = vld [vmem:[#allocation7 + $0x100] sm:$0xff] }
 0x927   : > { %v4647_v19 = vpop.permute.xlu0 %4646  ;;  %4912 = vmatprep.subr.bf16.mxu0 %v4868_v13  ;;  %v4661_v30 = vsel %vm4658_vm5, %v4653_v26, %v4655_v25  ;;  %v10396_v25 = vmov 0.0   ;;  %v9071_v13 = vld [vmem:[%s12960_s3 + $0x1] ss:$2 sm:$0x7] }
 0x928   : > { %v4659_v23 = vsel %vm4658_vm5, %v4647_v19, %v4649_v39  ;;  %5016 = vst [vmem:[#allocation2] sm:$0xff] %v10396_v25  ;;  %5018 = vst.msk [vmem:[#allocation2 + $0x10] sm:$0xff] %vm2891_vm3, %v10396_v25 }
 0x929   : > { %v4867_v32 = vpack.c.bf16 %v4661_v30, %v4659_v23  ;;  %5019 = vst [vmem:[#allocation2 + $0x50] sm:$0xff] %v10396_v25  ;;  %5021 = vst.msk [vmem:[#allocation2 + $0x60] sm:$0xff] %vm2891_vm3, %v10396_v25  ;;  %v5002_v30 = vrot.slane %v9071_v13, %v1482_v52  ;;  %vm5040_vm3 = vcmask 154624  }
 0x92a   : > { %v4692_v27 = vpop.permute.xlu1 %4691  ;;  %v4833_v35 = vld [vmem:[#allocation7 + $0x118] sm:$0xff] }
 0x92b   : > { %v4690_v6 = vpop.permute.xlu0 %4689  ;;  %4913 = vmatpush1.bf16.msra.mxu0 %v4867_v32  ;;  %4712 = vst.msk [vmem:[#allocation7 + $0x130] sm:$0xff] %vm2902_vm0, %v4692_v27  ;;  %v4869_v33 = vpack.c.bf16 %v4833_v35, %v4830_v61  ;;  %v5006_v35 = vrot.slane %v9071_v13, %v1486_v60 }
 0x92c   : > { %v4701_v9 = vsel %vm864_vm15, %v4690_v6, %v4692_v27 }
 0x92d   : > { %4956 = vmatpush1.bf16.msra.mxu1 %v4869_v33 }
 0x92e   : > { %v4698_v12 = vpop.permute.xlu1 %4697  ;;  %4957 = vmatprep.subr.bf16.mxu1 %v10388_v47 }
 0x92f   : > { %v4696_v31 = vpop.permute.xlu0 %4695  ;;  %4715 = vst.msk [vmem:[#allocation7 + $0x148] sm:$0xff] %vm2902_vm0, %v4698_v12 }
 0x930   : > { %v4703_v20 = vsel %vm864_vm15, %v4696_v31, %v4698_v12 }
 0x931   : > { %v4871_v16 = vpack.c.bf16 %v4703_v20, %v4701_v9 }
 0x932   : > { %v4694_v4 = vpop.permute.xlu1 %4693  ;;  %v4836_v37 = vld [vmem:[#allocation7 + $0x130] sm:$0xff] }
 0x933   : > { %v4688_v29 = vpop.permute.xlu0 %4687  ;;  %4914 = vmatprep.subr.bf16.mxu0 %v4871_v16  ;;  %v4702_v7 = vsel %vm864_vm15, %v4694_v4, %v4696_v31  ;;  %v4998_v31 = vrot.slane %v9071_v13, %v11004_v49 }
 0x934   : > { %v4700_v5 = vsel %vm864_vm15, %v4688_v29, %v4690_v6 }
 0x935   : > { %v4870_v43 = vpack.c.bf16 %v4702_v7, %v4700_v5 }
 0x936   : > { %v4733_v38 = vpop.permute.xlu1 %4732  ;;  %v4839_v24 = vld [vmem:[#allocation7 + $0x148] sm:$0xff] }
 0x937   : > { %v4731_v44 = vpop.permute.xlu0 %4730  ;;  %4915 = vmatpush1.bf16.msra.mxu0 %v4870_v43  ;;  %4753 = vst.msk [vmem:[#allocation7 + $0x160] sm:$0xff] %vm2902_vm0, %v4733_v38  ;;  %v4872_v34 = vpack.c.bf16 %v4839_v24, %v4836_v37 }
 0x938   : > { %v4742_v54 = vsel %vm4740_vm6, %v4731_v44, %v4733_v38 }
 0x939   : > { %4958 = vmatpush1.bf16.msra.mxu1 %v4872_v34 }
 0x93a   : > { %v4739_v10 = vpop.permute.xlu1 %4738  ;;  %4959 = vmatprep.subr.bf16.mxu1 %v10388_v47 }
 0x93b   : > { %v4737_v57 = vpop.permute.xlu0 %4736  ;;  %4756 = vst.msk [vmem:[#allocation7 + $0x178] sm:$0xff] %vm2902_vm0, %v4739_v10 }
 0x93c   : > { %v4744_v63 = vsel %vm4740_vm6, %v4737_v57, %v4739_v10 }
 0x93d   : > { %v4874_v17 = vpack.c.bf16 %v4744_v63, %v4742_v54 }
 0x93e   : > { %v4735_v42 = vpop.permute.xlu1 %4734  ;;  %v4842_v18 = vld [vmem:[#allocation7 + $0x160] sm:$0xff] }
 0x93f   : > { %v4729_v36 = vpop.permute.xlu0 %4728  ;;  %4916 = vmatprep.subr.bf16.mxu0 %v4874_v17  ;;  %v4743_v14 = vsel %vm4740_vm6, %v4735_v42, %v4737_v57 }
 0x940   : > { %v4741_v22 = vsel %vm4740_vm6, %v4729_v36, %v4731_v44 }
 0x941   : > { %v4873_v55 = vpack.c.bf16 %v4743_v14, %v4741_v22 }
 0x942   : > { %v4774_v11 = vpop.permute.xlu1 %4773  ;;  %v4845_v51 = vld [vmem:[#allocation7 + $0x178] sm:$0xff] }
 0x943   : > { %v4772_v56 = vpop.permute.xlu0 %4771  ;;  %4917 = vmatpush1.bf16.msra.mxu0 %v4873_v55  ;;  %4794 = vst.msk [vmem:[#allocation7 + $0x190] sm:$0xff] %vm2902_vm0, %v4774_v11  ;;  %v4875_v46 = vpack.c.bf16 %v4845_v51, %v4842_v18  ;;  %v12001_v55 = vld [vmem:[%s12897_s1 + $0x90] sm:$0xff]  ;;  %v12021_v51 = vld [vmem:[%s12898_s2 + $0x60] sm:$0xff] }
 0x944   : > { %v4783_v8 = vsel %vm4781_vm7, %v4772_v56, %v4774_v11  ;;  %v12006_v11 = vld [vmem:[%s12897_s1 + $0x9c] sm:$0xff]  ;;  %v12016_v18 = vld [vmem:[%s12897_s1 + $0xb4] sm:$0xff] }
 0x945   : > { %4960 = vmatpush1.bf16.msra.mxu1 %v4875_v46  ;;  %v12031_v46 = vld [vmem:[%s12898_s2 + $0x70] sm:$0xff] }
 0x946   : > { %v4780_v59 = vpop.permute.xlu1 %4779  ;;  %4961 = vmatprep.subr.bf16.mxu1 %v10388_v47 }
 0x947   : > { %v4778_v62 = vpop.permute.xlu0 %4777  ;;  %4797 = vst.msk [vmem:[#allocation7 + $0x1a8] sm:$0xff] %vm2902_vm0, %v4780_v59 }
 0x948   : > { %v4785_v41 = vsel %vm4781_vm7, %v4778_v62, %v4780_v59  ;;  %v12036_v59 = vld [vmem:[%s12898_s2 + $0x78] sm:$0xff] }
 0x949   : > { %v4877_v28 = vpack.c.bf16 %v4785_v41, %v4783_v8  ;;  %v12026_v8 = vld [vmem:[%s12898_s2 + $0x68] sm:$0xff] }
 0x94a   : > { %v4776_v15 = vpop.permute.xlu1 %4775  ;;  %v4848_v1 = vld [vmem:[#allocation7 + $0x190] sm:$0xff] }
 0x94b   : > { %v4770_v3 = vpop.permute.xlu0 %4769  ;;  %4918 = vmatprep.subr.bf16.mxu0 %v4877_v28  ;;  %v4784_v39 = vsel %vm4781_vm7, %v4776_v15, %v4778_v62 }
 0x94c   : > { %v4782_v58 = vsel %vm4781_vm7, %v4770_v3, %v4772_v56  ;;  %v12011_v56 = vld [vmem:[%s12897_s1 + $0xa8] sm:$0xff] }
 0x94d   : > { %v4876_v40 = vpack.c.bf16 %v4784_v39, %v4782_v58 }
 0x94e   : > { %v4851_v21 = vld [vmem:[#allocation7 + $0x1a8] sm:$0xff] }
 0x94f   : > { %4919 = vmatpush1.bf16.msra.mxu0 %v4876_v40  ;;  %v4878_v47 = vpack.c.bf16 %v4851_v21, %v4848_v1 }
 0x951   : > { %4962 = vmatpush1.bf16.msra.mxu1 %v4878_v47 }
 0x952   : > { %4935 = vmatmul.mubr.bf16.vlgmr.msra.gmra.mrb[36].mxu0 %v9067_v53 }
 0x954   : > { %4978 = vmatmul.mubr.bf16.vlgmr.msra.gmra.mrb[36].mxu1 %v9067_v53 }
 0x95b   : > { %v4887_v45 = vpop.permute.xlu1 %4886 }
 0x95c   : > { %v4882_v2 = vpop.permute.xlu0 %4881 }
 0xa25   : > { %v4936_v50 = vpop.f32.mrb[36].mxu0 }
 0xa26   : > { %v4938_v26 = vpop.f32.mrb[37].mxu0  ;;  %v4937_v33 = vadd.f32 %v4936_v50, %v4882_v2 }
 0xa27   : > { %v4939_v19 = vadd.f32 %v4938_v26, %v4882_v2  ;;  %v4940_v23 = vpop.f32.mrb[38].mxu0  ;;  %v4979_v32 = vpop.f32.mrb[36].mxu1 }
 0xa28   : > { %v4941_v27 = vadd.f32 %v4940_v23, %v4887_v45  ;;  %v4942_v6 = vpop.f32.mrb[39].mxu0  ;;  %v4980_v61 = vadd.f32 %v4979_v32, %v4882_v2  ;;  %v4981_v9 = vpop.f32.mrb[37].mxu1  ;;  %v4986_v43 = vmax.f32 %v4937_v33, 0.0 }
 0xa29   : > { %v4987_v12 = vmax.f32 %v4939_v19, 0.0  ;;  %v4982_v20 = vpop.f32.mrb[38].mxu1  ;;  %v4943_v38 = vadd.f32 %v4942_v6, %v4887_v45 }
 0xa2a   : > { %v4988_v16 = vmax.f32 %v4980_v61, 0.0  ;;  %v4983_v4 = vadd.f32 %v4982_v20, %v4887_v45  ;;  %v4984_v7 = vpop.f32.mrb[39].mxu1  ;;  %v4989_v5 = vmax.f32 %v4941_v27, 0.0  ;;  %v5010_v48 = vmul.f32 %v4998_v31, %v4986_v43 }
 0xa2b   : > { %v5011_v29 = vmul.f32 %v5002_v30, %v4987_v12  ;;  %v4990_v60 = vmax.f32 %v4943_v38, 0.0 }
 0xa2c   : > { %v5012_v52 = vmul.f32 %v5006_v35, %v4988_v16  ;;  %v4991_v44 = vmax.f32 %v4983_v4, 0.0  ;;  %v5013_v37 = vmul.f32 %v4998_v31, %v4989_v5 }
 0xa2d   : > { %5030 = vrot.lane.b32.xlu0 %v5011_v29, %s10397_s22  ;;  %v5014_v49 = vmul.f32 %v5002_v30, %v4990_v60 }
 0xa2e   : > { %5032 = vrot.lane.b32.xlu1 %v5012_v52, %s10397_s22  ;;  %v5015_v24 = vmul.f32 %v5006_v35, %v4991_v44 }
 0xa31   : > { %5034 = vrot.lane.b32.xlu0 %v5013_v37, %s10397_s22 }
 0xa32   : > { %5028 = vrot.lane.b32.xlu1 %v5010_v48, %s10397_s22 }
 0xa35   : > { %5038 = vrot.lane.b32.xlu0 %v5015_v24, %s10397_s22 }
 0xa36   : > { %5036 = vrot.lane.b32.xlu1 %v5014_v49, %s10397_s22 }
 0xa9f   : > { %v5031_v54 = vpop.permute.xlu0 %5030 }
 0xaa0   : > { %v5033_v34 = vpop.permute.xlu1 %5032 }
 0xaa1   : > { %v5042_v10 = vsel %vm5040_vm3, %v5031_v54, %v5033_v34 }
 0xaa2   : > { %5055 = vst.msk [vmem:[#allocation2 + $0x10] sm:$0xff] %vm5054_vm8, %v5042_v10 }
 0xaa3   : > { %v5035_v57 = vpop.permute.xlu0 %5034 }
 0xaa4   : > { %5056 = vst.msk [vmem:[#allocation2 + $0x50] sm:$0xff] %vm5051_vm9, %v5035_v57  ;;  %v5029_v63 = vpop.permute.xlu1 %5028 }
 0xaa5   : > { %5052 = vst.msk [vmem:[#allocation2] sm:$0xff] %vm5051_vm9, %v5029_v63  ;;  %v5041_v17 = vsel %vm5040_vm3, %v5029_v63, %v5031_v54 }
 0xaa6   : > { %5053 = vst [vmem:[#allocation2 + $0x8] sm:$0xff] %v5041_v17 }
 0xaa7   : > { %v5039_v36 = vpop.permute.xlu0 %5038 }
 0xaa8   : > { %v5037_v42 = vpop.permute.xlu1 %5036 }
 0xaa9   : > { %v5043_v14 = vsel %vm5040_vm3, %v5035_v57, %v5037_v42  ;;  %v5044_v22 = vsel %vm5040_vm3, %v5037_v42, %v5039_v36 }
 0xaaa   : > { %5057 = vst [vmem:[#allocation2 + $0x58] sm:$0xff] %v5043_v14  ;;  %5058 = vst.msk [vmem:[#allocation2 + $0x60] sm:$0xff] %vm5054_vm8, %v5044_v22 }
 0xaab   : > { %s10398_s3 = smov 127   ;;  %v12046_v15 = vld [vmem:[#allocation2 + $0x10] sm:$0xff]  ;;  %v10399_v40 = vmov 0   ;;  %s10400_s0 = smov 126   ;;  %v9081_v25 = vcombine.high %v12001_v55, %v12006_v11  ;;  %vm6500_vm10 = vcmask 482712   ;;  %vm6622_vm13 = vcmask 564712  }
 0xaac   : > { %v12048_v3 = vld [vmem:[#allocation2 + $0x50] sm:$0xff]  ;;  %v12050_v39 = vld [vmem:[#allocation2] sm:$0xff]  ;;  %5587 = vmatprep.subr.bf16.mxu1 %v10399_v40  ;;  %5077 = vst.msk [vmem:[#allocation8 + $0x10] sm:$0xff] %vm2902_vm0, %v12046_v15  ;;  %10207 = vset.pattern.permute.xlu1 %v10399_v40  ;;  %s10401_s14 = smov 110   ;;  %s10402_s22 = smov 109  }
 0xaad   : > { %v12040_v41 = vld [vmem:[#allocation2 + $0x8] sm:$0xff]  ;;  %v5462_v53 = vpack.c.bf16 %v12048_v3, %v12050_v39  ;;  %10206 = vset.pattern.permute.xlu0 %v10399_v40  ;;  %s10403_s18 = smov 108   ;;  %s10404_s13 = smov 92   ;;  %9086 = vmatprep.mubr.msk.bf16.mxu1 %vm4898_vm14, %v9081_v25 }
 0xaae   : > { %5095 = vrot.lane.b32.xlu0 %v12040_v41, %s10398_s3  ;;  %s10405_s17 = smov 91   ;;  %s10406_s12 = smov 90   ;;  %9084 = vmatprep.mubr.msk.bf16.mxu0 %vm4898_vm14, %v9081_v25 }
 0xaaf   : > { %s10407_s19 = smov 19   ;;  %s10408_s10 = smov 110  }
 0xab1   : > { %v12038_v62 = vld [vmem:[#allocation2 + $0x58] sm:$0xff]  ;;  %v12042_v28 = vld [vmem:[#allocation2 + $0x60] sm:$0xff] }
 0xab2   : > { %5101 = vrot.lane.b32.xlu1 %v12038_v62, %s10398_s3  ;;  %5080 = vst.msk [vmem:[#allocation8 + $0x28] sm:$0xff] %vm2902_vm0, %v12042_v28  ;;  %v5463_v58 = vpack.c.bf16 %v12038_v62, %v12040_v41  ;;  %5097 = vrot.lane.b32.xlu0 %v12046_v15, %s10398_s3 }
 0xab3   : > { %v5410_v21 = vld [vmem:[#allocation8 + $0x10] sm:$0xff] }
 0xab4   : > { %5534 = vmatprep.subr.bf16.mxu0 %v5463_v58 }
 0xab5   : > { %5535 = vmatpush1.bf16.msra.mxu0 %v5462_v53 }
 0xab6   : > { %5103 = vrot.lane.b32.xlu1 %v12042_v28, %s10398_s3  ;;  %5093 = vrot.lane.b32.xlu0 %v12050_v39, %s10398_s3 }
 0xab9   : > { %v5413_v1 = vld [vmem:[#allocation8 + $0x28] sm:$0xff] }
 0xaba   : > { %5099 = vrot.lane.b32.xlu1 %v12048_v3, %s10398_s3  ;;  %v5464_v47 = vpack.c.bf16 %v5413_v1, %v5410_v21  ;;  %5135 = vrot.lane.b32.xlu0 %v12040_v41, %s10400_s0  ;;  %s12978_s3 = smov 41  }
 0xabc   : > { %5588 = vmatpush1.bf16.msra.mxu1 %v5464_v47 }
 0xabd   : > { %5589 = vmatprep.subr.bf16.mxu1 %v10399_v40 }
 0xabe   : > { %5137 = vrot.lane.b32.xlu1 %v12046_v15, %s10400_s0  ;;  %5141 = vrot.lane.b32.xlu0 %v12038_v62, %s10400_s0 }
 0xac2   : > { %5143 = vrot.lane.b32.xlu1 %v12042_v28, %s10400_s0  ;;  %5133 = vrot.lane.b32.xlu0 %v12050_v39, %s10400_s0 }
 0xac6   : > { %5139 = vrot.lane.b32.xlu1 %v12048_v3, %s10400_s0  ;;  %5176 = vrot.lane.b32.xlu0 %v12040_v41, %s10401_s14  ;;  %s12979_s0 = smov 51  }
 0xaca   : > { %5178 = vrot.lane.b32.xlu1 %v12046_v15, %s10401_s14  ;;  %5182 = vrot.lane.b32.xlu0 %v12038_v62, %s10401_s14 }
 0xace   : > { %5184 = vrot.lane.b32.xlu1 %v12042_v28, %s10401_s14  ;;  %5174 = vrot.lane.b32.xlu0 %v12050_v39, %s10401_s14 }
 0xad2   : > { %5180 = vrot.lane.b32.xlu1 %v12048_v3, %s10401_s14  ;;  %5217 = vrot.lane.b32.xlu0 %v12040_v41, %s10402_s22  ;;  %s12980_s14 = smov 81  }
 0xad6   : > { %5219 = vrot.lane.b32.xlu1 %v12046_v15, %s10402_s22  ;;  %5223 = vrot.lane.b32.xlu0 %v12038_v62, %s10402_s22 }
 0xada   : > { %5225 = vrot.lane.b32.xlu1 %v12042_v28, %s10402_s22  ;;  %5215 = vrot.lane.b32.xlu0 %v12050_v39, %s10402_s22 }
 0xade   : > { %5221 = vrot.lane.b32.xlu1 %v12048_v3, %s10402_s22  ;;  %5258 = vrot.lane.b32.xlu0 %v12040_v41, %s10403_s18 }
 0xae2   : > { %5260 = vrot.lane.b32.xlu1 %v12046_v15, %s10403_s18  ;;  %5264 = vrot.lane.b32.xlu0 %v12038_v62, %s10403_s18 }
 0xae6   : > { %5266 = vrot.lane.b32.xlu1 %v12042_v28, %s10403_s18  ;;  %5256 = vrot.lane.b32.xlu0 %v12050_v39, %s10403_s18 }
 0xaea   : > { %5262 = vrot.lane.b32.xlu1 %v12048_v3, %s10403_s18  ;;  %5299 = vrot.lane.b32.xlu0 %v12040_v41, %s10404_s13  ;;  %s12973_s18 = smov 113  }
 0xaee   : > { %5301 = vrot.lane.b32.xlu1 %v12046_v15, %s10404_s13  ;;  %5305 = vrot.lane.b32.xlu0 %v12038_v62, %s10404_s13 }
 0xaf2   : > { %5307 = vrot.lane.b32.xlu1 %v12042_v28, %s10404_s13  ;;  %5297 = vrot.lane.b32.xlu0 %v12050_v39, %s10404_s13 }
 0xaf6   : > { %5303 = vrot.lane.b32.xlu1 %v12048_v3, %s10404_s13  ;;  %5340 = vrot.lane.b32.xlu0 %v12040_v41, %s10405_s17  ;;  %s12974_s13 = smov 109  }
 0xafa   : > { %5342 = vrot.lane.b32.xlu1 %v12046_v15, %s10405_s17  ;;  %5346 = vrot.lane.b32.xlu0 %v12038_v62, %s10405_s17 }
 0xafe   : > { %5348 = vrot.lane.b32.xlu1 %v12042_v28, %s10405_s17  ;;  %5338 = vrot.lane.b32.xlu0 %v12050_v39, %s10405_s17 }
 0xb02   : > { %5344 = vrot.lane.b32.xlu1 %v12048_v3, %s10405_s17  ;;  %5381 = vrot.lane.b32.xlu0 %v12040_v41, %s10406_s12  ;;  %s12975_s17 = smov 1  }
 0xb06   : > { %5383 = vrot.lane.b32.xlu1 %v12046_v15, %s10406_s12  ;;  %5387 = vrot.lane.b32.xlu0 %v12038_v62, %s10406_s12 }
 0xb0a   : > { %5389 = vrot.lane.b32.xlu1 %v12042_v28, %s10406_s12  ;;  %5379 = vrot.lane.b32.xlu0 %v12050_v39, %s10406_s12 }
 0xb0e   : > { %5385 = vrot.lane.b32.xlu1 %v12048_v3, %s10406_s12  ;;  %5491 = vperm.xlu0 %10206, %v12021_v51   ;;  %s12977_s12 = smov 57  }
 0xb12   : > { %5496 = vperm.xlu1 %10207, %v12026_v8   ;;  %5506 = vperm.xlu0 %10206, %v12036_v59  }
 0xb16   : > { %5501 = vperm.xlu1 %10207, %v12031_v46  }
 0xb20   : > { %v5096_v13 = vpop.permute.xlu0 %5095 }
 0xb24   : > { %v5102_v2 = vpop.permute.xlu1 %5101  ;;  %v5098_v45 = vpop.permute.xlu0 %5097 }
 0xb25   : > { %v5106_v19 = vsel %vm612_vm11, %v5096_v13, %v5098_v45  ;;  %5117 = vst.msk [vmem:[#allocation8 + $0x40] sm:$0xff] %vm2902_vm0, %v5098_v45 }
 0xb28   : > { %v5104_v50 = vpop.permute.xlu1 %5103  ;;  %v5094_v32 = vpop.permute.xlu0 %5093 }
 0xb29   : > { %v5108_v26 = vsel %vm612_vm11, %v5102_v2, %v5104_v50  ;;  %5120 = vst.msk [vmem:[#allocation8 + $0x58] sm:$0xff] %vm2902_vm0, %v5104_v50  ;;  %v5105_v6 = vsel %vm612_vm11, %v5094_v32, %v5096_v13 }
 0xb2a   : > { %v5466_v30 = vpack.c.bf16 %v5108_v26, %v5106_v19 }
 0xb2c   : > { %v5100_v23 = vpop.permute.xlu1 %5099  ;;  %5536 = vmatprep.subr.bf16.mxu0 %v5466_v30  ;;  %v5136_v9 = vpop.permute.xlu0 %5135  ;;  %v5416_v33 = vld [vmem:[#allocation8 + $0x40] sm:$0xff] }
 0xb2d   : > { %v5107_v27 = vsel %vm612_vm11, %v5100_v23, %v5102_v2 }
 0xb2e   : > { %v5465_v61 = vpack.c.bf16 %v5107_v27, %v5105_v6 }
 0xb30   : > { %v5138_v35 = vpop.permute.xlu1 %5137  ;;  %v5419_v12 = vld [vmem:[#allocation8 + $0x58] sm:$0xff]  ;;  %5537 = vmatpush1.bf16.msra.mxu0 %v5465_v61  ;;  %v5142_v4 = vpop.permute.xlu0 %5141 }
 0xb31   : > { %5158 = vst.msk [vmem:[#allocation8 + $0x70] sm:$0xff] %vm2902_vm0, %v5138_v35  ;;  %v5147_v31 = vsel %vm675_vm12, %v5136_v9, %v5138_v35  ;;  %v5467_v20 = vpack.c.bf16 %v5419_v12, %v5416_v33 }
 0xb33   : > { %5590 = vmatpush1.bf16.msra.mxu1 %v5467_v20 }
 0xb34   : > { %v5144_v16 = vpop.permute.xlu1 %5143  ;;  %5591 = vmatprep.subr.bf16.mxu1 %v10399_v40  ;;  %v5134_v52 = vpop.permute.xlu0 %5133 }
 0xb35   : > { %5161 = vst.msk [vmem:[#allocation8 + $0x88] sm:$0xff] %vm2902_vm0, %v5144_v16  ;;  %v5149_v29 = vsel %vm675_vm12, %v5142_v4, %v5144_v16  ;;  %v5146_v38 = vsel %vm675_vm12, %v5134_v52, %v5136_v9 }
 0xb36   : > { %v5469_v7 = vpack.c.bf16 %v5149_v29, %v5147_v31 }
 0xb38   : > { %v5140_v5 = vpop.permute.xlu1 %5139  ;;  %5538 = vmatprep.subr.bf16.mxu0 %v5469_v7  ;;  %v5177_v48 = vpop.permute.xlu0 %5176  ;;  %v5422_v60 = vld [vmem:[#allocation8 + $0x70] sm:$0xff] }
 0xb39   : > { %v5148_v43 = vsel %vm675_vm12, %v5140_v5, %v5142_v4  ;;  %vm6118_vm12 = vcmask 236712  }
 0xb3a   : > { %v5468_v44 = vpack.c.bf16 %v5148_v43, %v5146_v38 }
 0xb3c   : > { %v5179_v37 = vpop.permute.xlu1 %5178  ;;  %v5425_v24 = vld [vmem:[#allocation8 + $0x88] sm:$0xff]  ;;  %5539 = vmatpush1.bf16.msra.mxu0 %v5468_v44  ;;  %v5183_v10 = vpop.permute.xlu0 %5182 }
 0xb3d   : > { %5199 = vst.msk [vmem:[#allocation8 + $0xa0] sm:$0xff] %vm2902_vm0, %v5179_v37  ;;  %v5188_v49 = vsel %vm4576_vm1, %v5177_v48, %v5179_v37  ;;  %v5470_v54 = vpack.c.bf16 %v5425_v24, %v5422_v60 }
 0xb3f   : > { %5592 = vmatpush1.bf16.msra.mxu1 %v5470_v54 }
 0xb40   : > { %v5185_v34 = vpop.permute.xlu1 %5184  ;;  %5593 = vmatprep.subr.bf16.mxu1 %v10399_v40  ;;  %v5175_v42 = vpop.permute.xlu0 %5174 }
 0xb41   : > { %5202 = vst.msk [vmem:[#allocation8 + $0xb8] sm:$0xff] %vm2902_vm0, %v5185_v34  ;;  %v5190_v57 = vsel %vm4576_vm1, %v5183_v10, %v5185_v34  ;;  %v5187_v14 = vsel %vm4576_vm1, %v5175_v42, %v5177_v48 }
 0xb42   : > { %v5472_v63 = vpack.c.bf16 %v5190_v57, %v5188_v49 }
 0xb44   : > { %v5181_v17 = vpop.permute.xlu1 %5180  ;;  %5540 = vmatprep.subr.bf16.mxu0 %v5472_v63  ;;  %v5218_v8 = vpop.permute.xlu0 %5217  ;;  %v5428_v46 = vld [vmem:[#allocation8 + $0xa0] sm:$0xff] }
 0xb45   : > { %v5189_v36 = vsel %vm4576_vm1, %v5181_v17, %v5183_v10 }
 0xb46   : > { %v5471_v22 = vpack.c.bf16 %v5189_v36, %v5187_v14 }
 0xb48   : > { %v5220_v51 = vpop.permute.xlu1 %5219  ;;  %v5431_v59 = vld [vmem:[#allocation8 + $0xb8] sm:$0xff]  ;;  %5541 = vmatpush1.bf16.msra.mxu0 %v5471_v22  ;;  %v5224_v15 = vpop.permute.xlu0 %5223 }
 0xb49   : > { %5240 = vst.msk [vmem:[#allocation8 + $0xd0] sm:$0xff] %vm2902_vm0, %v5220_v51  ;;  %v5229_v62 = vsel %vm4617_vm4, %v5218_v8, %v5220_v51  ;;  %v5473_v41 = vpack.c.bf16 %v5431_v59, %v5428_v46 }
 0xb4b   : > { %5594 = vmatpush1.bf16.msra.mxu1 %v5473_v41 }
 0xb4c   : > { %v5226_v28 = vpop.permute.xlu1 %5225  ;;  %5595 = vmatprep.subr.bf16.mxu1 %v10399_v40  ;;  %v5216_v53 = vpop.permute.xlu0 %5215 }
 0xb4d   : > { %5243 = vst.msk [vmem:[#allocation8 + $0xe8] sm:$0xff] %vm2902_vm0, %v5226_v28  ;;  %v5231_v3 = vsel %vm4617_vm4, %v5224_v15, %v5226_v28  ;;  %v5228_v21 = vsel %vm4617_vm4, %v5216_v53, %v5218_v8 }
 0xb4e   : > { %v5475_v39 = vpack.c.bf16 %v5231_v3, %v5229_v62 }
 0xb50   : > { %v5222_v58 = vpop.permute.xlu1 %5221  ;;  %5542 = vmatprep.subr.bf16.mxu0 %v5475_v39  ;;  %v5259_v2 = vpop.permute.xlu0 %5258  ;;  %v5434_v13 = vld [vmem:[#allocation8 + $0xd0] sm:$0xff] }
 0xb51   : > { %v5230_v1 = vsel %vm4617_vm4, %v5222_v58, %v5224_v15 }
 0xb52   : > { %v5474_v47 = vpack.c.bf16 %v5230_v1, %v5228_v21 }
 0xb54   : > { %v5261_v25 = vpop.permute.xlu1 %5260  ;;  %v5437_v50 = vld [vmem:[#allocation8 + $0xe8] sm:$0xff]  ;;  %5543 = vmatpush1.bf16.msra.mxu0 %v5474_v47  ;;  %v5265_v30 = vpop.permute.xlu0 %5264 }
 0xb55   : > { %5281 = vst.msk [vmem:[#allocation8 + $0x100] sm:$0xff] %vm2902_vm0, %v5261_v25  ;;  %v5270_v45 = vsel %vm4658_vm5, %v5259_v2, %v5261_v25  ;;  %v5476_v26 = vpack.c.bf16 %v5437_v50, %v5434_v13  ;;  %v9080_v13 = vcombine.low %v12001_v55, %v12006_v11 }
 0xb57   : > { %5596 = vmatpush1.bf16.msra.mxu1 %v5476_v26 }
 0xb58   : > { %v5267_v19 = vpop.permute.xlu1 %5266  ;;  %5597 = vmatprep.subr.bf16.mxu1 %v10399_v40  ;;  %v5257_v6 = vpop.permute.xlu0 %5256 }
 0xb59   : > { %5284 = vst.msk [vmem:[#allocation8 + $0x118] sm:$0xff] %vm2902_vm0, %v5267_v19  ;;  %v5272_v23 = vsel %vm4658_vm5, %v5265_v30, %v5267_v19  ;;  %v5269_v35 = vsel %vm4658_vm5, %v5257_v6, %v5259_v2  ;;  %v9082_v19 = vcombine.low %v12011_v56, %v12016_v18 }
 0xb5a   : > { %v5478_v32 = vpack.c.bf16 %v5272_v23, %v5270_v45 }
 0xb5c   : > { %v5263_v27 = vpop.permute.xlu1 %5262  ;;  %5544 = vmatprep.subr.bf16.mxu0 %v5478_v32  ;;  %v5300_v12 = vpop.permute.xlu0 %5299  ;;  %v5440_v31 = vld [vmem:[#allocation8 + $0x100] sm:$0xff] }
 0xb5d   : > { %v5271_v61 = vsel %vm4658_vm5, %v5263_v27, %v5265_v30 }
 0xb5e   : > { %v5477_v9 = vpack.c.bf16 %v5271_v61, %v5269_v35 }
 0xb60   : > { %v5302_v33 = vpop.permute.xlu1 %5301  ;;  %v5443_v20 = vld [vmem:[#allocation8 + $0x118] sm:$0xff]  ;;  %5545 = vmatpush1.bf16.msra.mxu0 %v5477_v9  ;;  %v5306_v7 = vpop.permute.xlu0 %5305 }
 0xb61   : > { %5322 = vst.msk [vmem:[#allocation8 + $0x130] sm:$0xff] %vm2902_vm0, %v5302_v33  ;;  %v5311_v16 = vsel %vm864_vm15, %v5300_v12, %v5302_v33  ;;  %v5479_v4 = vpack.c.bf16 %v5443_v20, %v5440_v31 }
 0xb63   : > { %5598 = vmatpush1.bf16.msra.mxu1 %v5479_v4 }
 0xb64   : > { %v5308_v29 = vpop.permute.xlu1 %5307  ;;  %5599 = vmatprep.subr.bf16.mxu1 %v10399_v40  ;;  %v5298_v38 = vpop.permute.xlu0 %5297 }
 0xb65   : > { %5325 = vst.msk [vmem:[#allocation8 + $0x148] sm:$0xff] %vm2902_vm0, %v5308_v29  ;;  %v5313_v5 = vsel %vm864_vm15, %v5306_v7, %v5308_v29  ;;  %v5310_v37 = vsel %vm864_vm15, %v5298_v38, %v5300_v12 }
 0xb66   : > { %v5481_v52 = vpack.c.bf16 %v5313_v5, %v5311_v16 }
 0xb68   : > { %v5304_v43 = vpop.permute.xlu1 %5303  ;;  %5546 = vmatprep.subr.bf16.mxu0 %v5481_v52  ;;  %v5341_v24 = vpop.permute.xlu0 %5340  ;;  %v5446_v49 = vld [vmem:[#allocation8 + $0x130] sm:$0xff] }
 0xb69   : > { %v5312_v44 = vsel %vm864_vm15, %v5304_v43, %v5306_v7  ;;  %vm6240_vm15 = vcmask 318712  }
 0xb6a   : > { %v5480_v48 = vpack.c.bf16 %v5312_v44, %v5310_v37 }
 0xb6c   : > { %v5343_v60 = vpop.permute.xlu1 %5342  ;;  %v5449_v54 = vld [vmem:[#allocation8 + $0x148] sm:$0xff]  ;;  %5547 = vmatpush1.bf16.msra.mxu0 %v5480_v48  ;;  %v5347_v63 = vpop.permute.xlu0 %5346 }
 0xb6d   : > { %5363 = vst.msk [vmem:[#allocation8 + $0x160] sm:$0xff] %vm2902_vm0, %v5343_v60  ;;  %v5352_v34 = vsel %vm4740_vm6, %v5341_v24, %v5343_v60  ;;  %v5482_v10 = vpack.c.bf16 %v5449_v54, %v5446_v49 }
 0xb6f   : > { %5600 = vmatpush1.bf16.msra.mxu1 %v5482_v10 }
 0xb70   : > { %v5349_v57 = vpop.permute.xlu1 %5348  ;;  %5601 = vmatprep.subr.bf16.mxu1 %v10399_v40  ;;  %v5339_v14 = vpop.permute.xlu0 %5338 }
 0xb71   : > { %5366 = vst.msk [vmem:[#allocation8 + $0x178] sm:$0xff] %vm2902_vm0, %v5349_v57  ;;  %v5354_v17 = vsel %vm4740_vm6, %v5347_v63, %v5349_v57  ;;  %v5351_v51 = vsel %vm4740_vm6, %v5339_v14, %v5341_v24 }
 0xb72   : > { %v5484_v42 = vpack.c.bf16 %v5354_v17, %v5352_v34 }
 0xb74   : > { %v5345_v36 = vpop.permute.xlu1 %5344  ;;  %5548 = vmatprep.subr.bf16.mxu0 %v5484_v42  ;;  %v5382_v59 = vpop.permute.xlu0 %5381  ;;  %v5452_v62 = vld [vmem:[#allocation8 + $0x160] sm:$0xff] }
 0xb75   : > { %v5353_v22 = vsel %vm4740_vm6, %v5345_v36, %v5347_v63 }
 0xb76   : > { %v5483_v8 = vpack.c.bf16 %v5353_v22, %v5351_v51 }
 0xb78   : > { %v5384_v46 = vpop.permute.xlu1 %5383  ;;  %v5455_v41 = vld [vmem:[#allocation8 + $0x178] sm:$0xff]  ;;  %5549 = vmatpush1.bf16.msra.mxu0 %v5483_v8  ;;  %v5388_v39 = vpop.permute.xlu0 %5387 }
 0xb79   : > { %5404 = vst.msk [vmem:[#allocation8 + $0x190] sm:$0xff] %vm2902_vm0, %v5384_v46  ;;  %v5393_v28 = vsel %vm4781_vm7, %v5382_v59, %v5384_v46  ;;  %v5485_v15 = vpack.c.bf16 %v5455_v41, %v5452_v62 }
 0xb7b   : > { %5602 = vmatpush1.bf16.msra.mxu1 %v5485_v15 }
 0xb7c   : > { %v5390_v3 = vpop.permute.xlu1 %5389  ;;  %5603 = vmatprep.subr.bf16.mxu1 %v10399_v40  ;;  %v5380_v21 = vpop.permute.xlu0 %5379  ;;  %v9083_v40 = vcombine.high %v12011_v56, %v12016_v18 }
 0xb7d   : > { %5407 = vst.msk [vmem:[#allocation8 + $0x1a8] sm:$0xff] %vm2902_vm0, %v5390_v3  ;;  %v5395_v58 = vsel %vm4781_vm7, %v5388_v39, %v5390_v3  ;;  %v5392_v25 = vsel %vm4781_vm7, %v5380_v21, %v5382_v59 }
 0xb7e   : > { %v5487_v53 = vpack.c.bf16 %v5395_v58, %v5393_v28 }
 0xb80   : > { %v5386_v1 = vpop.permute.xlu1 %5385  ;;  %5550 = vmatprep.subr.bf16.mxu0 %v5487_v53  ;;  %v5458_v50 = vld [vmem:[#allocation8 + $0x190] sm:$0xff] }
 0xb81   : > { %v5394_v47 = vsel %vm4781_vm7, %v5386_v1, %v5388_v39 }
 0xb82   : > { %v5486_v2 = vpack.c.bf16 %v5394_v47, %v5392_v25 }
 0xb84   : > { %v5461_v45 = vld [vmem:[#allocation8 + $0x1a8] sm:$0xff]  ;;  %5551 = vmatpush1.bf16.msra.mxu0 %v5486_v2 }
 0xb85   : > { %v5488_v26 = vpack.c.bf16 %v5461_v45, %v5458_v50 }
 0xb87   : > { %5604 = vmatpush1.bf16.msra.mxu1 %v5488_v26  ;;  %5567 = vmatmul.mubr.bf16.vlgmr.msra.gmra.mrb[40].mxu0 %v9080_v13 }
 0xb88   : > { %9085 = vmatprep.mubr.msk.bf16.mxu0 %vm4898_vm14, %v9083_v40 }
 0xb8a   : > { %5620 = vmatmul.mubr.bf16.vlgmr.msra.gmra.mrb[40].mxu1 %v9080_v13 }
 0xb8b   : > { %9087 = vmatprep.mubr.msk.bf16.mxu1 %vm4898_vm14, %v9083_v40 }
 0xb8d   : > { %v5492_v30 = vpop.permute.xlu0 %5491 }
 0xb8f   : > { %5577 = vmatmul.mubr.bf16.gmra.mrb[44].mxu0 %v9082_v19 }
 0xb91   : > { %v5497_v35 = vpop.permute.xlu1 %5496  ;;  %v5507_v17 = vpop.permute.xlu0 %5506 }
 0xb92   : > { %5628 = vmatmul.mubr.bf16.gmra.mrb[44].mxu1 %v9082_v19 }
 0xb95   : > { %v5502_v48 = vpop.permute.xlu1 %5501 }
 0xc5a   : > { %v5568_v55 = vpop.f32.mrb[40].mxu0 }
 0xc5b   : > { %v5570_v11 = vpop.f32.mrb[41].mxu0  ;;  %v5569_v20 = vadd.f32 %v5568_v55, %v5492_v30 }
 0xc5c   : > { %v5572_v23 = vpop.f32.mrb[42].mxu0  ;;  %v5571_v56 = vadd.f32 %v5570_v11, %v5492_v30 }
 0xc5d   : > { %v5621_v32 = vpop.f32.mrb[40].mxu1  ;;  %v5574_v27 = vpop.f32.mrb[43].mxu0  ;;  %v5636_v29 = vmax.f32 %v5569_v20, 0.0  ;;  %v5573_v44 = vadd.f32 %v5572_v23, %v5497_v35 }
 0xc5e   : > { %v5622_v6 = vadd.f32 %v5621_v32, %v5492_v30  ;;  %v5623_v61 = vpop.f32.mrb[41].mxu1  ;;  %v5575_v7 = vadd.f32 %v5574_v27, %v5497_v35  ;;  %v5637_v38 = vmax.f32 %v5571_v56, 0.0 }
 0xc5f   : > { %v5624_v9 = vpop.f32.mrb[42].mxu1  ;;  %v5639_v34 = vmax.f32 %v5573_v44, 0.0 }
 0xc60   : > { %v5638_v33 = vmax.f32 %v5622_v6, 0.0  ;;  %v5625_v12 = vadd.f32 %v5624_v9, %v5497_v35  ;;  %v5626_v31 = vpop.f32.mrb[43].mxu1  ;;  %v5640_v24 = vmax.f32 %v5575_v7, 0.0 }
 0xc62   : > { %v5641_v16 = vmax.f32 %v5625_v12, 0.0  ;;  %5664 = vrot.lane.b32.xlu1 %v5638_v33, %s10407_s19  ;;  %v5578_v18 = vpop.f32.mrb[44].mxu0 }
 0xc63   : > { %v5580_v4 = vpop.f32.mrb[45].mxu0  ;;  %v5579_v63 = vadd.f32 %v5578_v18, %v5502_v48 }
 0xc64   : > { %5670 = vrot.lane.b32.xlu0 %v5641_v16, %s10407_s19  ;;  %v5582_v5 = vpop.f32.mrb[46].mxu0  ;;  %v5581_v10 = vadd.f32 %v5580_v4, %v5502_v48 }
 0xc65   : > { %v5629_v52 = vpop.f32.mrb[44].mxu1  ;;  %v5584_v43 = vpop.f32.mrb[47].mxu0  ;;  %v5583_v36 = vadd.f32 %v5582_v5, %v5507_v17  ;;  %v5642_v14 = vmax.f32 %v5579_v63, 0.0 }
 0xc66   : > { %v5631_v37 = vpop.f32.mrb[45].mxu1  ;;  %5660 = vrot.lane.b32.xlu1 %v5636_v29, %s10407_s19  ;;  %v5630_v49 = vadd.f32 %v5629_v52, %v5502_v48  ;;  %v5643_v42 = vmax.f32 %v5581_v10, 0.0  ;;  %v5585_v22 = vadd.f32 %v5584_v43, %v5507_v17 }
 0xc67   : > { %v5632_v60 = vpop.f32.mrb[46].mxu1  ;;  %v5645_v8 = vmax.f32 %v5583_v36, 0.0 }
 0xc68   : > { %5662 = vrot.lane.b32.xlu0 %v5637_v38, %s10407_s19  ;;  %v5634_v54 = vpop.f32.mrb[47].mxu1  ;;  %v5644_v57 = vmax.f32 %v5630_v49, 0.0  ;;  %v5633_v51 = vadd.f32 %v5632_v60, %v5507_v17  ;;  %v5646_v46 = vmax.f32 %v5585_v22, 0.0 }
 0xc6a   : > { %5668 = vrot.lane.b32.xlu1 %v5640_v24, %s10407_s19  ;;  %v5647_v59 = vmax.f32 %v5633_v51, 0.0 }
 0xc6c   : > { %5666 = vrot.lane.b32.xlu0 %v5639_v34, %s10407_s19 }
 0xc6e   : > { %5676 = vrot.lane.b32.xlu1 %v5644_v57, %s10407_s19 }
 0xc70   : > { %5674 = vrot.lane.b32.xlu0 %v5643_v42, %s10407_s19 }
 0xc72   : > { %5672 = vrot.lane.b32.xlu1 %v5642_v14, %s10407_s19 }
 0xc74   : > { %5678 = vrot.lane.b32.xlu0 %v5645_v8, %s10407_s19 }
 0xc76   : > { %5680 = vrot.lane.b32.xlu1 %v5646_v46, %s10407_s19 }
 0xc78   : > { %5682 = vrot.lane.b32.xlu0 %v5647_v59, %s10407_s19  ;;  %s10410_s19 = smov 11  }
 0xcd4   : > { %v5665_v62 = vpop.permute.xlu1 %5664 }
 0xcd6   : > { %v5671_v41 = vpop.permute.xlu0 %5670 }
 0xcd8   : > { %v5661_v28 = vpop.permute.xlu1 %5660 }
 0xcd9   : > { %5706 = vst.msk [vmem:[#allocation2] sm:$0xff] %vm5051_vm9, %v5661_v28 }
 0xcda   : > { %v5663_v15 = vpop.permute.xlu0 %5662 }
 0xcdb   : > { %v5685_v3 = vsel %vm5040_vm3, %v5661_v28, %v5663_v15  ;;  %v5686_v39 = vsel %vm5040_vm3, %v5663_v15, %v5665_v62 }
 0xcdc   : > { %5707 = vst [vmem:[#allocation2 + $0x8] sm:$0xff] %v5685_v3  ;;  %5709 = vst.msk [vmem:[#allocation2 + $0x10] sm:$0xff] %vm5054_vm8, %v5686_v39  ;;  %v5669_v58 = vpop.permute.xlu1 %5668  ;;  %v5868_v39 = vld [vmem:[%s12900_s4] sm:$0xff] }
 0xcdd   : > { %v5688_v53 = vsel %vm5040_vm3, %v5669_v58, %v5671_v41 }
 0xcde   : > { %5712 = vst.msk [vmem:[#allocation2 + $0x60] sm:$0xff] %vm5054_vm8, %v5688_v53  ;;  %v5667_v1 = vpop.permute.xlu0 %5666 }
 0xcdf   : > { %v5687_v21 = vsel %vm5040_vm3, %v5667_v1, %v5669_v58  ;;  %5710 = vst.msk [vmem:[#allocation2 + $0x50] sm:$0xff] %vm5051_vm9, %v5667_v1  ;;  %v5869_v58 = vld [vmem:[%s12900_s4 + $0x8] sm:$0xff] }
 0xce0   : > { %5711 = vst [vmem:[#allocation2 + $0x58] sm:$0xff] %v5687_v21  ;;  %v5677_v47 = vpop.permute.xlu1 %5676  ;;  %v5719_v30 = vld [vmem:[#allocation2] sm:$0xff]  ;;  %v12280_v53 = vpack.c.bf16 %v5869_v58, %v5868_v39 }
 0xce1   : > { %5743 = vrot.lane.b32.xlu0 %v5719_v30, %s12969_s26  ;;  %5870 = vst.msk [vmem:[#allocation2] sm:$0xff] %vm4576_vm1, %v10315_v0 }
 0xce2   : > { %v5675_v25 = vpop.permute.xlu0 %5674  ;;  %9976 = vmatprep.subr.bf16.mxu0 %v12280_v53  ;;  %9980 = vmatprep.subr.bf16.mxu1 %v12280_v53 }
 0xce3   : > { %v5690_v2 = vsel %vm5040_vm3, %v5675_v25, %v5677_v47  ;;  %v12209_v11 = vld [vmem:[#allocation2 + $0x10] sm:$0xff]  ;;  %v5720_v32 = vld [vmem:[#allocation2 + $0x8] sm:$0xff]  ;;  %9978 = vmatpush3.bf16.msra.mxu0 %v12280_v53  ;;  %9982 = vmatpush3.bf16.msra.mxu1 %v12280_v53 }
 0xce4   : > { %5715 = vst.msk [vmem:[#allocation2 + $0xb0] sm:$0xff] %vm5054_vm8, %v5690_v2  ;;  %v5673_v13 = vpop.permute.xlu1 %5672  ;;  %5747 = vrot.lane.b32.xlu1 %v12209_v11, %s12969_s26  ;;  %9984 = vmatprep.subr.bf16.mxu0 %v12280_v53 }
 0xce5   : > { %v5689_v50 = vsel %vm5040_vm3, %v5673_v13, %v5675_v25  ;;  %5713 = vst.msk [vmem:[#allocation2 + $0xa0] sm:$0xff] %vm5051_vm9, %v5673_v13  ;;  %5745 = vrot.lane.b32.xlu0 %v5720_v32, %s12969_s26  ;;  %v5724_v61 = vld [vmem:[#allocation2 + $0x60] sm:$0xff]  ;;  %9988 = vmatprep.subr.bf16.mxu1 %v12280_v53 }
 0xce6   : > { %5714 = vst [vmem:[#allocation2 + $0xa8] sm:$0xff] %v5689_v50  ;;  %v5679_v45 = vpop.permute.xlu0 %5678  ;;  %v5722_v23 = vld [vmem:[#allocation2 + $0x50] sm:$0xff] }
 0xce7   : > { %5716 = vst.msk [vmem:[#allocation2 + $0xf0] sm:$0xff] %vm5051_vm9, %v5679_v45  ;;  %v5723_v35 = vld [vmem:[#allocation2 + $0x58] sm:$0xff] }
 0xce8   : > { %v5681_v40 = vpop.permute.xlu1 %5680  ;;  %5871 = vst.msk [vmem:[#allocation2 + $0x50] sm:$0xff] %vm4576_vm1, %v10315_v0  ;;  %5749 = vrot.lane.b32.xlu1 %v5722_v23, %s12969_s26 }
 0xce9   : > { %v5691_v26 = vsel %vm5040_vm3, %v5679_v45, %v5681_v40  ;;  %5751 = vrot.lane.b32.xlu0 %v5723_v35, %s12969_s26 }
 0xcea   : > { %5717 = vst [vmem:[#allocation2 + $0xf8] sm:$0xff] %v5691_v26  ;;  %v5683_v19 = vpop.permute.xlu0 %5682 }
 0xceb   : > { %v5692_v55 = vsel %vm5040_vm3, %v5681_v40, %v5683_v19  ;;  %v5727_v33 = vld [vmem:[#allocation2 + $0xb0] sm:$0xff] }
 0xcec   : > { %5718 = vst.msk [vmem:[#allocation2 + $0x100] sm:$0xff] %vm5054_vm8, %v5692_v55  ;;  %v5725_v27 = vld [vmem:[#allocation2 + $0xa0] sm:$0xff]  ;;  %5753 = vrot.lane.b32.xlu1 %v5724_v61, %s12969_s26 }
 0xced   : > { %5872 = vst.msk [vmem:[#allocation2 + $0xa0] sm:$0xff] %vm4576_vm1, %v10315_v0  ;;  %v5726_v9 = vld [vmem:[#allocation2 + $0xa8] sm:$0xff]  ;;  %5755 = vrot.lane.b32.xlu0 %v5725_v27, %s12969_s26 }
 0xcee   : > { %v5728_v6 = vld [vmem:[#allocation2 + $0xf0] sm:$0xff] }
 0xcef   : > { %5873 = vst.msk [vmem:[#allocation2 + $0xf0] sm:$0xff] %vm4576_vm1, %v10315_v0 }
 0xcf0   : > { %5757 = vrot.lane.b32.xlu1 %v5726_v9, %s12969_s26 }
 0xcf1   : > { %5759 = vrot.lane.b32.xlu0 %v5727_v33, %s12969_s26  ;;  %v5729_v31 = vld [vmem:[#allocation2 + $0xf8] sm:$0xff] }
 0xcf3   : > { %v5730_v12 = vld [vmem:[#allocation2 + $0x100] sm:$0xff] }
 0xcf4   : > { %5761 = vrot.lane.b32.xlu1 %v5728_v6, %s12969_s26 }
 0xcf5   : > { %5763 = vrot.lane.b32.xlu0 %v5729_v31, %s12969_s26 }
 0xcf8   : > { %5765 = vrot.lane.b32.xlu1 %v5730_v12, %s12969_s26 }
 0xd53   : > { %v5744_v16 = vpop.permute.xlu0 %5743 }
 0xd56   : > { %v5748_v20 = vpop.permute.xlu1 %5747 }
 0xd57   : > { %v5746_v18 = vpop.permute.xlu0 %5745  ;;  %v5789_v8 = vmax.f32 %v12209_v11, %v5748_v20 }
 0xd58   : > { %v5767_v4 = vsel %vm612_vm11, %v5744_v16, %v5746_v18  ;;  %v5768_v29 = vsel %vm612_vm11, %v5746_v18, %v5748_v20 }
 0xd59   : > { %v12234_v7 = vmax.f32 %v5719_v30, %v5767_v4  ;;  %v12236_v5 = vmax.f32 %v5720_v32, %v5768_v29 }
 0xd5a   : > { %v5750_v56 = vpop.permute.xlu1 %5749 }
 0xd5b   : > { %5813 = vrot.lane.b32.xlu1 %v12236_v5, %s10408_s10  ;;  %5811 = vrot.lane.b32.xlu0 %v12234_v7, %s10408_s10  ;;  %v5752_v43 = vpop.permute.xlu0 %5751 }
 0xd5c   : > { %v5769_v38 = vsel %vm612_vm11, %v5750_v56, %v5752_v43 }
 0xd5d   : > { %v5790_v37 = vmax.f32 %v5722_v23, %v5769_v38 }
 0xd5e   : > { %v5754_v52 = vpop.permute.xlu1 %5753 }
 0xd5f   : > { %v5770_v44 = vsel %vm612_vm11, %v5752_v43, %v5754_v52  ;;  %5817 = vrot.lane.b32.xlu0 %v5790_v37, %s10408_s10  ;;  %v5756_v24 = vpop.permute.xlu0 %5755  ;;  %v5792_v46 = vmax.f32 %v5724_v61, %v5754_v52 }
 0xd60   : > { %v12244_v48 = vmax.f32 %v5723_v35, %v5770_v44 }
 0xd62   : > { %v5758_v60 = vpop.permute.xlu1 %5757  ;;  %5819 = vrot.lane.b32.xlu1 %v12244_v48, %s10408_s10 }
 0xd63   : > { %v5771_v49 = vsel %vm612_vm11, %v5756_v24, %v5758_v60  ;;  %v5760_v10 = vpop.permute.xlu0 %5759 }
 0xd64   : > { %v5793_v54 = vmax.f32 %v5725_v27, %v5771_v49  ;;  %v5772_v57 = vsel %vm612_vm11, %v5758_v60, %v5760_v10  ;;  %v12266_v59 = vmax.f32 %v5727_v33, %v5760_v10 }
 0xd65   : > { %v12252_v63 = vmax.f32 %v5726_v9, %v5772_v57 }
 0xd66   : > { %v5762_v34 = vpop.permute.xlu1 %5761  ;;  %5823 = vrot.lane.b32.xlu0 %v5793_v54, %s10408_s10 }
 0xd67   : > { %5825 = vrot.lane.b32.xlu1 %v12252_v63, %s10408_s10  ;;  %v5764_v42 = vpop.permute.xlu0 %5763 }
 0xd68   : > { %v5773_v36 = vsel %vm612_vm11, %v5762_v34, %v5764_v42 }
 0xd69   : > { %v5796_v22 = vmax.f32 %v5728_v6, %v5773_v36 }
 0xd6a   : > { %v5766_v17 = vpop.permute.xlu1 %5765 }
 0xd6b   : > { %v5774_v14 = vsel %vm612_vm11, %v5764_v42, %v5766_v17  ;;  %5829 = vrot.lane.b32.xlu0 %v5796_v22, %s10408_s10  ;;  %v12268_v62 = vmax.f32 %v5730_v12, %v5766_v17  ;;  %vm5996_vm11 = vcmask 154712  }
 0xd6c   : > { %v12258_v51 = vmax.f32 %v5729_v31, %v5774_v14 }
 0xd6e   : > { %5831 = vrot.lane.b32.xlu1 %v12258_v51, %s10408_s10 }
 0xd6f   : > { %5815 = vrot.lane.b32.xlu0 %v5789_v8, %s10408_s10 }
 0xd72   : > { %5821 = vrot.lane.b32.xlu1 %v5792_v46, %s10408_s10 }
 0xd73   : > { %5827 = vrot.lane.b32.xlu0 %v12266_v59, %s10408_s10 }
 0xd76   : > { %5833 = vrot.lane.b32.xlu1 %v12268_v62, %s10408_s10  ;;  %s10411_s10 = smov 31  }
 0xdcd   : > { %v5812_v41 = vpop.permute.xlu0 %5811  ;;  %v5814_v28 = vpop.permute.xlu1 %5813 }
 0xdce   : > { %v5836_v40 = vsel %vm4576_vm1, %v5812_v41, %v5814_v28 }
 0xdcf   : > { %v5856_v19 = vmax.f32 %v12234_v7, %v5836_v40 }
 0xdd1   : > { %v5818_v15 = vpop.permute.xlu0 %5817 }
 0xdd4   : > { %v5820_v3 = vpop.permute.xlu1 %5819 }
 0xdd5   : > { %v5838_v26 = vsel %vm4576_vm1, %v5818_v15, %v5820_v3 }
 0xdd6   : > { %v5859_v55 = vmax.f32 %v5790_v37, %v5838_v26 }
 0xdd8   : > { %v5824_v1 = vpop.permute.xlu0 %5823 }
 0xdd9   : > { %v5826_v21 = vpop.permute.xlu1 %5825 }
 0xdda   : > { %v5840_v11 = vsel %vm4576_vm1, %v5824_v1, %v5826_v21 }
 0xddb   : > { %v5862_v23 = vmax.f32 %v5793_v54, %v5840_v11 }
 0xddd   : > { %v5830_v25 = vpop.permute.xlu0 %5829 }
 0xde0   : > { %v5832_v47 = vpop.permute.xlu1 %5831 }
 0xde1   : > { %v5816_v13 = vpop.permute.xlu0 %5815  ;;  %v5842_v30 = vsel %vm4576_vm1, %v5830_v25, %v5832_v47 }
 0xde2   : > { %v5858_v45 = vmax.f32 %v5789_v8, %v5816_v13  ;;  %v5865_v32 = vmax.f32 %v5796_v22, %v5842_v30  ;;  %v5837_v27 = vsel %vm4576_vm1, %v5814_v28, %v5816_v13 }
 0xde3   : > { %v5857_v6 = vmax.f32 %v12236_v5, %v5837_v27 }
 0xde4   : > { %v5822_v2 = vpop.permute.xlu1 %5821  ;;  %6753 = vrot.lane.b32.xlu0 %v5858_v45, %s12973_s18 }
 0xde5   : > { %v5861_v50 = vmax.f32 %v5792_v46, %v5822_v2  ;;  %v5839_v61 = vsel %vm4576_vm1, %v5820_v3, %v5822_v2  ;;  %v5828_v9 = vpop.permute.xlu0 %5827 }
 0xde6   : > { %v5860_v35 = vmax.f32 %v12244_v48, %v5839_v61  ;;  %v5841_v33 = vsel %vm4576_vm1, %v5826_v21, %v5828_v9  ;;  %v5864_v18 = vmax.f32 %v12266_v59, %v5828_v9 }
 0xde7   : > { %6755 = vrot.lane.b32.xlu1 %v5861_v50, %s12973_s18  ;;  %v5863_v31 = vmax.f32 %v12252_v63, %v5841_v33 }
 0xde8   : > { %5878 = vrot.lane.b32.xlu0 %v5856_v19, %s12974_s13  ;;  %v5834_v12 = vpop.permute.xlu1 %5833 }
 0xde9   : > { %v5843_v20 = vsel %vm4576_vm1, %v5832_v47, %v5834_v12  ;;  %v5867_v56 = vmax.f32 %v12268_v62, %v5834_v12  ;;  %vm6870_vm1 = vcmask 728712  }
 0xdea   : > { %v5866_v16 = vmax.f32 %v12258_v51, %v5843_v20 }
 0xdeb   : > { %5880 = vrot.lane.b32.xlu1 %v5859_v55, %s12974_s13 }
 0xdec   : > { %6001 = vrot.lane.b32.xlu0 %v5856_v19, %s12967_s23 }
 0xdef   : > { %6003 = vrot.lane.b32.xlu1 %v5859_v55, %s12967_s23 }
 0xdf0   : > { %5882 = vrot.lane.b32.xlu0 %v5862_v23, %s12974_s13 }
 0xdf3   : > { %5884 = vrot.lane.b32.xlu1 %v5865_v32, %s12974_s13 }
 0xdf4   : > { %6005 = vrot.lane.b32.xlu0 %v5862_v23, %s12967_s23 }
 0xdf7   : > { %6007 = vrot.lane.b32.xlu1 %v5865_v32, %s12967_s23  ;;  %s12976_s23 = smov 93  }
 0xdf8   : > { %6123 = vrot.lane.b32.xlu0 %v5856_v19, %s12965_s25 }
 0xdfb   : > { %6249 = vrot.lane.b32.xlu1 %v5856_v19, %s12975_s17 }
 0xdfc   : > { %6251 = vrot.lane.b32.xlu0 %v5857_v6, %s12975_s17 }
 0xdff   : > { %6125 = vrot.lane.b32.xlu1 %v5859_v55, %s12965_s25 }
 0xe00   : > { %6253 = vrot.lane.b32.xlu0 %v5859_v55, %s12975_s17 }
 0xe03   : > { %6255 = vrot.lane.b32.xlu1 %v5860_v35, %s12975_s17 }
 0xe04   : > { %6127 = vrot.lane.b32.xlu0 %v5862_v23, %s12965_s25 }
 0xe07   : > { %6257 = vrot.lane.b32.xlu1 %v5862_v23, %s12975_s17 }
 0xe08   : > { %6259 = vrot.lane.b32.xlu0 %v5863_v31, %s12975_s17 }
 0xe0b   : > { %6129 = vrot.lane.b32.xlu1 %v5865_v32, %s12965_s25  ;;  %s10409_s25 = smov 21  }
 0xe0c   : > { %6261 = vrot.lane.b32.xlu0 %v5865_v32, %s12975_s17 }
 0xe0f   : > { %6263 = vrot.lane.b32.xlu1 %v5866_v16, %s12975_s17 }
 0xe10   : > { %6383 = vrot.lane.b32.xlu0 %v5857_v6, %s12976_s23 }
 0xe13   : > { %6385 = vrot.lane.b32.xlu1 %v5860_v35, %s12976_s23 }
 0xe14   : > { %6505 = vrot.lane.b32.xlu0 %v5857_v6, %s12977_s12 }
 0xe17   : > { %6507 = vrot.lane.b32.xlu1 %v5860_v35, %s12977_s12 }
 0xe18   : > { %6387 = vrot.lane.b32.xlu0 %v5863_v31, %s12976_s23 }
 0xe1b   : > { %6389 = vrot.lane.b32.xlu1 %v5866_v16, %s12976_s23 }
 0xe1c   : > { %6509 = vrot.lane.b32.xlu0 %v5863_v31, %s12977_s12 }
 0xe1f   : > { %6511 = vrot.lane.b32.xlu1 %v5866_v16, %s12977_s12 }
 0xe20   : > { %6627 = vrot.lane.b32.xlu0 %v5857_v6, %s10409_s25 }
 0xe23   : > { %6629 = vrot.lane.b32.xlu1 %v5860_v35, %s10409_s25 }
 0xe24   : > { %6631 = vrot.lane.b32.xlu0 %v5863_v31, %s10409_s25 }
 0xe27   : > { %6633 = vrot.lane.b32.xlu1 %v5866_v16, %s10409_s25 }
 0xe28   : > { %6757 = vrot.lane.b32.xlu0 %v5864_v18, %s12973_s18 }
 0xe2b   : > { %6759 = vrot.lane.b32.xlu1 %v5867_v56, %s12973_s18 }
 0xe56   : > { %v12341_v29 = vpop.permute.xlu0 %6753 }
 0xe59   : > { %v12339_v4 = vpop.permute.xlu1 %6755 }
 0xe5a   : > { %v5879_v5 = vpop.permute.xlu0 %5878 }
 0xe5b   : > { %9678 = vmatprep.mubr.msk.f32.mxu0 %vm4898_vm14, %v5879_v5 }
 0xe5d   : > { %v5881_v7 = vpop.permute.xlu1 %5880 }
 0xe5e   : > { %9679 = vmatmul.mubr.msk.f32.vlgmr.msra.gmra.mrb[48].mxu0 %vm4898_vm14, %v5881_v7  ;;  %v6002_v43 = vpop.permute.xlu0 %6001 }
 0xe5f   : > { %9986 = vmatpush3.bf16.msra.mxu0 %v12280_v53  ;;  %9688 = vmatprep.mubr.msk.f32.mxu1 %vm4898_vm14, %v6002_v43  ;;  %v12411_v43 = vld [vmem:[%s12897_s1 + $0xc0] sm:$0xff] }
 0xe60   : > { %9992 = vmatprep.subr.bf16.mxu0 %v12280_v53 }
 0xe61   : > { %v6004_v52 = vpop.permute.xlu1 %6003 }
 0xe62   : > { %9689 = vmatmul.mubr.msk.f32.vlgmr.msra.gmra.mrb[48].mxu1 %vm4898_vm14, %v6004_v52  ;;  %v5883_v44 = vpop.permute.xlu0 %5882 }
 0xe63   : > { %9990 = vmatpush3.bf16.msra.mxu1 %v12280_v53  ;;  %9681 = vmatprep.mubr.msk.f32.mxu0 %vm4898_vm14, %v5883_v44  ;;  %v12421_v44 = vld [vmem:[%s12897_s1 + $0xcc] sm:$0xff] }
 0xe64   : > { %9996 = vmatprep.subr.bf16.mxu1 %v12280_v53 }
 0xe65   : > { %v5885_v38 = vpop.permute.xlu1 %5884 }
 0xe66   : > { %9682 = vmatmul.mubr.msk.f32.gmra.mrb[50].mxu0 %vm4898_vm14, %v5885_v38  ;;  %v6006_v48 = vpop.permute.xlu0 %6005  ;;  %v12416_v38 = vld [vmem:[%s12897_s1 + $0xc8] sm:$0xf] }
 0xe67   : > { %9691 = vmatprep.mubr.msk.f32.mxu1 %vm4898_vm14, %v6006_v48  ;;  %v12432_v48 = vld [vmem:[%s12897_s1 + $0xd8] sm:$0xff] }
 0xe69   : > { %v6008_v37 = vpop.permute.xlu1 %6007 }
 0xe6a   : > { %9692 = vmatmul.mubr.msk.f32.gmra.mrb[50].mxu1 %vm4898_vm14, %v6008_v37  ;;  %v6124_v24 = vpop.permute.xlu0 %6123  ;;  %v12427_v37 = vld [vmem:[%s12897_s1 + $0xd4] sm:$0xf] }
 0xe6b   : > { %9698 = vmatprep.mubr.msk.f32.mxu0 %vm4898_vm14, %v6124_v24  ;;  %v12442_v24 = vld [vmem:[%s12897_s1 + $0xe4] sm:$0xff] }
 0xe6d   : > { %v6250_v60 = vpop.permute.xlu1 %6249 }
 0xe6e   : > { %v6252_v54 = vpop.permute.xlu0 %6251 }
 0xe6f   : > { %v6265_v34 = vsel %vm3597_vm2, %v6250_v60, %v6252_v54  ;;  %v12437_v60 = vld [vmem:[%s12897_s1 + $0xe0] sm:$0xf] }
 0xe70   : > { %9708 = vmatprep.mubr.msk.f32.mxu1 %vm4898_vm14, %v6265_v34  ;;  %v12452_v54 = vld [vmem:[%s12898_s2 + $0x80] sm:$0xff] }
 0xe71   : > { %v6126_v49 = vpop.permute.xlu1 %6125 }
 0xe72   : > { %9699 = vmatmul.mubr.msk.f32.vlgmr.msra.gmra.mrb[52].mxu0 %vm4898_vm14, %v6126_v49  ;;  %v6254_v57 = vpop.permute.xlu0 %6253  ;;  %v12447_v49 = vld [vmem:[%s12897_s1 + $0xec] sm:$0xf] }
 0xe73   : > { %9994 = vmatpush3.bf16.msra.mxu0 %v12280_v53 }
 0xe74   : > { %10000 = vmatprep.subr.bf16.mxu0 %v12280_v53 }
 0xe75   : > { %v6256_v10 = vpop.permute.xlu1 %6255 }
 0xe76   : > { %v6266_v63 = vsel %vm3597_vm2, %v6254_v57, %v6256_v10  ;;  %v6128_v42 = vpop.permute.xlu0 %6127  ;;  %v12457_v10 = vld [vmem:[%s12898_s2 + $0x88] sm:$0xff]  ;;  %v12462_v57 = vld [vmem:[%s12898_s2 + $0x90] sm:$0xff] }
 0xe77   : > { %9709 = vmatmul.mubr.msk.f32.vlgmr.msra.gmra.mrb[52].mxu1 %vm4898_vm14, %v6266_v63  ;;  %9701 = vmatprep.mubr.msk.f32.mxu0 %vm4898_vm14, %v6128_v42  ;;  %v12467_v63 = vld [vmem:[%s12898_s2 + $0x98] sm:$0xff] }
 0xe78   : > { %9998 = vmatpush3.bf16.msra.mxu1 %v12280_v53 }
 0xe79   : > { %v6258_v17 = vpop.permute.xlu1 %6257  ;;  %10004 = vmatprep.subr.bf16.mxu1 %v12280_v53 }
 0xe7a   : > { %v6260_v14 = vpop.permute.xlu0 %6259 }
 0xe7b   : > { %v6267_v22 = vsel %vm3597_vm2, %v6258_v17, %v6260_v14 }
 0xe7c   : > { %9711 = vmatprep.mubr.msk.f32.mxu1 %vm4898_vm14, %v6267_v22 }
 0xe7d   : > { %v6130_v36 = vpop.permute.xlu1 %6129 }
 0xe7e   : > { %9702 = vmatmul.mubr.msk.f32.gmra.mrb[54].mxu0 %vm4898_vm14, %v6130_v36  ;;  %v6262_v8 = vpop.permute.xlu0 %6261 }
 0xe81   : > { %v6264_v51 = vpop.permute.xlu1 %6263 }
 0xe82   : > { %v6268_v46 = vsel %vm3597_vm2, %v6262_v8, %v6264_v51  ;;  %v6384_v62 = vpop.permute.xlu0 %6383  ;;  %vm6378_vm2 = vcmask 400712  }
 0xe83   : > { %9712 = vmatmul.mubr.msk.f32.gmra.mrb[54].mxu1 %vm4898_vm14, %v6268_v46  ;;  %9718 = vmatprep.mubr.msk.f32.mxu0 %vm4898_vm14, %v6384_v62 }
 0xe85   : > { %v6386_v59 = vpop.permute.xlu1 %6385 }
 0xe86   : > { %9719 = vmatmul.mubr.msk.f32.vlgmr.msra.gmra.mrb[56].mxu0 %vm4898_vm14, %v6386_v59  ;;  %v6506_v28 = vpop.permute.xlu0 %6505 }
 0xe87   : > { %10002 = vmatpush3.bf16.msra.mxu0 %v12280_v53  ;;  %9728 = vmatprep.mubr.msk.f32.mxu1 %vm4898_vm14, %v6506_v28 }
 0xe89   : > { %v6508_v41 = vpop.permute.xlu1 %6507 }
 0xe8a   : > { %9729 = vmatmul.mubr.msk.f32.vlgmr.msra.gmra.mrb[56].mxu1 %vm4898_vm14, %v6508_v41  ;;  %v6388_v3 = vpop.permute.xlu0 %6387 }
 0xe8b   : > { %10006 = vmatpush3.bf16.msra.mxu1 %v12280_v53  ;;  %9721 = vmatprep.mubr.msk.f32.mxu0 %vm4898_vm14, %v6388_v3 }
 0xe8d   : > { %v6390_v15 = vpop.permute.xlu1 %6389 }
 0xe8e   : > { %9722 = vmatmul.mubr.msk.f32.gmra.mrb[58].mxu0 %vm4898_vm14, %v6390_v15  ;;  %v6510_v58 = vpop.permute.xlu0 %6509 }
 0xe8f   : > { %9731 = vmatprep.mubr.msk.f32.mxu1 %vm4898_vm14, %v6510_v58 }
 0xe91   : > { %v6512_v39 = vpop.permute.xlu1 %6511 }
 0xe92   : > { %9732 = vmatmul.mubr.msk.f32.gmra.mrb[58].mxu1 %vm4898_vm14, %v6512_v39  ;;  %v6628_v21 = vpop.permute.xlu0 %6627 }
 0xe93   : > { %9748 = vmatprep.mubr.msk.f32.mxu1 %vm4898_vm14, %v12341_v29  ;;  %9738 = vmatprep.mubr.msk.f32.mxu0 %vm4898_vm14, %v6628_v21 }
 0xe95   : > { %v6630_v1 = vpop.permute.xlu1 %6629 }
 0xe96   : > { %9739 = vmatmul.mubr.msk.f32.vlgmr.msra.gmra.mrb[60].mxu0 %vm4898_vm14, %v6630_v1  ;;  %9749 = vmatmul.mubr.msk.f32.vlgmr.msra.gmra.mrb[60].mxu1 %vm4898_vm14, %v12339_v4  ;;  %v6632_v47 = vpop.permute.xlu0 %6631 }
 0xe97   : > { %9741 = vmatprep.mubr.msk.f32.mxu0 %vm4898_vm14, %v6632_v47 }
 0xe99   : > { %v6634_v53 = vpop.permute.xlu1 %6633 }
 0xe9a   : > { %9742 = vmatmul.mubr.msk.f32.gmra.mrb[62].mxu0 %vm4898_vm14, %v6634_v53  ;;  %v6758_v2 = vpop.permute.xlu0 %6757 }
 0xe9b   : > { %9751 = vmatprep.mubr.msk.f32.mxu1 %vm4898_vm14, %v6758_v2 }
 0xe9d   : > { %v6760_v25 = vpop.permute.xlu1 %6759 }
 0xe9e   : > { %9752 = vmatmul.mubr.msk.f32.gmra.mrb[62].mxu1 %vm4898_vm14, %v6760_v25  ;;  %vm6744_vm14 = vcmask 646712  }
 0xf31   : > { %v9680_v13 = vpop.f32.mrb[48].mxu0 }
 0xf32   : > { %5986 = vrot.lane.b32.xlu1 %v9680_v13, %s10410_s19  ;;  %v5961_v50 = vpop.f32.mrb[49].mxu0 }
 0xf33   : > { %5984 = vrot.lane.b32.xlu0 %v5961_v50, %s10410_s19 }
 0xf35   : > { %v9690_v45 = vpop.f32.mrb[48].mxu1 }
 0xf36   : > { %6108 = vrot.lane.b32.xlu1 %v9690_v45, %s10409_s25  ;;  %v6083_v40 = vpop.f32.mrb[49].mxu1 }
 0xf37   : > { %6106 = vrot.lane.b32.xlu0 %v6083_v40, %s10409_s25 }
 0xf39   : > { %v9683_v26 = vpop.f32.mrb[50].mxu0 }
 0xf3a   : > { %5990 = vrot.lane.b32.xlu1 %v9683_v26, %s10410_s19  ;;  %v5971_v19 = vpop.f32.mrb[51].mxu0 }
 0xf3b   : > { %5988 = vrot.lane.b32.xlu0 %v5971_v19, %s10410_s19 }
 0xf3d   : > { %v9693_v55 = vpop.f32.mrb[50].mxu1 }
 0xf3e   : > { %6112 = vrot.lane.b32.xlu1 %v9693_v55, %s10409_s25  ;;  %v6093_v11 = vpop.f32.mrb[51].mxu1 }
 0xf3f   : > { %6110 = vrot.lane.b32.xlu0 %v6093_v11, %s10409_s25 }
 0xf45   : > { %v9700_v30 = vpop.f32.mrb[52].mxu0 }
 0xf46   : > { %6230 = vrot.lane.b32.xlu1 %v9700_v30, %s10411_s10  ;;  %v6205_v23 = vpop.f32.mrb[53].mxu0 }
 0xf47   : > { %6228 = vrot.lane.b32.xlu0 %v6205_v23, %s10411_s10 }
 0xf4a   : > { %v9710_v32 = vpop.f32.mrb[52].mxu1 }
 0xf4b   : > { %6368 = vrot.lane.b32.xlu1 %v9710_v32, %s12978_s3  ;;  %v6343_v27 = vpop.f32.mrb[53].mxu1 }
 0xf4c   : > { %6366 = vrot.lane.b32.xlu0 %v6343_v27, %s12978_s3 }
 0xf51   : > { %v9703_v6 = vpop.f32.mrb[54].mxu0 }
 0xf52   : > { %6234 = vrot.lane.b32.xlu1 %v9703_v6, %s10411_s10  ;;  %v6215_v61 = vpop.f32.mrb[55].mxu0 }
 0xf53   : > { %6232 = vrot.lane.b32.xlu0 %v6215_v61, %s10411_s10 }
 0xf56   : > { %v9713_v35 = vpop.f32.mrb[54].mxu1 }
 0xf57   : > { %6372 = vrot.lane.b32.xlu1 %v9713_v35, %s12978_s3  ;;  %v6353_v9 = vpop.f32.mrb[55].mxu1 }
 0xf58   : > { %6370 = vrot.lane.b32.xlu0 %v6353_v9, %s12978_s3 }
 0xf59   : > { %v9720_v33 = vpop.f32.mrb[56].mxu0 }
 0xf5a   : > { %v6465_v12 = vpop.f32.mrb[57].mxu0 }
 0xf5b   : > { %6490 = vrot.lane.b32.xlu1 %v9720_v33, %s12979_s0 }
 0xf5c   : > { %6488 = vrot.lane.b32.xlu0 %v6465_v12, %s12979_s0 }
 0xf5d   : > { %v9730_v31 = vpop.f32.mrb[56].mxu1 }
 0xf5e   : > { %v6587_v20 = vpop.f32.mrb[57].mxu1 }
 0xf5f   : > { %6612 = vrot.lane.b32.xlu1 %v9730_v31, %s12962_s20 }
 0xf60   : > { %6610 = vrot.lane.b32.xlu0 %v6587_v20, %s12962_s20 }
 0xf61   : > { %v9723_v16 = vpop.f32.mrb[58].mxu0 }
 0xf62   : > { %v6475_v56 = vpop.f32.mrb[59].mxu0 }
 0xf63   : > { %6494 = vrot.lane.b32.xlu1 %v9723_v16, %s12979_s0 }
 0xf64   : > { %6492 = vrot.lane.b32.xlu0 %v6475_v56, %s12979_s0 }
 0xf65   : > { %v9733_v18 = vpop.f32.mrb[58].mxu1 }
 0xf66   : > { %v6597_v4 = vpop.f32.mrb[59].mxu1 }
 0xf67   : > { %6616 = vrot.lane.b32.xlu1 %v9733_v18, %s12962_s20 }
 0xf68   : > { %6614 = vrot.lane.b32.xlu0 %v6597_v4, %s12962_s20 }
 0xf69   : > { %v9740_v29 = vpop.f32.mrb[60].mxu0  ;;  %v9750_v7 = vpop.f32.mrb[60].mxu1 }
 0xf6a   : > { %v6835_v5 = vpop.f32.mrb[61].mxu1  ;;  %v6709_v52 = vpop.f32.mrb[61].mxu0 }
 0xf6b   : > { %6734 = vrot.lane.b32.xlu1 %v9740_v29, %s12971_s24 }
 0xf6c   : > { %6732 = vrot.lane.b32.xlu0 %v6709_v52, %s12971_s24 }
 0xf6d   : > { %v9743_v34 = vpop.f32.mrb[62].mxu0 }
 0xf6e   : > { %v6719_v17 = vpop.f32.mrb[63].mxu0 }
 0xf6f   : > { %6860 = vrot.lane.b32.xlu1 %v9750_v7, %s12980_s14 }
 0xf70   : > { %6858 = vrot.lane.b32.xlu0 %v6835_v5, %s12980_s14 }
 0xf71   : > { %v9753_v42 = vpop.f32.mrb[62].mxu1 }
 0xf72   : > { %v6845_v36 = vpop.f32.mrb[63].mxu1 }
 0xf73   : > { %6738 = vrot.lane.b32.xlu1 %v9743_v34, %s12971_s24 }
 0xf74   : > { %6736 = vrot.lane.b32.xlu0 %v6719_v17, %s12971_s24 }
 0xf77   : > { %6864 = vrot.lane.b32.xlu1 %v9753_v42, %s12980_s14 }
 0xf78   : > { %6862 = vrot.lane.b32.xlu0 %v6845_v36, %s12980_s14 }
 0xfa4   : > { %v5987_v14 = vpop.permute.xlu1 %5986 }
 0xfa5   : > { %5998 = vst.msk [vmem:[#allocation2 + $0x50] sm:$0xff] %vm5996_vm11, %v5987_v14  ;;  %v5985_v22 = vpop.permute.xlu0 %5984 }
 0xfa6   : > { %5997 = vst.msk [vmem:[#allocation2] sm:$0xff] %vm5996_vm11, %v5985_v22 }
 0xfa8   : > { %v6109_v51 = vpop.permute.xlu1 %6108 }
 0xfa9   : > { %6120 = vst.msk [vmem:[#allocation2 + $0x50] sm:$0xff] %vm6118_vm12, %v6109_v51  ;;  %v6107_v8 = vpop.permute.xlu0 %6106 }
 0xfaa   : > { %6119 = vst.msk [vmem:[#allocation2] sm:$0xff] %vm6118_vm12, %v6107_v8 }
 0xfac   : > { %v5991_v46 = vpop.permute.xlu1 %5990 }
 0xfad   : > { %6000 = vst.msk [vmem:[#allocation2 + $0xf0] sm:$0xff] %vm5996_vm11, %v5991_v46  ;;  %v5989_v59 = vpop.permute.xlu0 %5988 }
 0xfae   : > { %5999 = vst.msk [vmem:[#allocation2 + $0xa0] sm:$0xff] %vm5996_vm11, %v5989_v59 }
 0xfb0   : > { %v6113_v62 = vpop.permute.xlu1 %6112 }
 0xfb1   : > { %6122 = vst.msk [vmem:[#allocation2 + $0xf0] sm:$0xff] %vm6118_vm12, %v6113_v62  ;;  %v6111_v41 = vpop.permute.xlu0 %6110 }
 0xfb2   : > { %6121 = vst.msk [vmem:[#allocation2 + $0xa0] sm:$0xff] %vm6118_vm12, %v6111_v41 }
 0xfb8   : > { %v6231_v28 = vpop.permute.xlu1 %6230 }
 0xfb9   : > { %6242 = vst.msk [vmem:[#allocation2 + $0x50] sm:$0xff] %vm6240_vm15, %v6231_v28  ;;  %v6229_v15 = vpop.permute.xlu0 %6228 }
 0xfba   : > { %6241 = vst.msk [vmem:[#allocation2] sm:$0xff] %vm6240_vm15, %v6229_v15 }
 0xfbd   : > { %v6369_v3 = vpop.permute.xlu1 %6368 }
 0xfbe   : > { %6380 = vst.msk [vmem:[#allocation2 + $0x50] sm:$0xff] %vm6378_vm2, %v6369_v3  ;;  %v6367_v39 = vpop.permute.xlu0 %6366 }
 0xfbf   : > { %6379 = vst.msk [vmem:[#allocation2] sm:$0xff] %vm6378_vm2, %v6367_v39 }
 0xfc4   : > { %v6235_v58 = vpop.permute.xlu1 %6234 }
 0xfc5   : > { %6244 = vst.msk [vmem:[#allocation2 + $0xf0] sm:$0xff] %vm6240_vm15, %v6235_v58  ;;  %v6233_v1 = vpop.permute.xlu0 %6232 }
 0xfc6   : > { %6243 = vst.msk [vmem:[#allocation2 + $0xa0] sm:$0xff] %vm6240_vm15, %v6233_v1 }
 0xfc9   : > { %v6373_v21 = vpop.permute.xlu1 %6372 }
 0xfca   : > { %6382 = vst.msk [vmem:[#allocation2 + $0xf0] sm:$0xff] %vm6378_vm2, %v6373_v21  ;;  %v6371_v53 = vpop.permute.xlu0 %6370 }
 0xfcb   : > { %6381 = vst.msk [vmem:[#allocation2 + $0xa0] sm:$0xff] %vm6378_vm2, %v6371_v53 }
 0xfcd   : > { %v6491_v47 = vpop.permute.xlu1 %6490 }
 0xfce   : > { %6502 = vst.msk [vmem:[#allocation2 + $0x50] sm:$0xff] %vm6500_vm10, %v6491_v47  ;;  %v6489_v25 = vpop.permute.xlu0 %6488 }
 0xfcf   : > { %6501 = vst.msk [vmem:[#allocation2] sm:$0xff] %vm6500_vm10, %v6489_v25 }
 0xfd1   : > { %v6613_v2 = vpop.permute.xlu1 %6612 }
 0xfd2   : > { %6624 = vst.msk [vmem:[#allocation2 + $0x50] sm:$0xff] %vm6622_vm13, %v6613_v2  ;;  %v6611_v13 = vpop.permute.xlu0 %6610 }
 0xfd3   : > { %6623 = vst.msk [vmem:[#allocation2] sm:$0xff] %vm6622_vm13, %v6611_v13 }
 0xfd5   : > { %v6495_v50 = vpop.permute.xlu1 %6494 }
 0xfd6   : > { %6504 = vst.msk [vmem:[#allocation2 + $0xf0] sm:$0xff] %vm6500_vm10, %v6495_v50  ;;  %v6493_v45 = vpop.permute.xlu0 %6492 }
 0xfd7   : > { %6503 = vst.msk [vmem:[#allocation2 + $0xa0] sm:$0xff] %vm6500_vm10, %v6493_v45 }
 0xfd9   : > { %v6617_v40 = vpop.permute.xlu1 %6616 }
 0xfda   : > { %6626 = vst.msk [vmem:[#allocation2 + $0xf0] sm:$0xff] %vm6622_vm13, %v6617_v40  ;;  %v6615_v26 = vpop.permute.xlu0 %6614 }
 0xfdb   : > { %6625 = vst.msk [vmem:[#allocation2 + $0xa0] sm:$0xff] %vm6622_vm13, %v6615_v26 }
 0xfdd   : > { %v6735_v19 = vpop.permute.xlu1 %6734 }
 0xfde   : > { %6746 = vst.msk [vmem:[#allocation2 + $0x50] sm:$0xff] %vm6744_vm14, %v6735_v19  ;;  %v6733_v55 = vpop.permute.xlu0 %6732 }
 0xfdf   : > { %6745 = vst.msk [vmem:[#allocation2] sm:$0xff] %vm6744_vm14, %v6733_v55 }
 0xfe1   : > { %v6861_v11 = vpop.permute.xlu1 %6860 }
 0xfe2   : > { %6872 = vst.msk [vmem:[#allocation2 + $0x50] sm:$0xff] %vm6870_vm1, %v6861_v11  ;;  %v6859_v30 = vpop.permute.xlu0 %6858 }
 0xfe3   : > { %6871 = vst.msk [vmem:[#allocation2] sm:$0xff] %vm6870_vm1, %v6859_v30 }
 0xfe5   : > { %v6739_v23 = vpop.permute.xlu1 %6738 }
 0xfe6   : > { %6748 = vst.msk [vmem:[#allocation2 + $0xf0] sm:$0xff] %vm6744_vm14, %v6739_v23  ;;  %v6737_v32 = vpop.permute.xlu0 %6736 }
 0xfe7   : > { %6747 = vst.msk [vmem:[#allocation2 + $0xa0] sm:$0xff] %vm6744_vm14, %v6737_v32 }
 0xfe9   : > { %v6865_v27 = vpop.permute.xlu1 %6864 }
 0xfea   : > { %6874 = vst.msk [vmem:[#allocation2 + $0xf0] sm:$0xff] %vm6870_vm1, %v6865_v27  ;;  %v6863_v6 = vpop.permute.xlu0 %6862 }
 0xfeb   : > { %6873 = vst.msk [vmem:[#allocation2 + $0xa0] sm:$0xff] %vm6870_vm1, %v6863_v6 }
 0xfec   : > { %v6970_v35 = vld [vmem:[#allocation2] sm:$0xff]  ;;  %vm6893_vm4 = vcmask 654336   ;;  %s10412_s24 = smov 117   ;;  %v6971_v33 = vld [vmem:[#allocation2 + $0x50] sm:$0xff]  ;;  %s10413_s22 = smov 116   ;;  %v9133_v12 = vcombine.high %v12411_v43, %v12421_v44  ;;  %v9134_v31 = vcombine.low %v12416_v38, %v12427_v37  ;;  %v10420_v20 = vmov 0  }
 0xfed   : > { %6978 = vrot.lane.b32.xlu0 %v6970_v35, %s10412_s24  ;;  %6894 = vst.msk [vmem:[#allocation9] sm:$0xff] %vm6893_vm4, %v6970_v35  ;;  %6895 = vst.msk [vmem:[#allocation9 + $0x8] sm:$0xff] %vm6893_vm4, %v6971_v33  ;;  %s10414_s18 = smov 127   ;;  %s10415_s13 = smov 108   ;;  %10209 = vset.pattern.permute.xlu1 %v10420_v20  ;;  %vm7318_vm5 = vcmask 744536   ;;  %vm7385_vm6 = vcmask 64512  }
 0xfee   : > { %s10416_s17 = smov 126   ;;  %s10417_s23 = smov 107   ;;  %7232 = vmatprep.mubr.bf16.mxu0 %v9133_v12  ;;  %9758 = vmatprep.mubr.msk.bf16.mxu1 %vm2902_vm0, %v9134_v31  ;;  %vm7368_vm7 = vcmask 343040   ;;  %vm7495_vm3 = vcmask 89144   ;;  %vm7617_vm8 = vcmask 138344   ;;  %vm7739_vm9 = vcmask 187544  }
 0xfef   : > { %s10418_s20 = smov 118   ;;  %s10419_s25 = smov 106   ;;  %10208 = vset.pattern.permute.xlu0 %v10420_v20  ;;  %vm7861_vm11 = vcmask 236744  }
 0xff0   : > { %s10421_s19 = smov 11   ;;  %s10422_s10 = smov 118  }
 0xff1   : > { %v6973_v9 = vld [vmem:[#allocation2 + $0xf0] sm:$0xff]  ;;  %6980 = vrot.lane.b32.xlu0 %v6971_v33, %s10412_s24  ;;  %s10423_s14 = smov 117  }
 0xff2   : > { %v6972_v61 = vld [vmem:[#allocation2 + $0xa0] sm:$0xff]  ;;  %6897 = vst.msk [vmem:[#allocation9 + $0x18] sm:$0xff] %vm6893_vm4, %v6973_v9 }
 0xff3   : > { %6982 = vrot.lane.b32.xlu1 %v6972_v61, %s10412_s24  ;;  %6896 = vst.msk [vmem:[#allocation9 + $0x10] sm:$0xff] %vm6893_vm4, %v6972_v61 }
 0xff4   : > { %v7090_v5 = vld [vmem:[#allocation9] sm:$0xff]  ;;  %v7091_v52 = vld [vmem:[#allocation9 + $0x8] sm:$0xff] }
 0xff5   : > { %7002 = vrot.lane.b32.xlu0 %v6970_v35, %s10413_s22 }
 0xff7   : > { %6984 = vrot.lane.b32.xlu1 %v6973_v9, %s10412_s24  ;;  %s12981_s24 = smov 97  }
 0xff9   : > { %6906 = vrot.lane.b32.xlu0 %v6970_v35, %s10414_s18  ;;  %v7093_v42 = vld [vmem:[#allocation9 + $0x18] sm:$0xff] }
 0xffa   : > { %v7092_v17 = vld [vmem:[#allocation9 + $0x10] sm:$0xff] }
 0xffb   : > { %7004 = vrot.lane.b32.xlu1 %v6971_v33, %s10413_s22  ;;  %v7127_v8 = vpack.c.bf16 %v7093_v42, %v7092_v17 }
 0xffd   : > { %7006 = vrot.lane.b32.xlu0 %v6972_v61, %s10413_s22 }
 0xfff   : > { %6908 = vrot.lane.b32.xlu1 %v6971_v33, %s10414_s18 }
0x1001   : > { %6910 = vrot.lane.b32.xlu0 %v6972_v61, %s10414_s18 }
0x1003   : > { %7008 = vrot.lane.b32.xlu1 %v6973_v9, %s10413_s22  ;;  %s12982_s22 = smov 77  }
0x1005   : > { %7026 = vrot.lane.b32.xlu0 %v6970_v35, %s10415_s13 }
0x1007   : > { %6912 = vrot.lane.b32.xlu1 %v6973_v9, %s10414_s18  ;;  %s10425_s18 = smov 13  }
0x1009   : > { %6930 = vrot.lane.b32.xlu0 %v6970_v35, %s10416_s17 }
0x100b   : > { %7028 = vrot.lane.b32.xlu1 %v6971_v33, %s10415_s13 }
0x100d   : > { %7030 = vrot.lane.b32.xlu0 %v6972_v61, %s10415_s13 }
0x100f   : > { %6932 = vrot.lane.b32.xlu1 %v6971_v33, %s10416_s17 }
0x1011   : > { %6934 = vrot.lane.b32.xlu0 %v6972_v61, %s10416_s17 }
0x1013   : > { %7032 = vrot.lane.b32.xlu1 %v6973_v9, %s10415_s13  ;;  %s12983_s13 = smov 19  }
0x1015   : > { %7050 = vrot.lane.b32.xlu0 %v6970_v35, %s10417_s23 }
0x1017   : > { %6936 = vrot.lane.b32.xlu1 %v6973_v9, %s10416_s17 }
0x1019   : > { %6954 = vrot.lane.b32.xlu0 %v6970_v35, %s10418_s20 }
0x101b   : > { %7052 = vrot.lane.b32.xlu1 %v6971_v33, %s10417_s23 }
0x101d   : > { %7054 = vrot.lane.b32.xlu0 %v6972_v61, %s10417_s23 }
0x101f   : > { %6956 = vrot.lane.b32.xlu1 %v6971_v33, %s10418_s20 }
0x1021   : > { %6958 = vrot.lane.b32.xlu0 %v6972_v61, %s10418_s20 }
0x1023   : > { %7056 = vrot.lane.b32.xlu1 %v6973_v9, %s10417_s23 }
0x1025   : > { %7074 = vrot.lane.b32.xlu0 %v6970_v35, %s10419_s25 }
0x1027   : > { %6960 = vrot.lane.b32.xlu1 %v6973_v9, %s10418_s20 }
0x1029   : > { %7078 = vrot.lane.b32.xlu0 %v6972_v61, %s10419_s25 }
0x102b   : > { %7076 = vrot.lane.b32.xlu1 %v6971_v33, %s10419_s25 }
0x102d   : > { %7146 = vperm.xlu0 %10208, %v12452_v54  }
0x102f   : > { %7080 = vrot.lane.b32.xlu1 %v6973_v9, %s10419_s25 }
0x1031   : > { %7161 = vperm.xlu0 %10208, %v12467_v63  }
0x1033   : > { %7151 = vperm.xlu1 %10209, %v12457_v10   ;;  %v7126_v10 = vpack.c.bf16 %v7091_v52, %v7090_v5 }
0x1037   : > { %7156 = vperm.xlu1 %10209, %v12462_v57  }
0x105f   : > { %v6979_v56 = vpop.permute.xlu0 %6978 }
0x1060   : > { %6990 = vst.msk [vmem:[#allocation9 + $0x80] sm:$0xff] %vm6893_vm4, %v6979_v56 }
0x1063   : > { %v6981_v4 = vpop.permute.xlu0 %6980 }
0x1064   : > { %6991 = vst.msk [vmem:[#allocation9 + $0x88] sm:$0xff] %vm6893_vm4, %v6981_v4 }
0x1065   : > { %v6983_v16 = vpop.permute.xlu1 %6982 }
0x1066   : > { %6992 = vst.msk [vmem:[#allocation9 + $0x90] sm:$0xff] %vm6893_vm4, %v6983_v16 }
0x1067   : > { %v7003_v7 = vpop.permute.xlu0 %7002  ;;  %v7106_v54 = vld [vmem:[#allocation9 + $0x80] sm:$0xff] }
0x1068   : > { %7014 = vst.msk [vmem:[#allocation9 + $0xa0] sm:$0xff] %vm6893_vm4, %v7003_v7 }
0x1069   : > { %v6985_v18 = vpop.permute.xlu1 %6984 }
0x106a   : > { %6993 = vst.msk [vmem:[#allocation9 + $0x98] sm:$0xff] %vm6893_vm4, %v6985_v18 }
0x106b   : > { %v6907_v37 = vpop.permute.xlu0 %6906  ;;  %v7107_v34 = vld [vmem:[#allocation9 + $0x88] sm:$0xff] }
0x106c   : > { %6918 = vst.msk [vmem:[#allocation9 + $0x20] sm:$0xff] %vm6893_vm4, %v6907_v37  ;;  %v7134_v63 = vpack.c.bf16 %v7107_v34, %v7106_v54 }
0x106d   : > { %v7005_v29 = vpop.permute.xlu1 %7004  ;;  %v7108_v36 = vld [vmem:[#allocation9 + $0x90] sm:$0xff] }
0x106e   : > { %7015 = vst.msk [vmem:[#allocation9 + $0xa8] sm:$0xff] %vm6893_vm4, %v7005_v29  ;;  %9366 = vmatprep.subr.bf16.mxu0 %v7134_v63 }
0x106f   : > { %v7007_v51 = vpop.permute.xlu0 %7006  ;;  %9367 = vmatpush3.bf16.msra.mxu0 %v7126_v10  ;;  %v7110_v46 = vld [vmem:[#allocation9 + $0xa0] sm:$0xff] }
0x1070   : > { %7016 = vst.msk [vmem:[#allocation9 + $0xb0] sm:$0xff] %vm6893_vm4, %v7007_v51 }
0x1071   : > { %v6909_v38 = vpop.permute.xlu1 %6908  ;;  %v7109_v57 = vld [vmem:[#allocation9 + $0x98] sm:$0xff] }
0x1072   : > { %6919 = vst.msk [vmem:[#allocation9 + $0x28] sm:$0xff] %vm6893_vm4, %v6909_v38  ;;  %v7135_v14 = vpack.c.bf16 %v7109_v57, %v7108_v36 }
0x1073   : > { %v6911_v28 = vpop.permute.xlu0 %6910  ;;  %v7094_v15 = vld [vmem:[#allocation9 + $0x20] sm:$0xff] }
0x1074   : > { %9368 = vmatprep.subr.bf16.mxu0 %v7135_v14  ;;  %6920 = vst.msk [vmem:[#allocation9 + $0x30] sm:$0xff] %vm6893_vm4, %v6911_v28 }
0x1075   : > { %v7009_v22 = vpop.permute.xlu1 %7008  ;;  %v7111_v59 = vld [vmem:[#allocation9 + $0xa8] sm:$0xff]  ;;  %9369 = vmatpush3.bf16.msra.mxu0 %v7127_v8 }
0x1076   : > { %7017 = vst.msk [vmem:[#allocation9 + $0xb8] sm:$0xff] %vm6893_vm4, %v7009_v22  ;;  %v7136_v62 = vpack.c.bf16 %v7111_v59, %v7110_v46  ;;  %v9132_v59 = vcombine.low %v12411_v43, %v12421_v44  ;;  %v9137_v43 = vcombine.low %v12437_v60, %v12447_v49 }
0x1077   : > { %v7027_v1 = vpop.permute.xlu0 %7026  ;;  %v7112_v21 = vld [vmem:[#allocation9 + $0xb0] sm:$0xff] }
0x1078   : > { %9370 = vmatprep.subr.bf16.mxu0 %v7136_v62  ;;  %7038 = vst.msk [vmem:[#allocation9 + $0xc0] sm:$0xff] %vm6893_vm4, %v7027_v1  ;;  %v9136_v62 = vcombine.high %v12432_v48, %v12442_v24  ;;  %v9135_v1 = vcombine.low %v12432_v48, %v12442_v24 }
0x1079   : > { %v6913_v41 = vpop.permute.xlu1 %6912  ;;  %v7095_v3 = vld [vmem:[#allocation9 + $0x28] sm:$0xff] }
0x107a   : > { %6921 = vst.msk [vmem:[#allocation9 + $0x38] sm:$0xff] %vm6893_vm4, %v6913_v41  ;;  %v7128_v39 = vpack.c.bf16 %v7095_v3, %v7094_v15 }
0x107b   : > { %v6931_v2 = vpop.permute.xlu0 %6930  ;;  %v7096_v13 = vld [vmem:[#allocation9 + $0x30] sm:$0xff] }
0x107c   : > { %9371 = vmatpush3.bf16.msra.mxu0 %v7128_v39  ;;  %6942 = vst.msk [vmem:[#allocation9 + $0x40] sm:$0xff] %vm6893_vm4, %v6931_v2 }
0x107d   : > { %v7029_v58 = vpop.permute.xlu1 %7028  ;;  %v7113_v53 = vld [vmem:[#allocation9 + $0xb8] sm:$0xff] }
0x107e   : > { %7039 = vst.msk [vmem:[#allocation9 + $0xc8] sm:$0xff] %vm6893_vm4, %v7029_v58  ;;  %v7137_v47 = vpack.c.bf16 %v7113_v53, %v7112_v21 }
0x107f   : > { %v7031_v26 = vpop.permute.xlu0 %7030  ;;  %v7114_v19 = vld [vmem:[#allocation9 + $0xc0] sm:$0xff] }
0x1080   : > { %9372 = vmatprep.subr.bf16.mxu0 %v7137_v47  ;;  %7040 = vst.msk [vmem:[#allocation9 + $0xd0] sm:$0xff] %vm6893_vm4, %v7031_v26 }
0x1081   : > { %v6933_v25 = vpop.permute.xlu1 %6932  ;;  %v7097_v50 = vld [vmem:[#allocation9 + $0x38] sm:$0xff] }
0x1082   : > { %6943 = vst.msk [vmem:[#allocation9 + $0x48] sm:$0xff] %vm6893_vm4, %v6933_v25  ;;  %v7129_v45 = vpack.c.bf16 %v7097_v50, %v7096_v13 }
0x1083   : > { %v6935_v23 = vpop.permute.xlu0 %6934  ;;  %v7098_v32 = vld [vmem:[#allocation9 + $0x40] sm:$0xff] }
0x1084   : > { %9373 = vmatpush3.bf16.msra.mxu0 %v7129_v45  ;;  %6944 = vst.msk [vmem:[#allocation9 + $0x50] sm:$0xff] %vm6893_vm4, %v6935_v23 }
0x1085   : > { %v7033_v40 = vpop.permute.xlu1 %7032  ;;  %v7115_v55 = vld [vmem:[#allocation9 + $0xc8] sm:$0xff] }
0x1086   : > { %7041 = vst.msk [vmem:[#allocation9 + $0xd8] sm:$0xff] %vm6893_vm4, %v7033_v40  ;;  %v7138_v11 = vpack.c.bf16 %v7115_v55, %v7114_v19 }
0x1087   : > { %v7051_v35 = vpop.permute.xlu0 %7050  ;;  %v7116_v9 = vld [vmem:[#allocation9 + $0xd0] sm:$0xff] }
0x1088   : > { %9374 = vmatprep.subr.bf16.mxu0 %v7138_v11  ;;  %7062 = vst.msk [vmem:[#allocation9 + $0xe0] sm:$0xff] %vm6893_vm4, %v7051_v35 }
0x1089   : > { %v6937_v30 = vpop.permute.xlu1 %6936  ;;  %v7099_v27 = vld [vmem:[#allocation9 + $0x48] sm:$0xff] }
0x108a   : > { %6945 = vst.msk [vmem:[#allocation9 + $0x58] sm:$0xff] %vm6893_vm4, %v6937_v30  ;;  %v7130_v6 = vpack.c.bf16 %v7099_v27, %v7098_v32 }
0x108b   : > { %v6955_v20 = vpop.permute.xlu0 %6954  ;;  %v7100_v16 = vld [vmem:[#allocation9 + $0x50] sm:$0xff] }
0x108c   : > { %9375 = vmatpush3.bf16.msra.mxu0 %v7130_v6  ;;  %6966 = vst.msk [vmem:[#allocation9 + $0x60] sm:$0xff] %vm6893_vm4, %v6955_v20 }
0x108d   : > { %v7053_v61 = vpop.permute.xlu1 %7052  ;;  %v7117_v33 = vld [vmem:[#allocation9 + $0xd8] sm:$0xff] }
0x108e   : > { %7063 = vst.msk [vmem:[#allocation9 + $0xe8] sm:$0xff] %vm6893_vm4, %v7053_v61  ;;  %v7139_v12 = vpack.c.bf16 %v7117_v33, %v7116_v9 }
0x108f   : > { %v7055_v29 = vpop.permute.xlu0 %7054  ;;  %v7118_v7 = vld [vmem:[#allocation9 + $0xe0] sm:$0xff] }
0x1090   : > { %9376 = vmatprep.subr.bf16.mxu0 %v7139_v12  ;;  %7064 = vst.msk [vmem:[#allocation9 + $0xf0] sm:$0xff] %vm6893_vm4, %v7055_v29 }
0x1091   : > { %v6957_v31 = vpop.permute.xlu1 %6956  ;;  %v7101_v56 = vld [vmem:[#allocation9 + $0x58] sm:$0xff] }
0x1092   : > { %6967 = vst.msk [vmem:[#allocation9 + $0x68] sm:$0xff] %vm6893_vm4, %v6957_v31  ;;  %v7131_v18 = vpack.c.bf16 %v7101_v56, %v7100_v16 }
0x1093   : > { %v6959_v37 = vpop.permute.xlu0 %6958  ;;  %v7102_v54 = vld [vmem:[#allocation9 + $0x60] sm:$0xff] }
0x1094   : > { %9377 = vmatpush3.bf16.msra.mxu0 %v7131_v18  ;;  %6968 = vst.msk [vmem:[#allocation9 + $0x70] sm:$0xff] %vm6893_vm4, %v6959_v37 }
0x1095   : > { %v7057_v4 = vpop.permute.xlu1 %7056  ;;  %v7119_v5 = vld [vmem:[#allocation9 + $0xe8] sm:$0xff] }
0x1096   : > { %7065 = vst.msk [vmem:[#allocation9 + $0xf8] sm:$0xff] %vm6893_vm4, %v7057_v4  ;;  %v7140_v52 = vpack.c.bf16 %v7119_v5, %v7118_v7 }
0x1097   : > { %v7075_v63 = vpop.permute.xlu0 %7074  ;;  %v7120_v17 = vld [vmem:[#allocation9 + $0xf0] sm:$0xff] }
0x1098   : > { %9378 = vmatprep.subr.bf16.mxu0 %v7140_v52  ;;  %7086 = vst.msk [vmem:[#allocation9 + $0x100] sm:$0xff] %vm6893_vm4, %v7075_v63 }
0x1099   : > { %v6961_v38 = vpop.permute.xlu1 %6960  ;;  %v7103_v34 = vld [vmem:[#allocation9 + $0x68] sm:$0xff] }
0x109a   : > { %6969 = vst.msk [vmem:[#allocation9 + $0x78] sm:$0xff] %vm6893_vm4, %v6961_v38  ;;  %v7132_v10 = vpack.c.bf16 %v7103_v34, %v7102_v54 }
0x109b   : > { %v7079_v22 = vpop.permute.xlu0 %7078  ;;  %v7104_v51 = vld [vmem:[#allocation9 + $0x70] sm:$0xff] }
0x109c   : > { %9379 = vmatpush3.bf16.msra.mxu0 %v7132_v10  ;;  %7088 = vst.msk [vmem:[#allocation9 + $0x110] sm:$0xff] %vm6893_vm4, %v7079_v22 }
0x109d   : > { %v7077_v57 = vpop.permute.xlu1 %7076  ;;  %v7121_v42 = vld [vmem:[#allocation9 + $0xf8] sm:$0xff] }
0x109e   : > { %7087 = vst.msk [vmem:[#allocation9 + $0x108] sm:$0xff] %vm6893_vm4, %v7077_v57  ;;  %v7141_v36 = vpack.c.bf16 %v7121_v42, %v7120_v17 }
0x109f   : > { %v7122_v41 = vld [vmem:[#allocation9 + $0x100] sm:$0xff] }
0x10a0   : > { %9380 = vmatprep.subr.bf16.mxu0 %v7141_v36 }
0x10a1   : > { %v7081_v14 = vpop.permute.xlu1 %7080  ;;  %v7105_v8 = vld [vmem:[#allocation9 + $0x78] sm:$0xff] }
0x10a2   : > { %7089 = vst.msk [vmem:[#allocation9 + $0x118] sm:$0xff] %vm6893_vm4, %v7081_v14  ;;  %v7133_v46 = vpack.c.bf16 %v7105_v8, %v7104_v51  ;;  %v7367_v14 = vld [vmem:[%s12900_s4] sm:$0xff] }
0x10a3   : > { %v7124_v3 = vld [vmem:[#allocation9 + $0x110] sm:$0xff] }
0x10a4   : > { %9381 = vmatpush3.bf16.msra.mxu0 %v7133_v46 }
0x10a5   : > { %v7123_v28 = vld [vmem:[#allocation9 + $0x108] sm:$0xff] }
0x10a6   : > { %v7142_v15 = vpack.c.bf16 %v7123_v28, %v7122_v41 }
0x10a7   : > { %7233 = vmatmul.mubr.bf16.vlgmr.msra.gmra.mrb[64].mxu0 %v9132_v59 }
0x10a8   : > { %9754 = vmatprep.subr.bf16.mxu1 %v7142_v15  ;;  %7240 = vmatprep.mubr.bf16.mxu0 %v9136_v62 }
0x10a9   : > { %9755 = vmatpush3.bf16.msra.mxu1 %v7142_v15  ;;  %v7125_v39 = vld [vmem:[#allocation9 + $0x118] sm:$0xff] }
0x10aa   : > { %v7143_v58 = vpack.c.bf16 %v7125_v39, %v7124_v3 }
0x10ac   : > { %9756 = vmatprep.subr.bf16.mxu1 %v7143_v58  ;;  %v7147_v50 = vpop.permute.xlu0 %7146 }
0x10ad   : > { %9757 = vmatpush3.bf16.msra.mxu1 %v7143_v58 }
0x10ae   : > { %9762 = vmatprep.subr.mxu1 %v7367_v14 }
0x10af   : > { %7241 = vmatmul.mubr.bf16.gmra.mrb[68].mxu0 %v9135_v1 }
0x10b0   : > { %9759 = vmatmul.mubr.msk.bf16.vlgmr.msra.gmra.mrb[64].mxu1 %vm2902_vm0, %v9137_v43  ;;  %v7162_v61 = vpop.permute.xlu0 %7161 }
0x10b1   : > { %9763 = vmatpush3.msra.mxu1 %v7367_v14 }
0x10b2   : > { %v7152_v25 = vpop.permute.xlu1 %7151  ;;  %9770 = vmatprep.subr.mxu1 %v7367_v14 }
0x10b6   : > { %v7157_v40 = vpop.permute.xlu1 %7156 }
0x117a   : > { %v9382_v44 = vpop.f32.mrb[64].mxu0 }
0x117b   : > { %v9383_v21 = vpop.f32.mrb[65].mxu0 }
0x117c   : > { %v9384_v53 = vadd.f32 %v9383_v21, %v9382_v44  ;;  %v9385_v47 = vpop.f32.mrb[66].mxu0 }
0x117d   : > { %v9386_v2 = vpop.f32.mrb[67].mxu0 }
0x117e   : > { %v9387_v13 = vadd.f32 %v9386_v2, %v9385_v47  ;;  %v7235_v26 = vadd.f32 %v9384_v53, %v7147_v50 }
0x1180   : > { %v7238_v49 = vadd.f32 %v9387_v13, %v7152_v25 }
0x1182   : > { %v9388_v45 = vpop.f32.mrb[68].mxu0 }
0x1183   : > { %v9389_v48 = vpop.f32.mrb[69].mxu0  ;;  %v9760_v24 = vpop.f32.mrb[64].mxu1 }
0x1184   : > { %v9390_v19 = vadd.f32 %v9389_v48, %v9388_v45  ;;  %v9391_v55 = vpop.f32.mrb[70].mxu0  ;;  %v7283_v60 = vpop.f32.mrb[65].mxu1 }
0x1185   : > { %v7284_v11 = vadd.f32 %v7283_v60, %v7235_v26  ;;  %v9392_v30 = vpop.f32.mrb[71].mxu0  ;;  %v9761_v23 = vpop.f32.mrb[66].mxu1 }
0x1186   : > { %v7243_v32 = vadd.f32 %v9390_v19, %v7157_v40  ;;  %v9393_v27 = vadd.f32 %v9392_v30, %v9391_v55  ;;  %v7286_v6 = vpop.f32.mrb[67].mxu1 }
0x1187   : > { %v7298_v35 = vmax.f32 %v7284_v11, 0.0  ;;  %v7287_v9 = vadd.f32 %v7286_v6, %v7238_v49  ;;  %v12582_v6 = vld [vmem:[%s12897_s1 + $0xfc] sm:$0xff] }
0x1188   : > { %v7292_v33 = vadd.f32 %v9760_v24, %v7243_v32  ;;  %v7246_v12 = vadd.f32 %v9393_v27, %v7162_v61  ;;  %v12572_v32 = vld [vmem:[%s12897_s1 + $0xf0] sm:$0xff]  ;;  %v12577_v27 = vld [vmem:[%s12897_s1 + $0xf8] sm:$0xf]  ;;  %v12588_v61 = vld [vmem:[%s12897_s1 + $0x104] sm:$0xf] }
0x1189   : > { %v7299_v31 = vmax.f32 %v7287_v9, 0.0  ;;  %7306 = vrot.lane.b32.xlu1 %v7298_v35, %s10421_s19  ;;  %v12593_v35 = vld [vmem:[%s12897_s1 + $0x108] sm:$0xff]  ;;  %v12598_v9 = vld [vmem:[%s12897_s1 + $0x110] sm:$0xf] }
0x118a   : > { %v7300_v20 = vmax.f32 %v7292_v33, 0.0  ;;  %v7295_v16 = vadd.f32 %v9761_v23, %v7246_v12  ;;  %v12603_v33 = vld [vmem:[%s12897_s1 + $0x114] sm:$0xff]  ;;  %v12608_v12 = vld [vmem:[%s12897_s1 + $0x11c] sm:$0xf] }
0x118b   : > { %7308 = vrot.lane.b32.xlu0 %v7299_v31, %s10421_s19  ;;  %v12613_v31 = vld [vmem:[%s12898_s2 + $0xa0] sm:$0xff] }
0x118c   : > { %v7301_v56 = vmax.f32 %v7295_v16, 0.0  ;;  %v12618_v16 = vld [vmem:[%s12898_s2 + $0xa8] sm:$0xff] }
0x118d   : > { %7310 = vrot.lane.b32.xlu1 %v7300_v20, %s10421_s19 }
0x118f   : > { %7312 = vrot.lane.b32.xlu0 %v7301_v56, %s10421_s19  ;;  %v12623_v56 = vld [vmem:[%s12898_s2 + $0xb0] sm:$0xff] }
0x11fb   : > { %v7307_v18 = vpop.permute.xlu1 %7306 }
0x11fc   : > { %7319 = vst.msk [vmem:[#allocation2] sm:$0xff] %vm7318_vm5, %v7307_v18  ;;  %v12628_v18 = vld [vmem:[%s12898_s2 + $0xb8] sm:$0xff] }
0x11fd   : > { %v7309_v4 = vpop.permute.xlu0 %7308 }
0x11fe   : > { %7320 = vst.msk [vmem:[#allocation2 + $0x50] sm:$0xff] %vm7318_vm5, %v7309_v4 }
0x11ff   : > { %v7311_v29 = vpop.permute.xlu1 %7310 }
0x1200   : > { %7321 = vst.msk [vmem:[#allocation2 + $0xa0] sm:$0xff] %vm7318_vm5, %v7311_v29 }
0x1201   : > { %v7313_v7 = vpop.permute.xlu0 %7312 }
0x1202   : > { %7322 = vst.msk [vmem:[#allocation2 + $0xf0] sm:$0xff] %vm7318_vm5, %v7313_v7 }
0x1203   : > { %v7323_v5 = vld [vmem:[#allocation2] sm:$0xff] }
0x1204   : > { %7331 = vrot.lane.b32.xlu0 %v7323_v5, %s12969_s26  ;;  %7369 = vst.msk [vmem:[#allocation2] sm:$0xff] %vm7368_vm7, %v10315_v0 }
0x1205   : > { %v7324_v38 = vld [vmem:[#allocation2 + $0x50] sm:$0xff] }
0x1206   : > { %7370 = vst.msk [vmem:[#allocation2 + $0x50] sm:$0xff] %vm7368_vm7, %v10315_v0 }
0x1207   : > { %v7325_v52 = vld [vmem:[#allocation2 + $0xa0] sm:$0xff] }
0x1208   : > { %7335 = vrot.lane.b32.xlu1 %v7325_v52, %s12969_s26  ;;  %7333 = vrot.lane.b32.xlu0 %v7324_v38, %s12969_s26  ;;  %7371 = vst.msk [vmem:[#allocation2 + $0xa0] sm:$0xff] %vm7368_vm7, %v10315_v0 }
0x1209   : > { %v7326_v37 = vld [vmem:[#allocation2 + $0xf0] sm:$0xff] }
0x120a   : > { %7372 = vst.msk [vmem:[#allocation2 + $0xf0] sm:$0xff] %vm7368_vm7, %v10315_v0 }
0x120c   : > { %7337 = vrot.lane.b32.xlu1 %v7326_v37, %s12969_s26 }
0x1276   : > { %v7332_v54 = vpop.permute.xlu0 %7331 }
0x1277   : > { %v7343_v10 = vmax.f32 %v7323_v5, %v7332_v54 }
0x1279   : > { %7351 = vrot.lane.b32.xlu0 %v7343_v10, %s10422_s10 }
0x127a   : > { %v7336_v34 = vpop.permute.xlu1 %7335  ;;  %v7334_v63 = vpop.permute.xlu0 %7333 }
0x127b   : > { %v7345_v57 = vmax.f32 %v7325_v52, %v7336_v34  ;;  %v7344_v42 = vmax.f32 %v7324_v38, %v7334_v63 }
0x127d   : > { %7355 = vrot.lane.b32.xlu0 %v7345_v57, %s10422_s10  ;;  %7353 = vrot.lane.b32.xlu1 %v7344_v42, %s10422_s10 }
0x127e   : > { %v7338_v17 = vpop.permute.xlu1 %7337 }
0x127f   : > { %v7346_v36 = vmax.f32 %v7326_v37, %v7338_v17 }
0x1281   : > { %7357 = vrot.lane.b32.xlu1 %v7346_v36, %s10422_s10 }
0x12eb   : > { %v7352_v22 = vpop.permute.xlu0 %7351 }
0x12ec   : > { %v7363_v51 = vmax.f32 %v7343_v10, %v7352_v22 }
0x12ee   : > { %7377 = vrot.lane.b32.xlu0 %v7363_v51, %s10423_s14 }
0x12ef   : > { %v7354_v8 = vpop.permute.xlu1 %7353  ;;  %v7356_v46 = vpop.permute.xlu0 %7355 }
0x12f0   : > { %v7364_v59 = vmax.f32 %v7344_v42, %v7354_v8  ;;  %v7365_v62 = vmax.f32 %v7345_v57, %v7356_v46 }
0x12f2   : > { %7379 = vrot.lane.b32.xlu1 %v7364_v59, %s10423_s14  ;;  %7381 = vrot.lane.b32.xlu0 %v7365_v62, %s10423_s14 }
0x12f3   : > { %v7358_v41 = vpop.permute.xlu1 %7357 }
0x12f4   : > { %v7366_v28 = vmax.f32 %v7346_v36, %v7358_v41 }
0x12f6   : > { %7383 = vrot.lane.b32.xlu1 %v7366_v28, %s10423_s14  ;;  %7500 = vrot.lane.b32.xlu0 %v7363_v51, %s12981_s24 }
0x12fa   : > { %7502 = vrot.lane.b32.xlu1 %v7364_v59, %s12981_s24  ;;  %7504 = vrot.lane.b32.xlu0 %v7365_v62, %s12981_s24 }
0x12fe   : > { %7506 = vrot.lane.b32.xlu1 %v7366_v28, %s12981_s24  ;;  %7622 = vrot.lane.b32.xlu0 %v7363_v51, %s12982_s22 }
0x1302   : > { %7624 = vrot.lane.b32.xlu1 %v7364_v59, %s12982_s22  ;;  %7626 = vrot.lane.b32.xlu0 %v7365_v62, %s12982_s22 }
0x1306   : > { %7628 = vrot.lane.b32.xlu1 %v7366_v28, %s12982_s22  ;;  %7744 = vrot.lane.b32.xlu0 %v7363_v51, %s12977_s12 }
0x130a   : > { %7746 = vrot.lane.b32.xlu1 %v7364_v59, %s12977_s12  ;;  %7748 = vrot.lane.b32.xlu0 %v7365_v62, %s12977_s12 }
0x130e   : > { %7750 = vrot.lane.b32.xlu1 %v7366_v28, %s12977_s12  ;;  %s10424_s12 = smov 7  }
0x1360   : > { %v7378_v15 = vpop.permute.xlu0 %7377 }
0x1361   : > { %9764 = vmatprep.mubr.msk.f32.mxu1 %vm7385_vm6, %v7378_v15 }
0x1364   : > { %v7380_v3 = vpop.permute.xlu1 %7379  ;;  %v7382_v39 = vpop.permute.xlu0 %7381 }
0x1365   : > { %9765 = vmatmul.mubr.msk.f32.vlgmr.msra.gmra.mrb[68].mxu1 %vm7385_vm6, %v7380_v3 }
0x1366   : > { %9771 = vmatpush3.msra.mxu1 %v7367_v14  ;;  %9767 = vmatprep.mubr.msk.f32.mxu1 %vm7385_vm6, %v7382_v39 }
0x1367   : > { %9778 = vmatprep.subr.mxu1 %v7367_v14 }
0x1368   : > { %v7384_v58 = vpop.permute.xlu1 %7383  ;;  %v7501_v1 = vpop.permute.xlu0 %7500 }
0x1369   : > { %9768 = vmatmul.mubr.msk.f32.gmra.mrb[70].mxu1 %vm7385_vm6, %v7384_v58 }
0x136a   : > { %9772 = vmatprep.mubr.msk.f32.mxu1 %vm7385_vm6, %v7501_v1 }
0x136c   : > { %v7503_v43 = vpop.permute.xlu1 %7502  ;;  %v7505_v44 = vpop.permute.xlu0 %7504 }
0x136d   : > { %9773 = vmatmul.mubr.msk.f32.vlgmr.msra.gmra.mrb[72].mxu1 %vm7385_vm6, %v7503_v43 }
0x136e   : > { %9779 = vmatpush3.msra.mxu1 %v7367_v14  ;;  %9775 = vmatprep.mubr.msk.f32.mxu1 %vm7385_vm6, %v7505_v44 }
0x136f   : > { %9786 = vmatprep.subr.mxu1 %v7367_v14 }
0x1370   : > { %v7507_v21 = vpop.permute.xlu1 %7506  ;;  %v7623_v53 = vpop.permute.xlu0 %7622 }
0x1371   : > { %9776 = vmatmul.mubr.msk.f32.gmra.mrb[74].mxu1 %vm7385_vm6, %v7507_v21 }
0x1372   : > { %9780 = vmatprep.mubr.msk.f32.mxu1 %vm7385_vm6, %v7623_v53 }
0x1374   : > { %v7625_v47 = vpop.permute.xlu1 %7624  ;;  %v7627_v25 = vpop.permute.xlu0 %7626 }
0x1375   : > { %9781 = vmatmul.mubr.msk.f32.vlgmr.msra.gmra.mrb[76].mxu1 %vm7385_vm6, %v7625_v47 }
0x1376   : > { %9787 = vmatpush3.msra.mxu1 %v7367_v14  ;;  %9783 = vmatprep.mubr.msk.f32.mxu1 %vm7385_vm6, %v7627_v25 }
0x1378   : > { %v7629_v2 = vpop.permute.xlu1 %7628  ;;  %v7745_v13 = vpop.permute.xlu0 %7744 }
0x1379   : > { %9784 = vmatmul.mubr.msk.f32.gmra.mrb[78].mxu1 %vm7385_vm6, %v7629_v2 }
0x137a   : > { %9788 = vmatprep.mubr.msk.f32.mxu1 %vm7385_vm6, %v7745_v13 }
0x137c   : > { %v7747_v50 = vpop.permute.xlu1 %7746  ;;  %v7749_v45 = vpop.permute.xlu0 %7748 }
0x137d   : > { %9789 = vmatmul.mubr.msk.f32.vlgmr.msra.gmra.mrb[80].mxu1 %vm7385_vm6, %v7747_v50 }
0x137e   : > { %9791 = vmatprep.mubr.msk.f32.mxu1 %vm7385_vm6, %v7749_v45 }
0x1380   : > { %v7751_v40 = vpop.permute.xlu1 %7750 }
0x1381   : > { %9792 = vmatmul.mubr.msk.f32.gmra.mrb[82].mxu1 %vm7385_vm6, %v7751_v40 }
0x1438   : > { %v9766_v26 = vpop.f32.mrb[68].mxu1 }
0x1439   : > { %7485 = vrot.lane.b32.xlu1 %v9766_v26, %s10424_s12  ;;  %v7460_v48 = vpop.f32.mrb[69].mxu1 }
0x143a   : > { %7483 = vrot.lane.b32.xlu0 %v7460_v48, %s10424_s12 }
0x143c   : > { %v9769_v24 = vpop.f32.mrb[70].mxu1 }
0x143d   : > { %7489 = vrot.lane.b32.xlu1 %v9769_v24, %s10424_s12  ;;  %v7470_v19 = vpop.f32.mrb[71].mxu1 }
0x143e   : > { %7487 = vrot.lane.b32.xlu0 %v7470_v19, %s10424_s12  ;;  %s12984_s12 = smov 25  }
0x1440   : > { %v9774_v55 = vpop.f32.mrb[72].mxu1 }
0x1441   : > { %7607 = vrot.lane.b32.xlu1 %v9774_v55, %s10425_s18  ;;  %v7582_v60 = vpop.f32.mrb[73].mxu1 }
0x1442   : > { %7605 = vrot.lane.b32.xlu0 %v7582_v60, %s10425_s18 }
0x1444   : > { %v9777_v49 = vpop.f32.mrb[74].mxu1 }
0x1445   : > { %7611 = vrot.lane.b32.xlu1 %v9777_v49, %s10425_s18  ;;  %v7592_v11 = vpop.f32.mrb[75].mxu1 }
0x1446   : > { %7609 = vrot.lane.b32.xlu0 %v7592_v11, %s10425_s18 }
0x1448   : > { %v9782_v30 = vpop.f32.mrb[76].mxu1 }
0x1449   : > { %7729 = vrot.lane.b32.xlu1 %v9782_v30, %s12983_s13  ;;  %v7704_v23 = vpop.f32.mrb[77].mxu1 }
0x144a   : > { %7727 = vrot.lane.b32.xlu0 %v7704_v23, %s12983_s13 }
0x144c   : > { %v9785_v20 = vpop.f32.mrb[78].mxu1 }
0x144d   : > { %7733 = vrot.lane.b32.xlu1 %v9785_v20, %s12983_s13  ;;  %v7714_v4 = vpop.f32.mrb[79].mxu1 }
0x144e   : > { %7731 = vrot.lane.b32.xlu0 %v7714_v4, %s12983_s13 }
0x1450   : > { %v9790_v29 = vpop.f32.mrb[80].mxu1 }
0x1451   : > { %7851 = vrot.lane.b32.xlu1 %v9790_v29, %s12984_s12  ;;  %v7826_v7 = vpop.f32.mrb[81].mxu1 }
0x1452   : > { %7849 = vrot.lane.b32.xlu0 %v7826_v7, %s12984_s12 }
0x1454   : > { %v9793_v5 = vpop.f32.mrb[82].mxu1 }
0x1455   : > { %7855 = vrot.lane.b32.xlu1 %v9793_v5, %s12984_s12  ;;  %v7836_v52 = vpop.f32.mrb[83].mxu1 }
0x1456   : > { %7853 = vrot.lane.b32.xlu0 %v7836_v52, %s12984_s12 }
0x14ab   : > { %v7486_v38 = vpop.permute.xlu1 %7485 }
0x14ac   : > { %7497 = vst.msk [vmem:[#allocation2 + $0x50] sm:$0xff] %vm7495_vm3, %v7486_v38  ;;  %v7484_v37 = vpop.permute.xlu0 %7483 }
0x14ad   : > { %7496 = vst.msk [vmem:[#allocation2] sm:$0xff] %vm7495_vm3, %v7484_v37 }
0x14af   : > { %v7490_v54 = vpop.permute.xlu1 %7489 }
0x14b0   : > { %7499 = vst.msk [vmem:[#allocation2 + $0xf0] sm:$0xff] %vm7495_vm3, %v7490_v54  ;;  %v7488_v34 = vpop.permute.xlu0 %7487 }
0x14b1   : > { %7498 = vst.msk [vmem:[#allocation2 + $0xa0] sm:$0xff] %vm7495_vm3, %v7488_v34 }
0x14b3   : > { %v7608_v10 = vpop.permute.xlu1 %7607 }
0x14b4   : > { %7619 = vst.msk [vmem:[#allocation2 + $0x50] sm:$0xff] %vm7617_vm8, %v7608_v10  ;;  %v7606_v57 = vpop.permute.xlu0 %7605 }
0x14b5   : > { %7618 = vst.msk [vmem:[#allocation2] sm:$0xff] %vm7617_vm8, %v7606_v57 }
0x14b7   : > { %v7612_v63 = vpop.permute.xlu1 %7611 }
0x14b8   : > { %7621 = vst.msk [vmem:[#allocation2 + $0xf0] sm:$0xff] %vm7617_vm8, %v7612_v63  ;;  %v7610_v17 = vpop.permute.xlu0 %7609 }
0x14b9   : > { %7620 = vst.msk [vmem:[#allocation2 + $0xa0] sm:$0xff] %vm7617_vm8, %v7610_v17 }
0x14bb   : > { %v7730_v42 = vpop.permute.xlu1 %7729 }
0x14bc   : > { %7741 = vst.msk [vmem:[#allocation2 + $0x50] sm:$0xff] %vm7739_vm9, %v7730_v42  ;;  %v7728_v36 = vpop.permute.xlu0 %7727 }
0x14bd   : > { %7740 = vst.msk [vmem:[#allocation2] sm:$0xff] %vm7739_vm9, %v7728_v36 }
0x14bf   : > { %v7734_v14 = vpop.permute.xlu1 %7733 }
0x14c0   : > { %7743 = vst.msk [vmem:[#allocation2 + $0xf0] sm:$0xff] %vm7739_vm9, %v7734_v14  ;;  %v7732_v22 = vpop.permute.xlu0 %7731 }
0x14c1   : > { %7742 = vst.msk [vmem:[#allocation2 + $0xa0] sm:$0xff] %vm7739_vm9, %v7732_v22 }
0x14c3   : > { %v7852_v51 = vpop.permute.xlu1 %7851 }
0x14c4   : > { %7863 = vst.msk [vmem:[#allocation2 + $0x50] sm:$0xff] %vm7861_vm11, %v7852_v51  ;;  %v7850_v8 = vpop.permute.xlu0 %7849 }
0x14c5   : > { %7862 = vst.msk [vmem:[#allocation2] sm:$0xff] %vm7861_vm11, %v7850_v8 }
0x14c7   : > { %v7856_v46 = vpop.permute.xlu1 %7855 }
0x14c8   : > { %7865 = vst.msk [vmem:[#allocation2 + $0xf0] sm:$0xff] %vm7861_vm11, %v7856_v46  ;;  %v7854_v59 = vpop.permute.xlu0 %7853 }
0x14c9   : > { %7864 = vst.msk [vmem:[#allocation2 + $0xa0] sm:$0xff] %vm7861_vm11, %v7854_v59 }
0x14ca   : > { %vm7884_vm12 = vcmask 195584   ;;  %s10426_s13 = smov 121   ;;  %s10427_s18 = smov 120   ;;  %v9169_v3 = vcombine.high %v12572_v32, %v12582_v6  ;;  %v9170_v39 = vcombine.low %v12577_v27, %v12588_v61  ;;  %v10434_v58 = vmov 0  }
0x14cb   : > { %v7962_v15 = vld [vmem:[#allocation2 + $0x50] sm:$0xff]  ;;  %s10428_s17 = smov 127   ;;  %s10429_s23 = smov 116   ;;  %10210 = vset.pattern.permute.xlu0 %v10434_v58  ;;  %10211 = vset.pattern.permute.xlu1 %v10434_v58  ;;  %vm10442_vm15 = vmmov 0   ;;  %vm8506_vm2 = vcmask 1041408   ;;  %vm8473_vm10 = vcmask 408576  }
0x14cc   : > { %v7961_v41 = vld [vmem:[#allocation2] sm:$0xff]  ;;  %7886 = vst.msk [vmem:[#allocation10 + $0x8] sm:$0xff] %vm7884_vm12, %v7962_v15  ;;  %s10430_s20 = smov 126   ;;  %s10431_s25 = smov 115   ;;  %8223 = vmatprep.mubr.bf16.mxu0 %v9169_v3  ;;  %9798 = vmatprep.mubr.msk.bf16.mxu1 %vm2902_vm0, %v9170_v39  ;;  %vm10443_vm13 = vmmov 1   ;;  %vm8590_vm1 = vcmask 80896  }
0x14cd   : > { %7969 = vrot.lane.b32.xlu0 %v7961_v41, %s10426_s13  ;;  %7885 = vst.msk [vmem:[#allocation10] sm:$0xff] %vm7884_vm12, %v7961_v41  ;;  %s10432_s19 = smov 122   ;;  %s10433_s10 = smov 114   ;;  %vm12782_vm14 = vmpackc.low %vm8506_vm2, %vm10443_vm13  ;;  %vm8931_vm4 = vcmask 73728  }
0x14ce   : > { %s10435_s3 = smov 7   ;;  %s10437_s0 = smov 122  }
0x14cf   : > { %v7964_v28 = vld [vmem:[#allocation2 + $0xf0] sm:$0xff]  ;;  %s12987_s12 = sand.u32 1, %s10305_s28  }
0x14d0   : > { %v7963_v62 = vld [vmem:[#allocation2 + $0xa0] sm:$0xff]  ;;  %7888 = vst.msk [vmem:[#allocation10 + $0x18] sm:$0xff] %vm7884_vm12, %v7964_v28 }
0x14d1   : > { %7973 = vrot.lane.b32.xlu1 %v7963_v62, %s10426_s13  ;;  %7887 = vst.msk [vmem:[#allocation10 + $0x10] sm:$0xff] %vm7884_vm12, %v7963_v62  ;;  %7971 = vrot.lane.b32.xlu0 %v7962_v15, %s10426_s13 }
0x14d3   : > { %v8082_v2 = vld [vmem:[#allocation10 + $0x8] sm:$0xff] }
0x14d4   : > { %v8081_v25 = vld [vmem:[#allocation10] sm:$0xff] }
0x14d5   : > { %7975 = vrot.lane.b32.xlu1 %v7964_v28, %s10426_s13  ;;  %7993 = vrot.lane.b32.xlu0 %v7961_v41, %s10427_s18  ;;  %v8117_v26 = vpack.c.bf16 %v8082_v2, %v8081_v25  ;;  %s8934_s13 = scalar_lea.sflag [#allocation4], %s12987_s12 }
0x14d7   : > { %v8084_v55 = vld [vmem:[#allocation10 + $0x18] sm:$0xff] }
0x14d8   : > { %v8083_v19 = vld [vmem:[#allocation10 + $0x10] sm:$0xff] }
0x14d9   : > { %7995 = vrot.lane.b32.xlu1 %v7962_v15, %s10427_s18  ;;  %7897 = vrot.lane.b32.xlu0 %v7961_v41, %s10428_s17  ;;  %v8118_v23 = vpack.c.bf16 %v8084_v55, %v8083_v19 }
0x14dd   : > { %7899 = vrot.lane.b32.xlu1 %v7962_v15, %s10428_s17  ;;  %7997 = vrot.lane.b32.xlu0 %v7963_v62, %s10427_s18 }
0x14e1   : > { %7999 = vrot.lane.b32.xlu1 %v7964_v28, %s10427_s18  ;;  %7901 = vrot.lane.b32.xlu0 %v7963_v62, %s10428_s17 }
0x14e5   : > { %7903 = vrot.lane.b32.xlu1 %v7964_v28, %s10428_s17  ;;  %8017 = vrot.lane.b32.xlu0 %v7961_v41, %s10429_s23 }
0x14e9   : > { %8019 = vrot.lane.b32.xlu1 %v7962_v15, %s10429_s23  ;;  %7921 = vrot.lane.b32.xlu0 %v7961_v41, %s10430_s20 }
0x14ed   : > { %7923 = vrot.lane.b32.xlu1 %v7962_v15, %s10430_s20  ;;  %8021 = vrot.lane.b32.xlu0 %v7963_v62, %s10429_s23 }
0x14f1   : > { %8023 = vrot.lane.b32.xlu1 %v7964_v28, %s10429_s23  ;;  %7925 = vrot.lane.b32.xlu0 %v7963_v62, %s10430_s20 }
0x14f5   : > { %7927 = vrot.lane.b32.xlu1 %v7964_v28, %s10430_s20  ;;  %8041 = vrot.lane.b32.xlu0 %v7961_v41, %s10431_s25 }
0x14f9   : > { %8043 = vrot.lane.b32.xlu1 %v7962_v15, %s10431_s25  ;;  %7945 = vrot.lane.b32.xlu0 %v7961_v41, %s10432_s19 }
0x14fd   : > { %7947 = vrot.lane.b32.xlu1 %v7962_v15, %s10432_s19  ;;  %8045 = vrot.lane.b32.xlu0 %v7963_v62, %s10431_s25 }
0x1501   : > { %8047 = vrot.lane.b32.xlu1 %v7964_v28, %s10431_s25  ;;  %7949 = vrot.lane.b32.xlu0 %v7963_v62, %s10432_s19 }
0x1505   : > { %7951 = vrot.lane.b32.xlu1 %v7964_v28, %s10432_s19  ;;  %8065 = vrot.lane.b32.xlu0 %v7961_v41, %s10433_s10 }
0x1509   : > { %8067 = vrot.lane.b32.xlu1 %v7962_v15, %s10433_s10  ;;  %8069 = vrot.lane.b32.xlu0 %v7963_v62, %s10433_s10 }
0x150d   : > { %8071 = vrot.lane.b32.xlu1 %v7964_v28, %s10433_s10  ;;  %8137 = vperm.xlu0 %10210, %v12613_v31  }
0x1511   : > { %8142 = vperm.xlu1 %10211, %v12618_v16   ;;  %8152 = vperm.xlu0 %10210, %v12628_v18  }
0x1515   : > { %8147 = vperm.xlu1 %10211, %v12623_v56  }
0x153f   : > { %v7970_v43 = vpop.permute.xlu0 %7969 }
0x1540   : > { %7981 = vst.msk [vmem:[#allocation10 + $0x80] sm:$0xff] %vm7884_vm12, %v7970_v43 }
0x1543   : > { %v7974_v1 = vpop.permute.xlu1 %7973  ;;  %v7972_v21 = vpop.permute.xlu0 %7971 }
0x1544   : > { %7983 = vst.msk [vmem:[#allocation10 + $0x90] sm:$0xff] %vm7884_vm12, %v7974_v1  ;;  %7982 = vst.msk [vmem:[#allocation10 + $0x88] sm:$0xff] %vm7884_vm12, %v7972_v21 }
0x1547   : > { %v7976_v44 = vpop.permute.xlu1 %7975  ;;  %v7994_v47 = vpop.permute.xlu0 %7993  ;;  %v8097_v45 = vld [vmem:[#allocation10 + $0x80] sm:$0xff] }
0x1548   : > { %7984 = vst.msk [vmem:[#allocation10 + $0x98] sm:$0xff] %vm7884_vm12, %v7976_v44  ;;  %8005 = vst.msk [vmem:[#allocation10 + $0xa0] sm:$0xff] %vm7884_vm12, %v7994_v47 }
0x154b   : > { %v7996_v53 = vpop.permute.xlu1 %7995  ;;  %v7898_v50 = vpop.permute.xlu0 %7897  ;;  %v8098_v40 = vld [vmem:[#allocation10 + $0x88] sm:$0xff]  ;;  %v8099_v60 = vld [vmem:[#allocation10 + $0x90] sm:$0xff] }
0x154c   : > { %8006 = vst.msk [vmem:[#allocation10 + $0xa8] sm:$0xff] %vm7884_vm12, %v7996_v53  ;;  %7909 = vst.msk [vmem:[#allocation10 + $0x20] sm:$0xff] %vm7884_vm12, %v7898_v50  ;;  %v8125_v24 = vpack.c.bf16 %v8098_v40, %v8097_v45 }
0x154e   : > { %9418 = vmatprep.subr.bf16.mxu0 %v8125_v24 }
0x154f   : > { %v7900_v13 = vpop.permute.xlu1 %7899  ;;  %v8100_v48 = vld [vmem:[#allocation10 + $0x98] sm:$0xff]  ;;  %v7998_v30 = vpop.permute.xlu0 %7997  ;;  %9419 = vmatpush3.bf16.msra.mxu0 %v8117_v26  ;;  %v8101_v27 = vld [vmem:[#allocation10 + $0xa0] sm:$0xff] }
0x1550   : > { %7910 = vst.msk [vmem:[#allocation10 + $0x28] sm:$0xff] %vm7884_vm12, %v7900_v13  ;;  %v8126_v49 = vpack.c.bf16 %v8100_v48, %v8099_v60  ;;  %8007 = vst.msk [vmem:[#allocation10 + $0xb0] sm:$0xff] %vm7884_vm12, %v7998_v30 }
0x1552   : > { %9420 = vmatprep.subr.bf16.mxu0 %v8126_v49 }
0x1553   : > { %v8000_v11 = vpop.permute.xlu1 %7999  ;;  %v8102_v61 = vld [vmem:[#allocation10 + $0xa8] sm:$0xff]  ;;  %v7902_v16 = vpop.permute.xlu0 %7901  ;;  %9421 = vmatpush3.bf16.msra.mxu0 %v8118_v23  ;;  %v8085_v56 = vld [vmem:[#allocation10 + $0x20] sm:$0xff] }
0x1554   : > { %8008 = vst.msk [vmem:[#allocation10 + $0xb8] sm:$0xff] %vm7884_vm12, %v8000_v11  ;;  %v8127_v31 = vpack.c.bf16 %v8102_v61, %v8101_v27  ;;  %7911 = vst.msk [vmem:[#allocation10 + $0x30] sm:$0xff] %vm7884_vm12, %v7902_v16  ;;  %v9168_v61 = vcombine.low %v12572_v32, %v12582_v6  ;;  %v9173_v32 = vcombine.low %v12598_v9, %v12608_v12 }
0x1556   : > { %9422 = vmatprep.subr.bf16.mxu0 %v8127_v31  ;;  %v9172_v31 = vcombine.high %v12593_v35, %v12603_v33 }
0x1557   : > { %v7904_v20 = vpop.permute.xlu1 %7903  ;;  %v8086_v18 = vld [vmem:[#allocation10 + $0x28] sm:$0xff]  ;;  %v8018_v7 = vpop.permute.xlu0 %8017  ;;  %v8103_v5 = vld [vmem:[#allocation10 + $0xb0] sm:$0xff] }
0x1558   : > { %7912 = vst.msk [vmem:[#allocation10 + $0x38] sm:$0xff] %vm7884_vm12, %v7904_v20  ;;  %v8119_v4 = vpack.c.bf16 %v8086_v18, %v8085_v56  ;;  %8029 = vst.msk [vmem:[#allocation10 + $0xc0] sm:$0xff] %vm7884_vm12, %v8018_v7  ;;  %v9171_v7 = vcombine.low %v12593_v35, %v12603_v33 }
0x155a   : > { %9423 = vmatpush3.bf16.msra.mxu0 %v8119_v4 }
0x155b   : > { %v8020_v29 = vpop.permute.xlu1 %8019  ;;  %v8104_v52 = vld [vmem:[#allocation10 + $0xb8] sm:$0xff]  ;;  %v7922_v54 = vpop.permute.xlu0 %7921  ;;  %v8087_v34 = vld [vmem:[#allocation10 + $0x30] sm:$0xff] }
0x155c   : > { %8030 = vst.msk [vmem:[#allocation10 + $0xc8] sm:$0xff] %vm7884_vm12, %v8020_v29  ;;  %v8128_v38 = vpack.c.bf16 %v8104_v52, %v8103_v5  ;;  %7933 = vst.msk [vmem:[#allocation10 + $0x40] sm:$0xff] %vm7884_vm12, %v7922_v54 }
0x155e   : > { %9424 = vmatprep.subr.bf16.mxu0 %v8128_v38 }
0x155f   : > { %v7924_v37 = vpop.permute.xlu1 %7923  ;;  %v8088_v10 = vld [vmem:[#allocation10 + $0x38] sm:$0xff]  ;;  %v8022_v17 = vpop.permute.xlu0 %8021  ;;  %v8105_v42 = vld [vmem:[#allocation10 + $0xc0] sm:$0xff] }
0x1560   : > { %7934 = vst.msk [vmem:[#allocation10 + $0x48] sm:$0xff] %vm7884_vm12, %v7924_v37  ;;  %v8120_v57 = vpack.c.bf16 %v8088_v10, %v8087_v34  ;;  %8031 = vst.msk [vmem:[#allocation10 + $0xd0] sm:$0xff] %vm7884_vm12, %v8022_v17 }
0x1562   : > { %9425 = vmatpush3.bf16.msra.mxu0 %v8120_v57 }
0x1563   : > { %v8024_v63 = vpop.permute.xlu1 %8023  ;;  %v8106_v36 = vld [vmem:[#allocation10 + $0xc8] sm:$0xff]  ;;  %v7926_v51 = vpop.permute.xlu0 %7925  ;;  %v8089_v8 = vld [vmem:[#allocation10 + $0x40] sm:$0xff] }
0x1564   : > { %8032 = vst.msk [vmem:[#allocation10 + $0xd8] sm:$0xff] %vm7884_vm12, %v8024_v63  ;;  %v8129_v14 = vpack.c.bf16 %v8106_v36, %v8105_v42  ;;  %7935 = vst.msk [vmem:[#allocation10 + $0x50] sm:$0xff] %vm7884_vm12, %v7926_v51 }
0x1566   : > { %9426 = vmatprep.subr.bf16.mxu0 %v8129_v14 }
0x1567   : > { %v7928_v22 = vpop.permute.xlu1 %7927  ;;  %v8090_v46 = vld [vmem:[#allocation10 + $0x48] sm:$0xff]  ;;  %v8042_v41 = vpop.permute.xlu0 %8041  ;;  %v8107_v28 = vld [vmem:[#allocation10 + $0xd0] sm:$0xff] }
0x1568   : > { %7936 = vst.msk [vmem:[#allocation10 + $0x58] sm:$0xff] %vm7884_vm12, %v7928_v22  ;;  %v8121_v59 = vpack.c.bf16 %v8090_v46, %v8089_v8  ;;  %8053 = vst.msk [vmem:[#allocation10 + $0xe0] sm:$0xff] %vm7884_vm12, %v8042_v41 }
0x156a   : > { %9427 = vmatpush3.bf16.msra.mxu0 %v8121_v59 }
0x156b   : > { %v8044_v62 = vpop.permute.xlu1 %8043  ;;  %v8108_v15 = vld [vmem:[#allocation10 + $0xd8] sm:$0xff]  ;;  %v7946_v58 = vpop.permute.xlu0 %7945  ;;  %v8091_v1 = vld [vmem:[#allocation10 + $0x50] sm:$0xff] }
0x156c   : > { %8054 = vst.msk [vmem:[#allocation10 + $0xe8] sm:$0xff] %vm7884_vm12, %v8044_v62  ;;  %v8130_v3 = vpack.c.bf16 %v8108_v15, %v8107_v28  ;;  %7957 = vst.msk [vmem:[#allocation10 + $0x60] sm:$0xff] %vm7884_vm12, %v7946_v58 }
0x156e   : > { %9428 = vmatprep.subr.bf16.mxu0 %v8130_v3 }
0x156f   : > { %v7948_v39 = vpop.permute.xlu1 %7947  ;;  %v8092_v43 = vld [vmem:[#allocation10 + $0x58] sm:$0xff]  ;;  %v8046_v53 = vpop.permute.xlu0 %8045  ;;  %v8109_v47 = vld [vmem:[#allocation10 + $0xe0] sm:$0xff] }
0x1570   : > { %7958 = vst.msk [vmem:[#allocation10 + $0x68] sm:$0xff] %vm7884_vm12, %v7948_v39  ;;  %v8122_v44 = vpack.c.bf16 %v8092_v43, %v8091_v1  ;;  %8055 = vst.msk [vmem:[#allocation10 + $0xf0] sm:$0xff] %vm7884_vm12, %v8046_v53 }
0x1572   : > { %9429 = vmatpush3.bf16.msra.mxu0 %v8122_v44 }
0x1573   : > { %v8048_v21 = vpop.permute.xlu1 %8047  ;;  %v8110_v25 = vld [vmem:[#allocation10 + $0xe8] sm:$0xff]  ;;  %v7950_v50 = vpop.permute.xlu0 %7949  ;;  %v8093_v45 = vld [vmem:[#allocation10 + $0x60] sm:$0xff] }
0x1574   : > { %8056 = vst.msk [vmem:[#allocation10 + $0xf8] sm:$0xff] %vm7884_vm12, %v8048_v21  ;;  %v8131_v2 = vpack.c.bf16 %v8110_v25, %v8109_v47  ;;  %7959 = vst.msk [vmem:[#allocation10 + $0x70] sm:$0xff] %vm7884_vm12, %v7950_v50 }
0x1576   : > { %9430 = vmatprep.subr.bf16.mxu0 %v8131_v2 }
0x1577   : > { %v7952_v13 = vpop.permute.xlu1 %7951  ;;  %v8094_v40 = vld [vmem:[#allocation10 + $0x68] sm:$0xff]  ;;  %v8066_v24 = vpop.permute.xlu0 %8065  ;;  %v8111_v19 = vld [vmem:[#allocation10 + $0xf0] sm:$0xff] }
0x1578   : > { %7960 = vst.msk [vmem:[#allocation10 + $0x78] sm:$0xff] %vm7884_vm12, %v7952_v13  ;;  %v8123_v26 = vpack.c.bf16 %v8094_v40, %v8093_v45  ;;  %8077 = vst.msk [vmem:[#allocation10 + $0x100] sm:$0xff] %vm7884_vm12, %v8066_v24  ;;  %v10436_v45 = vmov 7  }
0x1579   : > { %10212 = vset.pattern.permute.xlu0 %v10436_v45  ;;  %10213 = vset.pattern.permute.xlu1 %v10436_v45 }
0x157a   : > { %9431 = vmatpush3.bf16.msra.mxu0 %v8123_v26 }
0x157b   : > { %v8068_v48 = vpop.permute.xlu1 %8067  ;;  %v8112_v55 = vld [vmem:[#allocation10 + $0xf8] sm:$0xff]  ;;  %v8070_v11 = vpop.permute.xlu0 %8069  ;;  %v8095_v30 = vld [vmem:[#allocation10 + $0x70] sm:$0xff] }
0x157c   : > { %8078 = vst.msk [vmem:[#allocation10 + $0x108] sm:$0xff] %vm7884_vm12, %v8068_v48  ;;  %v8132_v60 = vpack.c.bf16 %v8112_v55, %v8111_v19  ;;  %8079 = vst.msk [vmem:[#allocation10 + $0x110] sm:$0xff] %vm7884_vm12, %v8070_v11 }
0x157e   : > { %9432 = vmatprep.subr.bf16.mxu0 %v8132_v60 }
0x157f   : > { %v8072_v49 = vpop.permute.xlu1 %8071  ;;  %v8096_v23 = vld [vmem:[#allocation10 + $0x78] sm:$0xff]  ;;  %v8113_v20 = vld [vmem:[#allocation10 + $0x100] sm:$0xff] }
0x1580   : > { %8080 = vst.msk [vmem:[#allocation10 + $0x118] sm:$0xff] %vm7884_vm12, %v8072_v49  ;;  %v8124_v27 = vpack.c.bf16 %v8096_v23, %v8095_v30 }
0x1582   : > { %9433 = vmatpush3.bf16.msra.mxu0 %v8124_v27 }
0x1583   : > { %v8114_v16 = vld [vmem:[#allocation10 + $0x108] sm:$0xff]  ;;  %v8115_v18 = vld [vmem:[#allocation10 + $0x110] sm:$0xff] }
0x1584   : > { %v8133_v56 = vpack.c.bf16 %v8114_v16, %v8113_v20  ;;  %v10439_v20 = vmov 19  }
0x1585   : > { %8224 = vmatmul.mubr.bf16.vlgmr.msra.gmra.mrb[72].mxu0 %v9168_v61  ;;  %v10438_v61 = vmov 9  }
0x1586   : > { %9794 = vmatprep.subr.bf16.mxu1 %v8133_v56  ;;  %8231 = vmatprep.mubr.bf16.mxu0 %v9172_v31 }
0x1587   : > { %9795 = vmatpush3.bf16.msra.mxu1 %v8133_v56  ;;  %v8116_v4 = vld [vmem:[#allocation10 + $0x118] sm:$0xff] }
0x1588   : > { %v8134_v29 = vpack.c.bf16 %v8116_v4, %v8115_v18  ;;  %v10440_v4 = vmov 21  }
0x158a   : > { %9796 = vmatprep.subr.bf16.mxu1 %v8134_v29 }
0x158b   : > { %9797 = vmatpush3.bf16.msra.mxu1 %v8134_v29  ;;  %v8495_v29 = vld [vmem:[%s12902_s6] sm:$0xff] }
0x158c   : > { %v8138_v10 = vpop.permute.xlu0 %8137 }
0x158d   : > { %8232 = vmatmul.mubr.bf16.gmra.mrb[76].mxu0 %v9171_v7  ;;  %v8496_v7 = vld [vmem:[%s12902_s6 + $0x8] sm:$0xff] }
0x158e   : > { %9799 = vmatmul.mubr.msk.bf16.vlgmr.msra.gmra.mrb[84].mxu1 %vm2902_vm0, %v9173_v32  ;;  %vm8309_vm0 = vcmask 252984   ;;  %v10008_v32 = vpack.c.bf16 %v8496_v7, %v8495_v29 }
0x158f   : > { %9816 = vmatprep.mubr.msk.f32.mxu1 %vm10442_vm15, %v10315_v0 }
0x1590   : > { %v8143_v37 = vpop.permute.xlu1 %8142  ;;  %v8153_v62 = vpop.permute.xlu0 %8152 }
0x1594   : > { %v8148_v63 = vpop.permute.xlu1 %8147 }
0x1658   : > { %v9434_v6 = vpop.f32.mrb[72].mxu0 }
0x1659   : > { %v9435_v5 = vpop.f32.mrb[73].mxu0 }
0x165a   : > { %v9436_v52 = vadd.f32 %v9435_v5, %v9434_v6  ;;  %v9437_v38 = vpop.f32.mrb[74].mxu0  ;;  %v10441_v6 = vmov 0.0|0.0   ;;  %v8497_v5 = vld [vmem:[%s12902_s6 + $0x10] sm:$0xff] }
0x165b   : > { %v9438_v54 = vpop.f32.mrb[75].mxu0  ;;  %10007 = vmatprep.subr.bf16.mxu1 %v10441_v6 }
0x165c   : > { %v9439_v34 = vadd.f32 %v9438_v54, %v9437_v38  ;;  %v8226_v17 = vadd.f32 %v9436_v52, %v8138_v10  ;;  %10009 = vmatpush3.bf16.msra.mxu1 %v10008_v32  ;;  %v8498_v52 = vld [vmem:[%s12902_s6 + $0x18] sm:$0xff]  ;;  %v8500_v54 = vld [vmem:[%s12902_s6 + $0x28] sm:$0xff]  ;;  %v8501_v10 = vld [vmem:[%s12902_s6 + $0x30] sm:$0x3] }
0x165d   : > { %10010 = vmatprep.subr.bf16.mxu1 %v10441_v6  ;;  %v10011_v38 = vpack.c.bf16 %v8498_v52, %v8497_v5 }
0x165e   : > { %v8229_v12 = vadd.f32 %v9439_v34, %v8143_v37  ;;  %v8499_v37 = vld [vmem:[%s12902_s6 + $0x20] sm:$0xff] }
0x165f   : > { %v10014_v34 = vpack.c.bf16 %v8500_v54, %v8499_v37 }
0x1660   : > { %v9440_v57 = vpop.f32.mrb[76].mxu0  ;;  %10012 = vmatpush3.bf16.msra.mxu1 %v10011_v38 }
0x1661   : > { %v9441_v35 = vpop.f32.mrb[77].mxu0  ;;  %v9800_v33 = vpop.f32.mrb[84].mxu1  ;;  %10013 = vmatprep.subr.bf16.mxu1 %v10441_v6 }
0x1662   : > { %v9442_v42 = vadd.f32 %v9441_v35, %v9440_v57  ;;  %v9443_v36 = vpop.f32.mrb[78].mxu0  ;;  %v8274_v9 = vpop.f32.mrb[85].mxu1 }
0x1663   : > { %v8275_v14 = vadd.f32 %v8274_v9, %v8226_v17  ;;  %v9444_v22 = vpop.f32.mrb[79].mxu0  ;;  %v9801_v51 = vpop.f32.mrb[86].mxu1 }
0x1664   : > { %v8234_v8 = vadd.f32 %v9442_v42, %v8148_v63  ;;  %v9445_v46 = vadd.f32 %v9444_v22, %v9443_v36  ;;  %v8277_v59 = vpop.f32.mrb[87].mxu1  ;;  %10015 = vmatpush3.bf16.msra.mxu1 %v10014_v34 }
0x1665   : > { %v8289_v41 = vmax.f32 %v8275_v14, 0.0  ;;  %v8278_v28 = vadd.f32 %v8277_v59, %v8229_v12  ;;  %9814 = vmatprep.subr.mxu1 %v10315_v0  ;;  %v9176_v14 = vld [vmem:[%s12901_s5 + $0x20] sm:$0xff] }
0x1666   : > { %v8283_v15 = vadd.f32 %v9800_v33, %v8234_v8  ;;  %v8237_v3 = vadd.f32 %v9445_v46, %v8153_v62  ;;  %v8359_v8 = vld [vmem:[%s12901_s5 + $0x8] sm:$0xff] }
0x1667   : > { %v8290_v39 = vmax.f32 %v8278_v28, 0.0  ;;  %8297 = vrot.lane.b32.xlu1 %v8289_v41, %s10435_s3  ;;  %v9177_v46 = vld [vmem:[%s12901_s5 + $0x28] sm:$0xff]  ;;  %v9180_v41 = vld [vmem:[%s12901_s5 + $0x40] sm:$0xff] }
0x1668   : > { %v8291_v58 = vmax.f32 %v8283_v15, 0.0  ;;  %v8286_v1 = vadd.f32 %v9801_v51, %v8237_v3  ;;  %9815 = vmatpush3.msk.msra.mxu1 %vm8506_vm2, %v8501_v10  ;;  %v8358_v51 = vld [vmem:[%s12901_s5] sm:$0xff]  ;;  %v9181_v28 = vld [vmem:[%s12901_s5 + $0x48] sm:$0xff] }
0x1669   : > { %8299 = vrot.lane.b32.xlu0 %v8290_v39, %s10435_s3  ;;  %10016 = vmatprep.subr.bf16.mxu1 %v10441_v6 }
0x166a   : > { %v8292_v43 = vmax.f32 %v8286_v1, 0.0  ;;  %v9184_v1 = vld [vmem:[%s12901_s5 + $0x60] sm:$0xff] }
0x166b   : > { %8301 = vrot.lane.b32.xlu1 %v8291_v58, %s10435_s3  ;;  %v8361_v58 = vld [vmem:[%s12901_s5 + $0x18] sm:$0xff] }
0x166d   : > { %8303 = vrot.lane.b32.xlu0 %v8292_v43, %s10435_s3 }
0x16d9   : > { %v8298_v44 = vpop.permute.xlu1 %8297 }
0x16da   : > { %8310 = vst.msk [vmem:[#allocation2] sm:$0xff] %vm8309_vm0, %v8298_v44 }
0x16db   : > { %v8300_v21 = vpop.permute.xlu0 %8299 }
0x16dc   : > { %8311 = vst.msk [vmem:[#allocation2 + $0x50] sm:$0xff] %vm8309_vm0, %v8300_v21 }
0x16dd   : > { %v8302_v53 = vpop.permute.xlu1 %8301 }
0x16de   : > { %8312 = vst.msk [vmem:[#allocation2 + $0xa0] sm:$0xff] %vm8309_vm0, %v8302_v53 }
0x16df   : > { %v8304_v47 = vpop.permute.xlu0 %8303 }
0x16e0   : > { %8313 = vst.msk [vmem:[#allocation2 + $0xf0] sm:$0xff] %vm8309_vm0, %v8304_v47  ;;  %v9179_v47 = vld [vmem:[%s12901_s5 + $0x38] sm:$0xff] }
0x16e1   : > { %v8314_v25 = vld [vmem:[#allocation2] sm:$0xff] }
0x16e2   : > { %8322 = vrot.lane.b32.xlu0 %v8314_v25, %s12969_s26 }
0x16e3   : > { %v8315_v13 = vld [vmem:[#allocation2 + $0x50] sm:$0xff] }
0x16e5   : > { %v8316_v2 = vld [vmem:[#allocation2 + $0xa0] sm:$0xff] }
0x16e6   : > { %8326 = vrot.lane.b32.xlu1 %v8316_v2, %s12969_s26  ;;  %8324 = vrot.lane.b32.xlu0 %v8315_v13, %s12969_s26 }
0x16e7   : > { %v8317_v50 = vld [vmem:[#allocation2 + $0xf0] sm:$0xff] }
0x16ea   : > { %8328 = vrot.lane.b32.xlu1 %v8317_v50, %s12969_s26  ;;  %s8946_s26 = sshll.u32 %s10644_s21, 4  ;;  %s12853_s26 = int_to_ptr.vmem [resolvable:$true] %s8946_s26 }
0x16eb   : > { %s10251_s18 = scalar_lea.vmem %s12853_s26, 16 }
0x16ec   : > { %p10252_p11 = scmp.ne.s32.totalorder %s12853_s26, %s10251_s18 }
0x16ee   : > { %p10253_p12 = pnand %p10252_p11, %p10528_p5 }
0x16f0   : > { %p10254_p13 = pneg %p10253_p12 }
0x1754   : > { %v8323_v40 = vpop.permute.xlu0 %8322 }
0x1755   : > { %v8334_v48 = vmax.f32 %v8314_v25, %v8323_v40  ;;  %v9178_v25 = vld [vmem:[%s12901_s5 + $0x30] sm:$0xff] }
0x1757   : > { %8342 = vrot.lane.b32.xlu0 %v8334_v48, %s10437_s0 }
0x1758   : > { %v8327_v26 = vpop.permute.xlu1 %8326  ;;  %v8325_v19 = vpop.permute.xlu0 %8324 }
0x1759   : > { %v8336_v24 = vmax.f32 %v8316_v2, %v8327_v26  ;;  %v8335_v60 = vmax.f32 %v8315_v13, %v8325_v19  ;;  %v9183_v26 = vld [vmem:[%s12901_s5 + $0x58] sm:$0xff] }
0x175b   : > { %8346 = vrot.lane.b32.xlu0 %v8336_v24, %s10437_s0  ;;  %8344 = vrot.lane.b32.xlu1 %v8335_v60, %s10437_s0 }
0x175c   : > { %v8329_v55 = vpop.permute.xlu1 %8328 }
0x175d   : > { %v8337_v49 = vmax.f32 %v8317_v50, %v8329_v55  ;;  %v8360_v50 = vld [vmem:[%s12901_s5 + $0x10] sm:$0xff] }
0x175f   : > { %8348 = vrot.lane.b32.xlu1 %v8337_v49, %s10437_s0  ;;  %s9206_s0 = sshll.u32 %s10511_s9, 4  ;;  %s10444_s9 = smov [#allocation3]  }
0x1760   : > { %s12851_s22 = scalar_lea.hbm %s12904_s8, %s9206_s0  ;;  %s10255_s17 = sshll.u32 %s10444_s9, 4  ;;  %s10256_s17 = int_to_ptr.vmem [resolvable:$false] %s10255_s17 }
0x1761   : > { %s10257_s23 = scalar_lea.vmem %s10256_s17, 32  ;;  %p10258_p0 = scmp.lt.s32.totalorder %s12853_s26, %s10256_s17 }
0x1762   : > { %p10259_p1 = scmp.lt.s32.totalorder %s10257_s23, %s10251_s18 }
0x1764   : > { %p10260_p2 = por %p10259_p1, %p10258_p0 }
0x1766   : > { %p10261_p3 = pnand %p10260_p2, %p10254_p13 }
0x17c9   : > { %v8343_v11 = vpop.permute.xlu0 %8342 }
0x17ca   : > { %v8354_v30 = vmax.f32 %v8334_v48, %v8343_v11  ;;  %v9185_v48 = vld [vmem:[%s12901_s5 + $0x68] sm:$0xff] }
0x17cc   : > { %8364 = vperm.xlu0 %10212, %v8354_v30  }
0x17cd   : > { %v8345_v23 = vpop.permute.xlu1 %8344  ;;  %v8347_v31 = vpop.permute.xlu0 %8346 }
0x17ce   : > { %v8355_v27 = vmax.f32 %v8335_v60, %v8345_v23  ;;  %v8356_v56 = vmax.f32 %v8336_v24, %v8347_v31  ;;  %v9182_v24 = vld [vmem:[%s12901_s5 + $0x50] sm:$0xff] }
0x17d0   : > { %8369 = vperm.xlu1 %10213, %v8355_v27   ;;  %10215 = vset.pattern.permute.xlu0 %v10438_v61 }
0x17d1   : > { %8396 = vperm.xlu0 %10215, %v8355_v27   ;;  %v8349_v16 = vpop.permute.xlu1 %8348 }
0x17d2   : > { %v8357_v18 = vmax.f32 %v8337_v49, %v8349_v16  ;;  %v9187_v16 = vld [vmem:[%s12901_s5 + $0x78] sm:$0xff] }
0x17d4   : > { %10214 = vset.pattern.permute.xlu1 %v10438_v61 }
0x17d5   : > { %8392 = vperm.xlu1 %10214, %v8354_v30   ;;  %10218 = vset.pattern.permute.xlu0 %v10439_v20 }
0x17d6   : > { %8421 = vperm.xlu0 %10218, %v8354_v30  }
0x17d9   : > { %10216 = vset.pattern.permute.xlu1 %v10436_v45 }
0x17da   : > { %10221 = vset.pattern.permute.xlu0 %v10438_v61  ;;  %8374 = vperm.xlu1 %10216, %v8356_v56  }
0x17db   : > { %8404 = vperm.xlu0 %10221, %v8357_v18  }
0x17de   : > { %10217 = vset.pattern.permute.xlu1 %v10438_v61 }
0x17df   : > { %10224 = vset.pattern.permute.xlu0 %v10440_v4  ;;  %8400 = vperm.xlu1 %10217, %v8356_v56  }
0x17e0   : > { %8454 = vperm.xlu0 %10224, %v8355_v27  }
0x17e3   : > { %10219 = vset.pattern.permute.xlu1 %v10439_v20 }
0x17e4   : > { %8462 = vperm.xlu0 %10224, %v8357_v18   ;;  %8425 = vperm.xlu1 %10219, %v8355_v27  }
0x17e8   : > { %10220 = vset.pattern.permute.xlu1 %v10436_v45 }
0x17e9   : > { %8379 = vperm.xlu1 %10220, %v8357_v18  }
0x17ed   : > { %10222 = vset.pattern.permute.xlu1 %v10439_v20 }
0x17ee   : > { %8429 = vperm.xlu1 %10222, %v8356_v56  }
0x17f2   : > { %10223 = vset.pattern.permute.xlu1 %v10440_v4 }
0x17f3   : > { %8450 = vperm.xlu1 %10223, %v8354_v30  }
0x17f7   : > { %10225 = vset.pattern.permute.xlu1 %v10439_v20 }
0x17f8   : > { %8433 = vperm.xlu1 %10225, %v8357_v18   ;;  %v9186_v18 = vld [vmem:[%s12901_s5 + $0x70] sm:$0xff] }
0x17fc   : > { %10226 = vset.pattern.permute.xlu1 %v10440_v4 }
0x17fd   : > { %8458 = vperm.xlu1 %10226, %v8356_v56  }
0x184b   : > { %v8365_v35 = vpop.permute.xlu0 %8364 }
0x184c   : > { %v8382_v15 = vmul.f32 %v8365_v35, %v8358_v51 }
0x184f   : > { %v8370_v57 = vpop.permute.xlu1 %8369 }
0x1850   : > { %v8397_v42 = vpop.permute.xlu0 %8396  ;;  %v8383_v3 = vmul.f32 %v8370_v57, %v8359_v8 }
0x1851   : > { %v8408_v39 = vmul.f32 %v9177_v46, %v8397_v42 }
0x1853   : > { %v8412_v13 = vadd.f32 %v8408_v39, %v8383_v3  ;;  %v9190_v3 = vld [vmem:[%s12902_s6 + $0x38] sm:$0xff]  ;;  %v9191_v39 = vld [vmem:[%s12902_s6 + $0x40] sm:$0x3] }
0x1854   : > { %v8393_v63 = vpop.permute.xlu1 %8392 }
0x1855   : > { %v8422_v9 = vpop.permute.xlu0 %8421  ;;  %v8407_v62 = vmul.f32 %v9176_v14, %v8393_v63 }
0x1856   : > { %v8436_v21 = vmul.f32 %v9180_v41, %v8422_v9 }
0x1857   : > { %v8411_v44 = vadd.f32 %v8407_v62, %v8382_v15 }
0x1859   : > { %v8375_v17 = vpop.permute.xlu1 %8374  ;;  %v8440_v19 = vadd.f32 %v8436_v21, %v8411_v44 }
0x185a   : > { %v8405_v59 = vpop.permute.xlu0 %8404  ;;  %v8384_v30 = vmul.f32 %v8375_v17, %v8360_v50  ;;  %v9194_v50 = vld [vmem:[%s12902_s6 + $0x70] sm:$0xff] }
0x185b   : > { %v8410_v55 = vmul.f32 %v9179_v47, %v8405_v59 }
0x185e   : > { %v8401_v33 = vpop.permute.xlu1 %8400 }
0x185f   : > { %v8455_v2 = vpop.permute.xlu0 %8454  ;;  %v8409_v60 = vmul.f32 %v9178_v25, %v8401_v33 }
0x1860   : > { %v8466_v27 = vmul.f32 %v9185_v48, %v8455_v2 }
0x1861   : > { %v8413_v4 = vadd.f32 %v8409_v60, %v8384_v30 }
0x1863   : > { %v8426_v36 = vpop.permute.xlu1 %8425  ;;  %v8463_v56 = vpop.permute.xlu0 %8462 }
0x1864   : > { %v8437_v53 = vmul.f32 %v9181_v28, %v8426_v36  ;;  %v8468_v5 = vmul.f32 %v9187_v16, %v8463_v56 }
0x1866   : > { %v8441_v49 = vadd.f32 %v8437_v53, %v8412_v13 }
0x1868   : > { %v8380_v12 = vpop.permute.xlu1 %8379  ;;  %v8470_v29 = vadd.f32 %v8466_v27, %v8441_v49  ;;  %v9199_v27 = vld [vmem:[%s12902_s6 + $0xb0] sm:$0x3] }
0x1869   : > { %v8385_v45 = vmul.f32 %v8380_v12, %v8361_v58  ;;  %v10017_v58 = vpack.c.bf16 %v9191_v39, %v9190_v3 }
0x186a   : > { %v8475_v54 = vsel %vm8473_vm10, %v8470_v29, 0.0 }
0x186b   : > { %v8414_v61 = vadd.f32 %v8410_v55, %v8385_v45  ;;  %v9195_v45 = vld [vmem:[%s12902_s6 + $0x78] sm:$0x3] }
0x186d   : > { %v8430_v22 = vpop.permute.xlu1 %8429 }
0x186e   : > { %v8438_v31 = vmul.f32 %v9182_v24, %v8430_v22  ;;  %v8487_v22 = vld [vmem:[%s12903_s7] sm:$0x1] }
0x1870   : > { %v8442_v52 = vadd.f32 %v8438_v31, %v8413_v4  ;;  %v8676_v31 = vld [vmem:[%s12903_s7 + $0x3] sm:$0x1] }
0x1872   : > { %v8451_v43 = vpop.permute.xlu1 %8450 }
0x1873   : > { %v8465_v40 = vmul.f32 %v9184_v1, %v8451_v43  ;;  %v8502_v1 = vld [vmem:[%s12903_s7 + $0x1] sm:$0x1] }
0x1875   : > { %v8469_v20 = vadd.f32 %v8465_v40, %v8440_v19  ;;  %v10021_v40 = vpack.c.bf16 %v9195_v45, %v9194_v50 }
0x1877   : > { %v8434_v11 = vpop.permute.xlu1 %8433  ;;  %v8474_v38 = vsel %vm8473_vm10, %v8469_v20, 0.0 }
0x1878   : > { %v8439_v23 = vmul.f32 %v9183_v26, %v8434_v11  ;;  %v8476_v57 = vadd.f32 %v8475_v54, %v8474_v38  ;;  %v8589_v26 = vld [vmem:[%s12903_s7 + $0x2] sm:$0x1]  ;;  %v8762_v38 = vld [vmem:[%s12903_s7 + $0x4] sm:$0x1] }
0x187a   : > { %v8443_v7 = vadd.f32 %v8439_v23, %v8414_v61  ;;  %v9198_v23 = vld [vmem:[%s12902_s6 + $0xa8] sm:$0xff] }
0x187b   : > { %v10025_v61 = vpack.c.bf16 %v9199_v27, %v9198_v23 }
0x187c   : > { %v8459_v32 = vpop.permute.xlu1 %8458  ;;  %v8472_v34 = vadd.f32 %v8468_v5, %v8443_v7  ;;  %v9203_v5 = vld [vmem:[%s12902_s6 + $0xe8] sm:$0x3] }
0x187d   : > { %v8467_v37 = vmul.f32 %v9186_v18, %v8459_v32 }
0x187e   : > { %v8479_v35 = vsel %vm8473_vm10, %v8472_v34, 0.0 }
0x187f   : > { %v8471_v10 = vadd.f32 %v8467_v37, %v8442_v52 }
0x1881   : > { %v8477_v63 = vsel %vm8473_vm10, %v8471_v10, 0.0 }
0x1882   : > { %v8478_v17 = vadd.f32 %v8477_v63, %v8476_v57 }
0x1884   : > { %v8480_v33 = vadd.f32 %v8479_v35, %v8478_v17  ;;  %v8848_v35 = vld [vmem:[%s12903_s7 + $0x5] sm:$0x1] }
0x1886   : > { %v8481_v42 = vrot.slane %v8480_v33, 4 }
0x1888   : > { %v8482_v36 = vadd.f32 %v8481_v42, %v8480_v33 }
0x188a   : > { %v8483_v9 = vrot.slane %v8482_v36, 2 }
0x188c   : > { %v8484_v12 = vadd.f32 %v8483_v9, %v8482_v36 }
0x188e   : > { %v8485_v14 = vrot.slane %v8484_v12, 1 }
0x1890   : > { %v8486_v51 = vadd.f32 %v8485_v14, %v8484_v12 }
0x1892   : > { %v8488_v8 = vadd.f32 %v8487_v22, %v8486_v51 }
0x1894   : > { %v8489_v46 = vsub.f32 0.0, %v8488_v8 }
0x1896   : > { %v8490_v59 = vmul.f32 1.442695, %v8489_v46 }
0x1898   : > { %10227 = vpow2.f32 %v8490_v59 }
0x18a2   : > { %v10228_v62 = vpop.eup %10227 }
0x18a3   : > { %v8492_v41 = vadd.f32 1.0, %v10228_v62 }
0x18a5   : > { %10229 = vrcp.f32 %v8492_v41 }
0x18af   : > { %v10230_v28 = vpop.eup %10229 }
0x18b0   : > { %9817 = vmatmul.mubr.msk.f32.vlgmr.msra.gmra.mrb[88].mxu1 %vm8473_vm10, %v10230_v28 }
0x18b1   : > { %9823 = vmatprep.mubr.msk.f32.mxu1 %vm10442_vm15, %v10315_v0  ;;  %10019 = vmatpush3.bf16.msk.msra.mxu1 %vm12782_vm14, %v10017_v58 }
0x18b2   : > { %10020 = vmatprep.subr.bf16.mxu1 %v10441_v6 }
0x1983   : > { %v8576_v43 = vpop.f32.mrb[88].mxu1 }
0x1984   : > { %v8577_v44 = vadd.f32 %v8576_v43, %v8502_v1  ;;  %v9818_v21 = vpop.f32.mrb[89].mxu1 }
0x1986   : > { %v8580_v53 = vsub.f32 0.0, %v8577_v44 }
0x1988   : > { %v8581_v47 = vmul.f32 1.442695, %v8580_v53 }
0x198a   : > { %10231 = vpow2.f32 %v8581_v47 }
0x1994   : > { %v10232_v25 = vpop.eup %10231 }
0x1995   : > { %v8583_v2 = vadd.f32 1.0, %v10232_v25 }
0x1997   : > { %10233 = vrcp.f32 %v8583_v2 }
0x19a1   : > { %v10234_v13 = vpop.eup %10233 }
0x19a2   : > { %9824 = vmatmul.mubr.msk.f32.vlgmr.msra.gmra.mrb[90].mxu1 %vm8590_vm1, %v10234_v13 }
0x19a3   : > { %9830 = vmatprep.mubr.msk.f32.mxu1 %vm10442_vm15, %v10315_v0  ;;  %10023 = vmatpush3.bf16.msk.msra.mxu1 %vm12782_vm14, %v10021_v40 }
0x19a4   : > { %10024 = vmatprep.subr.bf16.mxu1 %v10441_v6 }
0x1a75   : > { %v8663_v48 = vpop.f32.mrb[90].mxu1 }
0x1a76   : > { %v8664_v24 = vadd.f32 %v8663_v48, %v8589_v26  ;;  %v9825_v19 = vpop.f32.mrb[91].mxu1 }
0x1a78   : > { %v8667_v55 = vsub.f32 0.0, %v8664_v24 }
0x1a7a   : > { %v8668_v60 = vmul.f32 1.442695, %v8667_v55 }
0x1a7c   : > { %10235 = vpow2.f32 %v8668_v60 }
0x1a86   : > { %v10236_v49 = vpop.eup %10235 }
0x1a87   : > { %v8670_v11 = vadd.f32 1.0, %v10236_v49 }
0x1a89   : > { %10237 = vrcp.f32 %v8670_v11 }
0x1a93   : > { %v10238_v30 = vpop.eup %10237 }
0x1a94   : > { %9831 = vmatmul.mubr.msk.f32.vlgmr.msra.gmra.mrb[92].mxu1 %vm8590_vm1, %v10238_v30 }
0x1a95   : > { %9837 = vmatprep.mubr.msk.f32.mxu1 %vm10442_vm15, %v10315_v0  ;;  %10027 = vmatpush3.bf16.msk.msra.mxu1 %vm12782_vm14, %v10025_v61 }
0x1a96   : > { %10028 = vmatprep.subr.bf16.mxu1 %v10441_v6  ;;  %v9202_v6 = vld [vmem:[%s12902_s6 + $0xe0] sm:$0xff] }
0x1a97   : > { %v10029_v52 = vpack.c.bf16 %v9203_v5, %v9202_v6 }
0x1b67   : > { %v8749_v20 = vpop.f32.mrb[92].mxu1 }
0x1b68   : > { %v8750_v16 = vadd.f32 %v8749_v20, %v8676_v31  ;;  %v9832_v56 = vpop.f32.mrb[93].mxu1 }
0x1b6a   : > { %v8753_v18 = vsub.f32 0.0, %v8750_v16 }
0x1b6c   : > { %v8754_v4 = vmul.f32 1.442695, %v8753_v18 }
0x1b6e   : > { %10239 = vpow2.f32 %v8754_v4 }
0x1b78   : > { %v10240_v29 = vpop.eup %10239 }
0x1b79   : > { %v8756_v7 = vadd.f32 1.0, %v10240_v29 }
0x1b7b   : > { %10241 = vrcp.f32 %v8756_v7 }
0x1b85   : > { %v10242_v32 = vpop.eup %10241 }
0x1b86   : > { %9838 = vmatmul.mubr.msk.f32.vlgmr.msra.gmra.mrb[94].mxu1 %vm8590_vm1, %v10242_v32 }
0x1b87   : > { %9844 = vmatprep.mubr.msk.f32.mxu1 %vm10442_vm15, %v10315_v0  ;;  %10031 = vmatpush3.bf16.msk.msra.mxu1 %vm12782_vm14, %v10029_v52 }
0x1c59   : > { %v8835_v37 = vpop.f32.mrb[94].mxu1 }
0x1c5a   : > { %v8836_v54 = vadd.f32 %v8835_v37, %v8762_v38  ;;  %v9839_v34 = vpop.f32.mrb[95].mxu1 }
0x1c5c   : > { %v8839_v0 = vsub.f32 0.0, %v8836_v54 }
0x1c5e   : > { %v8840_v10 = vmul.f32 1.442695, %v8839_v0 }
0x1c60   : > { %10243 = vpow2.f32 %v8840_v10 }
0x1c6a   : > { %v10244_v57 = vpop.eup %10243 }
0x1c6b   : > { %v8842_v63 = vadd.f32 1.0, %v10244_v57 }
0x1c6d   : > { %10245 = vrcp.f32 %v8842_v63 }
0x1c77   : > { %v10246_v17 = vpop.eup %10245 }
0x1c78   : > { %9845 = vmatmul.mubr.msk.f32.vlgmr.msra.gmra.mrb[96].mxu1 %vm8590_vm1, %v10246_v17 }
0x1d4b   : > { %v8921_v33 = vpop.f32.mrb[96].mxu1 }
0x1d4c   : > { %v8922_v42 = vadd.f32 %v8921_v33, %v8848_v35  ;;  %v9846_v36 = vpop.f32.mrb[97].mxu1 }
0x1d4e   : > { %v8925_v9 = vsub.f32 0.0, %v8922_v42 }
0x1d50   : > { %v8926_v12 = vmul.f32 1.442695, %v8925_v9 }
0x1d52   : > { %10247 = vpow2.f32 %v8926_v12 }
0x1d5c   : > { %v10248_v14 = vpop.eup %10247 }
0x1d5d   : > { %v8928_v22 = vadd.f32 1.0, %v10248_v14 }
0x1d5f   : > { %10249 = vrcp.f32 %v8928_v22 }
0x1d69   : > { %v10250_v51 = vpop.eup %10249 }
0x1d6a   : > { %8932 = vst.msk [vmem:[%s10644_s21] sm:$0x1] %vm8931_vm4, %v10250_v51 }
0x1d6b   : > { %10264 = shalt.err (!%p10261_p3)
}
0x1d6c   : > { %s10265_s21 = scalar_lea.hbm %s12851_s22, 16  ;;  %s10269_s19 = scalar_lea.hbm %s12904_s8, 32 }
0x1d6d   : > { %p10266_p4 = scmp.ne.s32.totalorder %s12851_s22, %s10265_s21  ;;  %p10270_p9 = scmp.lt.u32.totalorder %s12851_s22, %s12904_s8 }
0x1d6e   : > { %p10271_p10 = scmp.lt.u32.totalorder %s10269_s19, %s10265_s21  ;;  %p10273_p12 = scmp.lt.u32.totalorder %s10265_s21, %s12851_s22 }
0x1d6f   : > { %p10267_p7 = pnand %p10266_p4, %p10528_p5 }
0x1d70   : > { %p10272_p11 = por %p10271_p10, %p10270_p9 }
0x1d71   : > { %p10268_p8 = pneg %p10267_p7 }
0x1d72   : > { %p10274_p13 = por %p10273_p12, %p10272_p11 }
0x1d74   : > { %p10275_p0 = pnand %p10274_p13, %p10268_p8 }
0x1d76   : > { %10278 = shalt.err (!%p10275_p0)
}
0x1d77   : > { %10032 = dma.vmem_to_hbm [thread:$0]  (%p10528_p5), %s12853_s26, 16, %s12851_s22, %s8934_s13  }
0x1d78 PF: > { %p10038_p1 = scmp.ge.s32.totalorder %s10313_s30, 2  ;;  %s8958_s0 = sand.u32 1, %s10301_s27  }
0x1d79   : > { %s8959_s14 = scalar_lea.sflag [#allocation4], %s8958_s0 }
0x1d7a   : > { %p10035_p2 = pnand %p10038_p1, %p10532_p6 }
0x1d7c   : > { %10296 = dma.done.wait (!%p10035_p2), %s8959_s14, 16  }
0x1d7d   : > { %10298 = vsyncadd (!%p10035_p2), %s8959_s14, 4294967280  ;;  %s12988_s24 = sld [smem:[#allocation12_spill]]  ;;  %p18_p3 = scmp.ge.s32.totalorder %s10515_s11, 4  }
0x1d7e   : > { %s12989_s27 = smov %s10305_s28  ;;  %s12990_s28 = smov %s10309_s29 }
0x1d7f   : > { %s12992_s30 = smov %s10515_s11  ;;  %20 = sbr.rel (!%p18_p3) target bundleno = 6 (0x6), region = 112 }
0x1d83   : > { %s12991_s29 = smov %s12988_s24 }
0x1d86   :  { %8963 = vsyncpa [#allocation4], 1 }
0x1d87   :  { %8965 = vsyncpa [#allocation4 + $0x1], 1 }

</bundles_post_ra>
